<compile_context>
chip_gen: v5e
topology: v5e:2x2
jax: 0.10.0
libtpu: 0.0.40
codegen_flags: <defaults>
</compile_context>

<pallas_src>
import functools

import numpy as np
import jax
import jax.numpy as jnp
from jax.experimental import pallas as pl
from jax.experimental.pallas import tpu as pltpu

WIDTH = 16          # channel-reduction factor vs. the real PSPNet-50
CLASSES = 2
ZOOM_FACTOR = 8
BINS = (1, 2, 3, 6)
EPS = 1e-5


def _round_up(x, m):
    return ((x + m - 1) // m) * m


# ---------------------------------------------------------------------------
# Pallas matmul kernel with fused bias / residual / (masked) ReLU / post-affine
# ---------------------------------------------------------------------------
def _mm_kernel(*refs, relu, relu_masked, has_aff, has_res, has_post):
    idx = 0
    a_ref = refs[idx]; idx += 1
    b_ref = refs[idx]; idx += 1
    aff_ref = None
    if has_aff:
        aff_ref = refs[idx]; idx += 1
    res_ref = None
    if has_res:
        res_ref = refs[idx]; idx += 1
    o_ref = refs[idx]

    acc = jnp.dot(a_ref[...], b_ref[...], preferred_element_type=jnp.float32)
    if has_aff:
        acc = acc + aff_ref[0:1, :]                      # bias
    if has_res:
        acc = acc + res_ref[...].astype(jnp.float32)     # bf16 residual, upcast
    if relu:
        if relu_masked:
            # keep-row: 0 -> relu this channel, 1 -> pass-through
            acc = jnp.maximum(acc, acc * aff_ref[1:2, :])
        else:
            acc = jnp.maximum(acc, 0.0)
    if has_post:
        acc = acc * aff_ref[2:3, :] + aff_ref[3:4, :]    # post-ReLU affine
    o_ref[...] = acc.astype(o_ref.dtype)


def matmul_affine(a, b, bias=None, *, relu=False, relu_keep=None, res=None,
                  post_scale=None, post_bias=None, out_dtype=jnp.bfloat16):
    """(M,K) @ (K,N) on the MXU with f32 accumulation.

    Fused epilogue:  y = (a@b) + bias  [+res]  [relu / masked relu]  [*ps + pb]
    N is padded to a multiple of 128 (lane-dense stores); padded rows / columns
    are sliced away afterwards.  Compute dtype follows b.dtype (bf16 for all
    conv weights, f32 for the final resize operator).
    """
    M, K = a.shape
    K2, N = b.shape
    assert K == K2
    Np = _round_up(N, 128)

    if M <= 128:
        tile_m = max(16, _round_up(M, 16))
        Mp = tile_m
    else:
        # >= 2 blocks so both v7x TensorCores get work; <= ~512 rows per block
        nblk = max(2, -(-M // 512))
        tile_m = _round_up(-(-M // nblk), 16)
        Mp = _round_up(M, tile_m)

    compute_dtype = b.dtype
    a_p = jnp.pad(a, ((0, Mp - M), (0, 0)))
    if a_p.dtype != compute_dtype:
        a_p = a_p.astype(compute_dtype)
    b_p = jnp.pad(b, ((0, 0), (0, Np - N)))

    args = [a_p, b_p]
    in_specs = [
        pl.BlockSpec((tile_m, K), lambda i: (i, 0)),
        pl.BlockSpec((K, Np), lambda i: (0, 0)),
    ]

    has_post = post_scale is not None
    relu_masked = relu_keep is not None
    has_aff = (bias is not None) or relu_masked or has_post
    if has_aff:
        zero = jnp.zeros((N,), jnp.float32)
        one = jnp.ones((N,), jnp.float32)
        rows = [
            bias.astype(jnp.float32) if bias is not None else zero,
            relu_keep.astype(jnp.float32) if relu_masked else zero,
            post_scale.astype(jnp.float32) if has_post else one,
            post_bias.astype(jnp.float32) if has_post else zero,
        ]
        aff = jnp.pad(jnp.stack(rows, axis=0), ((0, 0), (0, Np - N)))
        args.append(aff)
        in_specs.append(pl.BlockSpec((4, Np), lambda i: (0, 0)))

    has_res = res is not None
    if has_res:
        r_p = jnp.pad(res, ((0, Mp - M), (0, Np - N)))
        args.append(r_p)
        in_specs.append(pl.BlockSpec((tile_m, Np), lambda i: (i, 0)))

    out = pl.pallas_call(
        functools.partial(_mm_kernel, relu=relu, relu_masked=relu_masked,
                          has_aff=has_aff, has_res=has_res, has_post=has_post),
        out_shape=jax.ShapeDtypeStruct((Mp, Np), out_dtype),
        grid_spec=pltpu.PrefetchScalarGridSpec(
            num_scalar_prefetch=0,
            grid=(Mp // tile_m,),
            in_specs=in_specs,
            out_specs=pl.BlockSpec((tile_m, Np), lambda i: (i, 0)),
        ),
        compiler_params=pltpu.CompilerParams(
            dimension_semantics=("parallel",)),
    )(*args)
    return out[:M, :N]


# ---------------------------------------------------------------------------
# Conv / pooling / resize built on the Pallas matmul kernel
# ---------------------------------------------------------------------------
def conv2d(x, prep, stride=1, padding=0, dilation=1, relu=False,
           relu_keep=None, res=None, post_scale=None, post_bias=None,
           out_dtype=jnp.bfloat16):
    """x: NHWC (bf16); prep: {'w': (kh,kw,Cin,Cout) bf16 (BN scale folded in),
    'bias': (Cout,) f32}.  Everything else is fused in the matmul epilogue."""
    w = prep['w']
    bias = prep['bias']
    N, H, W, Cin = x.shape
    kh, kw, _, Cout = w.shape
    if padding:
        x = jnp.pad(x, ((0, 0), (padding, padding), (padding, padding), (0, 0)))
    Hp, Wp = x.shape[1], x.shape[2]
    Ho = (Hp - dilation * (kh - 1) - 1) // stride + 1
    Wo = (Wp - dilation * (kw - 1) - 1) // stride + 1
    if kh == 1 and kw == 1 and stride == 1:
        a = x.reshape(N * Ho * Wo, Cin)
    else:
        # TODO(synk): im2col patch extraction kept as XLA slices/concatenate
        # (bf16, tiny spatial maps); in-kernel tap accumulation not attempted.
        patches = []
        for i in range(kh):
            for j in range(kw):
                patches.append(
                    x[:, i * dilation: i * dilation + stride * (Ho - 1) + 1: stride,
                         j * dilation: j * dilation + stride * (Wo - 1) + 1: stride, :])
        a = jnp.concatenate(patches, axis=-1).reshape(N * Ho * Wo, kh * kw * Cin)
    res_f = None if res is None else res.reshape(N * Ho * Wo, Cout)
    y = matmul_affine(a, w.reshape(kh * kw * Cin, Cout), bias, relu=relu,
                      relu_keep=relu_keep, res=res_f,
                      post_scale=post_scale, post_bias=post_bias,
                      out_dtype=out_dtype)
    return y.reshape(N, Ho, Wo, Cout)


def maxpool3x3_s2_p1(x):
    # TODO(synk): tiny 3x3/s2 max-pool window kept in plain JAX glue.
    N, H, W, C = x.shape
    xp = jnp.pad(x, ((0, 0), (1, 1), (1, 1), (0, 0)),
                 constant_values=-jnp.inf)
    Ho = (H + 2 - 3) // 2 + 1
    Wo = (W + 2 - 3) // 2 + 1
    slices = []
    for i in range(3):
        for j in range(3):
            slices.append(xp[:, i: i + 2 * (Ho - 1) + 1: 2,
                              j: j + 2 * (Wo - 1) + 1: 2, :])
    return jnp.max(jnp.stack(slices, 0), axis=0)


def adaptive_pool_matrix_np(out_size, in_size):
    m = np.zeros((out_size, in_size), np.float32)
    for o in range(out_size):
        s = (o * in_size) // out_size
        e = -(-((o + 1) * in_size) // out_size)
        m[o, s:e] = 1.0 / (e - s)
    return m


def bilinear_matrix_np(out_size, in_size):
    # align_corners=True
    m = np.zeros((out_size, in_size), np.float32)
    if in_size == 1:
        m[:, 0] = 1.0
    elif out_size == 1:
        m[0, 0] = 1.0
    else:
        scale = (in_size - 1) / (out_size - 1)
        for o in range(out_size):
            src = o * scale
            i0 = min(int(np.floor(src)), in_size - 1)
            i1 = min(i0 + 1, in_size - 1)
            w1 = src - i0
            m[o, i0] += 1.0 - w1
            m[o, i1] += w1
    return m


def bilinear_resize_to_nchw(x_nhwc, out_h, out_w):
    """Bilinear (align_corners=True) resize as one lane-dense kron matmul.

    Orientation is (N*C, HW_in) @ S^T so the big output dimension sits on the
    lane axis; the result lands directly in NCHW (no trailing transpose)."""
    N, H, W, C = x_nhwc.shape
    if (H, W) == (out_h, out_w):
        return jnp.transpose(x_nhwc, (0, 3, 1, 2))
    S = np.kron(bilinear_matrix_np(out_h, H), bilinear_matrix_np(out_w, W))
    a = jnp.transpose(x_nhwc, (0, 3, 1, 2)).reshape(N * C, H * W)
    a = a.astype(jnp.float32)
    b = jnp.asarray(S.T, jnp.float32)                       # (HW, oh*ow)
    y = matmul_affine(a, b, out_dtype=jnp.float32)          # (N*C, oh*ow)
    return y.reshape(N, C, out_h, out_w)


# ---------------------------------------------------------------------------
# Parameter construction (deterministic, synthetic)
# ---------------------------------------------------------------------------
class ParamGen:
    def __init__(self, key):
        self.key = key

    def next(self):
        self.key, k = jax.random.split(self.key)
        return k


def make_conv(pg, kh, kw, cin, cout, bias=False):
    w = jax.random.normal(pg.next(), (kh, kw, cin, cout), jnp.float32)
    w = w * np.sqrt(2.0 / (kh * kw * cin))
    b = (jax.random.normal(pg.next(), (cout,), jnp.float32) * 0.01
         if bias else None)
    return {'w': w, 'b': b}


def make_bn(c):
    return {'gamma': jnp.ones((c,), jnp.float32),
            'beta': jnp.zeros((c,), jnp.float32),
            'mean': jnp.zeros((c,), jnp.float32),
            'var': jnp.ones((c,), jnp.float32)}


def make_block(pg, inplanes, planes, conv2_stride, dilation, downsample,
               ds_stride):
    blk = {'conv1': make_conv(pg, 1, 1, inplanes, planes), 'bn1': make_bn(planes),
           'conv2': make_conv(pg, 3, 3, planes, planes), 'bn2': make_bn(planes),
           'conv3': make_conv(pg, 1, 1, planes, planes * 4),
           'bn3': make_bn(planes * 4),
           'conv2_stride': conv2_stride, 'dilation': dilation}
    if downsample:
        blk['ds_conv'] = make_conv(pg, 1, 1, inplanes, planes * 4)
        blk['ds_bn'] = make_bn(planes * 4)
        blk['ds_stride'] = ds_stride
    return blk


def make_layer(pg, inplanes, planes, blocks, stride, dilation):
    layers = []
    downsample = (stride != 1) or (inplanes != planes * 4)
    # PSPNet hack: in dilated layers conv2 and downsample strides are forced to 1
    conv2_stride = 1 if dilation > 1 else stride
    ds_stride = 1 if dilation > 1 else stride
    layers.append(make_block(pg, inplanes, planes, conv2_stride, dilation,
                             downsample, ds_stride))
    inplanes = planes * 4
    for _ in range(blocks - 1):
        layers.append(make_block(pg, inplanes, planes, 1, dilation, False, 1))
    return layers, inplanes


def init_pspnet_params(key):
    pg = ParamGen(key)
    base = 64 // WIDTH                     # 4
    p = {}
    # deep-base stem (layer0)
    p['l0_conv1'] = make_conv(pg, 3, 3, 3, base);        p['l0_bn1'] = make_bn(base)
    p['l0_conv2'] = make_conv(pg, 3, 3, base, base);     p['l0_bn2'] = make_bn(base)
    p['l0_conv3'] = make_conv(pg, 3, 3, base, base * 2); p['l0_bn3'] = make_bn(base * 2)
    inplanes = base * 2
    p['layer1'], inplanes = make_layer(pg, inplanes, base,     3, stride=1, dilation=1)
    p['layer2'], inplanes = make_layer(pg, inplanes, base * 2, 4, stride=2, dilation=1)
    p['layer3'], inplanes = make_layer(pg, inplanes, base * 4, 6, stride=2, dilation=2)
    p['layer4'], inplanes = make_layer(pg, inplanes, base * 8, 3, stride=2, dilation=4)
    fea = inplanes                          # 2048/WIDTH = 128
    red = fea // len(BINS)                  # 512/WIDTH  = 32
    p['ppm'] = [{'bin': b, 'conv': make_conv(pg, 1, 1, fea, red),
                 'bn': make_bn(red)} for b in BINS]
    fea2 = fea * 2                          # 4096/WIDTH = 256
    c512 = 512 // WIDTH                     # 32
    c96 = 96 // WIDTH                       # 6
    # cls3
    p['cls3_conv1'] = make_conv(pg, 3, 3, fea2, c512); p['cls3_bn1'] = make_bn(c512)
    p['cls3_conv2'] = make_conv(pg, 1, 1, c512, c96 * 2, bias=True)
    p['cls3_bn2'] = make_bn(c96 * 2)
    # cls2
    p['cls2_conv1'] = make_conv(pg, 3, 3, c96 * 2 + c96, c96); p['cls2_bn1'] = make_bn(c96)
    p['cls2_conv2'] = make_conv(pg, 1, 1, c96, CLASSES, bias=True)
    # reg
    p['reg_conv1'] = make_conv(pg, 3, 3, fea2, c512); p['reg_bn1'] = make_bn(c512)
    p['reg_conv2'] = make_conv(pg, 1, 1, c512, c96, bias=True)
    # reg2 / reg3
    p['reg2_conv1'] = make_conv(pg, 3, 3, c96, c96); p['reg2_bn1'] = make_bn(c96)
    p['reg2_conv2'] = make_conv(pg, 1, 1, c96, c96, bias=True)
    p['reg3_conv1'] = make_conv(pg, 3, 3, c96, c96); p['reg3_bn1'] = make_bn(c96)
    p['reg3_conv2'] = make_conv(pg, 1, 1, c96, c96, bias=True)
    p['bn'] = make_bn(c96)
    p['bn2'] = make_bn(c96)
    # TODO(synk): mean/var buffers come from .npy files in the original module;
    # replaced by deterministic per-channel constants (same broadcast semantics).
    p['mean_c'] = jax.random.normal(pg.next(), (c96,), jnp.float32) * 0.1
    p['var_c'] = jnp.abs(jax.random.normal(pg.next(), (c96,), jnp.float32)) * 0.1 + 1.0
    p['mean2d_c'] = jax.random.normal(pg.next(), (c96,), jnp.float32) * 0.1
    p['var2d_c'] = jnp.abs(jax.random.normal(pg.next(), (c96,), jnp.float32)) * 0.1 + 1.0
    p['c96'] = c96
    return p


# ---------------------------------------------------------------------------
# One-time parameter preparation (run eagerly, outside the jitted forward):
# BN scale folded into weights, weights cast to bf16, same-input convs fused.
# ---------------------------------------------------------------------------
def _bn_sb(bn):
    s = bn['gamma'] / jnp.sqrt(bn['var'] + EPS)
    b = bn['beta'] - bn['mean'] * s
    return s, b


def prep_convbn(conv, bn=None, out_scale=None, out_bias=None):
    """Fold optional BN and an optional trailing output affine into (w, bias)."""
    w = conv['w']
    cout = w.shape[-1]
    b = conv['b'] if conv['b'] is not None else jnp.zeros((cout,), jnp.float32)
    if bn is not None:
        s, bb = _bn_sb(bn)
        b = b * s + bb
        w = w * s
    if out_scale is not None:
        b = b * out_scale + (out_bias if out_bias is not None else 0.0)
        w = w * out_scale
    return {'w': w.astype(jnp.bfloat16), 'bias': b.astype(jnp.float32)}


def fuse_preps(preps):
    """Concatenate prepared convs (same input, same kernel geometry) along Cout."""
    return {'w': jnp.concatenate([q['w'] for q in preps], axis=-1),
            'bias': jnp.concatenate([q['bias'] for q in preps])}


def prep_block(blk):
    pb = {'conv2_stride': blk['conv2_stride'], 'dilation': blk['dilation'],
          'conv2': prep_convbn(blk['conv2'], blk['bn2']),
          'conv3': prep_convbn(blk['conv3'], blk['bn3'])}
    c1 = prep_convbn(blk['conv1'], blk['bn1'])
    if 'ds_conv' in blk:
        ds = prep_convbn(blk['ds_conv'], blk['ds_bn'])
        if blk['ds_stride'] == 1:
            # conv1 (ReLU) and downsample (no ReLU) share the input -> fuse
            # into one matmul with a channel-masked ReLU epilogue.
            planes = c1['w'].shape[-1]
            fused = fuse_preps([c1, ds])
            fused['keep'] = jnp.concatenate(
                [jnp.zeros((planes,), jnp.float32),
                 jnp.ones((ds['w'].shape[-1],), jnp.float32)])
            fused['split'] = planes
            pb['fused1'] = fused
        else:
            pb['conv1'] = c1
            pb['ds'] = ds
            pb['ds_stride'] = blk['ds_stride']
    else:
        pb['conv1'] = c1
    return pb


def prep_ppm(ppm_params):
    ws, bs = [], []
    red = None
    for f in ppm_params:
        q = prep_convbn(f['conv'], f['bn'])
        C, red = q['w'].shape[2], q['w'].shape[3]
        ws.append(q['w'].reshape(C, red))
        bs.append(q['bias'])
    return {'W_cat': jnp.concatenate(ws, axis=1),      # (C, nb*red) bf16
            'b_cat': jnp.concatenate(bs),
            'bins': tuple(f['bin'] for f in ppm_params),
            'red': red}


def prepare_pspnet(p):
    pp = {'l0': [prep_convbn(p['l0_conv1'], p['l0_bn1']),
                 prep_convbn(p['l0_conv2'], p['l0_bn2']),
                 prep_convbn(p['l0_conv3'], p['l0_bn3'])]}
    for name in ('layer1', 'layer2', 'layer3', 'layer4'):
        pp[name] = [prep_block(blk) for blk in p[name]]
    pp['ppm'] = prep_ppm(p['ppm'])

    hd = {}
    # cls3_conv1 + reg_conv1: same 3x3/pad=1 input, both BN+ReLU -> one matmul
    hd['head1'] = fuse_preps([prep_convbn(p['cls3_conv1'], p['cls3_bn1']),
                              prep_convbn(p['reg_conv1'], p['reg_bn1'])])
    # cls3_conv2 (bias+BN+ReLU) and reg_conv2 (bias, then bn*var+mean fold,
    # no ReLU) as one block-diagonal 1x1 conv with a masked-ReLU epilogue.
    cls3_c2 = prep_convbn(p['cls3_conv2'], p['cls3_bn2'])
    reg_c2 = prep_convbn(p['reg_conv2'], p['bn'],
                         out_scale=p['var_c'], out_bias=p['mean_c'])
    cin_c, cout_c = cls3_c2['w'].shape[2], cls3_c2['w'].shape[3]
    cin_r, cout_r = reg_c2['w'].shape[2], reg_c2['w'].shape[3]
    w_blk = jnp.zeros((1, 1, cin_c + cin_r, cout_c + cout_r), jnp.bfloat16)
    w_blk = w_blk.at[:, :, :cin_c, :cout_c].set(cls3_c2['w'])
    w_blk = w_blk.at[:, :, cin_c:, cout_c:].set(reg_c2['w'])
    hd['head2'] = {
        'w': w_blk,
        'bias': jnp.concatenate([cls3_c2['bias'], reg_c2['bias']]),
        'keep': jnp.concatenate([jnp.zeros((cout_c,), jnp.float32),
                                 jnp.ones((cout_r,), jnp.float32)]),
        'split': cout_c,
    }
    hd['reg2_conv1'] = prep_convbn(p['reg2_conv1'], p['reg2_bn1'])
    hd['reg2_conv2'] = prep_convbn(p['reg2_conv2'])
    bs2, bb2 = _bn_sb(p['bn2'])
    hd['post_s'] = bs2 * p['var2d_c']
    hd['post_b'] = bb2 * p['var2d_c'] + p['mean2d_c']
    hd['reg3_conv1'] = prep_convbn(p['reg3_conv1'], p['reg3_bn1'])
    hd['reg3_conv2'] = prep_convbn(p['reg3_conv2'])
    hd['cls2_conv1'] = prep_convbn(p['cls2_conv1'], p['cls2_bn1'])
    hd['cls2_conv2'] = prep_convbn(p['cls2_conv2'])
    pp['heads'] = hd
    return pp


# ---------------------------------------------------------------------------
# Forward pass (eval mode)
# ---------------------------------------------------------------------------
def bottleneck_fwd(pb, x):
    if 'fused1' in pb:
        f = pb['fused1']
        y = conv2d(x, f, relu=True, relu_keep=f['keep'])
        out = y[..., :f['split']]            # conv1 path (ReLU'd)
        identity = y[..., f['split']:]       # downsample path (no ReLU)
    else:
        out = conv2d(x, pb['conv1'], relu=True)
        if 'ds' in pb:
            identity = conv2d(x, pb['ds'], stride=pb['ds_stride'])
        else:
            identity = x
    out = conv2d(out, pb['conv2'], stride=pb['conv2_stride'],
                 padding=pb['dilation'], dilation=pb['dilation'], relu=True)
    # conv3 + bn3 + residual add + ReLU fused in one matmul epilogue
    out = conv2d(out, pb['conv3'], relu=True, res=identity)
    return out


def ppm_forward(pp_ppm, x):
    """Consolidated PPM: 3 pallas_calls total for all bins."""
    N, H, W, C = x.shape
    HW = H * W
    bins = pp_ppm['bins']
    red = pp_ppm['red']
    nb = len(bins)
    P = sum(b * b for b in bins)

    # 1) adaptive-avg pool for all bins at once (kron of separable matrices)
    pool_mats = [np.kron(adaptive_pool_matrix_np(b, H),
                         adaptive_pool_matrix_np(b, W)) for b in bins]
    S_pool = jnp.asarray(np.concatenate(pool_mats, axis=0), jnp.bfloat16)  # (P,HW)
    x_t = jnp.transpose(x, (1, 2, 0, 3)).reshape(HW, N * C)
    pooled_t = matmul_affine(S_pool, x_t)                     # (P, N*C) bf16

    # 2) all per-bin 1x1 convs + folded BN + ReLU in one lane-dense matmul
    A = pooled_t.reshape(P * N, C)
    conv_out = matmul_affine(A, pp_ppm['W_cat'], pp_ppm['b_cat'],
                             relu=True)                       # (P*N, nb*red)

    # 3) bilinear (align_corners=True) upsample of every bin as one
    #    block-diagonal matmul
    up_mats = [np.kron(bilinear_matrix_np(H, b),
                       bilinear_matrix_np(W, b)) for b in bins]
    A_up = np.zeros((HW, P), np.float32)
    Bmat = jnp.zeros((P, nb * N * red), jnp.bfloat16)
    off = 0
    for i, b in enumerate(bins):
        sz = b * b
        A_up[:, off:off + sz] = up_mats[i]
        Z = conv_out[off * N:(off + sz) * N, i * red:(i + 1) * red]
        Bmat = Bmat.at[off:off + sz, i * N * red:(i + 1) * N * red].set(
            Z.reshape(sz, N * red))
        off += sz
    up_t = matmul_affine(jnp.asarray(A_up, jnp.bfloat16), Bmat)  # (HW, nb*N*red)
    ups = up_t.reshape(HW, nb, N, red)
    ups = jnp.transpose(ups, (2, 0, 1, 3)).reshape(N, H, W, nb * red)
    return jnp.concatenate([x, ups], axis=-1)


def pspnet_forward(pp, x_nchw):
    N, Cin, H, W = x_nchw.shape
    assert (H - 1) % 8 == 0 and (W - 1) % 8 == 0
    h = (H - 1) // 8 * ZOOM_FACTOR + 1
    w = (W - 1) // 8 * ZOOM_FACTOR + 1
    x = jnp.transpose(x_nchw, (0, 2, 3, 1)).astype(jnp.bfloat16)   # NHWC bf16

    # layer0 (stem)
    x = conv2d(x, pp['l0'][0], stride=2, padding=1, relu=True)
    x = conv2d(x, pp['l0'][1], padding=1, relu=True)
    x = conv2d(x, pp['l0'][2], padding=1, relu=True)
    x = maxpool3x3_s2_p1(x)

    for blk in pp['layer1']:
        x = bottleneck_fwd(blk, x)
    for blk in pp['layer2']:
        x = bottleneck_fwd(blk, x)
    for blk in pp['layer3']:
        x = bottleneck_fwd(blk, x)
    x_tmp = x  # noqa: F841  (kept for structural parity with the module)
    for blk in pp['layer4']:
        x = bottleneck_fwd(blk, x)

    x = ppm_forward(pp['ppm'], x)

    hd = pp['heads']
    # fused cls3_conv1 + reg_conv1 (shared K=2304 im2col, one matmul)
    h1 = conv2d(x, hd['head1'], padding=1, relu=True)
    # fused cls3_conv2 (+bn+relu) / reg_conv2 (+bn*var+mean) block-diag matmul
    h2 = conv2d(h1, hd['head2'], relu=True, relu_keep=hd['head2']['keep'])
    sp = hd['head2']['split']
    xc = h2[..., :sp]            # cls3 output
    reg = h2[..., sp:]           # reg after statistics fold (no ReLU)

    # reg2: relu(conv2(...)+bias) followed by bn2(.)*var_2d+mean_2d
    # -> the statistics rescale runs as a post-ReLU affine epilogue
    t = conv2d(reg, hd['reg2_conv1'], padding=1, relu=True)
    reg = conv2d(t, hd['reg2_conv2'], relu=True,
                 post_scale=hd['post_s'], post_bias=hd['post_b'])

    # reg3
    reg = conv2d(reg, hd['reg3_conv1'], padding=1, relu=True)
    reg = conv2d(reg, hd['reg3_conv2'], relu=True)

    reg_x = jnp.concatenate([xc, reg], axis=-1)

    # cls2 (Dropout2d is identity in eval mode)
    x2 = conv2d(reg_x, hd['cls2_conv1'], padding=1, relu=True)
    x2 = conv2d(x2, hd['cls2_conv2'], out_dtype=jnp.float32)

    if ZOOM_FACTOR != 1:
        return bilinear_resize_to_nchw(x2, h, w)      # already NCHW
    return jnp.transpose(x2, (0, 3, 1, 2))


# TODO(synk): training branch (CrossEntropy / masked MSE losses, argmax
# outputs) is not exercised here; only the eval forward path is implemented.

if __name__ == "__main__":
    root = jax.random.PRNGKey(0)
    k_params, k_input = jax.random.split(root)
    params = init_pspnet_params(k_params)
    prepared = prepare_pspnet(params)   # fold BN / fuse / cast weights once

    # Input must satisfy (H-1)%8==0 and (W-1)%8==0  ->  33x33
    x = jax.random.normal(k_input, (2, 3, 33, 33), jnp.float32)

    fwd = jax.jit(functools.partial(pspnet_forward, prepared))
    out = fwd(x)
    out = jax.block_until_ready(out)
    assert out.shape == (2, CLASSES, 33, 33)
    assert bool(jnp.all(jnp.isfinite(out)))
    print("KERNEL_OK")
</pallas_src>

<mosaic_0001>
module attributes {stable_mosaic.version = 11 : i64} {
  func.func @_mm_kernel(%arg0: i32, %arg1: memref<304x27xbf16, #tpu.memory_space<vmem>>, %arg2: memref<27x128xbf16, #tpu.memory_space<vmem>>, %arg3: memref<4x128xf32, #tpu.memory_space<vmem>>, %arg4: memref<304x128xbf16, #tpu.memory_space<vmem>>) attributes {dimension_semantics = [#tpu.dimension_semantics<parallel>], iteration_bounds = array<i64: 2>, scalar_prefetch = 0 : i64, scratch_operands = 0 : i64, tpu.core_type = #tpu.core_type<tc>, window_params = [{transform_indices = @transform_0, window_bounds = array<i64: 304, 27>}, {pipeline_mode = #tpu.pipeline_mode<synchronous>, transform_indices = @transform_1, window_bounds = array<i64: 27, 128>}, {pipeline_mode = #tpu.pipeline_mode<synchronous>, transform_indices = @transform_2, window_bounds = array<i64: 4, 128>}, {transform_indices = @transform_3, window_bounds = array<i64: 304, 128>}]} {
    %c0 = arith.constant 0 : index
    %c0_0 = arith.constant 0 : index
    %0 = vector.load %arg1[%c0, %c0_0] : memref<304x27xbf16, #tpu.memory_space<vmem>>, vector<304x27xbf16>
    %c0_1 = arith.constant 0 : index
    %c0_2 = arith.constant 0 : index
    %1 = vector.load %arg2[%c0_1, %c0_2] : memref<27x128xbf16, #tpu.memory_space<vmem>>, vector<27x128xbf16>
    %cst = arith.constant dense<0.000000e+00> : vector<304x128xf32>
    %2 = tpu.matmul %0, %1, %cst {dimension_numbers = #tpu.dot_dimension_numbers<[1], [0], [0], [1], [0, 0, 1, 1], [], []>} : vector<304x27xbf16>, vector<27x128xbf16>, vector<304x128xf32> -> vector<304x128xf32>
    %c0_3 = arith.constant 0 : index
    %c0_4 = arith.constant 0 : index
    %3 = vector.load %arg3[%c0_3, %c0_4] : memref<4x128xf32, #tpu.memory_space<vmem>>, vector<1x128xf32>
    %4 = vector.broadcast %3 : vector<1x128xf32> to vector<304x128xf32>
    %5 = arith.addf %2, %4 : vector<304x128xf32>
    %cst_5 = arith.constant 0.000000e+00 : f32
    %6 = vector.broadcast %cst_5 : f32 to vector<304x128xf32>
    %7 = arith.maximumf %5, %6 : vector<304x128xf32>
    %8 = arith.truncf %7 : vector<304x128xf32> to vector<304x128xbf16>
    %c0_6 = arith.constant 0 : index
    %c0_7 = arith.constant 0 : index
    %9 = vector.load %arg4[%c0_6, %c0_7] : memref<304x128xbf16, #tpu.memory_space<vmem>>, vector<304x128xbf16>
    tpu.vector_store %arg4[%c0_6, %c0_7], %8 {strides = array<i32>} : memref<304x128xbf16, #tpu.memory_space<vmem>>, vector<304x128xbf16>,
    return
  }
  func.func @transform_0(%arg0: i32) -> (i32, i32) {
    %c0_i32 = arith.constant 0 : i32
    %c0_i32_0 = arith.constant 0 : i32
    return %arg0, %c0_i32 : i32, i32
  }
  func.func @transform_1(%arg0: i32) -> (i32, i32) {
    %c0_i32 = arith.constant 0 : i32
    %c0_i32_0 = arith.constant 0 : i32
    %c0_i32_1 = arith.constant 0 : i32
    return %c0_i32, %c0_i32_0 : i32, i32
  }
  func.func @transform_2(%arg0: i32) -> (i32, i32) {
    %c0_i32 = arith.constant 0 : i32
    %c0_i32_0 = arith.constant 0 : i32
    %c0_i32_1 = arith.constant 0 : i32
    return %c0_i32, %c0_i32_0 : i32, i32
  }
  func.func @transform_3(%arg0: i32) -> (i32, i32) {
    %c0_i32 = arith.constant 0 : i32
    %c0_i32_0 = arith.constant 0 : i32
    return %arg0, %c0_i32 : i32, i32
  }
}

module attributes {stable_mosaic.version = 11 : i64} {
  func.func @_mm_kernel(%arg0: i32, %arg1: memref<304x36xbf16, #tpu.memory_space<vmem>>, %arg2: memref<36x128xbf16, #tpu.memory_space<vmem>>, %arg3: memref<4x128xf32, #tpu.memory_space<vmem>>, %arg4: memref<304x128xbf16, #tpu.memory_space<vmem>>) attributes {dimension_semantics = [#tpu.dimension_semantics<parallel>], iteration_bounds = array<i64: 2>, scalar_prefetch = 0 : i64, scratch_operands = 0 : i64, tpu.core_type = #tpu.core_type<tc>, window_params = [{transform_indices = @transform_0, window_bounds = array<i64: 304, 36>}, {pipeline_mode = #tpu.pipeline_mode<synchronous>, transform_indices = @transform_1, window_bounds = array<i64: 36, 128>}, {pipeline_mode = #tpu.pipeline_mode<synchronous>, transform_indices = @transform_2, window_bounds = array<i64: 4, 128>}, {transform_indices = @transform_3, window_bounds = array<i64: 304, 128>}]} {
    %c0 = arith.constant 0 : index
    %c0_0 = arith.constant 0 : index
    %0 = vector.load %arg1[%c0, %c0_0] : memref<304x36xbf16, #tpu.memory_space<vmem>>, vector<304x36xbf16>
    %c0_1 = arith.constant 0 : index
    %c0_2 = arith.constant 0 : index
    %1 = vector.load %arg2[%c0_1, %c0_2] : memref<36x128xbf16, #tpu.memory_space<vmem>>, vector<36x128xbf16>
    %cst = arith.constant dense<0.000000e+00> : vector<304x128xf32>
    %2 = tpu.matmul %0, %1, %cst {dimension_numbers = #tpu.dot_dimension_numbers<[1], [0], [0], [1], [0, 0, 1, 1], [], []>} : vector<304x36xbf16>, vector<36x128xbf16>, vector<304x128xf32> -> vector<304x128xf32>
    %c0_3 = arith.constant 0 : index
    %c0_4 = arith.constant 0 : index
    %3 = vector.load %arg3[%c0_3, %c0_4] : memref<4x128xf32, #tpu.memory_space<vmem>>, vector<1x128xf32>
    %4 = vector.broadcast %3 : vector<1x128xf32> to vector<304x128xf32>
    %5 = arith.addf %2, %4 : vector<304x128xf32>
    %cst_5 = arith.constant 0.000000e+00 : f32
    %6 = vector.broadcast %cst_5 : f32 to vector<304x128xf32>
    %7 = arith.maximumf %5, %6 : vector<304x128xf32>
    %8 = arith.truncf %7 : vector<304x128xf32> to vector<304x128xbf16>
    %c0_6 = arith.constant 0 : index
    %c0_7 = arith.constant 0 : index
    %9 = vector.load %arg4[%c0_6, %c0_7] : memref<304x128xbf16, #tpu.memory_space<vmem>>, vector<304x128xbf16>
    tpu.vector_store %arg4[%c0_6, %c0_7], %8 {strides = array<i32>} : memref<304x128xbf16, #tpu.memory_space<vmem>>, vector<304x128xbf16>,
    return
  }
  func.func @transform_0(%arg0: i32) -> (i32, i32) {
    %c0_i32 = arith.constant 0 : i32
    %c0_i32_0 = arith.constant 0 : i32
    return %arg0, %c0_i32 : i32, i32
  }
  func.func @transform_1(%arg0: i32) -> (i32, i32) {
    %c0_i32 = arith.constant 0 : i32
    %c0_i32_0 = arith.constant 0 : i32
    %c0_i32_1 = arith.constant 0 : i32
    return %c0_i32, %c0_i32_0 : i32, i32
  }
  func.func @transform_2(%arg0: i32) -> (i32, i32) {
    %c0_i32 = arith.constant 0 : i32
    %c0_i32_0 = arith.constant 0 : i32
    %c0_i32_1 = arith.constant 0 : i32
    return %c0_i32, %c0_i32_0 : i32, i32
  }
  func.func @transform_3(%arg0: i32) -> (i32, i32) {
    %c0_i32 = arith.constant 0 : i32
    %c0_i32_0 = arith.constant 0 : i32
    return %arg0, %c0_i32 : i32, i32
  }
}

module attributes {stable_mosaic.version = 11 : i64} {
  func.func @_mm_kernel(%arg0: i32, %arg1: memref<96x8xbf16, #tpu.memory_space<vmem>>, %arg2: memref<8x128xbf16, #tpu.memory_space<vmem>>, %arg3: memref<4x128xf32, #tpu.memory_space<vmem>>, %arg4: memref<96x128xbf16, #tpu.memory_space<vmem>>) attributes {dimension_semantics = [#tpu.dimension_semantics<parallel>], iteration_bounds = array<i64: 2>, scalar_prefetch = 0 : i64, scratch_operands = 0 : i64, tpu.core_type = #tpu.core_type<tc>, window_params = [{transform_indices = @transform_0, window_bounds = array<i64: 96, 8>}, {pipeline_mode = #tpu.pipeline_mode<synchronous>, transform_indices = @transform_1, window_bounds = array<i64: 8, 128>}, {pipeline_mode = #tpu.pipeline_mode<synchronous>, transform_indices = @transform_2, window_bounds = array<i64: 4, 128>}, {transform_indices = @transform_3, window_bounds = array<i64: 96, 128>}]} {
    %c0 = arith.constant 0 : index
    %c0_0 = arith.constant 0 : index
    %0 = vector.load %arg1[%c0, %c0_0] : memref<96x8xbf16, #tpu.memory_space<vmem>>, vector<96x8xbf16>
    %c0_1 = arith.constant 0 : index
    %c0_2 = arith.constant 0 : index
    %1 = vector.load %arg2[%c0_1, %c0_2] : memref<8x128xbf16, #tpu.memory_space<vmem>>, vector<8x128xbf16>
    %cst = arith.constant dense<0.000000e+00> : vector<96x128xf32>
    %2 = tpu.matmul %0, %1, %cst {dimension_numbers = #tpu.dot_dimension_numbers<[1], [0], [0], [1], [0, 0, 1, 1], [], []>} : vector<96x8xbf16>, vector<8x128xbf16>, vector<96x128xf32> -> vector<96x128xf32>
    %c0_3 = arith.constant 0 : index
    %c0_4 = arith.constant 0 : index
    %3 = vector.load %arg3[%c0_3, %c0_4] : memref<4x128xf32, #tpu.memory_space<vmem>>, vector<1x128xf32>
    %4 = vector.broadcast %3 : vector<1x128xf32> to vector<96x128xf32>
    %5 = arith.addf %2, %4 : vector<96x128xf32>
    %c1 = arith.constant 1 : index
    %c0_5 = arith.constant 0 : index
    %6 = vector.load %arg3[%c1, %c0_5] : memref<4x128xf32, #tpu.memory_space<vmem>>, vector<1x128xf32>
    %7 = vector.broadcast %6 : vector<1x128xf32> to vector<96x128xf32>
    %8 = arith.mulf %5, %7 : vector<96x128xf32>
    %9 = arith.maximumf %5, %8 : vector<96x128xf32>
    %10 = arith.truncf %9 : vector<96x128xf32> to vector<96x128xbf16>
    %c0_6 = arith.constant 0 : index
    %c0_7 = arith.constant 0 : index
    %11 = vector.load %arg4[%c0_6, %c0_7] : memref<96x128xbf16, #tpu.memory_space<vmem>>, vector<96x128xbf16>
    tpu.vector_store %arg4[%c0_6, %c0_7], %10 {strides = array<i32>} : memref<96x128xbf16, #tpu.memory_space<vmem>>, vector<96x128xbf16>,
    return
  }
  func.func @transform_0(%arg0: i32) -> (i32, i32) {
    %c0_i32 = arith.constant 0 : i32
    %c0_i32_0 = arith.constant 0 : i32
    return %arg0, %c0_i32 : i32, i32
  }
  func.func @transform_1(%arg0: i32) -> (i32, i32) {
    %c0_i32 = arith.constant 0 : i32
    %c0_i32_0 = arith.constant 0 : i32
    %c0_i32_1 = arith.constant 0 : i32
    return %c0_i32, %c0_i32_0 : i32, i32
  }
  func.func @transform_2(%arg0: i32) -> (i32, i32) {
    %c0_i32 = arith.constant 0 : i32
    %c0_i32_0 = arith.constant 0 : i32
    %c0_i32_1 = arith.constant 0 : i32
    return %c0_i32, %c0_i32_0 : i32, i32
  }
  func.func @transform_3(%arg0: i32) -> (i32, i32) {
    %c0_i32 = arith.constant 0 : i32
    %c0_i32_0 = arith.constant 0 : i32
    return %arg0, %c0_i32 : i32, i32
  }
}

module attributes {stable_mosaic.version = 11 : i64} {
  func.func @_mm_kernel(%arg0: i32, %arg1: memref<96x36xbf16, #tpu.memory_space<vmem>>, %arg2: memref<36x128xbf16, #tpu.memory_space<vmem>>, %arg3: memref<4x128xf32, #tpu.memory_space<vmem>>, %arg4: memref<96x128xbf16, #tpu.memory_space<vmem>>) attributes {dimension_semantics = [#tpu.dimension_semantics<parallel>], iteration_bounds = array<i64: 2>, scalar_prefetch = 0 : i64, scratch_operands = 0 : i64, tpu.core_type = #tpu.core_type<tc>, window_params = [{transform_indices = @transform_0, window_bounds = array<i64: 96, 36>}, {pipeline_mode = #tpu.pipeline_mode<synchronous>, transform_indices = @transform_1, window_bounds = array<i64: 36, 128>}, {pipeline_mode = #tpu.pipeline_mode<synchronous>, transform_indices = @transform_2, window_bounds = array<i64: 4, 128>}, {transform_indices = @transform_3, window_bounds = array<i64: 96, 128>}]} {
    %c0 = arith.constant 0 : index
    %c0_0 = arith.constant 0 : index
    %0 = vector.load %arg1[%c0, %c0_0] : memref<96x36xbf16, #tpu.memory_space<vmem>>, vector<96x36xbf16>
    %c0_1 = arith.constant 0 : index
    %c0_2 = arith.constant 0 : index
    %1 = vector.load %arg2[%c0_1, %c0_2] : memref<36x128xbf16, #tpu.memory_space<vmem>>, vector<36x128xbf16>
    %cst = arith.constant dense<0.000000e+00> : vector<96x128xf32>
    %2 = tpu.matmul %0, %1, %cst {dimension_numbers = #tpu.dot_dimension_numbers<[1], [0], [0], [1], [0, 0, 1, 1], [], []>} : vector<96x36xbf16>, vector<36x128xbf16>, vector<96x128xf32> -> vector<96x128xf32>
    %c0_3 = arith.constant 0 : index
    %c0_4 = arith.constant 0 : index
    %3 = vector.load %arg3[%c0_3, %c0_4] : memref<4x128xf32, #tpu.memory_space<vmem>>, vector<1x128xf32>
    %4 = vector.broadcast %3 : vector<1x128xf32> to vector<96x128xf32>
    %5 = arith.addf %2, %4 : vector<96x128xf32>
    %cst_5 = arith.constant 0.000000e+00 : f32
    %6 = vector.broadcast %cst_5 : f32 to vector<96x128xf32>
    %7 = arith.maximumf %5, %6 : vector<96x128xf32>
    %8 = arith.truncf %7 : vector<96x128xf32> to vector<96x128xbf16>
    %c0_6 = arith.constant 0 : index
    %c0_7 = arith.constant 0 : index
    %9 = vector.load %arg4[%c0_6, %c0_7] : memref<96x128xbf16, #tpu.memory_space<vmem>>, vector<96x128xbf16>
    tpu.vector_store %arg4[%c0_6, %c0_7], %8 {strides = array<i32>} : memref<96x128xbf16, #tpu.memory_space<vmem>>, vector<96x128xbf16>,
    return
  }
  func.func @transform_0(%arg0: i32) -> (i32, i32) {
    %c0_i32 = arith.constant 0 : i32
    %c0_i32_0 = arith.constant 0 : i32
    return %arg0, %c0_i32 : i32, i32
  }
  func.func @transform_1(%arg0: i32) -> (i32, i32) {
    %c0_i32 = arith.constant 0 : i32
    %c0_i32_0 = arith.constant 0 : i32
    %c0_i32_1 = arith.constant 0 : i32
    return %c0_i32, %c0_i32_0 : i32, i32
  }
  func.func @transform_2(%arg0: i32) -> (i32, i32) {
    %c0_i32 = arith.constant 0 : i32
    %c0_i32_0 = arith.constant 0 : i32
    %c0_i32_1 = arith.constant 0 : i32
    return %c0_i32, %c0_i32_0 : i32, i32
  }
  func.func @transform_3(%arg0: i32) -> (i32, i32) {
    %c0_i32 = arith.constant 0 : i32
    %c0_i32_0 = arith.constant 0 : i32
    return %arg0, %c0_i32 : i32, i32
  }
}

module attributes {stable_mosaic.version = 11 : i64} {
  func.func @_mm_kernel(%arg0: i32, %arg1: memref<96x4xbf16, #tpu.memory_space<vmem>>, %arg2: memref<4x128xbf16, #tpu.memory_space<vmem>>, %arg3: memref<4x128xf32, #tpu.memory_space<vmem>>, %arg4: memref<96x128xbf16, #tpu.memory_space<vmem>>, %arg5: memref<96x128xbf16, #tpu.memory_space<vmem>>) attributes {dimension_semantics = [#tpu.dimension_semantics<parallel>], iteration_bounds = array<i64: 2>, scalar_prefetch = 0 : i64, scratch_operands = 0 : i64, tpu.core_type = #tpu.core_type<tc>, window_params = [{transform_indices = @transform_0, window_bounds = array<i64: 96, 4>}, {pipeline_mode = #tpu.pipeline_mode<synchronous>, transform_indices = @transform_1, window_bounds = array<i64: 4, 128>}, {pipeline_mode = #tpu.pipeline_mode<synchronous>, transform_indices = @transform_2, window_bounds = array<i64: 4, 128>}, {transform_indices = @transform_3, window_bounds = array<i64: 96, 128>}, {transform_indices = @transform_4, window_bounds = array<i64: 96, 128>}]} {
    %c0 = arith.constant 0 : index
    %c0_0 = arith.constant 0 : index
    %0 = vector.load %arg1[%c0, %c0_0] : memref<96x4xbf16, #tpu.memory_space<vmem>>, vector<96x4xbf16>
    %c0_1 = arith.constant 0 : index
    %c0_2 = arith.constant 0 : index
    %1 = vector.load %arg2[%c0_1, %c0_2] : memref<4x128xbf16, #tpu.memory_space<vmem>>, vector<4x128xbf16>
    %cst = arith.constant dense<0.000000e+00> : vector<96x128xf32>
    %2 = tpu.matmul %0, %1, %cst {dimension_numbers = #tpu.dot_dimension_numbers<[1], [0], [0], [1], [0, 0, 1, 1], [], []>} : vector<96x4xbf16>, vector<4x128xbf16>, vector<96x128xf32> -> vector<96x128xf32>
    %c0_3 = arith.constant 0 : index
    %c0_4 = arith.constant 0 : index
    %3 = vector.load %arg3[%c0_3, %c0_4] : memref<4x128xf32, #tpu.memory_space<vmem>>, vector<1x128xf32>
    %4 = vector.broadcast %3 : vector<1x128xf32> to vector<96x128xf32>
    %5 = arith.addf %2, %4 : vector<96x128xf32>
    %c0_5 = arith.constant 0 : index
    %c0_6 = arith.constant 0 : index
    %6 = vector.load %arg4[%c0_5, %c0_6] : memref<96x128xbf16, #tpu.memory_space<vmem>>, vector<96x128xbf16>
    %7 = arith.extf %6 : vector<96x128xbf16> to vector<96x128xf32>
    %8 = arith.addf %5, %7 : vector<96x128xf32>
    %cst_7 = arith.constant 0.000000e+00 : f32
    %9 = vector.broadcast %cst_7 : f32 to vector<96x128xf32>
    %10 = arith.maximumf %8, %9 : vector<96x128xf32>
    %11 = arith.truncf %10 : vector<96x128xf32> to vector<96x128xbf16>
    %c0_8 = arith.constant 0 : index
    %c0_9 = arith.constant 0 : index
    %12 = vector.load %arg5[%c0_8, %c0_9] : memref<96x128xbf16, #tpu.memory_space<vmem>>, vector<96x128xbf16>
    tpu.vector_store %arg5[%c0_8, %c0_9], %11 {strides = array<i32>} : memref<96x128xbf16, #tpu.memory_space<vmem>>, vector<96x128xbf16>,
    return
  }
  func.func @transform_0(%arg0: i32) -> (i32, i32) {
    %c0_i32 = arith.constant 0 : i32
    %c0_i32_0 = arith.constant 0 : i32
    return %arg0, %c0_i32 : i32, i32
  }
  func.func @transform_1(%arg0: i32) -> (i32, i32) {
    %c0_i32 = arith.constant 0 : i32
    %c0_i32_0 = arith.constant 0 : i32
    %c0_i32_1 = arith.constant 0 : i32
    return %c0_i32, %c0_i32_0 : i32, i32
  }
  func.func @transform_2(%arg0: i32) -> (i32, i32) {
    %c0_i32 = arith.constant 0 : i32
    %c0_i32_0 = arith.constant 0 : i32
    %c0_i32_1 = arith.constant 0 : i32
    return %c0_i32, %c0_i32_0 : i32, i32
  }
  func.func @transform_3(%arg0: i32) -> (i32, i32) {
    %c0_i32 = arith.constant 0 : i32
    %c0_i32_0 = arith.constant 0 : i32
    return %arg0, %c0_i32 : i32, i32
  }
  func.func @transform_4(%arg0: i32) -> (i32, i32) {
    %c0_i32 = arith.constant 0 : i32
    %c0_i32_0 = arith.constant 0 : i32
    return %arg0, %c0_i32 : i32, i32
  }
}

module attributes {stable_mosaic.version = 11 : i64} {
  func.func @_mm_kernel(%arg0: i32, %arg1: memref<96x16xbf16, #tpu.memory_space<vmem>>, %arg2: memref<16x128xbf16, #tpu.memory_space<vmem>>, %arg3: memref<4x128xf32, #tpu.memory_space<vmem>>, %arg4: memref<96x128xbf16, #tpu.memory_space<vmem>>) attributes {dimension_semantics = [#tpu.dimension_semantics<parallel>], iteration_bounds = array<i64: 2>, scalar_prefetch = 0 : i64, scratch_operands = 0 : i64, tpu.core_type = #tpu.core_type<tc>, window_params = [{transform_indices = @transform_0, window_bounds = array<i64: 96, 16>}, {pipeline_mode = #tpu.pipeline_mode<synchronous>, transform_indices = @transform_1, window_bounds = array<i64: 16, 128>}, {pipeline_mode = #tpu.pipeline_mode<synchronous>, transform_indices = @transform_2, window_bounds = array<i64: 4, 128>}, {transform_indices = @transform_3, window_bounds = array<i64: 96, 128>}]} {
    %c0 = arith.constant 0 : index
    %c0_0 = arith.constant 0 : index
    %0 = vector.load %arg1[%c0, %c0_0] : memref<96x16xbf16, #tpu.memory_space<vmem>>, vector<96x16xbf16>
    %c0_1 = arith.constant 0 : index
    %c0_2 = arith.constant 0 : index
    %1 = vector.load %arg2[%c0_1, %c0_2] : memref<16x128xbf16, #tpu.memory_space<vmem>>, vector<16x128xbf16>
    %cst = arith.constant dense<0.000000e+00> : vector<96x128xf32>
    %2 = tpu.matmul %0, %1, %cst {dimension_numbers = #tpu.dot_dimension_numbers<[1], [0], [0], [1], [0, 0, 1, 1], [], []>} : vector<96x16xbf16>, vector<16x128xbf16>, vector<96x128xf32> -> vector<96x128xf32>
    %c0_3 = arith.constant 0 : index
    %c0_4 = arith.constant 0 : index
    %3 = vector.load %arg3[%c0_3, %c0_4] : memref<4x128xf32, #tpu.memory_space<vmem>>, vector<1x128xf32>
    %4 = vector.broadcast %3 : vector<1x128xf32> to vector<96x128xf32>
    %5 = arith.addf %2, %4 : vector<96x128xf32>
    %cst_5 = arith.constant 0.000000e+00 : f32
    %6 = vector.broadcast %cst_5 : f32 to vector<96x128xf32>
    %7 = arith.maximumf %5, %6 : vector<96x128xf32>
    %8 = arith.truncf %7 : vector<96x128xf32> to vector<96x128xbf16>
    %c0_6 = arith.constant 0 : index
    %c0_7 = arith.constant 0 : index
    %9 = vector.load %arg4[%c0_6, %c0_7] : memref<96x128xbf16, #tpu.memory_space<vmem>>, vector<96x128xbf16>
    tpu.vector_store %arg4[%c0_6, %c0_7], %8 {strides = array<i32>} : memref<96x128xbf16, #tpu.memory_space<vmem>>, vector<96x128xbf16>,
    return
  }
  func.func @transform_0(%arg0: i32) -> (i32, i32) {
    %c0_i32 = arith.constant 0 : i32
    %c0_i32_0 = arith.constant 0 : i32
    return %arg0, %c0_i32 : i32, i32
  }
  func.func @transform_1(%arg0: i32) -> (i32, i32) {
    %c0_i32 = arith.constant 0 : i32
    %c0_i32_0 = arith.constant 0 : i32
    %c0_i32_1 = arith.constant 0 : i32
    return %c0_i32, %c0_i32_0 : i32, i32
  }
  func.func @transform_2(%arg0: i32) -> (i32, i32) {
    %c0_i32 = arith.constant 0 : i32
    %c0_i32_0 = arith.constant 0 : i32
    %c0_i32_1 = arith.constant 0 : i32
    return %c0_i32, %c0_i32_0 : i32, i32
  }
  func.func @transform_3(%arg0: i32) -> (i32, i32) {
    %c0_i32 = arith.constant 0 : i32
    %c0_i32_0 = arith.constant 0 : i32
    return %arg0, %c0_i32 : i32, i32
  }
}

module attributes {stable_mosaic.version = 11 : i64} {
  func.func @_mm_kernel(%arg0: i32, %arg1: memref<64x16xbf16, #tpu.memory_space<vmem>>, %arg2: memref<16x128xbf16, #tpu.memory_space<vmem>>, %arg3: memref<4x128xf32, #tpu.memory_space<vmem>>, %arg4: memref<64x128xbf16, #tpu.memory_space<vmem>>) attributes {dimension_semantics = [#tpu.dimension_semantics<parallel>], iteration_bounds = array<i64: 1>, scalar_prefetch = 0 : i64, scratch_operands = 0 : i64, tpu.core_type = #tpu.core_type<tc>, window_params = [{transform_indices = @transform_0, window_bounds = array<i64: 64, 16>}, {pipeline_mode = #tpu.pipeline_mode<synchronous>, transform_indices = @transform_1, window_bounds = array<i64: 16, 128>}, {pipeline_mode = #tpu.pipeline_mode<synchronous>, transform_indices = @transform_2, window_bounds = array<i64: 4, 128>}, {transform_indices = @transform_3, window_bounds = array<i64: 64, 128>}]} {
    %c0 = arith.constant 0 : index
    %c0_0 = arith.constant 0 : index
    %0 = vector.load %arg1[%c0, %c0_0] : memref<64x16xbf16, #tpu.memory_space<vmem>>, vector<64x16xbf16>
    %c0_1 = arith.constant 0 : index
    %c0_2 = arith.constant 0 : index
    %1 = vector.load %arg2[%c0_1, %c0_2] : memref<16x128xbf16, #tpu.memory_space<vmem>>, vector<16x128xbf16>
    %cst = arith.constant dense<0.000000e+00> : vector<64x128xf32>
    %2 = tpu.matmul %0, %1, %cst {dimension_numbers = #tpu.dot_dimension_numbers<[1], [0], [0], [1], [0, 0, 1, 1], [], []>} : vector<64x16xbf16>, vector<16x128xbf16>, vector<64x128xf32> -> vector<64x128xf32>
    %c0_3 = arith.constant 0 : index
    %c0_4 = arith.constant 0 : index
    %3 = vector.load %arg3[%c0_3, %c0_4] : memref<4x128xf32, #tpu.memory_space<vmem>>, vector<1x128xf32>
    %4 = vector.broadcast %3 : vector<1x128xf32> to vector<64x128xf32>
    %5 = arith.addf %2, %4 : vector<64x128xf32>
    %6 = arith.truncf %5 : vector<64x128xf32> to vector<64x128xbf16>
    %c0_5 = arith.constant 0 : index
    %c0_6 = arith.constant 0 : index
    %7 = vector.load %arg4[%c0_5, %c0_6] : memref<64x128xbf16, #tpu.memory_space<vmem>>, vector<64x128xbf16>
    tpu.vector_store %arg4[%c0_5, %c0_6], %6 {strides = array<i32>} : memref<64x128xbf16, #tpu.memory_space<vmem>>, vector<64x128xbf16>,
    return
  }
  func.func @transform_0(%arg0: i32) -> (i32, i32) {
    %c0_i32 = arith.constant 0 : i32
    %c0_i32_0 = arith.constant 0 : i32
    return %arg0, %c0_i32 : i32, i32
  }
  func.func @transform_1(%arg0: i32) -> (i32, i32) {
    %c0_i32 = arith.constant 0 : i32
    %c0_i32_0 = arith.constant 0 : i32
    %c0_i32_1 = arith.constant 0 : i32
    return %c0_i32, %c0_i32_0 : i32, i32
  }
  func.func @transform_2(%arg0: i32) -> (i32, i32) {
    %c0_i32 = arith.constant 0 : i32
    %c0_i32_0 = arith.constant 0 : i32
    %c0_i32_1 = arith.constant 0 : i32
    return %c0_i32, %c0_i32_0 : i32, i32
  }
  func.func @transform_3(%arg0: i32) -> (i32, i32) {
    %c0_i32 = arith.constant 0 : i32
    %c0_i32_0 = arith.constant 0 : i32
    return %arg0, %c0_i32 : i32, i32
  }
}

module attributes {stable_mosaic.version = 11 : i64} {
  func.func @_mm_kernel(%arg0: i32, %arg1: memref<64x32xbf16, #tpu.memory_space<vmem>>, %arg2: memref<32x128xbf16, #tpu.memory_space<vmem>>, %arg3: memref<4x128xf32, #tpu.memory_space<vmem>>, %arg4: memref<64x128xbf16, #tpu.memory_space<vmem>>) attributes {dimension_semantics = [#tpu.dimension_semantics<parallel>], iteration_bounds = array<i64: 1>, scalar_prefetch = 0 : i64, scratch_operands = 0 : i64, tpu.core_type = #tpu.core_type<tc>, window_params = [{transform_indices = @transform_0, window_bounds = array<i64: 64, 32>}, {pipeline_mode = #tpu.pipeline_mode<synchronous>, transform_indices = @transform_1, window_bounds = array<i64: 32, 128>}, {pipeline_mode = #tpu.pipeline_mode<synchronous>, transform_indices = @transform_2, window_bounds = array<i64: 4, 128>}, {transform_indices = @transform_3, window_bounds = array<i64: 64, 128>}]} {
    %c0 = arith.constant 0 : index
    %c0_0 = arith.constant 0 : index
    %0 = vector.load %arg1[%c0, %c0_0] : memref<64x32xbf16, #tpu.memory_space<vmem>>, vector<64x32xbf16>
    %c0_1 = arith.constant 0 : index
    %c0_2 = arith.constant 0 : index
    %1 = vector.load %arg2[%c0_1, %c0_2] : memref<32x128xbf16, #tpu.memory_space<vmem>>, vector<32x128xbf16>
    %cst = arith.constant dense<0.000000e+00> : vector<64x128xf32>
    %2 = tpu.matmul %0, %1, %cst {dimension_numbers = #tpu.dot_dimension_numbers<[1], [0], [0], [1], [0, 0, 1, 1], [], []>} : vector<64x32xbf16>, vector<32x128xbf16>, vector<64x128xf32> -> vector<64x128xf32>
    %c0_3 = arith.constant 0 : index
    %c0_4 = arith.constant 0 : index
    %3 = vector.load %arg3[%c0_3, %c0_4] : memref<4x128xf32, #tpu.memory_space<vmem>>, vector<1x128xf32>
    %4 = vector.broadcast %3 : vector<1x128xf32> to vector<64x128xf32>
    %5 = arith.addf %2, %4 : vector<64x128xf32>
    %cst_5 = arith.constant 0.000000e+00 : f32
    %6 = vector.broadcast %cst_5 : f32 to vector<64x128xf32>
    %7 = arith.maximumf %5, %6 : vector<64x128xf32>
    %8 = arith.truncf %7 : vector<64x128xf32> to vector<64x128xbf16>
    %c0_6 = arith.constant 0 : index
    %c0_7 = arith.constant 0 : index
    %9 = vector.load %arg4[%c0_6, %c0_7] : memref<64x128xbf16, #tpu.memory_space<vmem>>, vector<64x128xbf16>
    tpu.vector_store %arg4[%c0_6, %c0_7], %8 {strides = array<i32>} : memref<64x128xbf16, #tpu.memory_space<vmem>>, vector<64x128xbf16>,
    return
  }
  func.func @transform_0(%arg0: i32) -> (i32, i32) {
    %c0_i32 = arith.constant 0 : i32
    %c0_i32_0 = arith.constant 0 : i32
    return %arg0, %c0_i32 : i32, i32
  }
  func.func @transform_1(%arg0: i32) -> (i32, i32) {
    %c0_i32 = arith.constant 0 : i32
    %c0_i32_0 = arith.constant 0 : i32
    %c0_i32_1 = arith.constant 0 : i32
    return %c0_i32, %c0_i32_0 : i32, i32
  }
  func.func @transform_2(%arg0: i32) -> (i32, i32) {
    %c0_i32 = arith.constant 0 : i32
    %c0_i32_0 = arith.constant 0 : i32
    %c0_i32_1 = arith.constant 0 : i32
    return %c0_i32, %c0_i32_0 : i32, i32
  }
  func.func @transform_3(%arg0: i32) -> (i32, i32) {
    %c0_i32 = arith.constant 0 : i32
    %c0_i32_0 = arith.constant 0 : i32
    return %arg0, %c0_i32 : i32, i32
  }
}

module attributes {stable_mosaic.version = 11 : i64} {
  func.func @_mm_kernel(%arg0: i32, %arg1: memref<64x72xbf16, #tpu.memory_space<vmem>>, %arg2: memref<72x128xbf16, #tpu.memory_space<vmem>>, %arg3: memref<4x128xf32, #tpu.memory_space<vmem>>, %arg4: memref<64x128xbf16, #tpu.memory_space<vmem>>) attributes {dimension_semantics = [#tpu.dimension_semantics<parallel>], iteration_bounds = array<i64: 1>, scalar_prefetch = 0 : i64, scratch_operands = 0 : i64, tpu.core_type = #tpu.core_type<tc>, window_params = [{transform_indices = @transform_0, window_bounds = array<i64: 64, 72>}, {pipeline_mode = #tpu.pipeline_mode<synchronous>, transform_indices = @transform_1, window_bounds = array<i64: 72, 128>}, {pipeline_mode = #tpu.pipeline_mode<synchronous>, transform_indices = @transform_2, window_bounds = array<i64: 4, 128>}, {transform_indices = @transform_3, window_bounds = array<i64: 64, 128>}]} {
    %c0 = arith.constant 0 : index
    %c0_0 = arith.constant 0 : index
    %0 = vector.load %arg1[%c0, %c0_0] : memref<64x72xbf16, #tpu.memory_space<vmem>>, vector<64x72xbf16>
    %c0_1 = arith.constant 0 : index
    %c0_2 = arith.constant 0 : index
    %1 = vector.load %arg2[%c0_1, %c0_2] : memref<72x128xbf16, #tpu.memory_space<vmem>>, vector<72x128xbf16>
    %cst = arith.constant dense<0.000000e+00> : vector<64x128xf32>
    %2 = tpu.matmul %0, %1, %cst {dimension_numbers = #tpu.dot_dimension_numbers<[1], [0], [0], [1], [0, 0, 1, 1], [], []>} : vector<64x72xbf16>, vector<72x128xbf16>, vector<64x128xf32> -> vector<64x128xf32>
    %c0_3 = arith.constant 0 : index
    %c0_4 = arith.constant 0 : index
    %3 = vector.load %arg3[%c0_3, %c0_4] : memref<4x128xf32, #tpu.memory_space<vmem>>, vector<1x128xf32>
    %4 = vector.broadcast %3 : vector<1x128xf32> to vector<64x128xf32>
    %5 = arith.addf %2, %4 : vector<64x128xf32>
    %cst_5 = arith.constant 0.000000e+00 : f32
    %6 = vector.broadcast %cst_5 : f32 to vector<64x128xf32>
    %7 = arith.maximumf %5, %6 : vector<64x128xf32>
    %8 = arith.truncf %7 : vector<64x128xf32> to vector<64x128xbf16>
    %c0_6 = arith.constant 0 : index
    %c0_7 = arith.constant 0 : index
    %9 = vector.load %arg4[%c0_6, %c0_7] : memref<64x128xbf16, #tpu.memory_space<vmem>>, vector<64x128xbf16>
    tpu.vector_store %arg4[%c0_6, %c0_7], %8 {strides = array<i32>} : memref<64x128xbf16, #tpu.memory_space<vmem>>, vector<64x128xbf16>,
    return
  }
  func.func @transform_0(%arg0: i32) -> (i32, i32) {
    %c0_i32 = arith.constant 0 : i32
    %c0_i32_0 = arith.constant 0 : i32
    return %arg0, %c0_i32 : i32, i32
  }
  func.func @transform_1(%arg0: i32) -> (i32, i32) {
    %c0_i32 = arith.constant 0 : i32
    %c0_i32_0 = arith.constant 0 : i32
    %c0_i32_1 = arith.constant 0 : i32
    return %c0_i32, %c0_i32_0 : i32, i32
  }
  func.func @transform_2(%arg0: i32) -> (i32, i32) {
    %c0_i32 = arith.constant 0 : i32
    %c0_i32_0 = arith.constant 0 : i32
    %c0_i32_1 = arith.constant 0 : i32
    return %c0_i32, %c0_i32_0 : i32, i32
  }
  func.func @transform_3(%arg0: i32) -> (i32, i32) {
    %c0_i32 = arith.constant 0 : i32
    %c0_i32_0 = arith.constant 0 : i32
    return %arg0, %c0_i32 : i32, i32
  }
}

module attributes {stable_mosaic.version = 11 : i64} {
  func.func @_mm_kernel(%arg0: i32, %arg1: memref<64x8xbf16, #tpu.memory_space<vmem>>, %arg2: memref<8x128xbf16, #tpu.memory_space<vmem>>, %arg3: memref<4x128xf32, #tpu.memory_space<vmem>>, %arg4: memref<64x128xbf16, #tpu.memory_space<vmem>>, %arg5: memref<64x128xbf16, #tpu.memory_space<vmem>>) attributes {dimension_semantics = [#tpu.dimension_semantics<parallel>], iteration_bounds = array<i64: 1>, scalar_prefetch = 0 : i64, scratch_operands = 0 : i64, tpu.core_type = #tpu.core_type<tc>, window_params = [{transform_indices = @transform_0, window_bounds = array<i64: 64, 8>}, {pipeline_mode = #tpu.pipeline_mode<synchronous>, transform_indices = @transform_1, window_bounds = array<i64: 8, 128>}, {pipeline_mode = #tpu.pipeline_mode<synchronous>, transform_indices = @transform_2, window_bounds = array<i64: 4, 128>}, {transform_indices = @transform_3, window_bounds = array<i64: 64, 128>}, {transform_indices = @transform_4, window_bounds = array<i64: 64, 128>}]} {
    %c0 = arith.constant 0 : index
    %c0_0 = arith.constant 0 : index
    %0 = vector.load %arg1[%c0, %c0_0] : memref<64x8xbf16, #tpu.memory_space<vmem>>, vector<64x8xbf16>
    %c0_1 = arith.constant 0 : index
    %c0_2 = arith.constant 0 : index
    %1 = vector.load %arg2[%c0_1, %c0_2] : memref<8x128xbf16, #tpu.memory_space<vmem>>, vector<8x128xbf16>
    %cst = arith.constant dense<0.000000e+00> : vector<64x128xf32>
    %2 = tpu.matmul %0, %1, %cst {dimension_numbers = #tpu.dot_dimension_numbers<[1], [0], [0], [1], [0, 0, 1, 1], [], []>} : vector<64x8xbf16>, vector<8x128xbf16>, vector<64x128xf32> -> vector<64x128xf32>
    %c0_3 = arith.constant 0 : index
    %c0_4 = arith.constant 0 : index
    %3 = vector.load %arg3[%c0_3, %c0_4] : memref<4x128xf32, #tpu.memory_space<vmem>>, vector<1x128xf32>
    %4 = vector.broadcast %3 : vector<1x128xf32> to vector<64x128xf32>
    %5 = arith.addf %2, %4 : vector<64x128xf32>
    %c0_5 = arith.constant 0 : index
    %c0_6 = arith.constant 0 : index
    %6 = vector.load %arg4[%c0_5, %c0_6] : memref<64x128xbf16, #tpu.memory_space<vmem>>, vector<64x128xbf16>
    %7 = arith.extf %6 : vector<64x128xbf16> to vector<64x128xf32>
    %8 = arith.addf %5, %7 : vector<64x128xf32>
    %cst_7 = arith.constant 0.000000e+00 : f32
    %9 = vector.broadcast %cst_7 : f32 to vector<64x128xf32>
    %10 = arith.maximumf %8, %9 : vector<64x128xf32>
    %11 = arith.truncf %10 : vector<64x128xf32> to vector<64x128xbf16>
    %c0_8 = arith.constant 0 : index
    %c0_9 = arith.constant 0 : index
    %12 = vector.load %arg5[%c0_8, %c0_9] : memref<64x128xbf16, #tpu.memory_space<vmem>>, vector<64x128xbf16>
    tpu.vector_store %arg5[%c0_8, %c0_9], %11 {strides = array<i32>} : memref<64x128xbf16, #tpu.memory_space<vmem>>, vector<64x128xbf16>,
    return
  }
  func.func @transform_0(%arg0: i32) -> (i32, i32) {
    %c0_i32 = arith.constant 0 : i32
    %c0_i32_0 = arith.constant 0 : i32
    return %arg0, %c0_i32 : i32, i32
  }
  func.func @transform_1(%arg0: i32) -> (i32, i32) {
    %c0_i32 = arith.constant 0 : i32
    %c0_i32_0 = arith.constant 0 : i32
    %c0_i32_1 = arith.constant 0 : i32
    return %c0_i32, %c0_i32_0 : i32, i32
  }
  func.func @transform_2(%arg0: i32) -> (i32, i32) {
    %c0_i32 = arith.constant 0 : i32
    %c0_i32_0 = arith.constant 0 : i32
    %c0_i32_1 = arith.constant 0 : i32
    return %c0_i32, %c0_i32_0 : i32, i32
  }
  func.func @transform_3(%arg0: i32) -> (i32, i32) {
    %c0_i32 = arith.constant 0 : i32
    %c0_i32_0 = arith.constant 0 : i32
    return %arg0, %c0_i32 : i32, i32
  }
  func.func @transform_4(%arg0: i32) -> (i32, i32) {
    %c0_i32 = arith.constant 0 : i32
    %c0_i32_0 = arith.constant 0 : i32
    return %arg0, %c0_i32 : i32, i32
  }
}

module attributes {stable_mosaic.version = 11 : i64} {
  func.func @_mm_kernel(%arg0: i32, %arg1: memref<64x32xbf16, #tpu.memory_space<vmem>>, %arg2: memref<32x128xbf16, #tpu.memory_space<vmem>>, %arg3: memref<4x128xf32, #tpu.memory_space<vmem>>, %arg4: memref<64x128xbf16, #tpu.memory_space<vmem>>) attributes {dimension_semantics = [#tpu.dimension_semantics<parallel>], iteration_bounds = array<i64: 1>, scalar_prefetch = 0 : i64, scratch_operands = 0 : i64, tpu.core_type = #tpu.core_type<tc>, window_params = [{transform_indices = @transform_0, window_bounds = array<i64: 64, 32>}, {pipeline_mode = #tpu.pipeline_mode<synchronous>, transform_indices = @transform_1, window_bounds = array<i64: 32, 128>}, {pipeline_mode = #tpu.pipeline_mode<synchronous>, transform_indices = @transform_2, window_bounds = array<i64: 4, 128>}, {transform_indices = @transform_3, window_bounds = array<i64: 64, 128>}]} {
    %c0 = arith.constant 0 : index
    %c0_0 = arith.constant 0 : index
    %0 = vector.load %arg1[%c0, %c0_0] : memref<64x32xbf16, #tpu.memory_space<vmem>>, vector<64x32xbf16>
    %c0_1 = arith.constant 0 : index
    %c0_2 = arith.constant 0 : index
    %1 = vector.load %arg2[%c0_1, %c0_2] : memref<32x128xbf16, #tpu.memory_space<vmem>>, vector<32x128xbf16>
    %cst = arith.constant dense<0.000000e+00> : vector<64x128xf32>
    %2 = tpu.matmul %0, %1, %cst {dimension_numbers = #tpu.dot_dimension_numbers<[1], [0], [0], [1], [0, 0, 1, 1], [], []>} : vector<64x32xbf16>, vector<32x128xbf16>, vector<64x128xf32> -> vector<64x128xf32>
    %c0_3 = arith.constant 0 : index
    %c0_4 = arith.constant 0 : index
    %3 = vector.load %arg3[%c0_3, %c0_4] : memref<4x128xf32, #tpu.memory_space<vmem>>, vector<1x128xf32>
    %4 = vector.broadcast %3 : vector<1x128xf32> to vector<64x128xf32>
    %5 = arith.addf %2, %4 : vector<64x128xf32>
    %c1 = arith.constant 1 : index
    %c0_5 = arith.constant 0 : index
    %6 = vector.load %arg3[%c1, %c0_5] : memref<4x128xf32, #tpu.memory_space<vmem>>, vector<1x128xf32>
    %7 = vector.broadcast %6 : vector<1x128xf32> to vector<64x128xf32>
    %8 = arith.mulf %5, %7 : vector<64x128xf32>
    %9 = arith.maximumf %5, %8 : vector<64x128xf32>
    %10 = arith.truncf %9 : vector<64x128xf32> to vector<64x128xbf16>
    %c0_6 = arith.constant 0 : index
    %c0_7 = arith.constant 0 : index
    %11 = vector.load %arg4[%c0_6, %c0_7] : memref<64x128xbf16, #tpu.memory_space<vmem>>, vector<64x128xbf16>
    tpu.vector_store %arg4[%c0_6, %c0_7], %10 {strides = array<i32>} : memref<64x128xbf16, #tpu.memory_space<vmem>>, vector<64x128xbf16>,
    return
  }
  func.func @transform_0(%arg0: i32) -> (i32, i32) {
    %c0_i32 = arith.constant 0 : i32
    %c0_i32_0 = arith.constant 0 : i32
    return %arg0, %c0_i32 : i32, i32
  }
  func.func @transform_1(%arg0: i32) -> (i32, i32) {
    %c0_i32 = arith.constant 0 : i32
    %c0_i32_0 = arith.constant 0 : i32
    %c0_i32_1 = arith.constant 0 : i32
    return %c0_i32, %c0_i32_0 : i32, i32
  }
  func.func @transform_2(%arg0: i32) -> (i32, i32) {
    %c0_i32 = arith.constant 0 : i32
    %c0_i32_0 = arith.constant 0 : i32
    %c0_i32_1 = arith.constant 0 : i32
    return %c0_i32, %c0_i32_0 : i32, i32
  }
  func.func @transform_3(%arg0: i32) -> (i32, i32) {
    %c0_i32 = arith.constant 0 : i32
    %c0_i32_0 = arith.constant 0 : i32
    return %arg0, %c0_i32 : i32, i32
  }
}

module attributes {stable_mosaic.version = 11 : i64} {
  func.func @_mm_kernel(%arg0: i32, %arg1: memref<64x144xbf16, #tpu.memory_space<vmem>>, %arg2: memref<144x128xbf16, #tpu.memory_space<vmem>>, %arg3: memref<4x128xf32, #tpu.memory_space<vmem>>, %arg4: memref<64x128xbf16, #tpu.memory_space<vmem>>) attributes {dimension_semantics = [#tpu.dimension_semantics<parallel>], iteration_bounds = array<i64: 1>, scalar_prefetch = 0 : i64, scratch_operands = 0 : i64, tpu.core_type = #tpu.core_type<tc>, window_params = [{transform_indices = @transform_0, window_bounds = array<i64: 64, 144>}, {pipeline_mode = #tpu.pipeline_mode<synchronous>, transform_indices = @transform_1, window_bounds = array<i64: 144, 128>}, {pipeline_mode = #tpu.pipeline_mode<synchronous>, transform_indices = @transform_2, window_bounds = array<i64: 4, 128>}, {transform_indices = @transform_3, window_bounds = array<i64: 64, 128>}]} {
    %c0 = arith.constant 0 : index
    %c0_0 = arith.constant 0 : index
    %0 = vector.load %arg1[%c0, %c0_0] : memref<64x144xbf16, #tpu.memory_space<vmem>>, vector<64x144xbf16>
    %c0_1 = arith.constant 0 : index
    %c0_2 = arith.constant 0 : index
    %1 = vector.load %arg2[%c0_1, %c0_2] : memref<144x128xbf16, #tpu.memory_space<vmem>>, vector<144x128xbf16>
    %cst = arith.constant dense<0.000000e+00> : vector<64x128xf32>
    %2 = tpu.matmul %0, %1, %cst {dimension_numbers = #tpu.dot_dimension_numbers<[1], [0], [0], [1], [0, 0, 1, 1], [], []>} : vector<64x144xbf16>, vector<144x128xbf16>, vector<64x128xf32> -> vector<64x128xf32>
    %c0_3 = arith.constant 0 : index
    %c0_4 = arith.constant 0 : index
    %3 = vector.load %arg3[%c0_3, %c0_4] : memref<4x128xf32, #tpu.memory_space<vmem>>, vector<1x128xf32>
    %4 = vector.broadcast %3 : vector<1x128xf32> to vector<64x128xf32>
    %5 = arith.addf %2, %4 : vector<64x128xf32>
    %cst_5 = arith.constant 0.000000e+00 : f32
    %6 = vector.broadcast %cst_5 : f32 to vector<64x128xf32>
    %7 = arith.maximumf %5, %6 : vector<64x128xf32>
    %8 = arith.truncf %7 : vector<64x128xf32> to vector<64x128xbf16>
    %c0_6 = arith.constant 0 : index
    %c0_7 = arith.constant 0 : index
    %9 = vector.load %arg4[%c0_6, %c0_7] : memref<64x128xbf16, #tpu.memory_space<vmem>>, vector<64x128xbf16>
    tpu.vector_store %arg4[%c0_6, %c0_7], %8 {strides = array<i32>} : memref<64x128xbf16, #tpu.memory_space<vmem>>, vector<64x128xbf16>,
    return
  }
  func.func @transform_0(%arg0: i32) -> (i32, i32) {
    %c0_i32 = arith.constant 0 : i32
    %c0_i32_0 = arith.constant 0 : i32
    return %arg0, %c0_i32 : i32, i32
  }
  func.func @transform_1(%arg0: i32) -> (i32, i32) {
    %c0_i32 = arith.constant 0 : i32
    %c0_i32_0 = arith.constant 0 : i32
    %c0_i32_1 = arith.constant 0 : i32
    return %c0_i32, %c0_i32_0 : i32, i32
  }
  func.func @transform_2(%arg0: i32) -> (i32, i32) {
    %c0_i32 = arith.constant 0 : i32
    %c0_i32_0 = arith.constant 0 : i32
    %c0_i32_1 = arith.constant 0 : i32
    return %c0_i32, %c0_i32_0 : i32, i32
  }
  func.func @transform_3(%arg0: i32) -> (i32, i32) {
    %c0_i32 = arith.constant 0 : i32
    %c0_i32_0 = arith.constant 0 : i32
    return %arg0, %c0_i32 : i32, i32
  }
}

module attributes {stable_mosaic.version = 11 : i64} {
  func.func @_mm_kernel(%arg0: i32, %arg1: memref<64x16xbf16, #tpu.memory_space<vmem>>, %arg2: memref<16x128xbf16, #tpu.memory_space<vmem>>, %arg3: memref<4x128xf32, #tpu.memory_space<vmem>>, %arg4: memref<64x128xbf16, #tpu.memory_space<vmem>>, %arg5: memref<64x128xbf16, #tpu.memory_space<vmem>>) attributes {dimension_semantics = [#tpu.dimension_semantics<parallel>], iteration_bounds = array<i64: 1>, scalar_prefetch = 0 : i64, scratch_operands = 0 : i64, tpu.core_type = #tpu.core_type<tc>, window_params = [{transform_indices = @transform_0, window_bounds = array<i64: 64, 16>}, {pipeline_mode = #tpu.pipeline_mode<synchronous>, transform_indices = @transform_1, window_bounds = array<i64: 16, 128>}, {pipeline_mode = #tpu.pipeline_mode<synchronous>, transform_indices = @transform_2, window_bounds = array<i64: 4, 128>}, {transform_indices = @transform_3, window_bounds = array<i64: 64, 128>}, {transform_indices = @transform_4, window_bounds = array<i64: 64, 128>}]} {
    %c0 = arith.constant 0 : index
    %c0_0 = arith.constant 0 : index
    %0 = vector.load %arg1[%c0, %c0_0] : memref<64x16xbf16, #tpu.memory_space<vmem>>, vector<64x16xbf16>
    %c0_1 = arith.constant 0 : index
    %c0_2 = arith.constant 0 : index
    %1 = vector.load %arg2[%c0_1, %c0_2] : memref<16x128xbf16, #tpu.memory_space<vmem>>, vector<16x128xbf16>
    %cst = arith.constant dense<0.000000e+00> : vector<64x128xf32>
    %2 = tpu.matmul %0, %1, %cst {dimension_numbers = #tpu.dot_dimension_numbers<[1], [0], [0], [1], [0, 0, 1, 1], [], []>} : vector<64x16xbf16>, vector<16x128xbf16>, vector<64x128xf32> -> vector<64x128xf32>
    %c0_3 = arith.constant 0 : index
    %c0_4 = arith.constant 0 : index
    %3 = vector.load %arg3[%c0_3, %c0_4] : memref<4x128xf32, #tpu.memory_space<vmem>>, vector<1x128xf32>
    %4 = vector.broadcast %3 : vector<1x128xf32> to vector<64x128xf32>
    %5 = arith.addf %2, %4 : vector<64x128xf32>
    %c0_5 = arith.constant 0 : index
    %c0_6 = arith.constant 0 : index
    %6 = vector.load %arg4[%c0_5, %c0_6] : memref<64x128xbf16, #tpu.memory_space<vmem>>, vector<64x128xbf16>
    %7 = arith.extf %6 : vector<64x128xbf16> to vector<64x128xf32>
    %8 = arith.addf %5, %7 : vector<64x128xf32>
    %cst_7 = arith.constant 0.000000e+00 : f32
    %9 = vector.broadcast %cst_7 : f32 to vector<64x128xf32>
    %10 = arith.maximumf %8, %9 : vector<64x128xf32>
    %11 = arith.truncf %10 : vector<64x128xf32> to vector<64x128xbf16>
    %c0_8 = arith.constant 0 : index
    %c0_9 = arith.constant 0 : index
    %12 = vector.load %arg5[%c0_8, %c0_9] : memref<64x128xbf16, #tpu.memory_space<vmem>>, vector<64x128xbf16>
    tpu.vector_store %arg5[%c0_8, %c0_9], %11 {strides = array<i32>} : memref<64x128xbf16, #tpu.memory_space<vmem>>, vector<64x128xbf16>,
    return
  }
  func.func @transform_0(%arg0: i32) -> (i32, i32) {
    %c0_i32 = arith.constant 0 : i32
    %c0_i32_0 = arith.constant 0 : i32
    return %arg0, %c0_i32 : i32, i32
  }
  func.func @transform_1(%arg0: i32) -> (i32, i32) {
    %c0_i32 = arith.constant 0 : i32
    %c0_i32_0 = arith.constant 0 : i32
    %c0_i32_1 = arith.constant 0 : i32
    return %c0_i32, %c0_i32_0 : i32, i32
  }
  func.func @transform_2(%arg0: i32) -> (i32, i32) {
    %c0_i32 = arith.constant 0 : i32
    %c0_i32_0 = arith.constant 0 : i32
    %c0_i32_1 = arith.constant 0 : i32
    return %c0_i32, %c0_i32_0 : i32, i32
  }
  func.func @transform_3(%arg0: i32) -> (i32, i32) {
    %c0_i32 = arith.constant 0 : i32
    %c0_i32_0 = arith.constant 0 : i32
    return %arg0, %c0_i32 : i32, i32
  }
  func.func @transform_4(%arg0: i32) -> (i32, i32) {
    %c0_i32 = arith.constant 0 : i32
    %c0_i32_0 = arith.constant 0 : i32
    return %arg0, %c0_i32 : i32, i32
  }
}

module attributes {stable_mosaic.version = 11 : i64} {
  func.func @_mm_kernel(%arg0: i32, %arg1: memref<64x64xbf16, #tpu.memory_space<vmem>>, %arg2: memref<64x128xbf16, #tpu.memory_space<vmem>>, %arg3: memref<4x128xf32, #tpu.memory_space<vmem>>, %arg4: memref<64x128xbf16, #tpu.memory_space<vmem>>) attributes {dimension_semantics = [#tpu.dimension_semantics<parallel>], iteration_bounds = array<i64: 1>, scalar_prefetch = 0 : i64, scratch_operands = 0 : i64, tpu.core_type = #tpu.core_type<tc>, window_params = [{transform_indices = @transform_0, window_bounds = array<i64: 64, 64>}, {pipeline_mode = #tpu.pipeline_mode<synchronous>, transform_indices = @transform_1, window_bounds = array<i64: 64, 128>}, {pipeline_mode = #tpu.pipeline_mode<synchronous>, transform_indices = @transform_2, window_bounds = array<i64: 4, 128>}, {transform_indices = @transform_3, window_bounds = array<i64: 64, 128>}]} {
    %c0 = arith.constant 0 : index
    %c0_0 = arith.constant 0 : index
    %0 = vector.load %arg1[%c0, %c0_0] : memref<64x64xbf16, #tpu.memory_space<vmem>>, vector<64x64xbf16>
    %c0_1 = arith.constant 0 : index
    %c0_2 = arith.constant 0 : index
    %1 = vector.load %arg2[%c0_1, %c0_2] : memref<64x128xbf16, #tpu.memory_space<vmem>>, vector<64x128xbf16>
    %cst = arith.constant dense<0.000000e+00> : vector<64x128xf32>
    %2 = tpu.matmul %0, %1, %cst {dimension_numbers = #tpu.dot_dimension_numbers<[1], [0], [0], [1], [0, 0, 1, 1], [], []>} : vector<64x64xbf16>, vector<64x128xbf16>, vector<64x128xf32> -> vector<64x128xf32>
    %c0_3 = arith.constant 0 : index
    %c0_4 = arith.constant 0 : index
    %3 = vector.load %arg3[%c0_3, %c0_4] : memref<4x128xf32, #tpu.memory_space<vmem>>, vector<1x128xf32>
    %4 = vector.broadcast %3 : vector<1x128xf32> to vector<64x128xf32>
    %5 = arith.addf %2, %4 : vector<64x128xf32>
    %cst_5 = arith.constant 0.000000e+00 : f32
    %6 = vector.broadcast %cst_5 : f32 to vector<64x128xf32>
    %7 = arith.maximumf %5, %6 : vector<64x128xf32>
    %8 = arith.truncf %7 : vector<64x128xf32> to vector<64x128xbf16>
    %c0_6 = arith.constant 0 : index
    %c0_7 = arith.constant 0 : index
    %9 = vector.load %arg4[%c0_6, %c0_7] : memref<64x128xbf16, #tpu.memory_space<vmem>>, vector<64x128xbf16>
    tpu.vector_store %arg4[%c0_6, %c0_7], %8 {strides = array<i32>} : memref<64x128xbf16, #tpu.memory_space<vmem>>, vector<64x128xbf16>,
    return
  }
  func.func @transform_0(%arg0: i32) -> (i32, i32) {
    %c0_i32 = arith.constant 0 : i32
    %c0_i32_0 = arith.constant 0 : i32
    return %arg0, %c0_i32 : i32, i32
  }
  func.func @transform_1(%arg0: i32) -> (i32, i32) {
    %c0_i32 = arith.constant 0 : i32
    %c0_i32_0 = arith.constant 0 : i32
    %c0_i32_1 = arith.constant 0 : i32
    return %c0_i32, %c0_i32_0 : i32, i32
  }
  func.func @transform_2(%arg0: i32) -> (i32, i32) {
    %c0_i32 = arith.constant 0 : i32
    %c0_i32_0 = arith.constant 0 : i32
    %c0_i32_1 = arith.constant 0 : i32
    return %c0_i32, %c0_i32_0 : i32, i32
  }
  func.func @transform_3(%arg0: i32) -> (i32, i32) {
    %c0_i32 = arith.constant 0 : i32
    %c0_i32_0 = arith.constant 0 : i32
    return %arg0, %c0_i32 : i32, i32
  }
}

module attributes {stable_mosaic.version = 11 : i64} {
  func.func @_mm_kernel(%arg0: i32, %arg1: memref<64x64xbf16, #tpu.memory_space<vmem>>, %arg2: memref<64x256xbf16, #tpu.memory_space<vmem>>, %arg3: memref<4x256xf32, #tpu.memory_space<vmem>>, %arg4: memref<64x256xbf16, #tpu.memory_space<vmem>>) attributes {dimension_semantics = [#tpu.dimension_semantics<parallel>], iteration_bounds = array<i64: 1>, scalar_prefetch = 0 : i64, scratch_operands = 0 : i64, tpu.core_type = #tpu.core_type<tc>, window_params = [{transform_indices = @transform_0, window_bounds = array<i64: 64, 64>}, {pipeline_mode = #tpu.pipeline_mode<synchronous>, transform_indices = @transform_1, window_bounds = array<i64: 64, 256>}, {pipeline_mode = #tpu.pipeline_mode<synchronous>, transform_indices = @transform_2, window_bounds = array<i64: 4, 256>}, {transform_indices = @transform_3, window_bounds = array<i64: 64, 256>}]} {
    %c0 = arith.constant 0 : index
    %c0_0 = arith.constant 0 : index
    %0 = vector.load %arg1[%c0, %c0_0] : memref<64x64xbf16, #tpu.memory_space<vmem>>, vector<64x64xbf16>
    %c0_1 = arith.constant 0 : index
    %c0_2 = arith.constant 0 : index
    %1 = vector.load %arg2[%c0_1, %c0_2] : memref<64x256xbf16, #tpu.memory_space<vmem>>, vector<64x256xbf16>
    %cst = arith.constant dense<0.000000e+00> : vector<64x256xf32>
    %2 = tpu.matmul %0, %1, %cst {dimension_numbers = #tpu.dot_dimension_numbers<[1], [0], [0], [1], [0, 0, 1, 1], [], []>} : vector<64x64xbf16>, vector<64x256xbf16>, vector<64x256xf32> -> vector<64x256xf32>
    %c0_3 = arith.constant 0 : index
    %c0_4 = arith.constant 0 : index
    %3 = vector.load %arg3[%c0_3, %c0_4] : memref<4x256xf32, #tpu.memory_space<vmem>>, vector<1x256xf32>
    %4 = vector.broadcast %3 : vector<1x256xf32> to vector<64x256xf32>
    %5 = arith.addf %2, %4 : vector<64x256xf32>
    %c1 = arith.constant 1 : index
    %c0_5 = arith.constant 0 : index
    %6 = vector.load %arg3[%c1, %c0_5] : memref<4x256xf32, #tpu.memory_space<vmem>>, vector<1x256xf32>
    %7 = vector.broadcast %6 : vector<1x256xf32> to vector<64x256xf32>
    %8 = arith.mulf %5, %7 : vector<64x256xf32>
    %9 = arith.maximumf %5, %8 : vector<64x256xf32>
    %10 = arith.truncf %9 : vector<64x256xf32> to vector<64x256xbf16>
    %c0_6 = arith.constant 0 : index
    %c0_7 = arith.constant 0 : index
    %11 = vector.load %arg4[%c0_6, %c0_7] : memref<64x256xbf16, #tpu.memory_space<vmem>>, vector<64x256xbf16>
    tpu.vector_store %arg4[%c0_6, %c0_7], %10 {strides = array<i32>} : memref<64x256xbf16, #tpu.memory_space<vmem>>, vector<64x256xbf16>,
    return
  }
  func.func @transform_0(%arg0: i32) -> (i32, i32) {
    %c0_i32 = arith.constant 0 : i32
    %c0_i32_0 = arith.constant 0 : i32
    return %arg0, %c0_i32 : i32, i32
  }
  func.func @transform_1(%arg0: i32) -> (i32, i32) {
    %c0_i32 = arith.constant 0 : i32
    %c0_i32_0 = arith.constant 0 : i32
    %c0_i32_1 = arith.constant 0 : i32
    return %c0_i32, %c0_i32_0 : i32, i32
  }
  func.func @transform_2(%arg0: i32) -> (i32, i32) {
    %c0_i32 = arith.constant 0 : i32
    %c0_i32_0 = arith.constant 0 : i32
    %c0_i32_1 = arith.constant 0 : i32
    return %c0_i32, %c0_i32_0 : i32, i32
  }
  func.func @transform_3(%arg0: i32) -> (i32, i32) {
    %c0_i32 = arith.constant 0 : i32
    %c0_i32_0 = arith.constant 0 : i32
    return %arg0, %c0_i32 : i32, i32
  }
}

module attributes {stable_mosaic.version = 11 : i64} {
  func.func @_mm_kernel(%arg0: i32, %arg1: memref<64x288xbf16, #tpu.memory_space<vmem>>, %arg2: memref<288x128xbf16, #tpu.memory_space<vmem>>, %arg3: memref<4x128xf32, #tpu.memory_space<vmem>>, %arg4: memref<64x128xbf16, #tpu.memory_space<vmem>>) attributes {dimension_semantics = [#tpu.dimension_semantics<parallel>], iteration_bounds = array<i64: 1>, scalar_prefetch = 0 : i64, scratch_operands = 0 : i64, tpu.core_type = #tpu.core_type<tc>, window_params = [{transform_indices = @transform_0, window_bounds = array<i64: 64, 288>}, {pipeline_mode = #tpu.pipeline_mode<synchronous>, transform_indices = @transform_1, window_bounds = array<i64: 288, 128>}, {pipeline_mode = #tpu.pipeline_mode<synchronous>, transform_indices = @transform_2, window_bounds = array<i64: 4, 128>}, {transform_indices = @transform_3, window_bounds = array<i64: 64, 128>}]} {
    %c0 = arith.constant 0 : index
    %c0_0 = arith.constant 0 : index
    %0 = vector.load %arg1[%c0, %c0_0] : memref<64x288xbf16, #tpu.memory_space<vmem>>, vector<64x288xbf16>
    %c0_1 = arith.constant 0 : index
    %c0_2 = arith.constant 0 : index
    %1 = vector.load %arg2[%c0_1, %c0_2] : memref<288x128xbf16, #tpu.memory_space<vmem>>, vector<288x128xbf16>
    %cst = arith.constant dense<0.000000e+00> : vector<64x128xf32>
    %2 = tpu.matmul %0, %1, %cst {dimension_numbers = #tpu.dot_dimension_numbers<[1], [0], [0], [1], [0, 0, 1, 1], [], []>} : vector<64x288xbf16>, vector<288x128xbf16>, vector<64x128xf32> -> vector<64x128xf32>
    %c0_3 = arith.constant 0 : index
    %c0_4 = arith.constant 0 : index
    %3 = vector.load %arg3[%c0_3, %c0_4] : memref<4x128xf32, #tpu.memory_space<vmem>>, vector<1x128xf32>
    %4 = vector.broadcast %3 : vector<1x128xf32> to vector<64x128xf32>
    %5 = arith.addf %2, %4 : vector<64x128xf32>
    %cst_5 = arith.constant 0.000000e+00 : f32
    %6 = vector.broadcast %cst_5 : f32 to vector<64x128xf32>
    %7 = arith.maximumf %5, %6 : vector<64x128xf32>
    %8 = arith.truncf %7 : vector<64x128xf32> to vector<64x128xbf16>
    %c0_6 = arith.constant 0 : index
    %c0_7 = arith.constant 0 : index
    %9 = vector.load %arg4[%c0_6, %c0_7] : memref<64x128xbf16, #tpu.memory_space<vmem>>, vector<64x128xbf16>
    tpu.vector_store %arg4[%c0_6, %c0_7], %8 {strides = array<i32>} : memref<64x128xbf16, #tpu.memory_space<vmem>>, vector<64x128xbf16>,
    return
  }
  func.func @transform_0(%arg0: i32) -> (i32, i32) {
    %c0_i32 = arith.constant 0 : i32
    %c0_i32_0 = arith.constant 0 : i32
    return %arg0, %c0_i32 : i32, i32
  }
  func.func @transform_1(%arg0: i32) -> (i32, i32) {
    %c0_i32 = arith.constant 0 : i32
    %c0_i32_0 = arith.constant 0 : i32
    %c0_i32_1 = arith.constant 0 : i32
    return %c0_i32, %c0_i32_0 : i32, i32
  }
  func.func @transform_2(%arg0: i32) -> (i32, i32) {
    %c0_i32 = arith.constant 0 : i32
    %c0_i32_0 = arith.constant 0 : i32
    %c0_i32_1 = arith.constant 0 : i32
    return %c0_i32, %c0_i32_0 : i32, i32
  }
  func.func @transform_3(%arg0: i32) -> (i32, i32) {
    %c0_i32 = arith.constant 0 : i32
    %c0_i32_0 = arith.constant 0 : i32
    return %arg0, %c0_i32 : i32, i32
  }
}

module attributes {stable_mosaic.version = 11 : i64} {
  func.func @_mm_kernel(%arg0: i32, %arg1: memref<64x32xbf16, #tpu.memory_space<vmem>>, %arg2: memref<32x128xbf16, #tpu.memory_space<vmem>>, %arg3: memref<4x128xf32, #tpu.memory_space<vmem>>, %arg4: memref<64x128xbf16, #tpu.memory_space<vmem>>, %arg5: memref<64x128xbf16, #tpu.memory_space<vmem>>) attributes {dimension_semantics = [#tpu.dimension_semantics<parallel>], iteration_bounds = array<i64: 1>, scalar_prefetch = 0 : i64, scratch_operands = 0 : i64, tpu.core_type = #tpu.core_type<tc>, window_params = [{transform_indices = @transform_0, window_bounds = array<i64: 64, 32>}, {pipeline_mode = #tpu.pipeline_mode<synchronous>, transform_indices = @transform_1, window_bounds = array<i64: 32, 128>}, {pipeline_mode = #tpu.pipeline_mode<synchronous>, transform_indices = @transform_2, window_bounds = array<i64: 4, 128>}, {transform_indices = @transform_3, window_bounds = array<i64: 64, 128>}, {transform_indices = @transform_4, window_bounds = array<i64: 64, 128>}]} {
    %c0 = arith.constant 0 : index
    %c0_0 = arith.constant 0 : index
    %0 = vector.load %arg1[%c0, %c0_0] : memref<64x32xbf16, #tpu.memory_space<vmem>>, vector<64x32xbf16>
    %c0_1 = arith.constant 0 : index
    %c0_2 = arith.constant 0 : index
    %1 = vector.load %arg2[%c0_1, %c0_2] : memref<32x128xbf16, #tpu.memory_space<vmem>>, vector<32x128xbf16>
    %cst = arith.constant dense<0.000000e+00> : vector<64x128xf32>
    %2 = tpu.matmul %0, %1, %cst {dimension_numbers = #tpu.dot_dimension_numbers<[1], [0], [0], [1], [0, 0, 1, 1], [], []>} : vector<64x32xbf16>, vector<32x128xbf16>, vector<64x128xf32> -> vector<64x128xf32>
    %c0_3 = arith.constant 0 : index
    %c0_4 = arith.constant 0 : index
    %3 = vector.load %arg3[%c0_3, %c0_4] : memref<4x128xf32, #tpu.memory_space<vmem>>, vector<1x128xf32>
    %4 = vector.broadcast %3 : vector<1x128xf32> to vector<64x128xf32>
    %5 = arith.addf %2, %4 : vector<64x128xf32>
    %c0_5 = arith.constant 0 : index
    %c0_6 = arith.constant 0 : index
    %6 = vector.load %arg4[%c0_5, %c0_6] : memref<64x128xbf16, #tpu.memory_space<vmem>>, vector<64x128xbf16>
    %7 = arith.extf %6 : vector<64x128xbf16> to vector<64x128xf32>
    %8 = arith.addf %5, %7 : vector<64x128xf32>
    %cst_7 = arith.constant 0.000000e+00 : f32
    %9 = vector.broadcast %cst_7 : f32 to vector<64x128xf32>
    %10 = arith.maximumf %8, %9 : vector<64x128xf32>
    %11 = arith.truncf %10 : vector<64x128xf32> to vector<64x128xbf16>
    %c0_8 = arith.constant 0 : index
    %c0_9 = arith.constant 0 : index
    %12 = vector.load %arg5[%c0_8, %c0_9] : memref<64x128xbf16, #tpu.memory_space<vmem>>, vector<64x128xbf16>
    tpu.vector_store %arg5[%c0_8, %c0_9], %11 {strides = array<i32>} : memref<64x128xbf16, #tpu.memory_space<vmem>>, vector<64x128xbf16>,
    return
  }
  func.func @transform_0(%arg0: i32) -> (i32, i32) {
    %c0_i32 = arith.constant 0 : i32
    %c0_i32_0 = arith.constant 0 : i32
    return %arg0, %c0_i32 : i32, i32
  }
  func.func @transform_1(%arg0: i32) -> (i32, i32) {
    %c0_i32 = arith.constant 0 : i32
    %c0_i32_0 = arith.constant 0 : i32
    %c0_i32_1 = arith.constant 0 : i32
    return %c0_i32, %c0_i32_0 : i32, i32
  }
  func.func @transform_2(%arg0: i32) -> (i32, i32) {
    %c0_i32 = arith.constant 0 : i32
    %c0_i32_0 = arith.constant 0 : i32
    %c0_i32_1 = arith.constant 0 : i32
    return %c0_i32, %c0_i32_0 : i32, i32
  }
  func.func @transform_3(%arg0: i32) -> (i32, i32) {
    %c0_i32 = arith.constant 0 : i32
    %c0_i32_0 = arith.constant 0 : i32
    return %arg0, %c0_i32 : i32, i32
  }
  func.func @transform_4(%arg0: i32) -> (i32, i32) {
    %c0_i32 = arith.constant 0 : i32
    %c0_i32_0 = arith.constant 0 : i32
    return %arg0, %c0_i32 : i32, i32
  }
}

module attributes {stable_mosaic.version = 11 : i64} {
  func.func @_mm_kernel(%arg0: i32, %arg1: memref<64x128xbf16, #tpu.memory_space<vmem>>, %arg2: memref<128x128xbf16, #tpu.memory_space<vmem>>, %arg3: memref<4x128xf32, #tpu.memory_space<vmem>>, %arg4: memref<64x128xbf16, #tpu.memory_space<vmem>>) attributes {dimension_semantics = [#tpu.dimension_semantics<parallel>], iteration_bounds = array<i64: 1>, scalar_prefetch = 0 : i64, scratch_operands = 0 : i64, tpu.core_type = #tpu.core_type<tc>, window_params = [{transform_indices = @transform_0, window_bounds = array<i64: 64, 128>}, {pipeline_mode = #tpu.pipeline_mode<synchronous>, transform_indices = @transform_1, window_bounds = array<i64: 128, 128>}, {pipeline_mode = #tpu.pipeline_mode<synchronous>, transform_indices = @transform_2, window_bounds = array<i64: 4, 128>}, {transform_indices = @transform_3, window_bounds = array<i64: 64, 128>}]} {
    %c0 = arith.constant 0 : index
    %c0_0 = arith.constant 0 : index
    %0 = vector.load %arg1[%c0, %c0_0] : memref<64x128xbf16, #tpu.memory_space<vmem>>, vector<64x128xbf16>
    %c0_1 = arith.constant 0 : index
    %c0_2 = arith.constant 0 : index
    %1 = vector.load %arg2[%c0_1, %c0_2] : memref<128x128xbf16, #tpu.memory_space<vmem>>, vector<128x128xbf16>
    %cst = arith.constant dense<0.000000e+00> : vector<64x128xf32>
    %2 = tpu.matmul %0, %1, %cst {dimension_numbers = #tpu.dot_dimension_numbers<[1], [0], [0], [1], [0, 0, 1, 1], [], []>} : vector<64x128xbf16>, vector<128x128xbf16>, vector<64x128xf32> -> vector<64x128xf32>
    %c0_3 = arith.constant 0 : index
    %c0_4 = arith.constant 0 : index
    %3 = vector.load %arg3[%c0_3, %c0_4] : memref<4x128xf32, #tpu.memory_space<vmem>>, vector<1x128xf32>
    %4 = vector.broadcast %3 : vector<1x128xf32> to vector<64x128xf32>
    %5 = arith.addf %2, %4 : vector<64x128xf32>
    %cst_5 = arith.constant 0.000000e+00 : f32
    %6 = vector.broadcast %cst_5 : f32 to vector<64x128xf32>
    %7 = arith.maximumf %5, %6 : vector<64x128xf32>
    %8 = arith.truncf %7 : vector<64x128xf32> to vector<64x128xbf16>
    %c0_6 = arith.constant 0 : index
    %c0_7 = arith.constant 0 : index
    %9 = vector.load %arg4[%c0_6, %c0_7] : memref<64x128xbf16, #tpu.memory_space<vmem>>, vector<64x128xbf16>
    tpu.vector_store %arg4[%c0_6, %c0_7], %8 {strides = array<i32>} : memref<64x128xbf16, #tpu.memory_space<vmem>>, vector<64x128xbf16>,
    return
  }
  func.func @transform_0(%arg0: i32) -> (i32, i32) {
    %c0_i32 = arith.constant 0 : i32
    %c0_i32_0 = arith.constant 0 : i32
    return %arg0, %c0_i32 : i32, i32
  }
  func.func @transform_1(%arg0: i32) -> (i32, i32) {
    %c0_i32 = arith.constant 0 : i32
    %c0_i32_0 = arith.constant 0 : i32
    %c0_i32_1 = arith.constant 0 : i32
    return %c0_i32, %c0_i32_0 : i32, i32
  }
  func.func @transform_2(%arg0: i32) -> (i32, i32) {
    %c0_i32 = arith.constant 0 : i32
    %c0_i32_0 = arith.constant 0 : i32
    %c0_i32_1 = arith.constant 0 : i32
    return %c0_i32, %c0_i32_0 : i32, i32
  }
  func.func @transform_3(%arg0: i32) -> (i32, i32) {
    %c0_i32 = arith.constant 0 : i32
    %c0_i32_0 = arith.constant 0 : i32
    return %arg0, %c0_i32 : i32, i32
  }
}

module attributes {stable_mosaic.version = 11 : i64} {
  func.func @_mm_kernel(%arg0: i32, %arg1: memref<64x25xbf16, #tpu.memory_space<vmem>>, %arg2: memref<25x256xbf16, #tpu.memory_space<vmem>>, %arg3: memref<64x256xbf16, #tpu.memory_space<vmem>>) attributes {dimension_semantics = [#tpu.dimension_semantics<parallel>], iteration_bounds = array<i64: 1>, scalar_prefetch = 0 : i64, scratch_operands = 0 : i64, tpu.core_type = #tpu.core_type<tc>, window_params = [{transform_indices = @transform_0, window_bounds = array<i64: 64, 25>}, {pipeline_mode = #tpu.pipeline_mode<synchronous>, transform_indices = @transform_1, window_bounds = array<i64: 25, 256>}, {transform_indices = @transform_2, window_bounds = array<i64: 64, 256>}]} {
    %c0 = arith.constant 0 : index
    %c0_0 = arith.constant 0 : index
    %0 = vector.load %arg1[%c0, %c0_0] : memref<64x25xbf16, #tpu.memory_space<vmem>>, vector<64x25xbf16>
    %c0_1 = arith.constant 0 : index
    %c0_2 = arith.constant 0 : index
    %1 = vector.load %arg2[%c0_1, %c0_2] : memref<25x256xbf16, #tpu.memory_space<vmem>>, vector<25x256xbf16>
    %cst = arith.constant dense<0.000000e+00> : vector<64x256xf32>
    %2 = tpu.matmul %0, %1, %cst {dimension_numbers = #tpu.dot_dimension_numbers<[1], [0], [0], [1], [0, 0, 1, 1], [], []>} : vector<64x25xbf16>, vector<25x256xbf16>, vector<64x256xf32> -> vector<64x256xf32>
    %3 = arith.truncf %2 : vector<64x256xf32> to vector<64x256xbf16>
    %c0_3 = arith.constant 0 : index
    %c0_4 = arith.constant 0 : index
    %4 = vector.load %arg3[%c0_3, %c0_4] : memref<64x256xbf16, #tpu.memory_space<vmem>>, vector<64x256xbf16>
    tpu.vector_store %arg3[%c0_3, %c0_4], %3 {strides = array<i32>} : memref<64x256xbf16, #tpu.memory_space<vmem>>, vector<64x256xbf16>,
    return
  }
  func.func @transform_0(%arg0: i32) -> (i32, i32) {
    %c0_i32 = arith.constant 0 : i32
    %c0_i32_0 = arith.constant 0 : i32
    return %arg0, %c0_i32 : i32, i32
  }
  func.func @transform_1(%arg0: i32) -> (i32, i32) {
    %c0_i32 = arith.constant 0 : i32
    %c0_i32_0 = arith.constant 0 : i32
    %c0_i32_1 = arith.constant 0 : i32
    return %c0_i32, %c0_i32_0 : i32, i32
  }
  func.func @transform_2(%arg0: i32) -> (i32, i32) {
    %c0_i32 = arith.constant 0 : i32
    %c0_i32_0 = arith.constant 0 : i32
    return %arg0, %c0_i32 : i32, i32
  }
}

module attributes {stable_mosaic.version = 11 : i64} {
  func.func @_mm_kernel(%arg0: i32, %arg1: memref<112x128xbf16, #tpu.memory_space<vmem>>, %arg2: memref<128x128xbf16, #tpu.memory_space<vmem>>, %arg3: memref<4x128xf32, #tpu.memory_space<vmem>>, %arg4: memref<112x128xbf16, #tpu.memory_space<vmem>>) attributes {dimension_semantics = [#tpu.dimension_semantics<parallel>], iteration_bounds = array<i64: 1>, scalar_prefetch = 0 : i64, scratch_operands = 0 : i64, tpu.core_type = #tpu.core_type<tc>, window_params = [{transform_indices = @transform_0, window_bounds = array<i64: 112, 128>}, {pipeline_mode = #tpu.pipeline_mode<synchronous>, transform_indices = @transform_1, window_bounds = array<i64: 128, 128>}, {pipeline_mode = #tpu.pipeline_mode<synchronous>, transform_indices = @transform_2, window_bounds = array<i64: 4, 128>}, {transform_indices = @transform_3, window_bounds = array<i64: 112, 128>}]} {
    %c0 = arith.constant 0 : index
    %c0_0 = arith.constant 0 : index
    %0 = vector.load %arg1[%c0, %c0_0] : memref<112x128xbf16, #tpu.memory_space<vmem>>, vector<112x128xbf16>
    %c0_1 = arith.constant 0 : index
    %c0_2 = arith.constant 0 : index
    %1 = vector.load %arg2[%c0_1, %c0_2] : memref<128x128xbf16, #tpu.memory_space<vmem>>, vector<128x128xbf16>
    %cst = arith.constant dense<0.000000e+00> : vector<112x128xf32>
    %2 = tpu.matmul %0, %1, %cst {dimension_numbers = #tpu.dot_dimension_numbers<[1], [0], [0], [1], [0, 0, 1, 1], [], []>} : vector<112x128xbf16>, vector<128x128xbf16>, vector<112x128xf32> -> vector<112x128xf32>
    %c0_3 = arith.constant 0 : index
    %c0_4 = arith.constant 0 : index
    %3 = vector.load %arg3[%c0_3, %c0_4] : memref<4x128xf32, #tpu.memory_space<vmem>>, vector<1x128xf32>
    %4 = vector.broadcast %3 : vector<1x128xf32> to vector<112x128xf32>
    %5 = arith.addf %2, %4 : vector<112x128xf32>
    %cst_5 = arith.constant 0.000000e+00 : f32
    %6 = vector.broadcast %cst_5 : f32 to vector<112x128xf32>
    %7 = arith.maximumf %5, %6 : vector<112x128xf32>
    %8 = arith.truncf %7 : vector<112x128xf32> to vector<112x128xbf16>
    %c0_6 = arith.constant 0 : index
    %c0_7 = arith.constant 0 : index
    %9 = vector.load %arg4[%c0_6, %c0_7] : memref<112x128xbf16, #tpu.memory_space<vmem>>, vector<112x128xbf16>
    tpu.vector_store %arg4[%c0_6, %c0_7], %8 {strides = array<i32>} : memref<112x128xbf16, #tpu.memory_space<vmem>>, vector<112x128xbf16>,
    return
  }
  func.func @transform_0(%arg0: i32) -> (i32, i32) {
    %c0_i32 = arith.constant 0 : i32
    %c0_i32_0 = arith.constant 0 : i32
    return %arg0, %c0_i32 : i32, i32
  }
  func.func @transform_1(%arg0: i32) -> (i32, i32) {
    %c0_i32 = arith.constant 0 : i32
    %c0_i32_0 = arith.constant 0 : i32
    %c0_i32_1 = arith.constant 0 : i32
    return %c0_i32, %c0_i32_0 : i32, i32
  }
  func.func @transform_2(%arg0: i32) -> (i32, i32) {
    %c0_i32 = arith.constant 0 : i32
    %c0_i32_0 = arith.constant 0 : i32
    %c0_i32_1 = arith.constant 0 : i32
    return %c0_i32, %c0_i32_0 : i32, i32
  }
  func.func @transform_3(%arg0: i32) -> (i32, i32) {
    %c0_i32 = arith.constant 0 : i32
    %c0_i32_0 = arith.constant 0 : i32
    return %arg0, %c0_i32 : i32, i32
  }
}

module attributes {stable_mosaic.version = 11 : i64} {
  func.func @_mm_kernel(%arg0: i32, %arg1: memref<32x50xbf16, #tpu.memory_space<vmem>>, %arg2: memref<50x256xbf16, #tpu.memory_space<vmem>>, %arg3: memref<32x256xbf16, #tpu.memory_space<vmem>>) attributes {dimension_semantics = [#tpu.dimension_semantics<parallel>], iteration_bounds = array<i64: 1>, scalar_prefetch = 0 : i64, scratch_operands = 0 : i64, tpu.core_type = #tpu.core_type<tc>, window_params = [{transform_indices = @transform_0, window_bounds = array<i64: 32, 50>}, {pipeline_mode = #tpu.pipeline_mode<synchronous>, transform_indices = @transform_1, window_bounds = array<i64: 50, 256>}, {transform_indices = @transform_2, window_bounds = array<i64: 32, 256>}]} {
    %c0 = arith.constant 0 : index
    %c0_0 = arith.constant 0 : index
    %0 = vector.load %arg1[%c0, %c0_0] : memref<32x50xbf16, #tpu.memory_space<vmem>>, vector<32x50xbf16>
    %c0_1 = arith.constant 0 : index
    %c0_2 = arith.constant 0 : index
    %1 = vector.load %arg2[%c0_1, %c0_2] : memref<50x256xbf16, #tpu.memory_space<vmem>>, vector<50x256xbf16>
    %cst = arith.constant dense<0.000000e+00> : vector<32x256xf32>
    %2 = tpu.matmul %0, %1, %cst {dimension_numbers = #tpu.dot_dimension_numbers<[1], [0], [0], [1], [0, 0, 1, 1], [], []>} : vector<32x50xbf16>, vector<50x256xbf16>, vector<32x256xf32> -> vector<32x256xf32>
    %3 = arith.truncf %2 : vector<32x256xf32> to vector<32x256xbf16>
    %c0_3 = arith.constant 0 : index
    %c0_4 = arith.constant 0 : index
    %4 = vector.load %arg3[%c0_3, %c0_4] : memref<32x256xbf16, #tpu.memory_space<vmem>>, vector<32x256xbf16>
    tpu.vector_store %arg3[%c0_3, %c0_4], %3 {strides = array<i32>} : memref<32x256xbf16, #tpu.memory_space<vmem>>, vector<32x256xbf16>,
    return
  }
  func.func @transform_0(%arg0: i32) -> (i32, i32) {
    %c0_i32 = arith.constant 0 : i32
    %c0_i32_0 = arith.constant 0 : i32
    return %arg0, %c0_i32 : i32, i32
  }
  func.func @transform_1(%arg0: i32) -> (i32, i32) {
    %c0_i32 = arith.constant 0 : i32
    %c0_i32_0 = arith.constant 0 : i32
    %c0_i32_1 = arith.constant 0 : i32
    return %c0_i32, %c0_i32_0 : i32, i32
  }
  func.func @transform_2(%arg0: i32) -> (i32, i32) {
    %c0_i32 = arith.constant 0 : i32
    %c0_i32_0 = arith.constant 0 : i32
    return %arg0, %c0_i32 : i32, i32
  }
}

module attributes {stable_mosaic.version = 11 : i64} {
  func.func @_mm_kernel(%arg0: i32, %arg1: memref<64x2304xbf16, #tpu.memory_space<vmem>>, %arg2: memref<2304x128xbf16, #tpu.memory_space<vmem>>, %arg3: memref<4x128xf32, #tpu.memory_space<vmem>>, %arg4: memref<64x128xbf16, #tpu.memory_space<vmem>>) attributes {dimension_semantics = [#tpu.dimension_semantics<parallel>], iteration_bounds = array<i64: 1>, scalar_prefetch = 0 : i64, scratch_operands = 0 : i64, tpu.core_type = #tpu.core_type<tc>, window_params = [{transform_indices = @transform_0, window_bounds = array<i64: 64, 2304>}, {pipeline_mode = #tpu.pipeline_mode<synchronous>, transform_indices = @transform_1, window_bounds = array<i64: 2304, 128>}, {pipeline_mode = #tpu.pipeline_mode<synchronous>, transform_indices = @transform_2, window_bounds = array<i64: 4, 128>}, {transform_indices = @transform_3, window_bounds = array<i64: 64, 128>}]} {
    %c0 = arith.constant 0 : index
    %c0_0 = arith.constant 0 : index
    %0 = vector.load %arg1[%c0, %c0_0] : memref<64x2304xbf16, #tpu.memory_space<vmem>>, vector<64x2304xbf16>
    %c0_1 = arith.constant 0 : index
    %c0_2 = arith.constant 0 : index
    %1 = vector.load %arg2[%c0_1, %c0_2] : memref<2304x128xbf16, #tpu.memory_space<vmem>>, vector<2304x128xbf16>
    %cst = arith.constant dense<0.000000e+00> : vector<64x128xf32>
    %2 = tpu.matmul %0, %1, %cst {dimension_numbers = #tpu.dot_dimension_numbers<[1], [0], [0], [1], [0, 0, 1, 1], [], []>} : vector<64x2304xbf16>, vector<2304x128xbf16>, vector<64x128xf32> -> vector<64x128xf32>
    %c0_3 = arith.constant 0 : index
    %c0_4 = arith.constant 0 : index
    %3 = vector.load %arg3[%c0_3, %c0_4] : memref<4x128xf32, #tpu.memory_space<vmem>>, vector<1x128xf32>
    %4 = vector.broadcast %3 : vector<1x128xf32> to vector<64x128xf32>
    %5 = arith.addf %2, %4 : vector<64x128xf32>
    %cst_5 = arith.constant 0.000000e+00 : f32
    %6 = vector.broadcast %cst_5 : f32 to vector<64x128xf32>
    %7 = arith.maximumf %5, %6 : vector<64x128xf32>
    %8 = arith.truncf %7 : vector<64x128xf32> to vector<64x128xbf16>
    %c0_6 = arith.constant 0 : index
    %c0_7 = arith.constant 0 : index
    %9 = vector.load %arg4[%c0_6, %c0_7] : memref<64x128xbf16, #tpu.memory_space<vmem>>, vector<64x128xbf16>
    tpu.vector_store %arg4[%c0_6, %c0_7], %8 {strides = array<i32>} : memref<64x128xbf16, #tpu.memory_space<vmem>>, vector<64x128xbf16>,
    return
  }
  func.func @transform_0(%arg0: i32) -> (i32, i32) {
    %c0_i32 = arith.constant 0 : i32
    %c0_i32_0 = arith.constant 0 : i32
    return %arg0, %c0_i32 : i32, i32
  }
  func.func @transform_1(%arg0: i32) -> (i32, i32) {
    %c0_i32 = arith.constant 0 : i32
    %c0_i32_0 = arith.constant 0 : i32
    %c0_i32_1 = arith.constant 0 : i32
    return %c0_i32, %c0_i32_0 : i32, i32
  }
  func.func @transform_2(%arg0: i32) -> (i32, i32) {
    %c0_i32 = arith.constant 0 : i32
    %c0_i32_0 = arith.constant 0 : i32
    %c0_i32_1 = arith.constant 0 : i32
    return %c0_i32, %c0_i32_0 : i32, i32
  }
  func.func @transform_3(%arg0: i32) -> (i32, i32) {
    %c0_i32 = arith.constant 0 : i32
    %c0_i32_0 = arith.constant 0 : i32
    return %arg0, %c0_i32 : i32, i32
  }
}

module attributes {stable_mosaic.version = 11 : i64} {
  func.func @_mm_kernel(%arg0: i32, %arg1: memref<64x64xbf16, #tpu.memory_space<vmem>>, %arg2: memref<64x128xbf16, #tpu.memory_space<vmem>>, %arg3: memref<4x128xf32, #tpu.memory_space<vmem>>, %arg4: memref<64x128xbf16, #tpu.memory_space<vmem>>) attributes {dimension_semantics = [#tpu.dimension_semantics<parallel>], iteration_bounds = array<i64: 1>, scalar_prefetch = 0 : i64, scratch_operands = 0 : i64, tpu.core_type = #tpu.core_type<tc>, window_params = [{transform_indices = @transform_0, window_bounds = array<i64: 64, 64>}, {pipeline_mode = #tpu.pipeline_mode<synchronous>, transform_indices = @transform_1, window_bounds = array<i64: 64, 128>}, {pipeline_mode = #tpu.pipeline_mode<synchronous>, transform_indices = @transform_2, window_bounds = array<i64: 4, 128>}, {transform_indices = @transform_3, window_bounds = array<i64: 64, 128>}]} {
    %c0 = arith.constant 0 : index
    %c0_0 = arith.constant 0 : index
    %0 = vector.load %arg1[%c0, %c0_0] : memref<64x64xbf16, #tpu.memory_space<vmem>>, vector<64x64xbf16>
    %c0_1 = arith.constant 0 : index
    %c0_2 = arith.constant 0 : index
    %1 = vector.load %arg2[%c0_1, %c0_2] : memref<64x128xbf16, #tpu.memory_space<vmem>>, vector<64x128xbf16>
    %cst = arith.constant dense<0.000000e+00> : vector<64x128xf32>
    %2 = tpu.matmul %0, %1, %cst {dimension_numbers = #tpu.dot_dimension_numbers<[1], [0], [0], [1], [0, 0, 1, 1], [], []>} : vector<64x64xbf16>, vector<64x128xbf16>, vector<64x128xf32> -> vector<64x128xf32>
    %c0_3 = arith.constant 0 : index
    %c0_4 = arith.constant 0 : index
    %3 = vector.load %arg3[%c0_3, %c0_4] : memref<4x128xf32, #tpu.memory_space<vmem>>, vector<1x128xf32>
    %4 = vector.broadcast %3 : vector<1x128xf32> to vector<64x128xf32>
    %5 = arith.addf %2, %4 : vector<64x128xf32>
    %c1 = arith.constant 1 : index
    %c0_5 = arith.constant 0 : index
    %6 = vector.load %arg3[%c1, %c0_5] : memref<4x128xf32, #tpu.memory_space<vmem>>, vector<1x128xf32>
    %7 = vector.broadcast %6 : vector<1x128xf32> to vector<64x128xf32>
    %8 = arith.mulf %5, %7 : vector<64x128xf32>
    %9 = arith.maximumf %5, %8 : vector<64x128xf32>
    %10 = arith.truncf %9 : vector<64x128xf32> to vector<64x128xbf16>
    %c0_6 = arith.constant 0 : index
    %c0_7 = arith.constant 0 : index
    %11 = vector.load %arg4[%c0_6, %c0_7] : memref<64x128xbf16, #tpu.memory_space<vmem>>, vector<64x128xbf16>
    tpu.vector_store %arg4[%c0_6, %c0_7], %10 {strides = array<i32>} : memref<64x128xbf16, #tpu.memory_space<vmem>>, vector<64x128xbf16>,
    return
  }
  func.func @transform_0(%arg0: i32) -> (i32, i32) {
    %c0_i32 = arith.constant 0 : i32
    %c0_i32_0 = arith.constant 0 : i32
    return %arg0, %c0_i32 : i32, i32
  }
  func.func @transform_1(%arg0: i32) -> (i32, i32) {
    %c0_i32 = arith.constant 0 : i32
    %c0_i32_0 = arith.constant 0 : i32
    %c0_i32_1 = arith.constant 0 : i32
    return %c0_i32, %c0_i32_0 : i32, i32
  }
  func.func @transform_2(%arg0: i32) -> (i32, i32) {
    %c0_i32 = arith.constant 0 : i32
    %c0_i32_0 = arith.constant 0 : i32
    %c0_i32_1 = arith.constant 0 : i32
    return %c0_i32, %c0_i32_0 : i32, i32
  }
  func.func @transform_3(%arg0: i32) -> (i32, i32) {
    %c0_i32 = arith.constant 0 : i32
    %c0_i32_0 = arith.constant 0 : i32
    return %arg0, %c0_i32 : i32, i32
  }
}

module attributes {stable_mosaic.version = 11 : i64} {
  func.func @_mm_kernel(%arg0: i32, %arg1: memref<64x54xbf16, #tpu.memory_space<vmem>>, %arg2: memref<54x128xbf16, #tpu.memory_space<vmem>>, %arg3: memref<4x128xf32, #tpu.memory_space<vmem>>, %arg4: memref<64x128xbf16, #tpu.memory_space<vmem>>) attributes {dimension_semantics = [#tpu.dimension_semantics<parallel>], iteration_bounds = array<i64: 1>, scalar_prefetch = 0 : i64, scratch_operands = 0 : i64, tpu.core_type = #tpu.core_type<tc>, window_params = [{transform_indices = @transform_0, window_bounds = array<i64: 64, 54>}, {pipeline_mode = #tpu.pipeline_mode<synchronous>, transform_indices = @transform_1, window_bounds = array<i64: 54, 128>}, {pipeline_mode = #tpu.pipeline_mode<synchronous>, transform_indices = @transform_2, window_bounds = array<i64: 4, 128>}, {transform_indices = @transform_3, window_bounds = array<i64: 64, 128>}]} {
    %c0 = arith.constant 0 : index
    %c0_0 = arith.constant 0 : index
    %0 = vector.load %arg1[%c0, %c0_0] : memref<64x54xbf16, #tpu.memory_space<vmem>>, vector<64x54xbf16>
    %c0_1 = arith.constant 0 : index
    %c0_2 = arith.constant 0 : index
    %1 = vector.load %arg2[%c0_1, %c0_2] : memref<54x128xbf16, #tpu.memory_space<vmem>>, vector<54x128xbf16>
    %cst = arith.constant dense<0.000000e+00> : vector<64x128xf32>
    %2 = tpu.matmul %0, %1, %cst {dimension_numbers = #tpu.dot_dimension_numbers<[1], [0], [0], [1], [0, 0, 1, 1], [], []>} : vector<64x54xbf16>, vector<54x128xbf16>, vector<64x128xf32> -> vector<64x128xf32>
    %c0_3 = arith.constant 0 : index
    %c0_4 = arith.constant 0 : index
    %3 = vector.load %arg3[%c0_3, %c0_4] : memref<4x128xf32, #tpu.memory_space<vmem>>, vector<1x128xf32>
    %4 = vector.broadcast %3 : vector<1x128xf32> to vector<64x128xf32>
    %5 = arith.addf %2, %4 : vector<64x128xf32>
    %cst_5 = arith.constant 0.000000e+00 : f32
    %6 = vector.broadcast %cst_5 : f32 to vector<64x128xf32>
    %7 = arith.maximumf %5, %6 : vector<64x128xf32>
    %8 = arith.truncf %7 : vector<64x128xf32> to vector<64x128xbf16>
    %c0_6 = arith.constant 0 : index
    %c0_7 = arith.constant 0 : index
    %9 = vector.load %arg4[%c0_6, %c0_7] : memref<64x128xbf16, #tpu.memory_space<vmem>>, vector<64x128xbf16>
    tpu.vector_store %arg4[%c0_6, %c0_7], %8 {strides = array<i32>} : memref<64x128xbf16, #tpu.memory_space<vmem>>, vector<64x128xbf16>,
    return
  }
  func.func @transform_0(%arg0: i32) -> (i32, i32) {
    %c0_i32 = arith.constant 0 : i32
    %c0_i32_0 = arith.constant 0 : i32
    return %arg0, %c0_i32 : i32, i32
  }
  func.func @transform_1(%arg0: i32) -> (i32, i32) {
    %c0_i32 = arith.constant 0 : i32
    %c0_i32_0 = arith.constant 0 : i32
    %c0_i32_1 = arith.constant 0 : i32
    return %c0_i32, %c0_i32_0 : i32, i32
  }
  func.func @transform_2(%arg0: i32) -> (i32, i32) {
    %c0_i32 = arith.constant 0 : i32
    %c0_i32_0 = arith.constant 0 : i32
    %c0_i32_1 = arith.constant 0 : i32
    return %c0_i32, %c0_i32_0 : i32, i32
  }
  func.func @transform_3(%arg0: i32) -> (i32, i32) {
    %c0_i32 = arith.constant 0 : i32
    %c0_i32_0 = arith.constant 0 : i32
    return %arg0, %c0_i32 : i32, i32
  }
}

module attributes {stable_mosaic.version = 11 : i64} {
  func.func @_mm_kernel(%arg0: i32, %arg1: memref<64x6xbf16, #tpu.memory_space<vmem>>, %arg2: memref<6x128xbf16, #tpu.memory_space<vmem>>, %arg3: memref<4x128xf32, #tpu.memory_space<vmem>>, %arg4: memref<64x128xbf16, #tpu.memory_space<vmem>>) attributes {dimension_semantics = [#tpu.dimension_semantics<parallel>], iteration_bounds = array<i64: 1>, scalar_prefetch = 0 : i64, scratch_operands = 0 : i64, tpu.core_type = #tpu.core_type<tc>, window_params = [{transform_indices = @transform_0, window_bounds = array<i64: 64, 6>}, {pipeline_mode = #tpu.pipeline_mode<synchronous>, transform_indices = @transform_1, window_bounds = array<i64: 6, 128>}, {pipeline_mode = #tpu.pipeline_mode<synchronous>, transform_indices = @transform_2, window_bounds = array<i64: 4, 128>}, {transform_indices = @transform_3, window_bounds = array<i64: 64, 128>}]} {
    %c0 = arith.constant 0 : index
    %c0_0 = arith.constant 0 : index
    %0 = vector.load %arg1[%c0, %c0_0] : memref<64x6xbf16, #tpu.memory_space<vmem>>, vector<64x6xbf16>
    %c0_1 = arith.constant 0 : index
    %c0_2 = arith.constant 0 : index
    %1 = vector.load %arg2[%c0_1, %c0_2] : memref<6x128xbf16, #tpu.memory_space<vmem>>, vector<6x128xbf16>
    %cst = arith.constant dense<0.000000e+00> : vector<64x128xf32>
    %2 = tpu.matmul %0, %1, %cst {dimension_numbers = #tpu.dot_dimension_numbers<[1], [0], [0], [1], [0, 0, 1, 1], [], []>} : vector<64x6xbf16>, vector<6x128xbf16>, vector<64x128xf32> -> vector<64x128xf32>
    %c0_3 = arith.constant 0 : index
    %c0_4 = arith.constant 0 : index
    %3 = vector.load %arg3[%c0_3, %c0_4] : memref<4x128xf32, #tpu.memory_space<vmem>>, vector<1x128xf32>
    %4 = vector.broadcast %3 : vector<1x128xf32> to vector<64x128xf32>
    %5 = arith.addf %2, %4 : vector<64x128xf32>
    %cst_5 = arith.constant 0.000000e+00 : f32
    %6 = vector.broadcast %cst_5 : f32 to vector<64x128xf32>
    %7 = arith.maximumf %5, %6 : vector<64x128xf32>
    %c2 = arith.constant 2 : index
    %c0_6 = arith.constant 0 : index
    %8 = vector.load %arg3[%c2, %c0_6] : memref<4x128xf32, #tpu.memory_space<vmem>>, vector<1x128xf32>
    %9 = vector.broadcast %8 : vector<1x128xf32> to vector<64x128xf32>
    %10 = arith.mulf %7, %9 : vector<64x128xf32>
    %c3 = arith.constant 3 : index
    %c0_7 = arith.constant 0 : index
    %11 = vector.load %arg3[%c3, %c0_7] : memref<4x128xf32, #tpu.memory_space<vmem>>, vector<1x128xf32>
    %12 = vector.broadcast %11 : vector<1x128xf32> to vector<64x128xf32>
    %13 = arith.addf %10, %12 : vector<64x128xf32>
    %14 = arith.truncf %13 : vector<64x128xf32> to vector<64x128xbf16>
    %c0_8 = arith.constant 0 : index
    %c0_9 = arith.constant 0 : index
    %15 = vector.load %arg4[%c0_8, %c0_9] : memref<64x128xbf16, #tpu.memory_space<vmem>>, vector<64x128xbf16>
    tpu.vector_store %arg4[%c0_8, %c0_9], %14 {strides = array<i32>} : memref<64x128xbf16, #tpu.memory_space<vmem>>, vector<64x128xbf16>,
    return
  }
  func.func @transform_0(%arg0: i32) -> (i32, i32) {
    %c0_i32 = arith.constant 0 : i32
    %c0_i32_0 = arith.constant 0 : i32
    return %arg0, %c0_i32 : i32, i32
  }
  func.func @transform_1(%arg0: i32) -> (i32, i32) {
    %c0_i32 = arith.constant 0 : i32
    %c0_i32_0 = arith.constant 0 : i32
    %c0_i32_1 = arith.constant 0 : i32
    return %c0_i32, %c0_i32_0 : i32, i32
  }
  func.func @transform_2(%arg0: i32) -> (i32, i32) {
    %c0_i32 = arith.constant 0 : i32
    %c0_i32_0 = arith.constant 0 : i32
    %c0_i32_1 = arith.constant 0 : i32
    return %c0_i32, %c0_i32_0 : i32, i32
  }
  func.func @transform_3(%arg0: i32) -> (i32, i32) {
    %c0_i32 = arith.constant 0 : i32
    %c0_i32_0 = arith.constant 0 : i32
    return %arg0, %c0_i32 : i32, i32
  }
}

module attributes {stable_mosaic.version = 11 : i64} {
  func.func @_mm_kernel(%arg0: i32, %arg1: memref<64x6xbf16, #tpu.memory_space<vmem>>, %arg2: memref<6x128xbf16, #tpu.memory_space<vmem>>, %arg3: memref<4x128xf32, #tpu.memory_space<vmem>>, %arg4: memref<64x128xbf16, #tpu.memory_space<vmem>>) attributes {dimension_semantics = [#tpu.dimension_semantics<parallel>], iteration_bounds = array<i64: 1>, scalar_prefetch = 0 : i64, scratch_operands = 0 : i64, tpu.core_type = #tpu.core_type<tc>, window_params = [{transform_indices = @transform_0, window_bounds = array<i64: 64, 6>}, {pipeline_mode = #tpu.pipeline_mode<synchronous>, transform_indices = @transform_1, window_bounds = array<i64: 6, 128>}, {pipeline_mode = #tpu.pipeline_mode<synchronous>, transform_indices = @transform_2, window_bounds = array<i64: 4, 128>}, {transform_indices = @transform_3, window_bounds = array<i64: 64, 128>}]} {
    %c0 = arith.constant 0 : index
    %c0_0 = arith.constant 0 : index
    %0 = vector.load %arg1[%c0, %c0_0] : memref<64x6xbf16, #tpu.memory_space<vmem>>, vector<64x6xbf16>
    %c0_1 = arith.constant 0 : index
    %c0_2 = arith.constant 0 : index
    %1 = vector.load %arg2[%c0_1, %c0_2] : memref<6x128xbf16, #tpu.memory_space<vmem>>, vector<6x128xbf16>
    %cst = arith.constant dense<0.000000e+00> : vector<64x128xf32>
    %2 = tpu.matmul %0, %1, %cst {dimension_numbers = #tpu.dot_dimension_numbers<[1], [0], [0], [1], [0, 0, 1, 1], [], []>} : vector<64x6xbf16>, vector<6x128xbf16>, vector<64x128xf32> -> vector<64x128xf32>
    %c0_3 = arith.constant 0 : index
    %c0_4 = arith.constant 0 : index
    %3 = vector.load %arg3[%c0_3, %c0_4] : memref<4x128xf32, #tpu.memory_space<vmem>>, vector<1x128xf32>
    %4 = vector.broadcast %3 : vector<1x128xf32> to vector<64x128xf32>
    %5 = arith.addf %2, %4 : vector<64x128xf32>
    %cst_5 = arith.constant 0.000000e+00 : f32
    %6 = vector.broadcast %cst_5 : f32 to vector<64x128xf32>
    %7 = arith.maximumf %5, %6 : vector<64x128xf32>
    %8 = arith.truncf %7 : vector<64x128xf32> to vector<64x128xbf16>
    %c0_6 = arith.constant 0 : index
    %c0_7 = arith.constant 0 : index
    %9 = vector.load %arg4[%c0_6, %c0_7] : memref<64x128xbf16, #tpu.memory_space<vmem>>, vector<64x128xbf16>
    tpu.vector_store %arg4[%c0_6, %c0_7], %8 {strides = array<i32>} : memref<64x128xbf16, #tpu.memory_space<vmem>>, vector<64x128xbf16>,
    return
  }
  func.func @transform_0(%arg0: i32) -> (i32, i32) {
    %c0_i32 = arith.constant 0 : i32
    %c0_i32_0 = arith.constant 0 : i32
    return %arg0, %c0_i32 : i32, i32
  }
  func.func @transform_1(%arg0: i32) -> (i32, i32) {
    %c0_i32 = arith.constant 0 : i32
    %c0_i32_0 = arith.constant 0 : i32
    %c0_i32_1 = arith.constant 0 : i32
    return %c0_i32, %c0_i32_0 : i32, i32
  }
  func.func @transform_2(%arg0: i32) -> (i32, i32) {
    %c0_i32 = arith.constant 0 : i32
    %c0_i32_0 = arith.constant 0 : i32
    %c0_i32_1 = arith.constant 0 : i32
    return %c0_i32, %c0_i32_0 : i32, i32
  }
  func.func @transform_3(%arg0: i32) -> (i32, i32) {
    %c0_i32 = arith.constant 0 : i32
    %c0_i32_0 = arith.constant 0 : i32
    return %arg0, %c0_i32 : i32, i32
  }
}

module attributes {stable_mosaic.version = 11 : i64} {
  func.func @_mm_kernel(%arg0: i32, %arg1: memref<64x162xbf16, #tpu.memory_space<vmem>>, %arg2: memref<162x128xbf16, #tpu.memory_space<vmem>>, %arg3: memref<4x128xf32, #tpu.memory_space<vmem>>, %arg4: memref<64x128xbf16, #tpu.memory_space<vmem>>) attributes {dimension_semantics = [#tpu.dimension_semantics<parallel>], iteration_bounds = array<i64: 1>, scalar_prefetch = 0 : i64, scratch_operands = 0 : i64, tpu.core_type = #tpu.core_type<tc>, window_params = [{transform_indices = @transform_0, window_bounds = array<i64: 64, 162>}, {pipeline_mode = #tpu.pipeline_mode<synchronous>, transform_indices = @transform_1, window_bounds = array<i64: 162, 128>}, {pipeline_mode = #tpu.pipeline_mode<synchronous>, transform_indices = @transform_2, window_bounds = array<i64: 4, 128>}, {transform_indices = @transform_3, window_bounds = array<i64: 64, 128>}]} {
    %c0 = arith.constant 0 : index
    %c0_0 = arith.constant 0 : index
    %0 = vector.load %arg1[%c0, %c0_0] : memref<64x162xbf16, #tpu.memory_space<vmem>>, vector<64x162xbf16>
    %c0_1 = arith.constant 0 : index
    %c0_2 = arith.constant 0 : index
    %1 = vector.load %arg2[%c0_1, %c0_2] : memref<162x128xbf16, #tpu.memory_space<vmem>>, vector<162x128xbf16>
    %cst = arith.constant dense<0.000000e+00> : vector<64x128xf32>
    %2 = tpu.matmul %0, %1, %cst {dimension_numbers = #tpu.dot_dimension_numbers<[1], [0], [0], [1], [0, 0, 1, 1], [], []>} : vector<64x162xbf16>, vector<162x128xbf16>, vector<64x128xf32> -> vector<64x128xf32>
    %c0_3 = arith.constant 0 : index
    %c0_4 = arith.constant 0 : index
    %3 = vector.load %arg3[%c0_3, %c0_4] : memref<4x128xf32, #tpu.memory_space<vmem>>, vector<1x128xf32>
    %4 = vector.broadcast %3 : vector<1x128xf32> to vector<64x128xf32>
    %5 = arith.addf %2, %4 : vector<64x128xf32>
    %cst_5 = arith.constant 0.000000e+00 : f32
    %6 = vector.broadcast %cst_5 : f32 to vector<64x128xf32>
    %7 = arith.maximumf %5, %6 : vector<64x128xf32>
    %8 = arith.truncf %7 : vector<64x128xf32> to vector<64x128xbf16>
    %c0_6 = arith.constant 0 : index
    %c0_7 = arith.constant 0 : index
    %9 = vector.load %arg4[%c0_6, %c0_7] : memref<64x128xbf16, #tpu.memory_space<vmem>>, vector<64x128xbf16>
    tpu.vector_store %arg4[%c0_6, %c0_7], %8 {strides = array<i32>} : memref<64x128xbf16, #tpu.memory_space<vmem>>, vector<64x128xbf16>,
    return
  }
  func.func @transform_0(%arg0: i32) -> (i32, i32) {
    %c0_i32 = arith.constant 0 : i32
    %c0_i32_0 = arith.constant 0 : i32
    return %arg0, %c0_i32 : i32, i32
  }
  func.func @transform_1(%arg0: i32) -> (i32, i32) {
    %c0_i32 = arith.constant 0 : i32
    %c0_i32_0 = arith.constant 0 : i32
    %c0_i32_1 = arith.constant 0 : i32
    return %c0_i32, %c0_i32_0 : i32, i32
  }
  func.func @transform_2(%arg0: i32) -> (i32, i32) {
    %c0_i32 = arith.constant 0 : i32
    %c0_i32_0 = arith.constant 0 : i32
    %c0_i32_1 = arith.constant 0 : i32
    return %c0_i32, %c0_i32_0 : i32, i32
  }
  func.func @transform_3(%arg0: i32) -> (i32, i32) {
    %c0_i32 = arith.constant 0 : i32
    %c0_i32_0 = arith.constant 0 : i32
    return %arg0, %c0_i32 : i32, i32
  }
}

module attributes {stable_mosaic.version = 11 : i64} {
  func.func @_mm_kernel(%arg0: i32, %arg1: memref<64x6xbf16, #tpu.memory_space<vmem>>, %arg2: memref<6x128xbf16, #tpu.memory_space<vmem>>, %arg3: memref<4x128xf32, #tpu.memory_space<vmem>>, %arg4: memref<64x128xf32, #tpu.memory_space<vmem>>) attributes {dimension_semantics = [#tpu.dimension_semantics<parallel>], iteration_bounds = array<i64: 1>, scalar_prefetch = 0 : i64, scratch_operands = 0 : i64, tpu.core_type = #tpu.core_type<tc>, window_params = [{transform_indices = @transform_0, window_bounds = array<i64: 64, 6>}, {pipeline_mode = #tpu.pipeline_mode<synchronous>, transform_indices = @transform_1, window_bounds = array<i64: 6, 128>}, {pipeline_mode = #tpu.pipeline_mode<synchronous>, transform_indices = @transform_2, window_bounds = array<i64: 4, 128>}, {transform_indices = @transform_3, window_bounds = array<i64: 64, 128>}]} {
    %c0 = arith.constant 0 : index
    %c0_0 = arith.constant 0 : index
    %0 = vector.load %arg1[%c0, %c0_0] : memref<64x6xbf16, #tpu.memory_space<vmem>>, vector<64x6xbf16>
    %c0_1 = arith.constant 0 : index
    %c0_2 = arith.constant 0 : index
    %1 = vector.load %arg2[%c0_1, %c0_2] : memref<6x128xbf16, #tpu.memory_space<vmem>>, vector<6x128xbf16>
    %cst = arith.constant dense<0.000000e+00> : vector<64x128xf32>
    %2 = tpu.matmul %0, %1, %cst {dimension_numbers = #tpu.dot_dimension_numbers<[1], [0], [0], [1], [0, 0, 1, 1], [], []>} : vector<64x6xbf16>, vector<6x128xbf16>, vector<64x128xf32> -> vector<64x128xf32>
    %c0_3 = arith.constant 0 : index
    %c0_4 = arith.constant 0 : index
    %3 = vector.load %arg3[%c0_3, %c0_4] : memref<4x128xf32, #tpu.memory_space<vmem>>, vector<1x128xf32>
    %4 = vector.broadcast %3 : vector<1x128xf32> to vector<64x128xf32>
    %5 = arith.addf %2, %4 : vector<64x128xf32>
    %c0_5 = arith.constant 0 : index
    %c0_6 = arith.constant 0 : index
    %6 = vector.load %arg4[%c0_5, %c0_6] : memref<64x128xf32, #tpu.memory_space<vmem>>, vector<64x128xf32>
    tpu.vector_store %arg4[%c0_5, %c0_6], %5 {strides = array<i32>} : memref<64x128xf32, #tpu.memory_space<vmem>>, vector<64x128xf32>,
    return
  }
  func.func @transform_0(%arg0: i32) -> (i32, i32) {
    %c0_i32 = arith.constant 0 : i32
    %c0_i32_0 = arith.constant 0 : i32
    return %arg0, %c0_i32 : i32, i32
  }
  func.func @transform_1(%arg0: i32) -> (i32, i32) {
    %c0_i32 = arith.constant 0 : i32
    %c0_i32_0 = arith.constant 0 : i32
    %c0_i32_1 = arith.constant 0 : i32
    return %c0_i32, %c0_i32_0 : i32, i32
  }
  func.func @transform_2(%arg0: i32) -> (i32, i32) {
    %c0_i32 = arith.constant 0 : i32
    %c0_i32_0 = arith.constant 0 : i32
    %c0_i32_1 = arith.constant 0 : i32
    return %c0_i32, %c0_i32_0 : i32, i32
  }
  func.func @transform_3(%arg0: i32) -> (i32, i32) {
    %c0_i32 = arith.constant 0 : i32
    %c0_i32_0 = arith.constant 0 : i32
    return %arg0, %c0_i32 : i32, i32
  }
}

module attributes {stable_mosaic.version = 11 : i64} {
  func.func @_mm_kernel(%arg0: i32, %arg1: memref<16x25xf32, #tpu.memory_space<vmem>>, %arg2: memref<25x1152xf32, #tpu.memory_space<vmem>>, %arg3: memref<16x1152xf32, #tpu.memory_space<vmem>>) attributes {dimension_semantics = [#tpu.dimension_semantics<parallel>], iteration_bounds = array<i64: 1>, scalar_prefetch = 0 : i64, scratch_operands = 0 : i64, tpu.core_type = #tpu.core_type<tc>, window_params = [{transform_indices = @transform_0, window_bounds = array<i64: 16, 25>}, {pipeline_mode = #tpu.pipeline_mode<synchronous>, transform_indices = @transform_1, window_bounds = array<i64: 25, 1152>}, {transform_indices = @transform_2, window_bounds = array<i64: 16, 1152>}]} {
    %c0 = arith.constant 0 : index
    %c0_0 = arith.constant 0 : index
    %0 = vector.load %arg1[%c0, %c0_0] : memref<16x25xf32, #tpu.memory_space<vmem>>, vector<16x25xf32>
    %c0_1 = arith.constant 0 : index
    %c0_2 = arith.constant 0 : index
    %1 = vector.load %arg2[%c0_1, %c0_2] : memref<25x1152xf32, #tpu.memory_space<vmem>>, vector<25x1152xf32>
    %cst = arith.constant dense<0.000000e+00> : vector<16x1152xf32>
    %2 = tpu.matmul %0, %1, %cst {dimension_numbers = #tpu.dot_dimension_numbers<[1], [0], [0], [1], [0, 0, 1, 1], [], []>} : vector<16x25xf32>, vector<25x1152xf32>, vector<16x1152xf32> -> vector<16x1152xf32>
    %c0_3 = arith.constant 0 : index
    %c0_4 = arith.constant 0 : index
    %3 = vector.load %arg3[%c0_3, %c0_4] : memref<16x1152xf32, #tpu.memory_space<vmem>>, vector<16x1152xf32>
    tpu.vector_store %arg3[%c0_3, %c0_4], %2 {strides = array<i32>} : memref<16x1152xf32, #tpu.memory_space<vmem>>, vector<16x1152xf32>,
    return
  }
  func.func @transform_0(%arg0: i32) -> (i32, i32) {
    %c0_i32 = arith.constant 0 : i32
    %c0_i32_0 = arith.constant 0 : i32
    return %arg0, %c0_i32 : i32, i32
  }
  func.func @transform_1(%arg0: i32) -> (i32, i32) {
    %c0_i32 = arith.constant 0 : i32
    %c0_i32_0 = arith.constant 0 : i32
    %c0_i32_1 = arith.constant 0 : i32
    return %c0_i32, %c0_i32_0 : i32, i32
  }
  func.func @transform_2(%arg0: i32) -> (i32, i32) {
    %c0_i32 = arith.constant 0 : i32
    %c0_i32_0 = arith.constant 0 : i32
    return %arg0, %c0_i32 : i32, i32
  }
}

</mosaic_0001>

<bundles_post_ra>
// kernel: pspnet_forward.64
= control target key start
LH: loop header
LB: loop body
LE: loop exit
PB: predicated region body
PF: predicated region fallthrough
CT: control target
= control target key end

     0   :  { %s955_s12 = smov 0   ;;  %s1092_s0 = inlined_call_operand.vmem [shape: bf16[608,27], index: 0, kind: input, shape index: {}]   ;;  %s1093_s1 = inlined_call_operand.vmem [shape: bf16[27,128], index: 1, kind: input, shape index: {}]   ;;  %s1094_s2 = inlined_call_operand.vmem [shape: f32[4,128], index: 2, kind: input, shape index: {}]   ;;  %s1095_s3 = inlined_call_operand.vmem [shape: bf16[608,128], index: 3, kind: output, shape index: {}]  }
   0x1 LB: > { %s664_s13 = sadd.s32 4294967295, %s932_s12   ;;  %p668_p0 = scmp.ge.s32.totalorder %s932_s12, 1  ;;  %s932_s12 = sphi %s955_s12, %s13_s12  }
   0x2   : > { %p138_p1 = scmp.lt.s32.totalorder %s932_s12, 3 }
   0x4   : > { %p139_p2 = pnand %p668_p0, %p138_p1 }
   0x5   : > { %s162_s18 = smul.u32 (!%p139_p2), 38, %s664_s13 }
   0x6   : > { %142 = sbr.rel (%p139_p2) target bundleno = 236 (0xec), region = 32 }
   0x7   : > { %p163_p3 = scmp.lt.s32.totalorder (!%p139_p2), %s162_s18, 75 }
   0xb   : > { %v753_v0 = vld [vmem:[%s1093_s1 + $0x8] sm:$0xf]  ;;  %v796_v1 = vld [vmem:[%s1093_s1 + $0x8] sm:$0x30]  ;;  %vm383_vm0 = vcmask 1044480   ;;  %vm384_vm1 = vcmask 1045504  }
   0xc   : > { %v754_v2 = vor.u32 %v796_v1, %v753_v0  ;;  %v934_v3 = vmov 65535   ;;  %s1097_s18 = smov (!%p163_p3, %s162_s18), 75  ;;  %v795_v7 = vld [vmem:[%s1093_s1] sm:$0xff]  ;;  %vm325_vm2 = vcmask 220160  }
   0xd   : > { %v385_v4 = vsel %vm383_vm0, 4294967295, %v934_v3  ;;  %s669_s21 = sshll.u32 %s1097_s18, 2  ;;  %v1023_v29 = vld [vmem:[%s1094_s2] ss:$0 sm:$0xff] }
   0xe   : > { %v386_v5 = vsel %vm384_vm1, %v385_v4, 0  ;;  %s980_s24 = scalar_lea.vmem %s1092_s0, %s669_s21  ;;  %s1034_s29 = scalar_lea.vmem %s1095_s3, %s669_s21 }
   0xf   : > { %v388_v6 = vand.u32 %v754_v2, %v386_v5  ;;  %v776_v8 = vld [vmem:[%s980_s24] sm:$0xff]  ;;  %v781_v9 = vld [vmem:[%s980_s24 + $0x28] sm:$0xff]  ;;  %v786_v10 = vld [vmem:[%s980_s24 + $0x50] sm:$0xff] }
  0x10   : > { %v791_v11 = vld [vmem:[%s980_s24 + $0x78] sm:$0xff]  ;;  %v777_v12 = vld [vmem:[%s980_s24 + $0x8] sm:$0xff]  ;;  %v782_v13 = vld [vmem:[%s980_s24 + $0x30] sm:$0xff] }
  0x11   : > { %396 = vmatpush.bf16.msra.mxu0 %v388_v6  ;;  %910 = vmatpush.bf16.msra.mxu1 %v388_v6  ;;  %v787_v14 = vld [vmem:[%s980_s24 + $0x58] sm:$0xff]  ;;  %v792_v15 = vld [vmem:[%s980_s24 + $0x80] sm:$0xff]  ;;  %v778_v16 = vld [vmem:[%s980_s24 + $0x10] sm:$0xff] }
  0x12   : > { %911 = vmatpush.bf16.msra.mxu2 %v388_v6  ;;  %912 = vmatpush.bf16.msra.mxu3 %v388_v6  ;;  %v783_v17 = vld [vmem:[%s980_s24 + $0x38] sm:$0xff]  ;;  %v788_v18 = vld [vmem:[%s980_s24 + $0x60] sm:$0xff]  ;;  %v793_v19 = vld [vmem:[%s980_s24 + $0x88] sm:$0xff] }
  0x13   : > { %v779_v20 = vld [vmem:[%s980_s24 + $0x18] sm:$0xff]  ;;  %v784_v21 = vld [vmem:[%s980_s24 + $0x40] sm:$0xff]  ;;  %v789_v22 = vld [vmem:[%s980_s24 + $0x68] sm:$0xff] }
  0x14   : > { %v794_v23 = vld [vmem:[%s980_s24 + $0x90] sm:$0xff]  ;;  %v780_v24 = vld [vmem:[%s980_s24 + $0x20] sm:$0xff]  ;;  %v785_v25 = vld [vmem:[%s980_s24 + $0x48] sm:$0xff] }
  0x15   : > { %397 = vmatpush.bf16.msra.mxu0 %v795_v7  ;;  %913 = vmatpush.bf16.msra.mxu1 %v795_v7  ;;  %v790_v26 = vld [vmem:[%s980_s24 + $0x70] sm:$0xff] }
  0x16   : > { %914 = vmatpush.bf16.msra.mxu2 %v795_v7  ;;  %915 = vmatpush.bf16.msra.mxu3 %v795_v7 }
  0x18   : > { %755 = vmatmul.msk.bf16.vlgmr.msra.gmra.mxu0 %vm325_vm2, %v776_v8  ;;  %760 = vmatmul.msk.bf16.vlgmr.msra.gmra.mxu1 %vm325_vm2, %v781_v9 }
  0x19   : > { %765 = vmatmul.msk.bf16.vlgmr.msra.gmra.mxu2 %vm325_vm2, %v786_v10  ;;  %770 = vmatmul.msk.bf16.vlgmr.msra.gmra.mxu3 %vm325_vm2, %v791_v11 }
  0x28   : > { %756 = vmatmul.msk.bf16.gmra.mxu0 %vm325_vm2, %v777_v12  ;;  %761 = vmatmul.msk.bf16.gmra.mxu1 %vm325_vm2, %v782_v13 }
  0x29   : > { %766 = vmatmul.msk.bf16.gmra.mxu2 %vm325_vm2, %v787_v14  ;;  %771 = vmatmul.msk.bf16.gmra.mxu3 %vm325_vm2, %v792_v15 }
  0x38   : > { %757 = vmatmul.msk.bf16.gmra.mxu0 %vm325_vm2, %v778_v16  ;;  %762 = vmatmul.msk.bf16.gmra.mxu1 %vm325_vm2, %v783_v17 }
  0x39   : > { %767 = vmatmul.msk.bf16.gmra.mxu2 %vm325_vm2, %v788_v18  ;;  %772 = vmatmul.msk.bf16.gmra.mxu3 %vm325_vm2, %v793_v19 }
  0x48   : > { %758 = vmatmul.msk.bf16.gmra.mxu0 %vm325_vm2, %v779_v20  ;;  %763 = vmatmul.msk.bf16.gmra.mxu1 %vm325_vm2, %v784_v21 }
  0x49   : > { %768 = vmatmul.msk.bf16.gmra.mxu2 %vm325_vm2, %v789_v22  ;;  %773 = vmatmul.msk.bf16.gmra.mxu3 %vm325_vm2, %v794_v23 }
  0x58   : > { %759 = vmatmul.msk.bf16.gmra.mxu0 %vm325_vm2, %v780_v24  ;;  %764 = vmatmul.msk.bf16.gmra.mxu1 %vm325_vm2, %v785_v25 }
  0x59   : > { %769 = vmatmul.msk.bf16.gmra.mxu2 %vm325_vm2, %v790_v26 }
  0x95   : > { %v399_v27 = vpop.f32.mrf.mxu0  ;;  %v424_v28 = vpop.f32.mrf.mxu1 }
  0x96   : > { %v400_v30 = vadd.f32 %v1023_v29, %v399_v27  ;;  %v425_v31 = vadd.f32 %v1023_v29, %v424_v28 }
  0x98   : > { %v494_v38 = vmax.f32 %v400_v30, 0.0  ;;  %v504_v39 = vmax.f32 %v425_v31, 0.0 }
  0x9c   : > { %v449_v32 = vpop.f32.mrf.mxu2  ;;  %v474_v33 = vpop.f32.mrf.mxu3 }
  0x9d   : > { %v401_v34 = vpop.f32.mrf.mxu0  ;;  %v426_v35 = vpop.f32.mrf.mxu1  ;;  %v475_v42 = vadd.f32 %v1023_v29, %v474_v33  ;;  %v450_v45 = vadd.f32 %v1023_v29, %v449_v32 }
  0x9e   : > { %v402_v36 = vadd.f32 %v1023_v29, %v401_v34  ;;  %v427_v37 = vadd.f32 %v1023_v29, %v426_v35 }
  0x9f   : > { %v524_v49 = vmax.f32 %v475_v42, 0.0  ;;  %v514_v53 = vmax.f32 %v450_v45, 0.0 }
  0xa0   : > { %v495_v40 = vmax.f32 %v402_v36, 0.0  ;;  %v505_v41 = vmax.f32 %v427_v37, 0.0 }
  0xa2   : > { %v800_v43 = vpack.c.bf16 %v495_v40, %v494_v38  ;;  %v825_v44 = vpack.c.bf16 %v505_v41, %v504_v39 }
  0xa4   : > { %801 = vst [vmem:[%s1034_s29] sm:$0xff] %v800_v43   ;;  %v451_v46 = vpop.f32.mrf.mxu2  ;;  %v476_v47 = vpop.f32.mrf.mxu3 }
  0xa5   : > { %896 = vst [vmem:[%s1034_s29 + $0x28] sm:$0xff] %v825_v44   ;;  %v452_v48 = vadd.f32 %v1023_v29, %v451_v46  ;;  %v404_v50 = vpop.f32.mrf.mxu0  ;;  %v429_v51 = vpop.f32.mrf.mxu1  ;;  %v477_v52 = vadd.f32 %v1023_v29, %v476_v47 }
  0xa6   : > { %v405_v58 = vadd.f32 %v1023_v29, %v404_v50  ;;  %v430_v59 = vadd.f32 %v1023_v29, %v429_v51 }
  0xa7   : > { %v515_v54 = vmax.f32 %v452_v48, 0.0  ;;  %v525_v55 = vmax.f32 %v477_v52, 0.0 }
  0xa8   : > { %v496_v2 = vmax.f32 %v405_v58, 0.0  ;;  %v506_v3 = vmax.f32 %v430_v59, 0.0 }
  0xa9   : > { %v850_v56 = vpack.c.bf16 %v515_v54, %v514_v53  ;;  %v875_v57 = vpack.c.bf16 %v525_v55, %v524_v49 }
  0xab   : > { %901 = vst [vmem:[%s1034_s29 + $0x50] sm:$0xff] %v850_v56  }
  0xac   : > { %v454_v60 = vpop.f32.mrf.mxu2  ;;  %906 = vst [vmem:[%s1034_s29 + $0x78] sm:$0xff] %v875_v57   ;;  %v479_v61 = vpop.f32.mrf.mxu3 }
  0xad   : > { %v406_v62 = vpop.f32.mrf.mxu0  ;;  %v431_v63 = vpop.f32.mrf.mxu1  ;;  %v480_v6 = vadd.f32 %v1023_v29, %v479_v61  ;;  %v455_v9 = vadd.f32 %v1023_v29, %v454_v60 }
  0xae   : > { %v407_v0 = vadd.f32 %v1023_v29, %v406_v62  ;;  %v432_v1 = vadd.f32 %v1023_v29, %v431_v63 }
  0xaf   : > { %v526_v13 = vmax.f32 %v480_v6, 0.0  ;;  %v516_v17 = vmax.f32 %v455_v9, 0.0 }
  0xb0   : > { %v497_v4 = vmax.f32 %v407_v0, 0.0  ;;  %v507_v5 = vmax.f32 %v432_v1, 0.0 }
  0xb2   : > { %v805_v7 = vpack.c.bf16 %v497_v4, %v496_v2  ;;  %v830_v8 = vpack.c.bf16 %v507_v5, %v506_v3 }
  0xb4   : > { %892 = vst [vmem:[%s1034_s29 + $0x8] sm:$0xff] %v805_v7   ;;  %v456_v10 = vpop.f32.mrf.mxu2  ;;  %v481_v11 = vpop.f32.mrf.mxu3 }
  0xb5   : > { %897 = vst [vmem:[%s1034_s29 + $0x30] sm:$0xff] %v830_v8   ;;  %v457_v12 = vadd.f32 %v1023_v29, %v456_v10  ;;  %v409_v14 = vpop.f32.mrf.mxu0  ;;  %v434_v15 = vpop.f32.mrf.mxu1  ;;  %v482_v16 = vadd.f32 %v1023_v29, %v481_v11 }
  0xb6   : > { %v410_v22 = vadd.f32 %v1023_v29, %v409_v14  ;;  %v435_v23 = vadd.f32 %v1023_v29, %v434_v15 }
  0xb7   : > { %v517_v18 = vmax.f32 %v457_v12, 0.0  ;;  %v527_v19 = vmax.f32 %v482_v16, 0.0 }
  0xb8   : > { %v498_v31 = vmax.f32 %v410_v22, 0.0  ;;  %v508_v32 = vmax.f32 %v435_v23, 0.0 }
  0xb9   : > { %v855_v20 = vpack.c.bf16 %v517_v18, %v516_v17  ;;  %v880_v21 = vpack.c.bf16 %v527_v19, %v526_v13 }
  0xbb   : > { %902 = vst [vmem:[%s1034_s29 + $0x58] sm:$0xff] %v855_v20  }
  0xbc   : > { %v459_v24 = vpop.f32.mrf.mxu2  ;;  %907 = vst [vmem:[%s1034_s29 + $0x80] sm:$0xff] %v880_v21   ;;  %v484_v25 = vpop.f32.mrf.mxu3 }
  0xbd   : > { %v411_v26 = vpop.f32.mrf.mxu0  ;;  %v436_v27 = vpop.f32.mrf.mxu1  ;;  %v485_v35 = vadd.f32 %v1023_v29, %v484_v25  ;;  %v460_v38 = vadd.f32 %v1023_v29, %v459_v24 }
  0xbe   : > { %v412_v28 = vadd.f32 %v1023_v29, %v411_v26  ;;  %v437_v30 = vadd.f32 %v1023_v29, %v436_v27 }
  0xbf   : > { %v528_v42 = vmax.f32 %v485_v35, 0.0  ;;  %v518_v46 = vmax.f32 %v460_v38, 0.0 }
  0xc0   : > { %v499_v33 = vmax.f32 %v412_v28, 0.0  ;;  %v509_v34 = vmax.f32 %v437_v30, 0.0 }
  0xc2   : > { %v810_v36 = vpack.c.bf16 %v499_v33, %v498_v31  ;;  %v835_v37 = vpack.c.bf16 %v509_v34, %v508_v32 }
  0xc4   : > { %893 = vst [vmem:[%s1034_s29 + $0x10] sm:$0xff] %v810_v36   ;;  %v461_v39 = vpop.f32.mrf.mxu2  ;;  %v486_v40 = vpop.f32.mrf.mxu3 }
  0xc5   : > { %898 = vst [vmem:[%s1034_s29 + $0x38] sm:$0xff] %v835_v37   ;;  %v462_v41 = vadd.f32 %v1023_v29, %v461_v39  ;;  %v414_v43 = vpop.f32.mrf.mxu0  ;;  %v439_v44 = vpop.f32.mrf.mxu1  ;;  %v487_v45 = vadd.f32 %v1023_v29, %v486_v40 }
  0xc6   : > { %v415_v51 = vadd.f32 %v1023_v29, %v414_v43  ;;  %v440_v52 = vadd.f32 %v1023_v29, %v439_v44 }
  0xc7   : > { %v519_v47 = vmax.f32 %v462_v41, 0.0  ;;  %v529_v48 = vmax.f32 %v487_v45, 0.0 }
  0xc8   : > { %v500_v59 = vmax.f32 %v415_v51, 0.0  ;;  %v510_v60 = vmax.f32 %v440_v52, 0.0 }
  0xc9   : > { %v860_v49 = vpack.c.bf16 %v519_v47, %v518_v46  ;;  %v885_v50 = vpack.c.bf16 %v529_v48, %v528_v42 }
  0xcb   : > { %903 = vst [vmem:[%s1034_s29 + $0x60] sm:$0xff] %v860_v49  }
  0xcc   : > { %v464_v53 = vpop.f32.mrf.mxu2  ;;  %908 = vst [vmem:[%s1034_s29 + $0x88] sm:$0xff] %v885_v50   ;;  %v489_v54 = vpop.f32.mrf.mxu3 }
  0xcd   : > { %v416_v55 = vpop.f32.mrf.mxu0  ;;  %v441_v56 = vpop.f32.mrf.mxu1  ;;  %v490_v63 = vadd.f32 %v1023_v29, %v489_v54  ;;  %v465_v2 = vadd.f32 %v1023_v29, %v464_v53 }
  0xce   : > { %v417_v57 = vadd.f32 %v1023_v29, %v416_v55  ;;  %v442_v58 = vadd.f32 %v1023_v29, %v441_v56 }
  0xcf   : > { %v530_v6 = vmax.f32 %v490_v63, 0.0  ;;  %v520_v10 = vmax.f32 %v465_v2, 0.0 }
  0xd0   : > { %v501_v61 = vmax.f32 %v417_v57, 0.0  ;;  %v511_v62 = vmax.f32 %v442_v58, 0.0 }
  0xd2   : > { %v815_v0 = vpack.c.bf16 %v501_v61, %v500_v59  ;;  %v840_v1 = vpack.c.bf16 %v511_v62, %v510_v60 }
  0xd4   : > { %894 = vst [vmem:[%s1034_s29 + $0x18] sm:$0xff] %v815_v0   ;;  %v466_v3 = vpop.f32.mrf.mxu2  ;;  %v491_v4 = vpop.f32.mrf.mxu3 }
  0xd5   : > { %899 = vst [vmem:[%s1034_s29 + $0x40] sm:$0xff] %v840_v1   ;;  %v467_v5 = vadd.f32 %v1023_v29, %v466_v3  ;;  %v419_v7 = vpop.f32.mrf.mxu0  ;;  %v444_v8 = vpop.f32.mrf.mxu1  ;;  %v492_v9 = vadd.f32 %v1023_v29, %v491_v4 }
  0xd6   : > { %v420_v15 = vadd.f32 %v1023_v29, %v419_v7  ;;  %v445_v16 = vadd.f32 %v1023_v29, %v444_v8 }
  0xd7   : > { %v521_v11 = vmax.f32 %v467_v5, 0.0  ;;  %v531_v12 = vmax.f32 %v492_v9, 0.0 }
  0xd8   : > { %v502_v22 = vmax.f32 %v420_v15, 0.0  ;;  %v512_v23 = vmax.f32 %v445_v16, 0.0 }
  0xd9   : > { %v865_v13 = vpack.c.bf16 %v521_v11, %v520_v10  ;;  %v890_v14 = vpack.c.bf16 %v531_v12, %v530_v6 }
  0xdb   : > { %904 = vst [vmem:[%s1034_s29 + $0x68] sm:$0xff] %v865_v13  }
  0xdc   : > { %v469_v17 = vpop.f32.mrf.mxu2  ;;  %909 = vst [vmem:[%s1034_s29 + $0x90] sm:$0xff] %v890_v14  }
  0xdd   : > { %v421_v18 = vpop.f32.mrf.mxu0  ;;  %v446_v19 = vpop.f32.mrf.mxu1  ;;  %v470_v28 = vadd.f32 %v1023_v29, %v469_v17 }
  0xde   : > { %v422_v20 = vadd.f32 %v1023_v29, %v421_v18  ;;  %v447_v21 = vadd.f32 %v1023_v29, %v446_v19 }
  0xdf   : > { %v522_v32 = vmax.f32 %v470_v28, 0.0 }
  0xe0   : > { %v503_v24 = vmax.f32 %v422_v20, 0.0  ;;  %v513_v25 = vmax.f32 %v447_v21, 0.0 }
  0xe2   : > { %v820_v26 = vpack.c.bf16 %v503_v24, %v502_v22  ;;  %v845_v27 = vpack.c.bf16 %v513_v25, %v512_v23 }
  0xe4   : > { %895 = vst [vmem:[%s1034_s29 + $0x20] sm:$0xff] %v820_v26   ;;  %v471_v30 = vpop.f32.mrf.mxu2 }
  0xe5   : > { %900 = vst [vmem:[%s1034_s29 + $0x48] sm:$0xff] %v845_v27   ;;  %v472_v31 = vadd.f32 %v1023_v29, %v471_v30 }
  0xe7   : > { %v523_v33 = vmax.f32 %v472_v31, 0.0 }
  0xe9   : > { %v870_v34 = vpack.c.bf16 %v523_v33, %v522_v32 }
  0xeb   : > { %905 = vst [vmem:[%s1034_s29 + $0x70] sm:$0xff] %v870_v34  }
  0xec PF: > { %s13_s12 = sadd.s32 1, %s932_s12  }
  0xed   : > { %p10_p4 = scmp.ge.s32.totalorder %s13_s12, 4  }
  0xef   :  { %12 = sbr.rel (!%p10_p4) target bundleno = 1 (0x1), region = 62 }

// kernel: pspnet_forward.65
= control target key start
LH: loop header
LB: loop body
LE: loop exit
PB: predicated region body
PF: predicated region fallthrough
CT: control target
= control target key end

     0   :  { %s958_s12 = smov 0   ;;  %s1095_s0 = inlined_call_operand.vmem [shape: bf16[608,36], index: 0, kind: input, shape index: {}]   ;;  %s1096_s1 = inlined_call_operand.vmem [shape: bf16[36,128], index: 1, kind: input, shape index: {}]   ;;  %s1097_s2 = inlined_call_operand.vmem [shape: f32[4,128], index: 2, kind: input, shape index: {}]   ;;  %s1098_s3 = inlined_call_operand.vmem [shape: bf16[608,128], index: 3, kind: output, shape index: {}]  }
   0x1 LB: > { %s666_s13 = sadd.s32 4294967295, %s936_s12   ;;  %p670_p0 = scmp.ge.s32.totalorder %s936_s12, 1  ;;  %s936_s12 = sphi %s958_s12, %s13_s12  }
   0x2   : > { %p138_p1 = scmp.lt.s32.totalorder %s936_s12, 3 }
   0x4   : > { %p139_p2 = pnand %p670_p0, %p138_p1 }
   0x5   : > { %s162_s16 = smul.u32 (!%p139_p2), 38, %s666_s13 }
   0x6   : > { %142 = sbr.rel (%p139_p2) target bundleno = 240 (0xf0), region = 32 }
   0x7   : > { %p163_p3 = scmp.lt.s32.totalorder (!%p139_p2), %s162_s16, 75 }
   0xb   : > { %v217_v0 = vld [vmem:[%s1096_s1 + $0x10] sm:$0x3]  ;;  %vm388_vm0 = vcmask 1041408   ;;  %s1100_s16 = smov (!%p163_p3, %s162_s16), 75  ;;  %v798_v4 = vld [vmem:[%s1096_s1 + $0x8] sm:$0xff]  ;;  %v797_v5 = vld [vmem:[%s1096_s1] sm:$0xff] }
   0xc   : > { %v324_v1 = vunpack.c.l.b16 %v217_v0  ;;  %s671_s19 = sshll.u32 %s1100_s16, 2  ;;  %vm330_vm1 = vcmask 293888   ;;  %v1026_v27 = vld [vmem:[%s1097_s2] ss:$0 sm:$0xff] }
   0xd   : > { %s983_s24 = scalar_lea.vmem %s1095_s0, %s671_s19  ;;  %s1037_s29 = scalar_lea.vmem %s1098_s3, %s671_s19 }
   0xe   : > { %v327_v2 = vpack.c.b16 %v324_v1, %v324_v1  ;;  %v778_v6 = vld [vmem:[%s983_s24] sm:$0xff]  ;;  %v783_v7 = vld [vmem:[%s983_s24 + $0x28] sm:$0xff]  ;;  %v788_v8 = vld [vmem:[%s983_s24 + $0x50] sm:$0xff] }
   0xf   : > { %v793_v9 = vld [vmem:[%s983_s24 + $0x78] sm:$0xff]  ;;  %v779_v10 = vld [vmem:[%s983_s24 + $0x8] sm:$0xff]  ;;  %v784_v11 = vld [vmem:[%s983_s24 + $0x30] sm:$0xff] }
  0x10   : > { %v390_v3 = vsel %vm388_vm0, %v327_v2, 0  ;;  %v789_v12 = vld [vmem:[%s983_s24 + $0x58] sm:$0xff]  ;;  %v794_v13 = vld [vmem:[%s983_s24 + $0x80] sm:$0xff]  ;;  %v780_v14 = vld [vmem:[%s983_s24 + $0x10] sm:$0xff] }
  0x11   : > { %397 = vmatpush.bf16.msra.mxu0 %v390_v3  ;;  %912 = vmatpush.bf16.msra.mxu1 %v390_v3  ;;  %v785_v15 = vld [vmem:[%s983_s24 + $0x38] sm:$0xff]  ;;  %v790_v16 = vld [vmem:[%s983_s24 + $0x60] sm:$0xff]  ;;  %v795_v17 = vld [vmem:[%s983_s24 + $0x88] sm:$0xff] }
  0x12   : > { %913 = vmatpush.bf16.msra.mxu2 %v390_v3  ;;  %914 = vmatpush.bf16.msra.mxu3 %v390_v3  ;;  %v781_v18 = vld [vmem:[%s983_s24 + $0x18] sm:$0xff]  ;;  %v786_v19 = vld [vmem:[%s983_s24 + $0x40] sm:$0xff]  ;;  %v791_v20 = vld [vmem:[%s983_s24 + $0x68] sm:$0xff] }
  0x13   : > { %v796_v21 = vld [vmem:[%s983_s24 + $0x90] sm:$0xff]  ;;  %v782_v22 = vld [vmem:[%s983_s24 + $0x20] sm:$0xff]  ;;  %v787_v23 = vld [vmem:[%s983_s24 + $0x48] sm:$0xff] }
  0x14   : > { %v792_v24 = vld [vmem:[%s983_s24 + $0x70] sm:$0xff] }
  0x15   : > { %398 = vmatpush.bf16.msra.mxu0 %v798_v4  ;;  %915 = vmatpush.bf16.msra.mxu1 %v798_v4 }
  0x16   : > { %916 = vmatpush.bf16.msra.mxu2 %v798_v4  ;;  %917 = vmatpush.bf16.msra.mxu3 %v798_v4 }
  0x19   : > { %399 = vmatpush.bf16.msra.mxu0 %v797_v5  ;;  %918 = vmatpush.bf16.msra.mxu1 %v797_v5 }
  0x1a   : > { %919 = vmatpush.bf16.msra.mxu2 %v797_v5  ;;  %920 = vmatpush.bf16.msra.mxu3 %v797_v5 }
  0x1c   : > { %757 = vmatmul.msk.bf16.vlgmr.msra.gmra.mxu0 %vm330_vm1, %v778_v6  ;;  %762 = vmatmul.msk.bf16.vlgmr.msra.gmra.mxu1 %vm330_vm1, %v783_v7 }
  0x1d   : > { %767 = vmatmul.msk.bf16.vlgmr.msra.gmra.mxu2 %vm330_vm1, %v788_v8  ;;  %772 = vmatmul.msk.bf16.vlgmr.msra.gmra.mxu3 %vm330_vm1, %v793_v9 }
  0x2c   : > { %758 = vmatmul.msk.bf16.gmra.mxu0 %vm330_vm1, %v779_v10  ;;  %763 = vmatmul.msk.bf16.gmra.mxu1 %vm330_vm1, %v784_v11 }
  0x2d   : > { %768 = vmatmul.msk.bf16.gmra.mxu2 %vm330_vm1, %v789_v12  ;;  %773 = vmatmul.msk.bf16.gmra.mxu3 %vm330_vm1, %v794_v13 }
  0x3c   : > { %759 = vmatmul.msk.bf16.gmra.mxu0 %vm330_vm1, %v780_v14  ;;  %764 = vmatmul.msk.bf16.gmra.mxu1 %vm330_vm1, %v785_v15 }
  0x3d   : > { %769 = vmatmul.msk.bf16.gmra.mxu2 %vm330_vm1, %v790_v16  ;;  %774 = vmatmul.msk.bf16.gmra.mxu3 %vm330_vm1, %v795_v17 }
  0x4c   : > { %760 = vmatmul.msk.bf16.gmra.mxu0 %vm330_vm1, %v781_v18  ;;  %765 = vmatmul.msk.bf16.gmra.mxu1 %vm330_vm1, %v786_v19 }
  0x4d   : > { %770 = vmatmul.msk.bf16.gmra.mxu2 %vm330_vm1, %v791_v20  ;;  %775 = vmatmul.msk.bf16.gmra.mxu3 %vm330_vm1, %v796_v21 }
  0x5c   : > { %761 = vmatmul.msk.bf16.gmra.mxu0 %vm330_vm1, %v782_v22  ;;  %766 = vmatmul.msk.bf16.gmra.mxu1 %vm330_vm1, %v787_v23 }
  0x5d   : > { %771 = vmatmul.msk.bf16.gmra.mxu2 %vm330_vm1, %v792_v24 }
  0x99   : > { %v401_v25 = vpop.f32.mrf.mxu0  ;;  %v426_v26 = vpop.f32.mrf.mxu1 }
  0x9a   : > { %v402_v28 = vadd.f32 %v1026_v27, %v401_v25  ;;  %v427_v29 = vadd.f32 %v1026_v27, %v426_v26 }
  0x9c   : > { %v496_v36 = vmax.f32 %v402_v28, 0.0  ;;  %v506_v37 = vmax.f32 %v427_v29, 0.0 }
  0xa0   : > { %v451_v30 = vpop.f32.mrf.mxu2  ;;  %v476_v31 = vpop.f32.mrf.mxu3 }
  0xa1   : > { %v403_v32 = vpop.f32.mrf.mxu0  ;;  %v428_v33 = vpop.f32.mrf.mxu1  ;;  %v477_v40 = vadd.f32 %v1026_v27, %v476_v31  ;;  %v452_v43 = vadd.f32 %v1026_v27, %v451_v30 }
  0xa2   : > { %v404_v34 = vadd.f32 %v1026_v27, %v403_v32  ;;  %v429_v35 = vadd.f32 %v1026_v27, %v428_v33 }
  0xa3   : > { %v526_v47 = vmax.f32 %v477_v40, 0.0  ;;  %v516_v51 = vmax.f32 %v452_v43, 0.0 }
  0xa4   : > { %v497_v38 = vmax.f32 %v404_v34, 0.0  ;;  %v507_v39 = vmax.f32 %v429_v35, 0.0 }
  0xa6   : > { %v802_v41 = vpack.c.bf16 %v497_v38, %v496_v36  ;;  %v827_v42 = vpack.c.bf16 %v507_v39, %v506_v37 }
  0xa8   : > { %803 = vst [vmem:[%s1037_s29] sm:$0xff] %v802_v41   ;;  %v453_v44 = vpop.f32.mrf.mxu2  ;;  %v478_v45 = vpop.f32.mrf.mxu3 }
  0xa9   : > { %898 = vst [vmem:[%s1037_s29 + $0x28] sm:$0xff] %v827_v42   ;;  %v454_v46 = vadd.f32 %v1026_v27, %v453_v44  ;;  %v406_v48 = vpop.f32.mrf.mxu0  ;;  %v431_v49 = vpop.f32.mrf.mxu1  ;;  %v479_v50 = vadd.f32 %v1026_v27, %v478_v45 }
  0xaa   : > { %v407_v56 = vadd.f32 %v1026_v27, %v406_v48  ;;  %v432_v57 = vadd.f32 %v1026_v27, %v431_v49 }
  0xab   : > { %v517_v52 = vmax.f32 %v454_v46, 0.0  ;;  %v527_v53 = vmax.f32 %v479_v50, 0.0 }
  0xac   : > { %v498_v0 = vmax.f32 %v407_v56, 0.0  ;;  %v508_v1 = vmax.f32 %v432_v57, 0.0 }
  0xad   : > { %v852_v54 = vpack.c.bf16 %v517_v52, %v516_v51  ;;  %v877_v55 = vpack.c.bf16 %v527_v53, %v526_v47 }
  0xaf   : > { %903 = vst [vmem:[%s1037_s29 + $0x50] sm:$0xff] %v852_v54  }
  0xb0   : > { %v456_v58 = vpop.f32.mrf.mxu2  ;;  %908 = vst [vmem:[%s1037_s29 + $0x78] sm:$0xff] %v877_v55   ;;  %v481_v59 = vpop.f32.mrf.mxu3 }
  0xb1   : > { %v408_v60 = vpop.f32.mrf.mxu0  ;;  %v433_v61 = vpop.f32.mrf.mxu1  ;;  %v482_v4 = vadd.f32 %v1026_v27, %v481_v59  ;;  %v457_v7 = vadd.f32 %v1026_v27, %v456_v58 }
  0xb2   : > { %v409_v62 = vadd.f32 %v1026_v27, %v408_v60  ;;  %v434_v63 = vadd.f32 %v1026_v27, %v433_v61 }
  0xb3   : > { %v528_v11 = vmax.f32 %v482_v4, 0.0  ;;  %v518_v15 = vmax.f32 %v457_v7, 0.0 }
  0xb4   : > { %v499_v2 = vmax.f32 %v409_v62, 0.0  ;;  %v509_v3 = vmax.f32 %v434_v63, 0.0 }
  0xb6   : > { %v807_v5 = vpack.c.bf16 %v499_v2, %v498_v0  ;;  %v832_v6 = vpack.c.bf16 %v509_v3, %v508_v1 }
  0xb8   : > { %894 = vst [vmem:[%s1037_s29 + $0x8] sm:$0xff] %v807_v5   ;;  %v458_v8 = vpop.f32.mrf.mxu2  ;;  %v483_v9 = vpop.f32.mrf.mxu3 }
  0xb9   : > { %899 = vst [vmem:[%s1037_s29 + $0x30] sm:$0xff] %v832_v6   ;;  %v459_v10 = vadd.f32 %v1026_v27, %v458_v8  ;;  %v411_v12 = vpop.f32.mrf.mxu0  ;;  %v436_v13 = vpop.f32.mrf.mxu1  ;;  %v484_v14 = vadd.f32 %v1026_v27, %v483_v9 }
  0xba   : > { %v412_v20 = vadd.f32 %v1026_v27, %v411_v12  ;;  %v437_v21 = vadd.f32 %v1026_v27, %v436_v13 }
  0xbb   : > { %v519_v16 = vmax.f32 %v459_v10, 0.0  ;;  %v529_v17 = vmax.f32 %v484_v14, 0.0 }
  0xbc   : > { %v500_v29 = vmax.f32 %v412_v20, 0.0  ;;  %v510_v30 = vmax.f32 %v437_v21, 0.0 }
  0xbd   : > { %v857_v18 = vpack.c.bf16 %v519_v16, %v518_v15  ;;  %v882_v19 = vpack.c.bf16 %v529_v17, %v528_v11 }
  0xbf   : > { %904 = vst [vmem:[%s1037_s29 + $0x58] sm:$0xff] %v857_v18  }
  0xc0   : > { %v461_v22 = vpop.f32.mrf.mxu2  ;;  %909 = vst [vmem:[%s1037_s29 + $0x80] sm:$0xff] %v882_v19   ;;  %v486_v23 = vpop.f32.mrf.mxu3 }
  0xc1   : > { %v413_v24 = vpop.f32.mrf.mxu0  ;;  %v438_v25 = vpop.f32.mrf.mxu1  ;;  %v487_v33 = vadd.f32 %v1026_v27, %v486_v23  ;;  %v462_v36 = vadd.f32 %v1026_v27, %v461_v22 }
  0xc2   : > { %v414_v26 = vadd.f32 %v1026_v27, %v413_v24  ;;  %v439_v28 = vadd.f32 %v1026_v27, %v438_v25 }
  0xc3   : > { %v530_v40 = vmax.f32 %v487_v33, 0.0  ;;  %v520_v44 = vmax.f32 %v462_v36, 0.0 }
  0xc4   : > { %v501_v31 = vmax.f32 %v414_v26, 0.0  ;;  %v511_v32 = vmax.f32 %v439_v28, 0.0 }
  0xc6   : > { %v812_v34 = vpack.c.bf16 %v501_v31, %v500_v29  ;;  %v837_v35 = vpack.c.bf16 %v511_v32, %v510_v30 }
  0xc8   : > { %895 = vst [vmem:[%s1037_s29 + $0x10] sm:$0xff] %v812_v34   ;;  %v463_v37 = vpop.f32.mrf.mxu2  ;;  %v488_v38 = vpop.f32.mrf.mxu3 }
  0xc9   : > { %900 = vst [vmem:[%s1037_s29 + $0x38] sm:$0xff] %v837_v35   ;;  %v464_v39 = vadd.f32 %v1026_v27, %v463_v37  ;;  %v416_v41 = vpop.f32.mrf.mxu0  ;;  %v441_v42 = vpop.f32.mrf.mxu1  ;;  %v489_v43 = vadd.f32 %v1026_v27, %v488_v38 }
  0xca   : > { %v417_v49 = vadd.f32 %v1026_v27, %v416_v41  ;;  %v442_v50 = vadd.f32 %v1026_v27, %v441_v42 }
  0xcb   : > { %v521_v45 = vmax.f32 %v464_v39, 0.0  ;;  %v531_v46 = vmax.f32 %v489_v43, 0.0 }
  0xcc   : > { %v502_v57 = vmax.f32 %v417_v49, 0.0  ;;  %v512_v58 = vmax.f32 %v442_v50, 0.0 }
  0xcd   : > { %v862_v47 = vpack.c.bf16 %v521_v45, %v520_v44  ;;  %v887_v48 = vpack.c.bf16 %v531_v46, %v530_v40 }
  0xcf   : > { %905 = vst [vmem:[%s1037_s29 + $0x60] sm:$0xff] %v862_v47  }
  0xd0   : > { %v466_v51 = vpop.f32.mrf.mxu2  ;;  %910 = vst [vmem:[%s1037_s29 + $0x88] sm:$0xff] %v887_v48   ;;  %v491_v52 = vpop.f32.mrf.mxu3 }
  0xd1   : > { %v418_v53 = vpop.f32.mrf.mxu0  ;;  %v443_v54 = vpop.f32.mrf.mxu1  ;;  %v492_v61 = vadd.f32 %v1026_v27, %v491_v52  ;;  %v467_v0 = vadd.f32 %v1026_v27, %v466_v51 }
  0xd2   : > { %v419_v55 = vadd.f32 %v1026_v27, %v418_v53  ;;  %v444_v56 = vadd.f32 %v1026_v27, %v443_v54 }
  0xd3   : > { %v532_v4 = vmax.f32 %v492_v61, 0.0  ;;  %v522_v8 = vmax.f32 %v467_v0, 0.0 }
  0xd4   : > { %v503_v59 = vmax.f32 %v419_v55, 0.0  ;;  %v513_v60 = vmax.f32 %v444_v56, 0.0 }
  0xd6   : > { %v817_v62 = vpack.c.bf16 %v503_v59, %v502_v57  ;;  %v842_v63 = vpack.c.bf16 %v513_v60, %v512_v58 }
  0xd8   : > { %896 = vst [vmem:[%s1037_s29 + $0x18] sm:$0xff] %v817_v62   ;;  %v468_v1 = vpop.f32.mrf.mxu2  ;;  %v493_v2 = vpop.f32.mrf.mxu3 }
  0xd9   : > { %901 = vst [vmem:[%s1037_s29 + $0x40] sm:$0xff] %v842_v63   ;;  %v469_v3 = vadd.f32 %v1026_v27, %v468_v1  ;;  %v421_v5 = vpop.f32.mrf.mxu0  ;;  %v446_v6 = vpop.f32.mrf.mxu1  ;;  %v494_v7 = vadd.f32 %v1026_v27, %v493_v2 }
  0xda   : > { %v422_v13 = vadd.f32 %v1026_v27, %v421_v5  ;;  %v447_v14 = vadd.f32 %v1026_v27, %v446_v6 }
  0xdb   : > { %v523_v9 = vmax.f32 %v469_v3, 0.0  ;;  %v533_v10 = vmax.f32 %v494_v7, 0.0 }
  0xdc   : > { %v504_v20 = vmax.f32 %v422_v13, 0.0  ;;  %v514_v21 = vmax.f32 %v447_v14, 0.0 }
  0xdd   : > { %v867_v11 = vpack.c.bf16 %v523_v9, %v522_v8  ;;  %v892_v12 = vpack.c.bf16 %v533_v10, %v532_v4 }
  0xdf   : > { %906 = vst [vmem:[%s1037_s29 + $0x68] sm:$0xff] %v867_v11  }
  0xe0   : > { %v471_v15 = vpop.f32.mrf.mxu2  ;;  %911 = vst [vmem:[%s1037_s29 + $0x90] sm:$0xff] %v892_v12  }
  0xe1   : > { %v423_v16 = vpop.f32.mrf.mxu0  ;;  %v448_v17 = vpop.f32.mrf.mxu1  ;;  %v472_v26 = vadd.f32 %v1026_v27, %v471_v15 }
  0xe2   : > { %v424_v18 = vadd.f32 %v1026_v27, %v423_v16  ;;  %v449_v19 = vadd.f32 %v1026_v27, %v448_v17 }
  0xe3   : > { %v524_v30 = vmax.f32 %v472_v26, 0.0 }
  0xe4   : > { %v505_v22 = vmax.f32 %v424_v18, 0.0  ;;  %v515_v23 = vmax.f32 %v449_v19, 0.0 }
  0xe6   : > { %v822_v24 = vpack.c.bf16 %v505_v22, %v504_v20  ;;  %v847_v25 = vpack.c.bf16 %v515_v23, %v514_v21 }
  0xe8   : > { %897 = vst [vmem:[%s1037_s29 + $0x20] sm:$0xff] %v822_v24   ;;  %v473_v28 = vpop.f32.mrf.mxu2 }
  0xe9   : > { %902 = vst [vmem:[%s1037_s29 + $0x48] sm:$0xff] %v847_v25   ;;  %v474_v29 = vadd.f32 %v1026_v27, %v473_v28 }
  0xeb   : > { %v525_v31 = vmax.f32 %v474_v29, 0.0 }
  0xed   : > { %v872_v32 = vpack.c.bf16 %v525_v31, %v524_v30 }
  0xef   : > { %907 = vst [vmem:[%s1037_s29 + $0x70] sm:$0xff] %v872_v32  }
  0xf0 PF: > { %s13_s12 = sadd.s32 1, %s936_s12  }
  0xf1   : > { %p10_p4 = scmp.ge.s32.totalorder %s13_s12, 4  }
  0xf3   :  { %12 = sbr.rel (!%p10_p4) target bundleno = 1 (0x1), region = 62 }

// kernel: pspnet_forward.67
= control target key start
LH: loop header
LB: loop body
LE: loop exit
PB: predicated region body
PF: predicated region fallthrough
CT: control target
= control target key end

     0   :  { %s509_s12 = smov 0   ;;  %s550_s0 = inlined_call_operand.vmem [shape: bf16[192,8], index: 0, kind: input, shape index: {}]   ;;  %s551_s1 = inlined_call_operand.vmem [shape: bf16[8,128], index: 1, kind: input, shape index: {}]   ;;  %s552_s2 = inlined_call_operand.vmem [shape: f32[4,128], index: 2, kind: input, shape index: {}]   ;;  %s553_s3 = inlined_call_operand.vmem [shape: bf16[192,128], index: 3, kind: output, shape index: {}]  }
   0x1 LB: > { %s388_s13 = sadd.s32 4294967295, %s487_s12   ;;  %p392_p0 = scmp.ge.s32.totalorder %s487_s12, 1  ;;  %s487_s12 = sphi %s509_s12, %s13_s12  }
   0x2   : > { %p138_p1 = scmp.lt.s32.totalorder %s487_s12, 3 }
   0x4   : > { %p139_p2 = pnand %p392_p0, %p138_p1 }
   0x5   : > { %s162_s16 = smul.u32 (!%p139_p2), 12, %s388_s13 }
   0x6   : > { %142 = sbr.rel (%p139_p2) target bundleno = 181 (0xb5), region = 32 }
   0x7   : > { %p163_p3 = scmp.lt.s32.totalorder (!%p139_p2), %s162_s16, 23 }
   0xb   : > { %v187_v0 = vld [vmem:[%s551_s1] sm:$0xf]  ;;  %vm239_vm0 = vcmask 1043456   ;;  %s555_s16 = smov (!%p163_p3, %s162_s16), 23  ;;  %vm220_vm1 = vcmask 64512  }
   0xc   : > { %v241_v1 = vsel %vm239_vm0, %v187_v0, 0  ;;  %s393_s17 = sshll.u32 %s555_s16, 2  ;;  %v479_v9 = vld [vmem:[%s552_s2] ss:$0 sm:$0xff]  ;;  %v480_v13 = vld [vmem:[%s552_s2 + $0x1] ss:$0 sm:$0xff] }
   0xd   : > { %468 = vmatpush.bf16.msra.mxu1 %v241_v1  ;;  %469 = vmatpush.bf16.msra.mxu2 %v241_v1  ;;  %s166_s20 = scalar_lea.vmem %s550_s0, %s393_s17  ;;  %s539_s27 = scalar_lea.vmem %s553_s3, %s393_s17 }
   0xe   : > { %470 = vmatpush.bf16.msra.mxu3 %v241_v1  ;;  %250 = vmatpush.bf16.msra.mxu0 %v241_v1  ;;  %v428_v2 = vld [vmem:[%s166_s20 + $0x8] sm:$0xff]  ;;  %v430_v3 = vld [vmem:[%s166_s20 + $0x18] sm:$0xff]  ;;  %v427_v5 = vld [vmem:[%s166_s20] sm:$0xff] }
   0xf   : > { %v432_v4 = vld [vmem:[%s166_s20 + $0x28] sm:$0xff]  ;;  %v429_v6 = vld [vmem:[%s166_s20 + $0x10] sm:$0xff]  ;;  %v431_v7 = vld [vmem:[%s166_s20 + $0x20] sm:$0xff] }
  0x10   : > { %420 = vmatmul.msk.bf16.vlgmr.msra.gmra.mxu1 %vm220_vm1, %v428_v2  ;;  %422 = vmatmul.msk.bf16.vlgmr.msra.gmra.mxu2 %vm220_vm1, %v430_v3 }
  0x11   : > { %424 = vmatmul.msk.bf16.vlgmr.msra.gmra.mxu3 %vm220_vm1, %v432_v4  ;;  %419 = vmatmul.msk.bf16.vlgmr.msra.gmra.mxu0 %vm220_vm1, %v427_v5 }
  0x20   : > { %421 = vmatmul.msk.bf16.gmra.mxu1 %vm220_vm1, %v429_v6  ;;  %423 = vmatmul.msk.bf16.gmra.mxu2 %vm220_vm1, %v431_v7 }
  0x8d   : > { %v257_v8 = vpop.f32.mrf.mxu1 }
  0x8e   : > { %v252_v10 = vpop.f32.mrf.mxu0  ;;  %v258_v12 = vadd.f32 %v479_v9, %v257_v8 }
  0x8f   : > { %v253_v11 = vadd.f32 %v479_v9, %v252_v10 }
  0x90   : > { %v286_v18 = vmul.f32 %v480_v13, %v258_v12 }
  0x91   : > { %v284_v17 = vmul.f32 %v480_v13, %v253_v11 }
  0x92   : > { %v298_v27 = vmax.f32 %v258_v12, %v286_v18 }
  0x93   : > { %v267_v14 = vpop.f32.mrf.mxu2  ;;  %v296_v25 = vmax.f32 %v253_v11, %v284_v17 }
  0x94   : > { %v277_v15 = vpop.f32.mrf.mxu3  ;;  %v268_v23 = vadd.f32 %v479_v9, %v267_v14 }
  0x95   : > { %v259_v16 = vpop.f32.mrf.mxu1  ;;  %v278_v21 = vadd.f32 %v479_v9, %v277_v15 }
  0x96   : > { %v260_v19 = vadd.f32 %v479_v9, %v259_v16  ;;  %v254_v20 = vpop.f32.mrf.mxu0  ;;  %v290_v32 = vmul.f32 %v480_v13, %v268_v23 }
  0x97   : > { %v255_v22 = vadd.f32 %v479_v9, %v254_v20  ;;  %v294_v29 = vmul.f32 %v480_v13, %v278_v21 }
  0x98   : > { %v287_v24 = vmul.f32 %v480_v13, %v260_v19  ;;  %v302_v42 = vmax.f32 %v268_v23, %v290_v32 }
  0x99   : > { %v285_v26 = vmul.f32 %v480_v13, %v255_v22  ;;  %v306_v40 = vmax.f32 %v278_v21, %v294_v29 }
  0x9a   : > { %v299_v28 = vmax.f32 %v260_v19, %v287_v24 }
  0x9b   : > { %v269_v30 = vpop.f32.mrf.mxu2  ;;  %v297_v31 = vmax.f32 %v255_v22, %v285_v26 }
  0x9c   : > { %v441_v33 = vpack.c.bf16 %v299_v28, %v298_v27  ;;  %v270_v34 = vadd.f32 %v479_v9, %v269_v30  ;;  %v279_v35 = vpop.f32.mrf.mxu3 }
  0x9d   : > { %v262_v36 = vpop.f32.mrf.mxu1  ;;  %v436_v37 = vpack.c.bf16 %v297_v31, %v296_v25  ;;  %v280_v38 = vadd.f32 %v479_v9, %v279_v35 }
  0x9e   : > { %463 = vst [vmem:[%s539_s27 + $0x8] sm:$0xff] %v441_v33   ;;  %v291_v39 = vmul.f32 %v480_v13, %v270_v34  ;;  %v263_v46 = vadd.f32 %v479_v9, %v262_v36 }
  0x9f   : > { %437 = vst [vmem:[%s539_s27] sm:$0xff] %v436_v37   ;;  %v295_v41 = vmul.f32 %v480_v13, %v280_v38 }
  0xa0   : > { %v303_v43 = vmax.f32 %v270_v34, %v291_v39  ;;  %v288_v50 = vmul.f32 %v480_v13, %v263_v46 }
  0xa1   : > { %v307_v44 = vmax.f32 %v280_v38, %v295_v41 }
  0xa2   : > { %v451_v45 = vpack.c.bf16 %v303_v43, %v302_v42  ;;  %v300_v54 = vmax.f32 %v263_v46, %v288_v50 }
  0xa3   : > { %v461_v47 = vpack.c.bf16 %v307_v44, %v306_v40  ;;  %v272_v48 = vpop.f32.mrf.mxu2 }
  0xa4   : > { %465 = vst [vmem:[%s539_s27 + $0x18] sm:$0xff] %v451_v45   ;;  %v273_v52 = vadd.f32 %v479_v9, %v272_v48 }
  0xa5   : > { %467 = vst [vmem:[%s539_s27 + $0x28] sm:$0xff] %v461_v47   ;;  %v264_v49 = vpop.f32.mrf.mxu1 }
  0xa6   : > { %v265_v51 = vadd.f32 %v479_v9, %v264_v49  ;;  %v292_v57 = vmul.f32 %v480_v13, %v273_v52 }
  0xa8   : > { %v289_v53 = vmul.f32 %v480_v13, %v265_v51  ;;  %v304_v61 = vmax.f32 %v273_v52, %v292_v57 }
  0xaa   : > { %v301_v55 = vmax.f32 %v265_v51, %v289_v53 }
  0xab   : > { %v274_v56 = vpop.f32.mrf.mxu2 }
  0xac   : > { %v446_v58 = vpack.c.bf16 %v301_v55, %v300_v54  ;;  %v275_v59 = vadd.f32 %v479_v9, %v274_v56 }
  0xae   : > { %464 = vst [vmem:[%s539_s27 + $0x10] sm:$0xff] %v446_v58   ;;  %v293_v60 = vmul.f32 %v480_v13, %v275_v59 }
  0xb0   : > { %v305_v62 = vmax.f32 %v275_v59, %v293_v60 }
  0xb2   : > { %v456_v63 = vpack.c.bf16 %v305_v62, %v304_v61 }
  0xb4   : > { %466 = vst [vmem:[%s539_s27 + $0x20] sm:$0xff] %v456_v63  }
  0xb5 PF: > { %s13_s12 = sadd.s32 1, %s487_s12  }
  0xb6   : > { %p10_p4 = scmp.ge.s32.totalorder %s13_s12, 4  }
  0xb8   :  { %12 = sbr.rel (!%p10_p4) target bundleno = 1 (0x1), region = 62 }

// kernel: pspnet_forward.68
= control target key start
LH: loop header
LB: loop body
LE: loop exit
PB: predicated region body
PF: predicated region fallthrough
CT: control target
= control target key end

     0   :  { %s529_s12 = smov 0   ;;  %s573_s0 = inlined_call_operand.vmem [shape: bf16[192,36], index: 0, kind: input, shape index: {}]   ;;  %s574_s1 = inlined_call_operand.vmem [shape: bf16[36,128], index: 1, kind: input, shape index: {}]   ;;  %s575_s2 = inlined_call_operand.vmem [shape: f32[4,128], index: 2, kind: input, shape index: {}]   ;;  %s576_s3 = inlined_call_operand.vmem [shape: bf16[192,128], index: 3, kind: output, shape index: {}]  }
   0x1 LB: > { %s393_s13 = sadd.s32 4294967295, %s507_s12   ;;  %p397_p0 = scmp.ge.s32.totalorder %s507_s12, 1  ;;  %s507_s12 = sphi %s529_s12, %s13_s12  }
   0x2   : > { %p138_p1 = scmp.lt.s32.totalorder %s507_s12, 3 }
   0x4   : > { %p139_p2 = pnand %p397_p0, %p138_p1 }
   0x5   : > { %s162_s16 = smul.u32 (!%p139_p2), 12, %s393_s13 }
   0x6   : > { %142 = sbr.rel (%p139_p2) target bundleno = 191 (0xbf), region = 32 }
   0x7   : > { %p163_p3 = scmp.lt.s32.totalorder (!%p139_p2), %s162_s16, 23 }
   0xb   : > { %v191_v0 = vld [vmem:[%s574_s1 + $0x10] sm:$0x3]  ;;  %vm258_vm0 = vcmask 1041408   ;;  %s578_s16 = smov (!%p163_p3, %s162_s16), 23  ;;  %v447_v4 = vld [vmem:[%s574_s1 + $0x8] sm:$0xff]  ;;  %v446_v5 = vld [vmem:[%s574_s1] sm:$0xff] }
   0xc   : > { %v233_v1 = vunpack.c.l.b16 %v191_v0  ;;  %s398_s19 = sshll.u32 %s578_s16, 2  ;;  %vm239_vm1 = vcmask 293888   ;;  %v500_v14 = vld [vmem:[%s575_s2] ss:$0 sm:$0xff] }
   0xd   : > { %s166_s24 = scalar_lea.vmem %s573_s0, %s398_s19  ;;  %s562_s29 = scalar_lea.vmem %s576_s3, %s398_s19 }
   0xe   : > { %v236_v2 = vpack.c.b16 %v233_v1, %v233_v1  ;;  %v441_v6 = vld [vmem:[%s166_s24 + $0x8] sm:$0xff]  ;;  %v443_v7 = vld [vmem:[%s166_s24 + $0x18] sm:$0xff]  ;;  %v440_v9 = vld [vmem:[%s166_s24] sm:$0xff] }
   0xf   : > { %v445_v8 = vld [vmem:[%s166_s24 + $0x28] sm:$0xff]  ;;  %v442_v10 = vld [vmem:[%s166_s24 + $0x10] sm:$0xff]  ;;  %v444_v11 = vld [vmem:[%s166_s24 + $0x20] sm:$0xff] }
  0x10   : > { %v260_v3 = vsel %vm258_vm0, %v236_v2, 0 }
  0x11   : > { %483 = vmatpush.bf16.msra.mxu1 %v260_v3  ;;  %484 = vmatpush.bf16.msra.mxu2 %v260_v3 }
  0x12   : > { %485 = vmatpush.bf16.msra.mxu3 %v260_v3  ;;  %267 = vmatpush.bf16.msra.mxu0 %v260_v3 }
  0x15   : > { %486 = vmatpush.bf16.msra.mxu1 %v447_v4  ;;  %487 = vmatpush.bf16.msra.mxu2 %v447_v4 }
  0x16   : > { %488 = vmatpush.bf16.msra.mxu3 %v447_v4  ;;  %268 = vmatpush.bf16.msra.mxu0 %v447_v4 }
  0x19   : > { %489 = vmatpush.bf16.msra.mxu1 %v446_v5  ;;  %490 = vmatpush.bf16.msra.mxu2 %v446_v5 }
  0x1a   : > { %491 = vmatpush.bf16.msra.mxu3 %v446_v5  ;;  %269 = vmatpush.bf16.msra.mxu0 %v446_v5 }
  0x1c   : > { %433 = vmatmul.msk.bf16.vlgmr.msra.gmra.mxu1 %vm239_vm1, %v441_v6  ;;  %435 = vmatmul.msk.bf16.vlgmr.msra.gmra.mxu2 %vm239_vm1, %v443_v7 }
  0x1d   : > { %437 = vmatmul.msk.bf16.vlgmr.msra.gmra.mxu3 %vm239_vm1, %v445_v8  ;;  %432 = vmatmul.msk.bf16.vlgmr.msra.gmra.mxu0 %vm239_vm1, %v440_v9 }
  0x2c   : > { %434 = vmatmul.msk.bf16.gmra.mxu1 %vm239_vm1, %v442_v10  ;;  %436 = vmatmul.msk.bf16.gmra.mxu2 %vm239_vm1, %v444_v11 }
  0x99   : > { %v276_v12 = vpop.f32.mrf.mxu1 }
  0x9a   : > { %v271_v13 = vpop.f32.mrf.mxu0  ;;  %v277_v17 = vadd.f32 %v500_v14, %v276_v12 }
  0x9b   : > { %v272_v16 = vadd.f32 %v500_v14, %v271_v13 }
  0x9c   : > { %v303_v24 = vmax.f32 %v277_v17, 0.0 }
  0x9d   : > { %v301_v22 = vmax.f32 %v272_v16, 0.0 }
  0x9f   : > { %v286_v15 = vpop.f32.mrf.mxu2 }
  0xa0   : > { %v296_v18 = vpop.f32.mrf.mxu3  ;;  %v287_v28 = vadd.f32 %v500_v14, %v286_v15 }
  0xa1   : > { %v278_v19 = vpop.f32.mrf.mxu1  ;;  %v297_v26 = vadd.f32 %v500_v14, %v296_v18 }
  0xa2   : > { %v279_v20 = vadd.f32 %v500_v14, %v278_v19  ;;  %v273_v21 = vpop.f32.mrf.mxu0  ;;  %v307_v37 = vmax.f32 %v287_v28, 0.0 }
  0xa3   : > { %v274_v23 = vadd.f32 %v500_v14, %v273_v21  ;;  %v311_v34 = vmax.f32 %v297_v26, 0.0 }
  0xa4   : > { %v304_v25 = vmax.f32 %v279_v20, 0.0 }
  0xa5   : > { %v302_v27 = vmax.f32 %v274_v23, 0.0 }
  0xa6   : > { %v456_v29 = vpack.c.bf16 %v304_v25, %v303_v24 }
  0xa7   : > { %v288_v30 = vpop.f32.mrf.mxu2  ;;  %v451_v31 = vpack.c.bf16 %v302_v27, %v301_v22 }
  0xa8   : > { %478 = vst [vmem:[%s562_s29 + $0x8] sm:$0xff] %v456_v29   ;;  %v289_v32 = vadd.f32 %v500_v14, %v288_v30  ;;  %v298_v33 = vpop.f32.mrf.mxu3 }
  0xa9   : > { %v281_v35 = vpop.f32.mrf.mxu1  ;;  %452 = vst [vmem:[%s562_s29] sm:$0xff] %v451_v31   ;;  %v299_v36 = vadd.f32 %v500_v14, %v298_v33 }
  0xaa   : > { %v308_v38 = vmax.f32 %v289_v32, 0.0  ;;  %v282_v43 = vadd.f32 %v500_v14, %v281_v35 }
  0xab   : > { %v312_v39 = vmax.f32 %v299_v36, 0.0 }
  0xac   : > { %v466_v40 = vpack.c.bf16 %v308_v38, %v307_v37  ;;  %v305_v46 = vmax.f32 %v282_v43, 0.0 }
  0xad   : > { %v476_v41 = vpack.c.bf16 %v312_v39, %v311_v34 }
  0xae   : > { %480 = vst [vmem:[%s562_s29 + $0x18] sm:$0xff] %v466_v40  }
  0xaf   : > { %v291_v42 = vpop.f32.mrf.mxu2  ;;  %482 = vst [vmem:[%s562_s29 + $0x28] sm:$0xff] %v476_v41  }
  0xb0   : > { %v292_v48 = vadd.f32 %v500_v14, %v291_v42 }
  0xb1   : > { %v283_v44 = vpop.f32.mrf.mxu1 }
  0xb2   : > { %v284_v45 = vadd.f32 %v500_v14, %v283_v44  ;;  %v309_v52 = vmax.f32 %v292_v48, 0.0 }
  0xb4   : > { %v306_v47 = vmax.f32 %v284_v45, 0.0 }
  0xb6   : > { %v461_v49 = vpack.c.bf16 %v306_v47, %v305_v46 }
  0xb7   : > { %v293_v50 = vpop.f32.mrf.mxu2 }
  0xb8   : > { %479 = vst [vmem:[%s562_s29 + $0x10] sm:$0xff] %v461_v49   ;;  %v294_v51 = vadd.f32 %v500_v14, %v293_v50 }
  0xba   : > { %v310_v53 = vmax.f32 %v294_v51, 0.0 }
  0xbc   : > { %v471_v54 = vpack.c.bf16 %v310_v53, %v309_v52 }
  0xbe   : > { %481 = vst [vmem:[%s562_s29 + $0x20] sm:$0xff] %v471_v54  }
  0xbf PF: > { %s13_s12 = sadd.s32 1, %s507_s12  }
  0xc0   : > { %p10_p4 = scmp.ge.s32.totalorder %s13_s12, 4  }
  0xc2   :  { %12 = sbr.rel (!%p10_p4) target bundleno = 1 (0x1), region = 62 }

// kernel: pspnet_forward.69
= control target key start
LH: loop header
LB: loop body
LE: loop exit
PB: predicated region body
PF: predicated region fallthrough
CT: control target
= control target key end

     0   :  { %s626_s15 = smov 0   ;;  %s687_s0 = inlined_call_operand.vmem [shape: bf16[192,4], index: 0, kind: input, shape index: {}]   ;;  %s688_s1 = inlined_call_operand.vmem [shape: bf16[4,128], index: 1, kind: input, shape index: {}]   ;;  %s689_s2 = inlined_call_operand.vmem [shape: f32[4,128], index: 2, kind: input, shape index: {}]   ;;  %s690_s3 = inlined_call_operand.vmem [shape: bf16[192,128], index: 3, kind: input, shape index: {}]   ;;  %s691_s4 = inlined_call_operand.vmem [shape: bf16[192,128], index: 4, kind: output, shape index: {}]  }
   0x1 LB: > { %s471_s16 = sadd.s32 4294967295, %s599_s15   ;;  %p475_p0 = scmp.ge.s32.totalorder %s599_s15, 1  ;;  %s599_s15 = sphi %s626_s15, %s14_s15  }
   0x2   : > { %p174_p1 = scmp.lt.s32.totalorder %s599_s15, 3 }
   0x4   : > { %p175_p2 = pnand %p475_p0, %p174_p1 }
   0x5   : > { %s205_s19 = smul.u32 (!%p175_p2), 12, %s471_s16 }
   0x6   : > { %178 = sbr.rel (%p175_p2) target bundleno = 181 (0xb5), region = 36 }
   0x7   : > { %p206_p3 = scmp.lt.s32.totalorder (!%p175_p2), %s205_s19, 23 }
   0xb   : > { %v236_v0 = vld [vmem:[%s688_s1] sm:$0x3]  ;;  %vm288_vm0 = vcmask 1041408   ;;  %s693_s19 = smov (!%p206_p3, %s205_s19), 23  ;;  %vm269_vm1 = vcmask 31744  }
   0xc   : > { %v290_v1 = vsel %vm288_vm0, %v236_v0, 0  ;;  %s637_s20 = sshll.u32 %s693_s19, 2  ;;  %v652_v9 = vld [vmem:[%s689_s2] ss:$0 sm:$0xff] }
   0xd   : > { %581 = vmatpush.bf16.msra.mxu1 %v290_v1  ;;  %582 = vmatpush.bf16.msra.mxu2 %v290_v1  ;;  %s209_s23 = scalar_lea.vmem %s687_s0, %s637_s20  ;;  %s647_s26 = scalar_lea.vmem %s690_s3, %s637_s20 }
   0xe   : > { %583 = vmatpush.bf16.msra.mxu3 %v290_v1  ;;  %299 = vmatpush.bf16.msra.mxu0 %v290_v1  ;;  %v512_v2 = vld [vmem:[%s209_s23 + $0x8] sm:$0xff]  ;;  %v514_v3 = vld [vmem:[%s209_s23 + $0x18] sm:$0xff]  ;;  %v511_v5 = vld [vmem:[%s209_s23] sm:$0xff]  ;;  %s668_s5 = scalar_lea.vmem %s691_s4, %s637_s20 }
   0xf   : > { %v516_v4 = vld [vmem:[%s209_s23 + $0x28] sm:$0xff]  ;;  %v513_v6 = vld [vmem:[%s209_s23 + $0x10] sm:$0xff]  ;;  %v515_v7 = vld [vmem:[%s209_s23 + $0x20] sm:$0xff] }
  0x10   : > { %504 = vmatmul.msk.bf16.vlgmr.msra.gmra.mxu1 %vm269_vm1, %v512_v2  ;;  %506 = vmatmul.msk.bf16.vlgmr.msra.gmra.mxu2 %vm269_vm1, %v514_v3  ;;  %v518_v11 = vld [vmem:[%s647_s26] sm:$0xff]   ;;  %v571_v12 = vld [vmem:[%s647_s26 + $0x8] sm:$0xff]   ;;  %v573_v21 = vld [vmem:[%s647_s26 + $0x18] sm:$0xff]  }
  0x11   : > { %508 = vmatmul.msk.bf16.vlgmr.msra.gmra.mxu3 %vm269_vm1, %v516_v4  ;;  %503 = vmatmul.msk.bf16.vlgmr.msra.gmra.mxu0 %vm269_vm1, %v511_v5  ;;  %v519_v14 = vunpack.c.l.bf16 %v518_v11  ;;  %v523_v16 = vunpack.c.l.bf16 %v571_v12  ;;  %v524_v18 = vunpack.c.h.bf16 %v571_v12  ;;  %v575_v20 = vld [vmem:[%s647_s26 + $0x28] sm:$0xff]   ;;  %v520_v24 = vunpack.c.h.bf16 %v518_v11  ;;  %v572_v52 = vld [vmem:[%s647_s26 + $0x10] sm:$0xff]   ;;  %v574_v63 = vld [vmem:[%s647_s26 + $0x20] sm:$0xff]  }
  0x12   : > { %v539_v29 = vunpack.c.l.bf16 %v575_v20  ;;  %v531_v32 = vunpack.c.l.bf16 %v573_v21  ;;  %v532_v38 = vunpack.c.h.bf16 %v573_v21  ;;  %v540_v42 = vunpack.c.h.bf16 %v575_v20 }
  0x13   : > { %v527_v59 = vunpack.c.l.bf16 %v572_v52  ;;  %v528_v62 = vunpack.c.h.bf16 %v572_v52  ;;  %v535_v4 = vunpack.c.l.bf16 %v574_v63 }
  0x20   : > { %505 = vmatmul.msk.bf16.gmra.mxu1 %vm269_vm1, %v513_v6  ;;  %507 = vmatmul.msk.bf16.gmra.mxu2 %vm269_vm1, %v515_v7 }
  0x8d   : > { %v306_v8 = vpop.f32.mrf.mxu1 }
  0x8e   : > { %v301_v10 = vpop.f32.mrf.mxu0  ;;  %v307_v15 = vadd.f32 %v652_v9, %v306_v8  ;;  %v536_v8 = vunpack.c.h.bf16 %v574_v63 }
  0x8f   : > { %v302_v13 = vadd.f32 %v652_v9, %v301_v10 }
  0x90   : > { %v357_v25 = vadd.f32 %v523_v16, %v307_v15 }
  0x91   : > { %v355_v23 = vadd.f32 %v519_v14, %v302_v13 }
  0x92   : > { %v369_v36 = vmax.f32 %v357_v25, 0.0 }
  0x93   : > { %v316_v17 = vpop.f32.mrf.mxu2  ;;  %v367_v34 = vmax.f32 %v355_v23, 0.0 }
  0x94   : > { %v326_v19 = vpop.f32.mrf.mxu3  ;;  %v317_v31 = vadd.f32 %v652_v9, %v316_v17 }
  0x95   : > { %v308_v22 = vpop.f32.mrf.mxu1  ;;  %v327_v28 = vadd.f32 %v652_v9, %v326_v19 }
  0x96   : > { %v309_v26 = vadd.f32 %v652_v9, %v308_v22  ;;  %v303_v27 = vpop.f32.mrf.mxu0  ;;  %v361_v43 = vadd.f32 %v531_v32, %v317_v31 }
  0x97   : > { %v304_v30 = vadd.f32 %v652_v9, %v303_v27  ;;  %v365_v40 = vadd.f32 %v539_v29, %v327_v28 }
  0x98   : > { %v358_v33 = vadd.f32 %v524_v18, %v309_v26  ;;  %v373_v54 = vmax.f32 %v361_v43, 0.0 }
  0x99   : > { %v356_v35 = vadd.f32 %v520_v24, %v304_v30  ;;  %v377_v51 = vmax.f32 %v365_v40, 0.0 }
  0x9a   : > { %v370_v37 = vmax.f32 %v358_v33, 0.0 }
  0x9b   : > { %v318_v39 = vpop.f32.mrf.mxu2  ;;  %v368_v41 = vmax.f32 %v356_v35, 0.0 }
  0x9c   : > { %v549_v44 = vpack.c.bf16 %v370_v37, %v369_v36  ;;  %v319_v45 = vadd.f32 %v652_v9, %v318_v39  ;;  %v328_v46 = vpop.f32.mrf.mxu3 }
  0x9d   : > { %v311_v47 = vpop.f32.mrf.mxu1  ;;  %v544_v48 = vpack.c.bf16 %v368_v41, %v367_v34  ;;  %v329_v49 = vadd.f32 %v652_v9, %v328_v46 }
  0x9e   : > { %576 = vst [vmem:[%s668_s5 + $0x8] sm:$0xff] %v549_v44   ;;  %v362_v50 = vadd.f32 %v532_v38, %v319_v45  ;;  %v312_v58 = vadd.f32 %v652_v9, %v311_v47 }
  0x9f   : > { %545 = vst [vmem:[%s668_s5] sm:$0xff] %v544_v48   ;;  %v366_v53 = vadd.f32 %v540_v42, %v329_v49 }
  0xa0   : > { %v374_v55 = vmax.f32 %v362_v50, 0.0  ;;  %v359_v1 = vadd.f32 %v527_v59, %v312_v58 }
  0xa1   : > { %v378_v56 = vmax.f32 %v366_v53, 0.0 }
  0xa2   : > { %v559_v57 = vpack.c.bf16 %v374_v55, %v373_v54  ;;  %v371_v6 = vmax.f32 %v359_v1, 0.0 }
  0xa3   : > { %v321_v60 = vpop.f32.mrf.mxu2  ;;  %v569_v61 = vpack.c.bf16 %v378_v56, %v377_v51 }
  0xa4   : > { %578 = vst [vmem:[%s668_s5 + $0x18] sm:$0xff] %v559_v57   ;;  %v322_v3 = vadd.f32 %v652_v9, %v321_v60 }
  0xa5   : > { %580 = vst [vmem:[%s668_s5 + $0x28] sm:$0xff] %v569_v61   ;;  %v313_v0 = vpop.f32.mrf.mxu1 }
  0xa6   : > { %v314_v2 = vadd.f32 %v652_v9, %v313_v0  ;;  %v363_v11 = vadd.f32 %v535_v4, %v322_v3 }
  0xa8   : > { %v360_v5 = vadd.f32 %v528_v62, %v314_v2  ;;  %v375_v15 = vmax.f32 %v363_v11, 0.0 }
  0xaa   : > { %v372_v7 = vmax.f32 %v360_v5, 0.0 }
  0xab   : > { %v323_v10 = vpop.f32.mrf.mxu2 }
  0xac   : > { %v554_v12 = vpack.c.bf16 %v372_v7, %v371_v6  ;;  %v324_v13 = vadd.f32 %v652_v9, %v323_v10 }
  0xae   : > { %577 = vst [vmem:[%s668_s5 + $0x10] sm:$0xff] %v554_v12   ;;  %v364_v14 = vadd.f32 %v536_v8, %v324_v13 }
  0xb0   : > { %v376_v16 = vmax.f32 %v364_v14, 0.0 }
  0xb2   : > { %v564_v17 = vpack.c.bf16 %v376_v16, %v375_v15 }
  0xb4   : > { %579 = vst [vmem:[%s668_s5 + $0x20] sm:$0xff] %v564_v17  }
  0xb5 PF: > { %s14_s15 = sadd.s32 1, %s599_s15  }
  0xb6   : > { %p11_p4 = scmp.ge.s32.totalorder %s14_s15, 4  }
  0xb8   :  { %13 = sbr.rel (!%p11_p4) target bundleno = 1 (0x1), region = 69 }

// kernel: pspnet_forward.70
= control target key start
LH: loop header
LB: loop body
LE: loop exit
PB: predicated region body
PF: predicated region fallthrough
CT: control target
= control target key end

     0   :  { %s502_s12 = smov 0   ;;  %s540_s0 = inlined_call_operand.vmem [shape: bf16[192,16], index: 0, kind: input, shape index: {}]   ;;  %s541_s1 = inlined_call_operand.vmem [shape: bf16[16,128], index: 1, kind: input, shape index: {}]   ;;  %s542_s2 = inlined_call_operand.vmem [shape: f32[4,128], index: 2, kind: input, shape index: {}]   ;;  %s543_s3 = inlined_call_operand.vmem [shape: bf16[192,128], index: 3, kind: output, shape index: {}]  }
   0x1 LB: > { %s377_s13 = sadd.s32 4294967295, %s480_s12   ;;  %p381_p0 = scmp.ge.s32.totalorder %s480_s12, 1  ;;  %s480_s12 = sphi %s502_s12, %s13_s12  }
   0x2   : > { %p138_p1 = scmp.lt.s32.totalorder %s480_s12, 3 }
   0x4   : > { %p139_p2 = pnand %p381_p0, %p138_p1 }
   0x5   : > { %s162_s16 = smul.u32 (!%p139_p2), 12, %s377_s13 }
   0x6   : > { %142 = sbr.rel (%p139_p2) target bundleno = 178 (0xb2), region = 32 }
   0x7   : > { %p163_p3 = scmp.lt.s32.totalorder (!%p139_p2), %s162_s16, 23 }
   0xb   : > { %v426_v0 = vld [vmem:[%s541_s1] sm:$0xff]  ;;  %s545_s16 = smov (!%p163_p3, %s162_s16), 23  ;;  %vm227_vm0 = vcmask 130048  }
   0xc   : > { %462 = vmatpush.bf16.msra.mxu1 %v426_v0  ;;  %463 = vmatpush.bf16.msra.mxu2 %v426_v0  ;;  %s382_s17 = sshll.u32 %s545_s16, 2  ;;  %v473_v9 = vld [vmem:[%s542_s2] ss:$0 sm:$0xff] }
   0xd   : > { %464 = vmatpush.bf16.msra.mxu3 %v426_v0  ;;  %253 = vmatpush.bf16.msra.mxu0 %v426_v0  ;;  %s166_s20 = scalar_lea.vmem %s540_s0, %s382_s17  ;;  %s529_s25 = scalar_lea.vmem %s543_s3, %s382_s17 }
   0xe   : > { %v421_v1 = vld [vmem:[%s166_s20 + $0x8] sm:$0xff]  ;;  %v423_v2 = vld [vmem:[%s166_s20 + $0x18] sm:$0xff]  ;;  %v420_v4 = vld [vmem:[%s166_s20] sm:$0xff] }
   0xf   : > { %v425_v3 = vld [vmem:[%s166_s20 + $0x28] sm:$0xff]  ;;  %413 = vmatmul.msk.bf16.vlgmr.msra.gmra.mxu1 %vm227_vm0, %v421_v1  ;;  %415 = vmatmul.msk.bf16.vlgmr.msra.gmra.mxu2 %vm227_vm0, %v423_v2  ;;  %v422_v5 = vld [vmem:[%s166_s20 + $0x10] sm:$0xff]  ;;  %v424_v6 = vld [vmem:[%s166_s20 + $0x20] sm:$0xff] }
  0x10   : > { %417 = vmatmul.msk.bf16.vlgmr.msra.gmra.mxu3 %vm227_vm0, %v425_v3  ;;  %412 = vmatmul.msk.bf16.vlgmr.msra.gmra.mxu0 %vm227_vm0, %v420_v4 }
  0x1f   : > { %414 = vmatmul.msk.bf16.gmra.mxu1 %vm227_vm0, %v422_v5  ;;  %416 = vmatmul.msk.bf16.gmra.mxu2 %vm227_vm0, %v424_v6 }
  0x8c   : > { %v260_v7 = vpop.f32.mrf.mxu1 }
  0x8d   : > { %v255_v8 = vpop.f32.mrf.mxu0  ;;  %v261_v12 = vadd.f32 %v473_v9, %v260_v7 }
  0x8e   : > { %v256_v11 = vadd.f32 %v473_v9, %v255_v8 }
  0x8f   : > { %v287_v19 = vmax.f32 %v261_v12, 0.0 }
  0x90   : > { %v285_v17 = vmax.f32 %v256_v11, 0.0 }
  0x92   : > { %v270_v10 = vpop.f32.mrf.mxu2 }
  0x93   : > { %v280_v13 = vpop.f32.mrf.mxu3  ;;  %v271_v23 = vadd.f32 %v473_v9, %v270_v10 }
  0x94   : > { %v262_v14 = vpop.f32.mrf.mxu1  ;;  %v281_v21 = vadd.f32 %v473_v9, %v280_v13 }
  0x95   : > { %v263_v15 = vadd.f32 %v473_v9, %v262_v14  ;;  %v257_v16 = vpop.f32.mrf.mxu0  ;;  %v291_v32 = vmax.f32 %v271_v23, 0.0 }
  0x96   : > { %v258_v18 = vadd.f32 %v473_v9, %v257_v16  ;;  %v295_v29 = vmax.f32 %v281_v21, 0.0 }
  0x97   : > { %v288_v20 = vmax.f32 %v263_v15, 0.0 }
  0x98   : > { %v286_v22 = vmax.f32 %v258_v18, 0.0 }
  0x99   : > { %v435_v24 = vpack.c.bf16 %v288_v20, %v287_v19 }
  0x9a   : > { %v272_v25 = vpop.f32.mrf.mxu2  ;;  %v430_v26 = vpack.c.bf16 %v286_v22, %v285_v17 }
  0x9b   : > { %457 = vst [vmem:[%s529_s25 + $0x8] sm:$0xff] %v435_v24   ;;  %v273_v27 = vadd.f32 %v473_v9, %v272_v25  ;;  %v282_v28 = vpop.f32.mrf.mxu3 }
  0x9c   : > { %v265_v30 = vpop.f32.mrf.mxu1  ;;  %431 = vst [vmem:[%s529_s25] sm:$0xff] %v430_v26   ;;  %v283_v31 = vadd.f32 %v473_v9, %v282_v28 }
  0x9d   : > { %v292_v33 = vmax.f32 %v273_v27, 0.0  ;;  %v266_v38 = vadd.f32 %v473_v9, %v265_v30 }
  0x9e   : > { %v296_v34 = vmax.f32 %v283_v31, 0.0 }
  0x9f   : > { %v445_v35 = vpack.c.bf16 %v292_v33, %v291_v32  ;;  %v289_v41 = vmax.f32 %v266_v38, 0.0 }
  0xa0   : > { %v455_v36 = vpack.c.bf16 %v296_v34, %v295_v29 }
  0xa1   : > { %459 = vst [vmem:[%s529_s25 + $0x18] sm:$0xff] %v445_v35  }
  0xa2   : > { %v275_v37 = vpop.f32.mrf.mxu2  ;;  %461 = vst [vmem:[%s529_s25 + $0x28] sm:$0xff] %v455_v36  }
  0xa3   : > { %v276_v43 = vadd.f32 %v473_v9, %v275_v37 }
  0xa4   : > { %v267_v39 = vpop.f32.mrf.mxu1 }
  0xa5   : > { %v268_v40 = vadd.f32 %v473_v9, %v267_v39  ;;  %v293_v47 = vmax.f32 %v276_v43, 0.0 }
  0xa7   : > { %v290_v42 = vmax.f32 %v268_v40, 0.0 }
  0xa9   : > { %v440_v44 = vpack.c.bf16 %v290_v42, %v289_v41 }
  0xaa   : > { %v277_v45 = vpop.f32.mrf.mxu2 }
  0xab   : > { %458 = vst [vmem:[%s529_s25 + $0x10] sm:$0xff] %v440_v44   ;;  %v278_v46 = vadd.f32 %v473_v9, %v277_v45 }
  0xad   : > { %v294_v48 = vmax.f32 %v278_v46, 0.0 }
  0xaf   : > { %v450_v49 = vpack.c.bf16 %v294_v48, %v293_v47 }
  0xb1   : > { %460 = vst [vmem:[%s529_s25 + $0x20] sm:$0xff] %v450_v49  }
  0xb2 PF: > { %s13_s12 = sadd.s32 1, %s480_s12  }
  0xb3   : > { %p10_p4 = scmp.ge.s32.totalorder %s13_s12, 4  }
  0xb5   :  { %12 = sbr.rel (!%p10_p4) target bundleno = 1 (0x1), region = 62 }

// kernel: pspnet_forward.77
= control target key start
LH: loop header
LB: loop body
LE: loop exit
PB: predicated region body
PF: predicated region fallthrough
CT: control target
= control target key end

     0   :  { %vm53_vm0 = vcmask 130048   ;;  %s221_s1 = inlined_call_operand.vmem [shape: bf16[16,128], index: 1, kind: input, shape index: {}]   ;;  %s222_s0 = inlined_call_operand.vmem [shape: bf16[64,16], index: 0, kind: input, shape index: {}]   ;;  %s223_s2 = inlined_call_operand.vmem [shape: f32[4,128], index: 2, kind: input, shape index: {}]   ;;  %s224_s3 = inlined_call_operand.vmem [shape: bf16[64,128], index: 3, kind: output, shape index: {}]  }
   0x1   :  { %v143_v0 = vld [vmem:[%s221_s1] sm:$0xff]  ;;  %v140_v2 = vld [vmem:[%s222_s0 + $0x8] sm:$0xff]  ;;  %v141_v3 = vld [vmem:[%s222_s0 + $0x10] sm:$0xff] }
   0x2   :  { %v139_v1 = vld [vmem:[%s222_s0] sm:$0xff]  ;;  %73 = vmatpush.bf16.msra.mxu0 %v143_v0  ;;  %167 = vmatpush.bf16.msra.mxu1 %v143_v0  ;;  %v142_v4 = vld [vmem:[%s222_s0 + $0x18] sm:$0xff] }
   0x3   :  { %168 = vmatpush.bf16.msra.mxu2 %v143_v0  ;;  %169 = vmatpush.bf16.msra.mxu3 %v143_v0  ;;  %v170_v7 = vld [vmem:[%s223_s2] ss:$0 sm:$0xff] }
   0x5   :  { %135 = vmatmul.msk.bf16.vlgmr.msra.gmra.mxu0 %vm53_vm0, %v139_v1  ;;  %136 = vmatmul.msk.bf16.vlgmr.msra.gmra.mxu1 %vm53_vm0, %v140_v2 }
   0x6   :  { %137 = vmatmul.msk.bf16.vlgmr.msra.gmra.mxu2 %vm53_vm0, %v141_v3  ;;  %138 = vmatmul.msk.bf16.vlgmr.msra.gmra.mxu3 %vm53_vm0, %v142_v4 }
  0x82   :  { %v75_v5 = vpop.f32.mrf.mxu0  ;;  %v80_v6 = vpop.f32.mrf.mxu1 }
  0x83   :  { %v76_v12 = vadd.f32 %v170_v7, %v75_v5  ;;  %v81_v13 = vadd.f32 %v170_v7, %v80_v6 }
  0x89   :  { %v85_v8 = vpop.f32.mrf.mxu2  ;;  %v90_v9 = vpop.f32.mrf.mxu3 }
  0x8a   :  { %v77_v10 = vpop.f32.mrf.mxu0  ;;  %v82_v11 = vpop.f32.mrf.mxu1  ;;  %v86_v20 = vadd.f32 %v170_v7, %v85_v8  ;;  %v91_v21 = vadd.f32 %v170_v7, %v90_v9 }
  0x8b   :  { %v78_v14 = vadd.f32 %v170_v7, %v77_v10  ;;  %v83_v15 = vadd.f32 %v170_v7, %v82_v11 }
  0x8d   :  { %v147_v16 = vpack.c.bf16 %v78_v14, %v76_v12  ;;  %v152_v17 = vpack.c.bf16 %v83_v15, %v81_v13 }
  0x8f   :  { %148 = vst [vmem:[%s224_s3] sm:$0xff] %v147_v16  }
  0x90   :  { %164 = vst [vmem:[%s224_s3 + $0x8] sm:$0xff] %v152_v17  }
  0x91   :  { %v87_v18 = vpop.f32.mrf.mxu2  ;;  %v92_v19 = vpop.f32.mrf.mxu3 }
  0x92   :  { %v88_v22 = vadd.f32 %v170_v7, %v87_v18  ;;  %v93_v23 = vadd.f32 %v170_v7, %v92_v19 }
  0x94   :  { %v157_v24 = vpack.c.bf16 %v88_v22, %v86_v20  ;;  %v162_v25 = vpack.c.bf16 %v93_v23, %v91_v21 }
  0x96   :  { %165 = vst [vmem:[%s224_s3 + $0x10] sm:$0xff] %v157_v24  }
  0x97   :  { %166 = vst [vmem:[%s224_s3 + $0x18] sm:$0xff] %v162_v25  }

// kernel: pspnet_forward.80
= control target key start
LH: loop header
LB: loop body
LE: loop exit
PB: predicated region body
PF: predicated region fallthrough
CT: control target
= control target key end

     0   :  { %vm61_vm0 = vcmask 261120   ;;  %s248_s1 = inlined_call_operand.vmem [shape: bf16[32,128], index: 1, kind: input, shape index: {}]   ;;  %s249_s2 = inlined_call_operand.vmem [shape: f32[4,128], index: 2, kind: input, shape index: {}]   ;;  %s250_s0 = inlined_call_operand.vmem [shape: bf16[64,32], index: 0, kind: input, shape index: {}]   ;;  %s251_s3 = inlined_call_operand.vmem [shape: bf16[64,128], index: 3, kind: output, shape index: {}]  }
   0x1   :  { %v164_v0 = vld [vmem:[%s248_s1 + $0x8] sm:$0xff]  ;;  %v163_v1 = vld [vmem:[%s248_s1] sm:$0xff]  ;;  %v161_v4 = vld [vmem:[%s250_s0 + $0x10] sm:$0xff] }
   0x2   :  { %80 = vmatpush.bf16.msra.mxu0 %v164_v0  ;;  %188 = vmatpush.bf16.msra.mxu1 %v164_v0  ;;  %v159_v2 = vld [vmem:[%s250_s0] sm:$0xff]  ;;  %v160_v3 = vld [vmem:[%s250_s0 + $0x8] sm:$0xff]  ;;  %v162_v5 = vld [vmem:[%s250_s0 + $0x18] sm:$0xff] }
   0x3   :  { %189 = vmatpush.bf16.msra.mxu2 %v164_v0  ;;  %190 = vmatpush.bf16.msra.mxu3 %v164_v0  ;;  %v194_v8 = vld [vmem:[%s249_s2] ss:$0 sm:$0xff] }
   0x6   :  { %81 = vmatpush.bf16.msra.mxu0 %v163_v1  ;;  %191 = vmatpush.bf16.msra.mxu1 %v163_v1 }
   0x7   :  { %192 = vmatpush.bf16.msra.mxu2 %v163_v1  ;;  %193 = vmatpush.bf16.msra.mxu3 %v163_v1 }
   0x9   :  { %155 = vmatmul.msk.bf16.vlgmr.msra.gmra.mxu0 %vm61_vm0, %v159_v2  ;;  %156 = vmatmul.msk.bf16.vlgmr.msra.gmra.mxu1 %vm61_vm0, %v160_v3 }
   0xa   :  { %157 = vmatmul.msk.bf16.vlgmr.msra.gmra.mxu2 %vm61_vm0, %v161_v4  ;;  %158 = vmatmul.msk.bf16.vlgmr.msra.gmra.mxu3 %vm61_vm0, %v162_v5 }
  0x86   :  { %v83_v6 = vpop.f32.mrf.mxu0  ;;  %v88_v7 = vpop.f32.mrf.mxu1 }
  0x87   :  { %v84_v9 = vadd.f32 %v194_v8, %v83_v6  ;;  %v89_v10 = vadd.f32 %v194_v8, %v88_v7 }
  0x89   :  { %v103_v17 = vmax.f32 %v84_v9, 0.0  ;;  %v105_v18 = vmax.f32 %v89_v10, 0.0 }
  0x8d   :  { %v93_v11 = vpop.f32.mrf.mxu2  ;;  %v98_v12 = vpop.f32.mrf.mxu3 }
  0x8e   :  { %v85_v13 = vpop.f32.mrf.mxu0  ;;  %v90_v14 = vpop.f32.mrf.mxu1  ;;  %v94_v23 = vadd.f32 %v194_v8, %v93_v11  ;;  %v99_v24 = vadd.f32 %v194_v8, %v98_v12 }
  0x8f   :  { %v86_v15 = vadd.f32 %v194_v8, %v85_v13  ;;  %v91_v16 = vadd.f32 %v194_v8, %v90_v14 }
  0x90   :  { %v107_v29 = vmax.f32 %v94_v23, 0.0  ;;  %v109_v30 = vmax.f32 %v99_v24, 0.0 }
  0x91   :  { %v104_v19 = vmax.f32 %v86_v15, 0.0  ;;  %v106_v20 = vmax.f32 %v91_v16, 0.0 }
  0x93   :  { %v168_v21 = vpack.c.bf16 %v104_v19, %v103_v17  ;;  %v173_v22 = vpack.c.bf16 %v106_v20, %v105_v18 }
  0x95   :  { %169 = vst [vmem:[%s251_s3] sm:$0xff] %v168_v21   ;;  %v95_v25 = vpop.f32.mrf.mxu2  ;;  %v100_v26 = vpop.f32.mrf.mxu3 }
  0x96   :  { %185 = vst [vmem:[%s251_s3 + $0x8] sm:$0xff] %v173_v22   ;;  %v96_v27 = vadd.f32 %v194_v8, %v95_v25  ;;  %v101_v28 = vadd.f32 %v194_v8, %v100_v26 }
  0x98   :  { %v108_v31 = vmax.f32 %v96_v27, 0.0  ;;  %v110_v32 = vmax.f32 %v101_v28, 0.0 }
  0x9a   :  { %v178_v33 = vpack.c.bf16 %v108_v31, %v107_v29  ;;  %v183_v34 = vpack.c.bf16 %v110_v32, %v109_v30 }
  0x9c   :  { %186 = vst [vmem:[%s251_s3 + $0x10] sm:$0xff] %v178_v33  }
  0x9d   :  { %187 = vst [vmem:[%s251_s3 + $0x18] sm:$0xff] %v183_v34  }

// kernel: pspnet_forward.78
= control target key start
LH: loop header
LB: loop body
LE: loop exit
PB: predicated region body
PF: predicated region fallthrough
CT: control target
= control target key end

     0   :  { %vm94_vm0 = vcmask 1043456   ;;  %vm81_vm1 = vcmask 588800   ;;  %s300_s1 = inlined_call_operand.vmem [shape: bf16[72,128], index: 1, kind: input, shape index: {}]   ;;  %s301_s2 = inlined_call_operand.vmem [shape: f32[4,128], index: 2, kind: input, shape index: {}]   ;;  %s302_s0 = inlined_call_operand.vmem [shape: bf16[64,72], index: 0, kind: input, shape index: {}]   ;;  %s303_s3 = inlined_call_operand.vmem [shape: bf16[64,128], index: 3, kind: output, shape index: {}]  }
   0x1   :  { %v31_v0 = vld [vmem:[%s300_s1 + $0x20] sm:$0xf]  ;;  %v198_v4 = vld [vmem:[%s300_s1 + $0x18] sm:$0xff]  ;;  %v197_v5 = vld [vmem:[%s300_s1 + $0x10] sm:$0xff] }
   0x2   :  { %v71_v1 = vunpack.c.l.b16 %v31_v0  ;;  %v196_v6 = vld [vmem:[%s300_s1 + $0x8] sm:$0xff]  ;;  %v195_v7 = vld [vmem:[%s300_s1] sm:$0xff]  ;;  %v193_v10 = vld [vmem:[%s302_s0 + $0x10] sm:$0xff] }
   0x3   :  { %v191_v8 = vld [vmem:[%s302_s0] sm:$0xff]  ;;  %v192_v9 = vld [vmem:[%s302_s0 + $0x8] sm:$0xff]  ;;  %v194_v11 = vld [vmem:[%s302_s0 + $0x18] sm:$0xff] }
   0x4   :  { %v76_v2 = vpack.c.b16 %v71_v1, %v71_v1  ;;  %v237_v14 = vld [vmem:[%s301_s2] ss:$0 sm:$0xff] }
   0x6   :  { %v96_v3 = vsel %vm94_vm0, %v76_v2, 0 }
   0x7   :  { %101 = vmatpush.bf16.msra.mxu0 %v96_v3  ;;  %222 = vmatpush.bf16.msra.mxu1 %v96_v3 }
   0x8   :  { %223 = vmatpush.bf16.msra.mxu2 %v96_v3  ;;  %224 = vmatpush.bf16.msra.mxu3 %v96_v3 }
   0xb   :  { %102 = vmatpush.bf16.msra.mxu0 %v198_v4  ;;  %225 = vmatpush.bf16.msra.mxu1 %v198_v4 }
   0xc   :  { %226 = vmatpush.bf16.msra.mxu2 %v198_v4  ;;  %227 = vmatpush.bf16.msra.mxu3 %v198_v4 }
   0xf   :  { %103 = vmatpush.bf16.msra.mxu0 %v197_v5  ;;  %228 = vmatpush.bf16.msra.mxu1 %v197_v5 }
  0x10   :  { %229 = vmatpush.bf16.msra.mxu2 %v197_v5  ;;  %230 = vmatpush.bf16.msra.mxu3 %v197_v5 }
  0x13   :  { %104 = vmatpush.bf16.msra.mxu0 %v196_v6  ;;  %231 = vmatpush.bf16.msra.mxu1 %v196_v6 }
  0x14   :  { %232 = vmatpush.bf16.msra.mxu2 %v196_v6  ;;  %233 = vmatpush.bf16.msra.mxu3 %v196_v6 }
  0x17   :  { %105 = vmatpush.bf16.msra.mxu0 %v195_v7  ;;  %234 = vmatpush.bf16.msra.mxu1 %v195_v7 }
  0x18   :  { %235 = vmatpush.bf16.msra.mxu2 %v195_v7  ;;  %236 = vmatpush.bf16.msra.mxu3 %v195_v7 }
  0x1a   :  { %187 = vmatmul.msk.bf16.vlgmr.msra.gmra.mxu0 %vm81_vm1, %v191_v8  ;;  %188 = vmatmul.msk.bf16.vlgmr.msra.gmra.mxu1 %vm81_vm1, %v192_v9 }
  0x1b   :  { %189 = vmatmul.msk.bf16.vlgmr.msra.gmra.mxu2 %vm81_vm1, %v193_v10  ;;  %190 = vmatmul.msk.bf16.vlgmr.msra.gmra.mxu3 %vm81_vm1, %v194_v11 }
  0x97   :  { %v107_v12 = vpop.f32.mrf.mxu0  ;;  %v112_v13 = vpop.f32.mrf.mxu1 }
  0x98   :  { %v108_v15 = vadd.f32 %v237_v14, %v107_v12  ;;  %v113_v16 = vadd.f32 %v237_v14, %v112_v13 }
  0x9a   :  { %v127_v23 = vmax.f32 %v108_v15, 0.0  ;;  %v129_v24 = vmax.f32 %v113_v16, 0.0 }
  0x9e   :  { %v117_v17 = vpop.f32.mrf.mxu2  ;;  %v122_v18 = vpop.f32.mrf.mxu3 }
  0x9f   :  { %v109_v19 = vpop.f32.mrf.mxu0  ;;  %v114_v20 = vpop.f32.mrf.mxu1  ;;  %v118_v29 = vadd.f32 %v237_v14, %v117_v17  ;;  %v123_v30 = vadd.f32 %v237_v14, %v122_v18 }
  0xa0   :  { %v110_v21 = vadd.f32 %v237_v14, %v109_v19  ;;  %v115_v22 = vadd.f32 %v237_v14, %v114_v20 }
  0xa1   :  { %v131_v35 = vmax.f32 %v118_v29, 0.0  ;;  %v133_v36 = vmax.f32 %v123_v30, 0.0 }
  0xa2   :  { %v128_v25 = vmax.f32 %v110_v21, 0.0  ;;  %v130_v26 = vmax.f32 %v115_v22, 0.0 }
  0xa4   :  { %v202_v27 = vpack.c.bf16 %v128_v25, %v127_v23  ;;  %v207_v28 = vpack.c.bf16 %v130_v26, %v129_v24 }
  0xa6   :  { %203 = vst [vmem:[%s303_s3] sm:$0xff] %v202_v27   ;;  %v119_v31 = vpop.f32.mrf.mxu2  ;;  %v124_v32 = vpop.f32.mrf.mxu3 }
  0xa7   :  { %219 = vst [vmem:[%s303_s3 + $0x8] sm:$0xff] %v207_v28   ;;  %v120_v33 = vadd.f32 %v237_v14, %v119_v31  ;;  %v125_v34 = vadd.f32 %v237_v14, %v124_v32 }
  0xa9   :  { %v132_v37 = vmax.f32 %v120_v33, 0.0  ;;  %v134_v38 = vmax.f32 %v125_v34, 0.0 }
  0xab   :  { %v212_v39 = vpack.c.bf16 %v132_v37, %v131_v35  ;;  %v217_v40 = vpack.c.bf16 %v134_v38, %v133_v36 }
  0xad   :  { %220 = vst [vmem:[%s303_s3 + $0x10] sm:$0xff] %v212_v39  }
  0xae   :  { %221 = vst [vmem:[%s303_s3 + $0x18] sm:$0xff] %v217_v40  }

// kernel: pspnet_forward.79
= control target key start
LH: loop header
LB: loop body
LE: loop exit
PB: predicated region body
PF: predicated region fallthrough
CT: control target
= control target key end

     0   :  { %vm62_vm0 = vcmask 1043456   ;;  %vm49_vm1 = vcmask 64512   ;;  %s284_s1 = inlined_call_operand.vmem [shape: bf16[8,128], index: 1, kind: input, shape index: {}]   ;;  %s285_s0 = inlined_call_operand.vmem [shape: bf16[64,8], index: 0, kind: input, shape index: {}]   ;;  %s286_s2 = inlined_call_operand.vmem [shape: f32[4,128], index: 2, kind: input, shape index: {}]   ;;  %s287_s3 = inlined_call_operand.vmem [shape: bf16[64,128], index: 3, kind: input, shape index: {}]   ;;  %s288_s4 = inlined_call_operand.vmem [shape: bf16[64,128], index: 4, kind: output, shape index: {}]  }
   0x1   :  { %v26_v0 = vld [vmem:[%s284_s1] sm:$0xf]  ;;  %v168_v3 = vld [vmem:[%s285_s0 + $0x8] sm:$0xff]  ;;  %v169_v4 = vld [vmem:[%s285_s0 + $0x10] sm:$0xff] }
   0x2   :  { %v64_v1 = vsel %vm62_vm0, %v26_v0, 0  ;;  %v167_v2 = vld [vmem:[%s285_s0] sm:$0xff]  ;;  %v170_v5 = vld [vmem:[%s285_s0 + $0x18] sm:$0xff]  ;;  %v207_v10 = vld [vmem:[%s287_s3 + $0x8] sm:$0xff]  }
   0x3   :  { %73 = vmatpush.bf16.msra.mxu0 %v64_v1  ;;  %213 = vmatpush.bf16.msra.mxu1 %v64_v1  ;;  %v216_v8 = vld [vmem:[%s286_s2] ss:$0 sm:$0xff]  ;;  %v177_v14 = vunpack.c.l.bf16 %v207_v10  ;;  %v178_v18 = vunpack.c.h.bf16 %v207_v10  ;;  %v208_v23 = vld [vmem:[%s287_s3 + $0x10] sm:$0xff]   ;;  %v209_v24 = vld [vmem:[%s287_s3 + $0x18] sm:$0xff]  }
   0x4   :  { %214 = vmatpush.bf16.msra.mxu2 %v64_v1  ;;  %215 = vmatpush.bf16.msra.mxu3 %v64_v1  ;;  %v172_v9 = vld [vmem:[%s287_s3] sm:$0xff]   ;;  %v181_v30 = vunpack.c.l.bf16 %v208_v23  ;;  %v185_v32 = vunpack.c.l.bf16 %v209_v24  ;;  %v182_v37 = vunpack.c.h.bf16 %v208_v23  ;;  %v186_v38 = vunpack.c.h.bf16 %v209_v24 }
   0x5   :  { %v173_v12 = vunpack.c.l.bf16 %v172_v9  ;;  %v174_v17 = vunpack.c.h.bf16 %v172_v9 }
   0x6   :  { %163 = vmatmul.msk.bf16.vlgmr.msra.gmra.mxu0 %vm49_vm1, %v167_v2  ;;  %164 = vmatmul.msk.bf16.vlgmr.msra.gmra.mxu1 %vm49_vm1, %v168_v3 }
   0x7   :  { %165 = vmatmul.msk.bf16.vlgmr.msra.gmra.mxu2 %vm49_vm1, %v169_v4  ;;  %166 = vmatmul.msk.bf16.vlgmr.msra.gmra.mxu3 %vm49_vm1, %v170_v5 }
  0x83   :  { %v75_v6 = vpop.f32.mrf.mxu0  ;;  %v80_v7 = vpop.f32.mrf.mxu1 }
  0x84   :  { %v76_v11 = vadd.f32 %v216_v8, %v75_v6  ;;  %v81_v13 = vadd.f32 %v216_v8, %v80_v7 }
  0x86   :  { %v111_v21 = vadd.f32 %v173_v12, %v76_v11  ;;  %v113_v22 = vadd.f32 %v177_v14, %v81_v13 }
  0x88   :  { %v119_v33 = vmax.f32 %v111_v21, 0.0  ;;  %v121_v34 = vmax.f32 %v113_v22, 0.0 }
  0x8a   :  { %v85_v15 = vpop.f32.mrf.mxu2  ;;  %v90_v16 = vpop.f32.mrf.mxu3 }
  0x8b   :  { %v77_v19 = vpop.f32.mrf.mxu0  ;;  %v82_v20 = vpop.f32.mrf.mxu1  ;;  %v86_v29 = vadd.f32 %v216_v8, %v85_v15  ;;  %v91_v31 = vadd.f32 %v216_v8, %v90_v16 }
  0x8c   :  { %v78_v25 = vadd.f32 %v216_v8, %v77_v19  ;;  %v83_v26 = vadd.f32 %v216_v8, %v82_v20 }
  0x8d   :  { %v115_v43 = vadd.f32 %v181_v30, %v86_v29  ;;  %v117_v44 = vadd.f32 %v185_v32, %v91_v31 }
  0x8e   :  { %v112_v27 = vadd.f32 %v174_v17, %v78_v25  ;;  %v114_v28 = vadd.f32 %v178_v18, %v83_v26 }
  0x8f   :  { %v123_v49 = vmax.f32 %v115_v43, 0.0  ;;  %v125_v50 = vmax.f32 %v117_v44, 0.0 }
  0x90   :  { %v120_v35 = vmax.f32 %v112_v27, 0.0  ;;  %v122_v36 = vmax.f32 %v114_v28, 0.0 }
  0x92   :  { %v190_v39 = vpack.c.bf16 %v120_v35, %v119_v33  ;;  %v195_v40 = vpack.c.bf16 %v122_v36, %v121_v34  ;;  %v87_v41 = vpop.f32.mrf.mxu2  ;;  %v92_v42 = vpop.f32.mrf.mxu3 }
  0x93   :  { %v88_v45 = vadd.f32 %v216_v8, %v87_v41  ;;  %v93_v46 = vadd.f32 %v216_v8, %v92_v42 }
  0x94   :  { %191 = vst [vmem:[%s288_s4] sm:$0xff] %v190_v39  }
  0x95   :  { %210 = vst [vmem:[%s288_s4 + $0x8] sm:$0xff] %v195_v40   ;;  %v116_v47 = vadd.f32 %v182_v37, %v88_v45  ;;  %v118_v48 = vadd.f32 %v186_v38, %v93_v46 }
  0x97   :  { %v124_v51 = vmax.f32 %v116_v47, 0.0  ;;  %v126_v52 = vmax.f32 %v118_v48, 0.0 }
  0x99   :  { %v200_v53 = vpack.c.bf16 %v124_v51, %v123_v49  ;;  %v205_v54 = vpack.c.bf16 %v126_v52, %v125_v50 }
  0x9b   :  { %211 = vst [vmem:[%s288_s4 + $0x10] sm:$0xff] %v200_v53  }
  0x9c   :  { %212 = vst [vmem:[%s288_s4 + $0x18] sm:$0xff] %v205_v54  }

// kernel: pspnet_forward.89
= control target key start
LH: loop header
LB: loop body
LE: loop exit
PB: predicated region body
PF: predicated region fallthrough
CT: control target
= control target key end

     0   :  { %vm61_vm0 = vcmask 261120   ;;  %s262_s1 = inlined_call_operand.vmem [shape: bf16[32,128], index: 1, kind: input, shape index: {}]   ;;  %s263_s2 = inlined_call_operand.vmem [shape: f32[4,128], index: 2, kind: input, shape index: {}]   ;;  %s264_s0 = inlined_call_operand.vmem [shape: bf16[64,32], index: 0, kind: input, shape index: {}]   ;;  %s265_s3 = inlined_call_operand.vmem [shape: bf16[64,128], index: 3, kind: output, shape index: {}]  }
   0x1   :  { %v174_v0 = vld [vmem:[%s262_s1 + $0x8] sm:$0xff]  ;;  %v173_v1 = vld [vmem:[%s262_s1] sm:$0xff]  ;;  %v171_v4 = vld [vmem:[%s264_s0 + $0x10] sm:$0xff] }
   0x2   :  { %80 = vmatpush.bf16.msra.mxu0 %v174_v0  ;;  %198 = vmatpush.bf16.msra.mxu1 %v174_v0  ;;  %v169_v2 = vld [vmem:[%s264_s0] sm:$0xff]  ;;  %v170_v3 = vld [vmem:[%s264_s0 + $0x8] sm:$0xff]  ;;  %v172_v5 = vld [vmem:[%s264_s0 + $0x18] sm:$0xff] }
   0x3   :  { %199 = vmatpush.bf16.msra.mxu2 %v174_v0  ;;  %200 = vmatpush.bf16.msra.mxu3 %v174_v0  ;;  %v204_v8 = vld [vmem:[%s263_s2] ss:$0 sm:$0xff]  ;;  %v205_v10 = vld [vmem:[%s263_s2 + $0x1] ss:$0 sm:$0xff] }
   0x6   :  { %81 = vmatpush.bf16.msra.mxu0 %v173_v1  ;;  %201 = vmatpush.bf16.msra.mxu1 %v173_v1 }
   0x7   :  { %202 = vmatpush.bf16.msra.mxu2 %v173_v1  ;;  %203 = vmatpush.bf16.msra.mxu3 %v173_v1 }
   0x9   :  { %165 = vmatmul.msk.bf16.vlgmr.msra.gmra.mxu0 %vm61_vm0, %v169_v2  ;;  %166 = vmatmul.msk.bf16.vlgmr.msra.gmra.mxu1 %vm61_vm0, %v170_v3 }
   0xa   :  { %167 = vmatmul.msk.bf16.vlgmr.msra.gmra.mxu2 %vm61_vm0, %v171_v4  ;;  %168 = vmatmul.msk.bf16.vlgmr.msra.gmra.mxu3 %vm61_vm0, %v172_v5 }
  0x86   :  { %v83_v6 = vpop.f32.mrf.mxu0  ;;  %v88_v7 = vpop.f32.mrf.mxu1 }
  0x87   :  { %v84_v9 = vadd.f32 %v204_v8, %v83_v6  ;;  %v89_v11 = vadd.f32 %v204_v8, %v88_v7 }
  0x89   :  { %v105_v16 = vmul.f32 %v205_v10, %v84_v9  ;;  %v107_v17 = vmul.f32 %v205_v10, %v89_v11 }
  0x8b   :  { %v113_v24 = vmax.f32 %v84_v9, %v105_v16  ;;  %v115_v25 = vmax.f32 %v89_v11, %v107_v17 }
  0x8d   :  { %v93_v12 = vpop.f32.mrf.mxu2  ;;  %v98_v13 = vpop.f32.mrf.mxu3 }
  0x8e   :  { %v85_v14 = vpop.f32.mrf.mxu0  ;;  %v90_v15 = vpop.f32.mrf.mxu1  ;;  %v94_v22 = vadd.f32 %v204_v8, %v93_v12  ;;  %v99_v23 = vadd.f32 %v204_v8, %v98_v13 }
  0x8f   :  { %v86_v18 = vadd.f32 %v204_v8, %v85_v14  ;;  %v91_v19 = vadd.f32 %v204_v8, %v90_v15 }
  0x90   :  { %v109_v32 = vmul.f32 %v205_v10, %v94_v22  ;;  %v111_v33 = vmul.f32 %v205_v10, %v99_v23 }
  0x91   :  { %v106_v20 = vmul.f32 %v205_v10, %v86_v18  ;;  %v108_v21 = vmul.f32 %v205_v10, %v91_v19 }
  0x92   :  { %v117_v38 = vmax.f32 %v94_v22, %v109_v32  ;;  %v119_v39 = vmax.f32 %v99_v23, %v111_v33 }
  0x93   :  { %v114_v26 = vmax.f32 %v86_v18, %v106_v20  ;;  %v116_v27 = vmax.f32 %v91_v19, %v108_v21 }
  0x95   :  { %v178_v28 = vpack.c.bf16 %v114_v26, %v113_v24  ;;  %v183_v29 = vpack.c.bf16 %v116_v27, %v115_v25  ;;  %v95_v30 = vpop.f32.mrf.mxu2  ;;  %v100_v31 = vpop.f32.mrf.mxu3 }
  0x96   :  { %v96_v34 = vadd.f32 %v204_v8, %v95_v30  ;;  %v101_v35 = vadd.f32 %v204_v8, %v100_v31 }
  0x97   :  { %179 = vst [vmem:[%s265_s3] sm:$0xff] %v178_v28  }
  0x98   :  { %195 = vst [vmem:[%s265_s3 + $0x8] sm:$0xff] %v183_v29   ;;  %v110_v36 = vmul.f32 %v205_v10, %v96_v34  ;;  %v112_v37 = vmul.f32 %v205_v10, %v101_v35 }
  0x9a   :  { %v118_v40 = vmax.f32 %v96_v34, %v110_v36  ;;  %v120_v41 = vmax.f32 %v101_v35, %v112_v37 }
  0x9c   :  { %v188_v42 = vpack.c.bf16 %v118_v40, %v117_v38  ;;  %v193_v43 = vpack.c.bf16 %v120_v41, %v119_v39 }
  0x9e   :  { %196 = vst [vmem:[%s265_s3 + $0x10] sm:$0xff] %v188_v42  }
  0x9f   :  { %197 = vst [vmem:[%s265_s3 + $0x18] sm:$0xff] %v193_v43  }

// kernel: pspnet_forward.90
= control target key start
LH: loop header
LB: loop body
LE: loop exit
PB: predicated region body
PF: predicated region fallthrough
CT: control target
= control target key end

     0   :  { %vm133_vm0 = vcmask 130048   ;;  %s468_s1 = inlined_call_operand.vmem [shape: bf16[144,128], index: 1, kind: input, shape index: {}]   ;;  %s469_s0 = inlined_call_operand.vmem [shape: bf16[64,144], index: 0, kind: input, shape index: {}]   ;;  %s470_s2 = inlined_call_operand.vmem [shape: f32[4,128], index: 2, kind: input, shape index: {}]   ;;  %s471_s3 = inlined_call_operand.vmem [shape: bf16[64,128], index: 3, kind: output, shape index: {}]  }
   0x1   :  { %v319_v0 = vld [vmem:[%s468_s1 + $0x38] sm:$0xff]  ;;  %v320_v1 = vld [vmem:[%s468_s1 + $0x40] sm:$0xff]  ;;  %v306_v2 = vld [vmem:[%s469_s0 + $0x14] sm:$0xf] }
   0x2   :  { %v244_v3 = vld [vmem:[%s469_s0 + $0x18] sm:$0xf0]  ;;  %146 = vmatpush.bf16.msra.mxu0 %v319_v0  ;;  %344 = vmatpush.bf16.msra.mxu2 %v319_v0  ;;  %v318_v4 = vld [vmem:[%s468_s1 + $0x30] sm:$0xff]  ;;  %v304_v6 = vld [vmem:[%s469_s0 + $0x4] sm:$0xf] }
   0x3   :  { %352 = vmatpush.bf16.msra.mxu3 %v320_v1  ;;  %v247_v5 = vor.u32 %v306_v2, %v244_v3  ;;  %182 = vmatpush.bf16.msra.mxu1 %v320_v1  ;;  %v317_v7 = vld [vmem:[%s468_s1 + $0x28] sm:$0xff]  ;;  %v316_v10 = vld [vmem:[%s468_s1 + $0x20] sm:$0xff]  ;;  %v315_v11 = vld [vmem:[%s468_s1 + $0x18] sm:$0xff] }
   0x4   :  { %v236_v8 = vld [vmem:[%s469_s0 + $0x8] sm:$0xf0]  ;;  %v308_v12 = vld [vmem:[%s469_s0 + $0x24] sm:$0xf]  ;;  %v314_v14 = vld [vmem:[%s468_s1 + $0x10] sm:$0xff] }
   0x5   :  { %v239_v9 = vor.u32 %v304_v6, %v236_v8  ;;  %v252_v13 = vld [vmem:[%s469_s0 + $0x28] sm:$0xf0]  ;;  %v312_v17 = vld [vmem:[%s468_s1] sm:$0xff]  ;;  %v305_v19 = vld [vmem:[%s469_s0 + $0x4] sm:$0xf0] }
   0x6   :  { %147 = vmatpush.bf16.msra.mxu0 %v318_v4  ;;  %345 = vmatpush.bf16.msra.mxu2 %v318_v4  ;;  %v255_v15 = vor.u32 %v308_v12, %v252_v13  ;;  %v313_v16 = vld [vmem:[%s468_s1 + $0x8] sm:$0xff]  ;;  %v234_v18 = vld [vmem:[%s469_s0] sm:$0xf]  ;;  %v310_v24 = vld [vmem:[%s469_s0 + $0x34] sm:$0xf] }
   0x7   :  { %301 = vmatmul.msk.bf16.vlgmr.msra.gmra.mxu3 %vm133_vm0, %v247_v5  ;;  %300 = vmatmul.msk.bf16.vlgmr.msra.gmra.mxu1 %vm133_vm0, %v239_v9  ;;  %v250_v20 = vld [vmem:[%s469_s0 + $0x20] sm:$0xf]  ;;  %v309_v21 = vld [vmem:[%s469_s0 + $0x24] sm:$0xf0]  ;;  %v235_v22 = vor.u32 %v305_v19, %v234_v18  ;;  %v260_v25 = vld [vmem:[%s469_s0 + $0x38] sm:$0xf0] }
   0x8   :  { %v251_v23 = vor.u32 %v309_v21, %v250_v20  ;;  %v263_v26 = vor.u32 %v310_v24, %v260_v25  ;;  %v242_v27 = vld [vmem:[%s469_s0 + $0x10] sm:$0xf]  ;;  %v307_v28 = vld [vmem:[%s469_s0 + $0x14] sm:$0xf0]  ;;  %v353_v37 = vld [vmem:[%s470_s2] ss:$0 sm:$0xff] }
   0x9   :  { %v258_v29 = vld [vmem:[%s469_s0 + $0x30] sm:$0xf]  ;;  %v311_v30 = vld [vmem:[%s469_s0 + $0x34] sm:$0xf0]  ;;  %v243_v31 = vor.u32 %v307_v28, %v242_v27 }
   0xa   :  { %148 = vmatpush.bf16.msra.mxu0 %v317_v7  ;;  %346 = vmatpush.bf16.msra.mxu2 %v317_v7  ;;  %v259_v32 = vor.u32 %v311_v30, %v258_v29 }
   0xe   :  { %149 = vmatpush.bf16.msra.mxu0 %v316_v10  ;;  %347 = vmatpush.bf16.msra.mxu2 %v316_v10 }
  0x12   :  { %150 = vmatpush.bf16.msra.mxu0 %v315_v11  ;;  %348 = vmatpush.bf16.msra.mxu2 %v315_v11 }
  0x16   :  { %151 = vmatpush.bf16.msra.mxu0 %v314_v14  ;;  %349 = vmatpush.bf16.msra.mxu2 %v314_v14 }
  0x17   :  { %302 = vmatmul.msk.bf16.gmra.mxu3 %vm133_vm0, %v255_v15 }
  0x1a   :  { %152 = vmatpush.bf16.msra.mxu0 %v313_v16  ;;  %350 = vmatpush.bf16.msra.mxu2 %v313_v16 }
  0x1e   :  { %153 = vmatpush.bf16.msra.mxu0 %v312_v17  ;;  %351 = vmatpush.bf16.msra.mxu2 %v312_v17 }
  0x21   :  { %154 = vmatmul.bf16.vlgmr.msra.gmra.mxu0 %v235_v22  ;;  %164 = vmatmul.bf16.vlgmr.msra.gmra.mxu2 %v251_v23 }
  0x27   :  { %303 = vmatmul.msk.bf16.gmra.mxu3 %vm133_vm0, %v263_v26 }
  0x31   :  { %159 = vmatmul.bf16.gmra.mxu0 %v243_v31  ;;  %169 = vmatmul.bf16.gmra.mxu2 %v259_v32 }
  0x84   :  { %v184_v35 = vpop.f32.mrf.mxu1 }
  0x8a   :  { %v189_v33 = vpop.f32.mrf.mxu3 }
  0x8c   :  { %v186_v42 = vpop.f32.mrf.mxu1 }
  0x92   :  { %v191_v34 = vpop.f32.mrf.mxu3 }
  0x9a   :  { %v194_v38 = vpop.f32.mrf.mxu3 }
  0x9e   :  { %v155_v36 = vpop.f32.mrf.mxu0 }
  0x9f   :  { %v156_v39 = vadd.f32 %v353_v37, %v155_v36 }
  0xa1   :  { %v185_v43 = vadd.f32 %v184_v35, %v156_v39 }
  0xa2   :  { %v196_v47 = vpop.f32.mrf.mxu3 }
  0xa3   :  { %v204_v48 = vmax.f32 %v185_v43, 0.0 }
  0xa4   :  { %v165_v40 = vpop.f32.mrf.mxu2 }
  0xa5   :  { %v166_v45 = vadd.f32 %v353_v37, %v165_v40 }
  0xa6   :  { %v157_v41 = vpop.f32.mrf.mxu0 }
  0xa7   :  { %v158_v44 = vadd.f32 %v353_v37, %v157_v41  ;;  %v195_v51 = vadd.f32 %v194_v38, %v166_v45 }
  0xa9   :  { %v187_v46 = vadd.f32 %v186_v42, %v158_v44  ;;  %v208_v56 = vmax.f32 %v195_v51, 0.0 }
  0xaa   :  { %v199_v60 = vpop.f32.mrf.mxu3 }
  0xab   :  { %v205_v49 = vmax.f32 %v187_v46, 0.0 }
  0xac   :  { %v167_v50 = vpop.f32.mrf.mxu2 }
  0xad   :  { %v324_v52 = vpack.c.bf16 %v205_v49, %v204_v48  ;;  %v168_v53 = vadd.f32 %v353_v37, %v167_v50 }
  0xae   :  { %v160_v54 = vpop.f32.mrf.mxu0 }
  0xaf   :  { %325 = vst [vmem:[%s471_s3] sm:$0xff] %v324_v52   ;;  %v197_v55 = vadd.f32 %v196_v47, %v168_v53  ;;  %v161_v59 = vadd.f32 %v353_v37, %v160_v54 }
  0xb1   :  { %v209_v57 = vmax.f32 %v197_v55, 0.0  ;;  %v190_v63 = vadd.f32 %v189_v33, %v161_v59 }
  0xb2   :  { %v201_v9 = vpop.f32.mrf.mxu3 }
  0xb3   :  { %v334_v58 = vpack.c.bf16 %v209_v57, %v208_v56  ;;  %v206_v3 = vmax.f32 %v190_v63, 0.0 }
  0xb4   :  { %v170_v61 = vpop.f32.mrf.mxu2 }
  0xb5   :  { %342 = vst [vmem:[%s471_s3 + $0x10] sm:$0xff] %v334_v58   ;;  %v171_v1 = vadd.f32 %v353_v37, %v170_v61 }
  0xb6   :  { %v162_v62 = vpop.f32.mrf.mxu0 }
  0xb7   :  { %v163_v0 = vadd.f32 %v353_v37, %v162_v62  ;;  %v200_v6 = vadd.f32 %v199_v60, %v171_v1 }
  0xb9   :  { %v192_v2 = vadd.f32 %v191_v34, %v163_v0  ;;  %v210_v11 = vmax.f32 %v200_v6, 0.0 }
  0xbb   :  { %v207_v4 = vmax.f32 %v192_v2, 0.0 }
  0xbc   :  { %v172_v5 = vpop.f32.mrf.mxu2 }
  0xbd   :  { %v329_v7 = vpack.c.bf16 %v207_v4, %v206_v3  ;;  %v173_v8 = vadd.f32 %v353_v37, %v172_v5 }
  0xbf   :  { %341 = vst [vmem:[%s471_s3 + $0x8] sm:$0xff] %v329_v7   ;;  %v202_v10 = vadd.f32 %v201_v9, %v173_v8 }
  0xc1   :  { %v211_v12 = vmax.f32 %v202_v10, 0.0 }
  0xc3   :  { %v339_v13 = vpack.c.bf16 %v211_v12, %v210_v11 }
  0xc5   :  { %343 = vst [vmem:[%s471_s3 + $0x18] sm:$0xff] %v339_v13  }

// kernel: pspnet_forward.91
= control target key start
LH: loop header
LB: loop body
LE: loop exit
PB: predicated region body
PF: predicated region fallthrough
CT: control target
= control target key end

     0   :  { %vm56_vm0 = vcmask 130048   ;;  %s292_s1 = inlined_call_operand.vmem [shape: bf16[16,128], index: 1, kind: input, shape index: {}]   ;;  %s293_s0 = inlined_call_operand.vmem [shape: bf16[64,16], index: 0, kind: input, shape index: {}]   ;;  %s294_s2 = inlined_call_operand.vmem [shape: f32[4,128], index: 2, kind: input, shape index: {}]   ;;  %s295_s3 = inlined_call_operand.vmem [shape: bf16[64,128], index: 3, kind: input, shape index: {}]   ;;  %s296_s4 = inlined_call_operand.vmem [shape: bf16[64,128], index: 4, kind: output, shape index: {}]  }
   0x1   :  { %v178_v0 = vld [vmem:[%s292_s1] sm:$0xff]  ;;  %v175_v2 = vld [vmem:[%s293_s0 + $0x8] sm:$0xff]  ;;  %v176_v3 = vld [vmem:[%s293_s0 + $0x10] sm:$0xff] }
   0x2   :  { %v174_v1 = vld [vmem:[%s293_s0] sm:$0xff]  ;;  %76 = vmatpush.bf16.msra.mxu0 %v178_v0  ;;  %221 = vmatpush.bf16.msra.mxu1 %v178_v0  ;;  %v177_v4 = vld [vmem:[%s293_s0 + $0x18] sm:$0xff]  ;;  %v215_v9 = vld [vmem:[%s295_s3 + $0x8] sm:$0xff]  }
   0x3   :  { %222 = vmatpush.bf16.msra.mxu2 %v178_v0  ;;  %223 = vmatpush.bf16.msra.mxu3 %v178_v0  ;;  %v224_v7 = vld [vmem:[%s294_s2] ss:$0 sm:$0xff]  ;;  %v185_v13 = vunpack.c.l.bf16 %v215_v9  ;;  %v186_v17 = vunpack.c.h.bf16 %v215_v9  ;;  %v216_v22 = vld [vmem:[%s295_s3 + $0x10] sm:$0xff]   ;;  %v217_v23 = vld [vmem:[%s295_s3 + $0x18] sm:$0xff]  }
   0x4   :  { %v180_v8 = vld [vmem:[%s295_s3] sm:$0xff]   ;;  %v189_v29 = vunpack.c.l.bf16 %v216_v22  ;;  %v193_v31 = vunpack.c.l.bf16 %v217_v23  ;;  %v190_v36 = vunpack.c.h.bf16 %v216_v22  ;;  %v194_v37 = vunpack.c.h.bf16 %v217_v23 }
   0x5   :  { %170 = vmatmul.msk.bf16.vlgmr.msra.gmra.mxu0 %vm56_vm0, %v174_v1  ;;  %171 = vmatmul.msk.bf16.vlgmr.msra.gmra.mxu1 %vm56_vm0, %v175_v2  ;;  %v181_v11 = vunpack.c.l.bf16 %v180_v8  ;;  %v182_v16 = vunpack.c.h.bf16 %v180_v8 }
   0x6   :  { %172 = vmatmul.msk.bf16.vlgmr.msra.gmra.mxu2 %vm56_vm0, %v176_v3  ;;  %173 = vmatmul.msk.bf16.vlgmr.msra.gmra.mxu3 %vm56_vm0, %v177_v4 }
  0x82   :  { %v78_v5 = vpop.f32.mrf.mxu0  ;;  %v83_v6 = vpop.f32.mrf.mxu1 }
  0x83   :  { %v79_v10 = vadd.f32 %v224_v7, %v78_v5  ;;  %v84_v12 = vadd.f32 %v224_v7, %v83_v6 }
  0x85   :  { %v114_v20 = vadd.f32 %v181_v11, %v79_v10  ;;  %v116_v21 = vadd.f32 %v185_v13, %v84_v12 }
  0x87   :  { %v122_v32 = vmax.f32 %v114_v20, 0.0  ;;  %v124_v33 = vmax.f32 %v116_v21, 0.0 }
  0x89   :  { %v88_v14 = vpop.f32.mrf.mxu2  ;;  %v93_v15 = vpop.f32.mrf.mxu3 }
  0x8a   :  { %v80_v18 = vpop.f32.mrf.mxu0  ;;  %v85_v19 = vpop.f32.mrf.mxu1  ;;  %v89_v28 = vadd.f32 %v224_v7, %v88_v14  ;;  %v94_v30 = vadd.f32 %v224_v7, %v93_v15 }
  0x8b   :  { %v81_v24 = vadd.f32 %v224_v7, %v80_v18  ;;  %v86_v25 = vadd.f32 %v224_v7, %v85_v19 }
  0x8c   :  { %v118_v42 = vadd.f32 %v189_v29, %v89_v28  ;;  %v120_v43 = vadd.f32 %v193_v31, %v94_v30 }
  0x8d   :  { %v115_v26 = vadd.f32 %v182_v16, %v81_v24  ;;  %v117_v27 = vadd.f32 %v186_v17, %v86_v25 }
  0x8e   :  { %v126_v48 = vmax.f32 %v118_v42, 0.0  ;;  %v128_v49 = vmax.f32 %v120_v43, 0.0 }
  0x8f   :  { %v123_v34 = vmax.f32 %v115_v26, 0.0  ;;  %v125_v35 = vmax.f32 %v117_v27, 0.0 }
  0x91   :  { %v198_v38 = vpack.c.bf16 %v123_v34, %v122_v32  ;;  %v203_v39 = vpack.c.bf16 %v125_v35, %v124_v33  ;;  %v90_v40 = vpop.f32.mrf.mxu2  ;;  %v95_v41 = vpop.f32.mrf.mxu3 }
  0x92   :  { %v91_v44 = vadd.f32 %v224_v7, %v90_v40  ;;  %v96_v45 = vadd.f32 %v224_v7, %v95_v41 }
  0x93   :  { %199 = vst [vmem:[%s296_s4] sm:$0xff] %v198_v38  }
  0x94   :  { %218 = vst [vmem:[%s296_s4 + $0x8] sm:$0xff] %v203_v39   ;;  %v119_v46 = vadd.f32 %v190_v36, %v91_v44  ;;  %v121_v47 = vadd.f32 %v194_v37, %v96_v45 }
  0x96   :  { %v127_v50 = vmax.f32 %v119_v46, 0.0  ;;  %v129_v51 = vmax.f32 %v121_v47, 0.0 }
  0x98   :  { %v208_v52 = vpack.c.bf16 %v127_v50, %v126_v48  ;;  %v213_v53 = vpack.c.bf16 %v129_v51, %v128_v49 }
  0x9a   :  { %219 = vst [vmem:[%s296_s4 + $0x10] sm:$0xff] %v208_v52  }
  0x9b   :  { %220 = vst [vmem:[%s296_s4 + $0x18] sm:$0xff] %v213_v53  }

// kernel: pspnet_forward.92
= control target key start
LH: loop header
LB: loop body
LE: loop exit
PB: predicated region body
PF: predicated region fallthrough
CT: control target
= control target key end

     0   :  { %vm77_vm0 = vcmask 523264   ;;  %s286_s1 = inlined_call_operand.vmem [shape: bf16[64,128], index: 1, kind: input, shape index: {}]   ;;  %s287_s2 = inlined_call_operand.vmem [shape: f32[4,128], index: 2, kind: input, shape index: {}]   ;;  %s288_s0 = inlined_call_operand.vmem [shape: bf16[64,64], index: 0, kind: input, shape index: {}]   ;;  %s289_s3 = inlined_call_operand.vmem [shape: bf16[64,128], index: 3, kind: output, shape index: {}]  }
   0x1   :  { %v190_v0 = vld [vmem:[%s286_s1 + $0x18] sm:$0xff]  ;;  %v189_v1 = vld [vmem:[%s286_s1 + $0x10] sm:$0xff]  ;;  %v188_v2 = vld [vmem:[%s286_s1 + $0x8] sm:$0xff] }
   0x2   :  { %94 = vmatpush.bf16.msra.mxu0 %v190_v0  ;;  %214 = vmatpush.bf16.msra.mxu1 %v190_v0  ;;  %v187_v3 = vld [vmem:[%s286_s1] sm:$0xff]  ;;  %v184_v5 = vld [vmem:[%s288_s0 + $0x8] sm:$0xff]  ;;  %v185_v6 = vld [vmem:[%s288_s0 + $0x10] sm:$0xff] }
   0x3   :  { %215 = vmatpush.bf16.msra.mxu2 %v190_v0  ;;  %216 = vmatpush.bf16.msra.mxu3 %v190_v0  ;;  %v183_v4 = vld [vmem:[%s288_s0] sm:$0xff]  ;;  %v186_v7 = vld [vmem:[%s288_s0 + $0x18] sm:$0xff] }
   0x4   :  { %v226_v10 = vld [vmem:[%s287_s2] ss:$0 sm:$0xff] }
   0x6   :  { %95 = vmatpush.bf16.msra.mxu0 %v189_v1  ;;  %217 = vmatpush.bf16.msra.mxu1 %v189_v1 }
   0x7   :  { %218 = vmatpush.bf16.msra.mxu2 %v189_v1  ;;  %219 = vmatpush.bf16.msra.mxu3 %v189_v1 }
   0xa   :  { %96 = vmatpush.bf16.msra.mxu0 %v188_v2  ;;  %220 = vmatpush.bf16.msra.mxu1 %v188_v2 }
   0xb   :  { %221 = vmatpush.bf16.msra.mxu2 %v188_v2  ;;  %222 = vmatpush.bf16.msra.mxu3 %v188_v2 }
   0xe   :  { %97 = vmatpush.bf16.msra.mxu0 %v187_v3  ;;  %223 = vmatpush.bf16.msra.mxu1 %v187_v3 }
   0xf   :  { %224 = vmatpush.bf16.msra.mxu2 %v187_v3  ;;  %225 = vmatpush.bf16.msra.mxu3 %v187_v3 }
  0x11   :  { %179 = vmatmul.msk.bf16.vlgmr.msra.gmra.mxu0 %vm77_vm0, %v183_v4  ;;  %180 = vmatmul.msk.bf16.vlgmr.msra.gmra.mxu1 %vm77_vm0, %v184_v5 }
  0x12   :  { %181 = vmatmul.msk.bf16.vlgmr.msra.gmra.mxu2 %vm77_vm0, %v185_v6  ;;  %182 = vmatmul.msk.bf16.vlgmr.msra.gmra.mxu3 %vm77_vm0, %v186_v7 }
  0x8e   :  { %v99_v8 = vpop.f32.mrf.mxu0  ;;  %v104_v9 = vpop.f32.mrf.mxu1 }
  0x8f   :  { %v100_v11 = vadd.f32 %v226_v10, %v99_v8  ;;  %v105_v12 = vadd.f32 %v226_v10, %v104_v9 }
  0x91   :  { %v119_v19 = vmax.f32 %v100_v11, 0.0  ;;  %v121_v20 = vmax.f32 %v105_v12, 0.0 }
  0x95   :  { %v109_v13 = vpop.f32.mrf.mxu2  ;;  %v114_v14 = vpop.f32.mrf.mxu3 }
  0x96   :  { %v101_v15 = vpop.f32.mrf.mxu0  ;;  %v106_v16 = vpop.f32.mrf.mxu1  ;;  %v110_v25 = vadd.f32 %v226_v10, %v109_v13  ;;  %v115_v26 = vadd.f32 %v226_v10, %v114_v14 }
  0x97   :  { %v102_v17 = vadd.f32 %v226_v10, %v101_v15  ;;  %v107_v18 = vadd.f32 %v226_v10, %v106_v16 }
  0x98   :  { %v123_v31 = vmax.f32 %v110_v25, 0.0  ;;  %v125_v32 = vmax.f32 %v115_v26, 0.0 }
  0x99   :  { %v120_v21 = vmax.f32 %v102_v17, 0.0  ;;  %v122_v22 = vmax.f32 %v107_v18, 0.0 }
  0x9b   :  { %v194_v23 = vpack.c.bf16 %v120_v21, %v119_v19  ;;  %v199_v24 = vpack.c.bf16 %v122_v22, %v121_v20 }
  0x9d   :  { %195 = vst [vmem:[%s289_s3] sm:$0xff] %v194_v23   ;;  %v111_v27 = vpop.f32.mrf.mxu2  ;;  %v116_v28 = vpop.f32.mrf.mxu3 }
  0x9e   :  { %211 = vst [vmem:[%s289_s3 + $0x8] sm:$0xff] %v199_v24   ;;  %v112_v29 = vadd.f32 %v226_v10, %v111_v27  ;;  %v117_v30 = vadd.f32 %v226_v10, %v116_v28 }
  0xa0   :  { %v124_v33 = vmax.f32 %v112_v29, 0.0  ;;  %v126_v34 = vmax.f32 %v117_v30, 0.0 }
  0xa2   :  { %v204_v35 = vpack.c.bf16 %v124_v33, %v123_v31  ;;  %v209_v36 = vpack.c.bf16 %v126_v34, %v125_v32 }
  0xa4   :  { %212 = vst [vmem:[%s289_s3 + $0x10] sm:$0xff] %v204_v35  }
  0xa5   :  { %213 = vst [vmem:[%s289_s3 + $0x18] sm:$0xff] %v209_v36  }

// kernel: pspnet_forward.107
= control target key start
LH: loop header
LB: loop body
LE: loop exit
PB: predicated region body
PF: predicated region fallthrough
CT: control target
= control target key end

     0   :  { %vm97_vm0 = vcmask 523264   ;;  %s454_s1 = inlined_call_operand.vmem [shape: bf16[64,256], index: 1, kind: input, shape index: {}]   ;;  %s455_s0 = inlined_call_operand.vmem [shape: bf16[64,64], index: 0, kind: input, shape index: {}]   ;;  %s456_s2 = inlined_call_operand.vmem [shape: f32[4,256], index: 2, kind: input, shape index: {}]   ;;  %s457_s3 = inlined_call_operand.vmem [shape: bf16[64,256], index: 3, kind: output, shape index: {}]  }
   0x1   :  { %v269_v0 = vld [vmem:[%s454_s1 + $0x30] sm:$0xf]  ;;  %v295_v1 = vld [vmem:[%s454_s1 + $0x34] sm:$0xf0]  ;;  %v294_v2 = vld [vmem:[%s454_s1 + $0x34] sm:$0xf] }
   0x2   :  { %v270_v3 = vor.u32 %v295_v1, %v269_v0  ;;  %v271_v4 = vld [vmem:[%s454_s1 + $0x38] sm:$0xf0]  ;;  %v261_v5 = vld [vmem:[%s454_s1 + $0x20] sm:$0xf]  ;;  %v293_v6 = vld [vmem:[%s454_s1 + $0x24] sm:$0xf0] }
   0x3   :  { %v274_v7 = vor.u32 %v294_v2, %v271_v4  ;;  %v292_v8 = vld [vmem:[%s454_s1 + $0x24] sm:$0xf]  ;;  %v263_v9 = vld [vmem:[%s454_s1 + $0x28] sm:$0xf0]  ;;  %v262_v10 = vor.u32 %v293_v6, %v261_v5  ;;  %v253_v12 = vld [vmem:[%s454_s1 + $0x10] sm:$0xf] }
   0x4   :  { %114 = vmatpush.bf16.msra.mxu0 %v270_v3  ;;  %296 = vmatpush.bf16.msra.mxu2 %v270_v3  ;;  %v266_v11 = vor.u32 %v292_v8, %v263_v9  ;;  %v291_v13 = vld [vmem:[%s454_s1 + $0x14] sm:$0xf0]  ;;  %v290_v14 = vld [vmem:[%s454_s1 + $0x14] sm:$0xf]  ;;  %v255_v15 = vld [vmem:[%s454_s1 + $0x18] sm:$0xf0] }
   0x5   :  { %143 = vmatpush.bf16.msra.mxu1 %v274_v7  ;;  %300 = vmatpush.bf16.msra.mxu3 %v274_v7  ;;  %v254_v16 = vor.u32 %v291_v13, %v253_v12  ;;  %v258_v17 = vor.u32 %v290_v14, %v255_v15  ;;  %v245_v18 = vld [vmem:[%s454_s1] sm:$0xf]  ;;  %v289_v19 = vld [vmem:[%s454_s1 + $0x4] sm:$0xf0]  ;;  %v288_v20 = vld [vmem:[%s454_s1 + $0x4] sm:$0xf] }
   0x6   :  { %v247_v21 = vld [vmem:[%s454_s1 + $0x8] sm:$0xf0]  ;;  %v246_v22 = vor.u32 %v289_v19, %v245_v18  ;;  %v284_v24 = vld [vmem:[%s455_s0] sm:$0xff]  ;;  %v286_v25 = vld [vmem:[%s455_s0 + $0x10] sm:$0xff] }
   0x7   :  { %v250_v23 = vor.u32 %v288_v20, %v247_v21  ;;  %v285_v26 = vld [vmem:[%s455_s0 + $0x8] sm:$0xff]  ;;  %v287_v27 = vld [vmem:[%s455_s0 + $0x18] sm:$0xff]  ;;  %v31_v28 = vld [vmem:[%s456_s2] ss:$4 sm:$0x3] }
   0x8   :  { %115 = vmatpush.bf16.msra.mxu0 %v262_v10  ;;  %297 = vmatpush.bf16.msra.mxu2 %v262_v10  ;;  %v283_v29 = vld [vmem:[%s456_s2 + $0x1] ss:$4 sm:$0x3]  ;;  %v390_v30 = vperm.slane %v31_v28, 0  ;;  %v392_v31 = vperm.slane %v31_v28, 1 }
   0x9   :  { %144 = vmatpush.bf16.msra.mxu1 %v266_v11  ;;  %301 = vmatpush.bf16.msra.mxu3 %v266_v11  ;;  %v394_v32 = vperm.slane %v283_v29, 0  ;;  %v396_v34 = vperm.slane %v283_v29, 1 }
   0xc   :  { %116 = vmatpush.bf16.msra.mxu0 %v254_v16  ;;  %298 = vmatpush.bf16.msra.mxu2 %v254_v16 }
   0xd   :  { %145 = vmatpush.bf16.msra.mxu1 %v258_v17  ;;  %302 = vmatpush.bf16.msra.mxu3 %v258_v17 }
  0x10   :  { %117 = vmatpush.bf16.msra.mxu0 %v246_v22  ;;  %299 = vmatpush.bf16.msra.mxu2 %v246_v22 }
  0x11   :  { %146 = vmatpush.bf16.msra.mxu1 %v250_v23  ;;  %303 = vmatpush.bf16.msra.mxu3 %v250_v23 }
  0x13   :  { %275 = vmatmul.msk.bf16.vlgmr.msra.gmra.mxu0 %vm97_vm0, %v284_v24  ;;  %277 = vmatmul.msk.bf16.vlgmr.msra.gmra.mxu2 %vm97_vm0, %v286_v25 }
  0x14   :  { %279 = vmatmul.msk.bf16.vlgmr.msra.gmra.mxu1 %vm97_vm0, %v284_v24  ;;  %281 = vmatmul.msk.bf16.vlgmr.msra.gmra.mxu3 %vm97_vm0, %v286_v25 }
  0x23   :  { %276 = vmatmul.msk.bf16.gmra.mxu0 %vm97_vm0, %v285_v26  ;;  %278 = vmatmul.msk.bf16.gmra.mxu2 %vm97_vm0, %v287_v27 }
  0x24   :  { %280 = vmatmul.msk.bf16.gmra.mxu1 %vm97_vm0, %v285_v26  ;;  %282 = vmatmul.msk.bf16.gmra.mxu3 %vm97_vm0, %v287_v27 }
  0x90   :  { %v119_v33 = vpop.f32.mrf.mxu0 }
  0x91   :  { %v120_v35 = vadd.f32 %v119_v33, %v390_v30  ;;  %v148_v36 = vpop.f32.mrf.mxu1 }
  0x92   :  { %v149_v37 = vadd.f32 %v148_v36, %v392_v31 }
  0x93   :  { %v175_v38 = vmul.f32 %v394_v32, %v120_v35 }
  0x94   :  { %v176_v39 = vmul.f32 %v396_v34, %v149_v37 }
  0x95   :  { %v191_v40 = vmax.f32 %v120_v35, %v175_v38 }
  0x96   :  { %v192_v41 = vmax.f32 %v149_v37, %v176_v39  ;;  %v129_v42 = vpop.f32.mrf.mxu2 }
  0x97   :  { %v130_v43 = vadd.f32 %v129_v42, %v390_v30  ;;  %v158_v44 = vpop.f32.mrf.mxu3 }
  0x98   :  { %v207_v45 = vpack.c.bf16 %v192_v41, %v191_v40  ;;  %v159_v46 = vadd.f32 %v158_v44, %v392_v31  ;;  %v121_v47 = vpop.f32.mrf.mxu0 }
  0x99   :  { %v183_v48 = vmul.f32 %v394_v32, %v130_v43  ;;  %v122_v49 = vadd.f32 %v121_v47, %v390_v30  ;;  %v150_v50 = vpop.f32.mrf.mxu1 }
  0x9a   :  { %215 = vst [vmem:[%s457_s3] sm:$0xff] %v207_v45  ;;  %v184_v51 = vmul.f32 %v396_v34, %v159_v46  ;;  %v151_v52 = vadd.f32 %v150_v50, %v392_v31 }
  0x9b   :  { %v199_v53 = vmax.f32 %v130_v43, %v183_v48  ;;  %v177_v54 = vmul.f32 %v394_v32, %v122_v49 }
  0x9c   :  { %v200_v55 = vmax.f32 %v159_v46, %v184_v51  ;;  %v178_v56 = vmul.f32 %v396_v34, %v151_v52 }
  0x9d   :  { %v193_v57 = vmax.f32 %v122_v49, %v177_v54 }
  0x9e   :  { %v211_v58 = vpack.c.bf16 %v200_v55, %v199_v53  ;;  %v194_v59 = vmax.f32 %v151_v52, %v178_v56  ;;  %v131_v60 = vpop.f32.mrf.mxu2 }
  0x9f   :  { %v132_v61 = vadd.f32 %v131_v60, %v390_v30  ;;  %v160_v62 = vpop.f32.mrf.mxu3 }
  0xa0   :  { %219 = vst [vmem:[%s457_s3 + $0x20] sm:$0xff] %v211_v58  ;;  %v208_v63 = vpack.c.bf16 %v194_v59, %v193_v57  ;;  %v161_v0 = vadd.f32 %v160_v62, %v392_v31  ;;  %v124_v1 = vpop.f32.mrf.mxu0 }
  0xa1   :  { %v185_v2 = vmul.f32 %v394_v32, %v132_v61  ;;  %v125_v3 = vadd.f32 %v124_v1, %v390_v30  ;;  %v153_v4 = vpop.f32.mrf.mxu1 }
  0xa2   :  { %216 = vst [vmem:[%s457_s3 + $0x8] sm:$0xff] %v208_v63  ;;  %v186_v5 = vmul.f32 %v396_v34, %v161_v0  ;;  %v154_v6 = vadd.f32 %v153_v4, %v392_v31 }
  0xa3   :  { %v201_v7 = vmax.f32 %v132_v61, %v185_v2  ;;  %v179_v8 = vmul.f32 %v394_v32, %v125_v3 }
  0xa4   :  { %v202_v9 = vmax.f32 %v161_v0, %v186_v5  ;;  %v180_v10 = vmul.f32 %v396_v34, %v154_v6 }
  0xa5   :  { %v195_v11 = vmax.f32 %v125_v3, %v179_v8 }
  0xa6   :  { %v212_v12 = vpack.c.bf16 %v202_v9, %v201_v7  ;;  %v196_v13 = vmax.f32 %v154_v6, %v180_v10  ;;  %v134_v14 = vpop.f32.mrf.mxu2 }
  0xa7   :  { %v135_v15 = vadd.f32 %v134_v14, %v390_v30  ;;  %v163_v16 = vpop.f32.mrf.mxu3 }
  0xa8   :  { %220 = vst [vmem:[%s457_s3 + $0x28] sm:$0xff] %v212_v12  ;;  %v209_v17 = vpack.c.bf16 %v196_v13, %v195_v11  ;;  %v164_v18 = vadd.f32 %v163_v16, %v392_v31  ;;  %v126_v19 = vpop.f32.mrf.mxu0 }
  0xa9   :  { %v187_v20 = vmul.f32 %v394_v32, %v135_v15  ;;  %v127_v21 = vadd.f32 %v126_v19, %v390_v30  ;;  %v155_v22 = vpop.f32.mrf.mxu1 }
  0xaa   :  { %217 = vst [vmem:[%s457_s3 + $0x10] sm:$0xff] %v209_v17  ;;  %v188_v23 = vmul.f32 %v396_v34, %v164_v18  ;;  %v156_v24 = vadd.f32 %v155_v22, %v392_v31 }
  0xab   :  { %v203_v25 = vmax.f32 %v135_v15, %v187_v20  ;;  %v181_v26 = vmul.f32 %v394_v32, %v127_v21 }
  0xac   :  { %v204_v27 = vmax.f32 %v164_v18, %v188_v23  ;;  %v182_v28 = vmul.f32 %v396_v34, %v156_v24 }
  0xad   :  { %v197_v29 = vmax.f32 %v127_v21, %v181_v26 }
  0xae   :  { %v213_v33 = vpack.c.bf16 %v204_v27, %v203_v25  ;;  %v198_v35 = vmax.f32 %v156_v24, %v182_v28  ;;  %v136_v36 = vpop.f32.mrf.mxu2 }
  0xaf   :  { %v137_v37 = vadd.f32 %v136_v36, %v390_v30  ;;  %v165_v38 = vpop.f32.mrf.mxu3 }
  0xb0   :  { %221 = vst [vmem:[%s457_s3 + $0x30] sm:$0xff] %v213_v33  ;;  %v210_v39 = vpack.c.bf16 %v198_v35, %v197_v29  ;;  %v166_v40 = vadd.f32 %v165_v38, %v392_v31 }
  0xb1   :  { %v189_v41 = vmul.f32 %v394_v32, %v137_v37 }
  0xb2   :  { %218 = vst [vmem:[%s457_s3 + $0x18] sm:$0xff] %v210_v39  ;;  %v190_v42 = vmul.f32 %v396_v34, %v166_v40 }
  0xb3   :  { %v205_v43 = vmax.f32 %v137_v37, %v189_v41 }
  0xb4   :  { %v206_v44 = vmax.f32 %v166_v40, %v190_v42 }
  0xb6   :  { %v214_v45 = vpack.c.bf16 %v206_v44, %v205_v43 }
  0xb8   :  { %222 = vst [vmem:[%s457_s3 + $0x38] sm:$0xff] %v214_v45 }

// kernel: pspnet_forward.109
= control target key start
LH: loop header
LB: loop body
LE: loop exit
PB: predicated region body
PF: predicated region fallthrough
CT: control target
= control target key end

     0   :  { %vm64_vm0 = vcmask 261120   ;;  %s311_s1 = inlined_call_operand.vmem [shape: bf16[32,128], index: 1, kind: input, shape index: {}]   ;;  %s312_s2 = inlined_call_operand.vmem [shape: f32[4,128], index: 2, kind: input, shape index: {}]   ;;  %s313_s0 = inlined_call_operand.vmem [shape: bf16[64,32], index: 0, kind: input, shape index: {}]   ;;  %s314_s3 = inlined_call_operand.vmem [shape: bf16[64,128], index: 3, kind: input, shape index: {}]   ;;  %s315_s4 = inlined_call_operand.vmem [shape: bf16[64,128], index: 4, kind: output, shape index: {}]  }
   0x1   :  { %v191_v0 = vld [vmem:[%s311_s1 + $0x8] sm:$0xff]  ;;  %v190_v1 = vld [vmem:[%s311_s1] sm:$0xff]  ;;  %v188_v4 = vld [vmem:[%s313_s0 + $0x10] sm:$0xff] }
   0x2   :  { %83 = vmatpush.bf16.msra.mxu0 %v191_v0  ;;  %234 = vmatpush.bf16.msra.mxu1 %v191_v0  ;;  %v186_v2 = vld [vmem:[%s313_s0] sm:$0xff]  ;;  %v187_v3 = vld [vmem:[%s313_s0 + $0x8] sm:$0xff]  ;;  %v189_v5 = vld [vmem:[%s313_s0 + $0x18] sm:$0xff] }
   0x3   :  { %235 = vmatpush.bf16.msra.mxu2 %v191_v0  ;;  %236 = vmatpush.bf16.msra.mxu3 %v191_v0  ;;  %v240_v8 = vld [vmem:[%s312_s2] ss:$0 sm:$0xff]  ;;  %v228_v10 = vld [vmem:[%s314_s3 + $0x8] sm:$0xff]   ;;  %v229_v23 = vld [vmem:[%s314_s3 + $0x10] sm:$0xff]  }
   0x4   :  { %v193_v9 = vld [vmem:[%s314_s3] sm:$0xff]   ;;  %v198_v14 = vunpack.c.l.bf16 %v228_v10  ;;  %v199_v18 = vunpack.c.h.bf16 %v228_v10  ;;  %v230_v24 = vld [vmem:[%s314_s3 + $0x18] sm:$0xff]   ;;  %v202_v30 = vunpack.c.l.bf16 %v229_v23  ;;  %v203_v37 = vunpack.c.h.bf16 %v229_v23 }
   0x5   :  { %v194_v12 = vunpack.c.l.bf16 %v193_v9  ;;  %v195_v17 = vunpack.c.h.bf16 %v193_v9  ;;  %v206_v32 = vunpack.c.l.bf16 %v230_v24  ;;  %v207_v38 = vunpack.c.h.bf16 %v230_v24 }
   0x6   :  { %84 = vmatpush.bf16.msra.mxu0 %v190_v1  ;;  %237 = vmatpush.bf16.msra.mxu1 %v190_v1 }
   0x7   :  { %238 = vmatpush.bf16.msra.mxu2 %v190_v1  ;;  %239 = vmatpush.bf16.msra.mxu3 %v190_v1 }
   0x9   :  { %182 = vmatmul.msk.bf16.vlgmr.msra.gmra.mxu0 %vm64_vm0, %v186_v2  ;;  %183 = vmatmul.msk.bf16.vlgmr.msra.gmra.mxu1 %vm64_vm0, %v187_v3 }
   0xa   :  { %184 = vmatmul.msk.bf16.vlgmr.msra.gmra.mxu2 %vm64_vm0, %v188_v4  ;;  %185 = vmatmul.msk.bf16.vlgmr.msra.gmra.mxu3 %vm64_vm0, %v189_v5 }
  0x86   :  { %v86_v6 = vpop.f32.mrf.mxu0  ;;  %v91_v7 = vpop.f32.mrf.mxu1 }
  0x87   :  { %v87_v11 = vadd.f32 %v240_v8, %v86_v6  ;;  %v92_v13 = vadd.f32 %v240_v8, %v91_v7 }
  0x89   :  { %v122_v21 = vadd.f32 %v194_v12, %v87_v11  ;;  %v124_v22 = vadd.f32 %v198_v14, %v92_v13 }
  0x8b   :  { %v130_v33 = vmax.f32 %v122_v21, 0.0  ;;  %v132_v34 = vmax.f32 %v124_v22, 0.0 }
  0x8d   :  { %v96_v15 = vpop.f32.mrf.mxu2  ;;  %v101_v16 = vpop.f32.mrf.mxu3 }
  0x8e   :  { %v88_v19 = vpop.f32.mrf.mxu0  ;;  %v93_v20 = vpop.f32.mrf.mxu1  ;;  %v97_v29 = vadd.f32 %v240_v8, %v96_v15  ;;  %v102_v31 = vadd.f32 %v240_v8, %v101_v16 }
  0x8f   :  { %v89_v25 = vadd.f32 %v240_v8, %v88_v19  ;;  %v94_v26 = vadd.f32 %v240_v8, %v93_v20 }
  0x90   :  { %v126_v43 = vadd.f32 %v202_v30, %v97_v29  ;;  %v128_v44 = vadd.f32 %v206_v32, %v102_v31 }
  0x91   :  { %v123_v27 = vadd.f32 %v195_v17, %v89_v25  ;;  %v125_v28 = vadd.f32 %v199_v18, %v94_v26 }
  0x92   :  { %v134_v49 = vmax.f32 %v126_v43, 0.0  ;;  %v136_v50 = vmax.f32 %v128_v44, 0.0 }
  0x93   :  { %v131_v35 = vmax.f32 %v123_v27, 0.0  ;;  %v133_v36 = vmax.f32 %v125_v28, 0.0 }
  0x95   :  { %v211_v39 = vpack.c.bf16 %v131_v35, %v130_v33  ;;  %v216_v40 = vpack.c.bf16 %v133_v36, %v132_v34  ;;  %v98_v41 = vpop.f32.mrf.mxu2  ;;  %v103_v42 = vpop.f32.mrf.mxu3 }
  0x96   :  { %v99_v45 = vadd.f32 %v240_v8, %v98_v41  ;;  %v104_v46 = vadd.f32 %v240_v8, %v103_v42 }
  0x97   :  { %212 = vst [vmem:[%s315_s4] sm:$0xff] %v211_v39  }
  0x98   :  { %231 = vst [vmem:[%s315_s4 + $0x8] sm:$0xff] %v216_v40   ;;  %v127_v47 = vadd.f32 %v203_v37, %v99_v45  ;;  %v129_v48 = vadd.f32 %v207_v38, %v104_v46 }
  0x9a   :  { %v135_v51 = vmax.f32 %v127_v47, 0.0  ;;  %v137_v52 = vmax.f32 %v129_v48, 0.0 }
  0x9c   :  { %v221_v53 = vpack.c.bf16 %v135_v51, %v134_v49  ;;  %v226_v54 = vpack.c.bf16 %v137_v52, %v136_v50 }
  0x9e   :  { %232 = vst [vmem:[%s315_s4 + $0x10] sm:$0xff] %v221_v53  }
  0x9f   :  { %233 = vst [vmem:[%s315_s4 + $0x18] sm:$0xff] %v226_v54  }

// kernel: pspnet_forward.108
= control target key start
LH: loop header
LB: loop body
LE: loop exit
PB: predicated region body
PF: predicated region fallthrough
CT: control target
= control target key end

     0   :  { %vm237_vm0 = vcmask 261120   ;;  %s724_s1 = inlined_call_operand.vmem [shape: bf16[288,128], index: 1, kind: input, shape index: {}]   ;;  %s725_s0 = inlined_call_operand.vmem [shape: bf16[64,288], index: 0, kind: input, shape index: {}]   ;;  %s726_s2 = inlined_call_operand.vmem [shape: f32[4,128], index: 2, kind: input, shape index: {}]   ;;  %s727_s3 = inlined_call_operand.vmem [shape: bf16[64,128], index: 3, kind: output, shape index: {}]  }
   0x1   :  { %v508_v0 = vld [vmem:[%s724_s1 + $0x38] sm:$0xff]  ;;  %v518_v2 = vld [vmem:[%s724_s1 + $0x88] sm:$0xff]  ;;  %v507_v3 = vld [vmem:[%s724_s1 + $0x30] sm:$0xff] }
   0x2   :  { %v516_v1 = vld [vmem:[%s724_s1 + $0x78] sm:$0xff]  ;;  %250 = vmatpush.bf16.msra.mxu0 %v508_v0  ;;  %542 = vmatpush.bf16.msra.mxu3 %v508_v0  ;;  %v515_v4 = vld [vmem:[%s724_s1 + $0x70] sm:$0xff]  ;;  %v517_v5 = vld [vmem:[%s724_s1 + $0x80] sm:$0xff] }
   0x3   :  { %550 = vmatpush.bf16.msra.mxu1 %v516_v1  ;;  %314 = vmatpush.bf16.msra.mxu2 %v518_v2  ;;  %v375_v6 = vld [vmem:[%s725_s0 + $0x8] sm:$0xf]  ;;  %v491_v7 = vld [vmem:[%s725_s0 + $0x10] sm:$0xf0]  ;;  %v505_v11 = vld [vmem:[%s724_s1 + $0x20] sm:$0xff] }
   0x4   :  { %v506_v8 = vld [vmem:[%s724_s1 + $0x28] sm:$0xff]  ;;  %v376_v10 = vor.u32 %v491_v7, %v375_v6  ;;  %v513_v12 = vld [vmem:[%s724_s1 + $0x60] sm:$0xff]  ;;  %v504_v13 = vld [vmem:[%s724_s1 + $0x18] sm:$0xff] }
   0x5   :  { %v514_v9 = vld [vmem:[%s724_s1 + $0x68] sm:$0xff]  ;;  %v512_v14 = vld [vmem:[%s724_s1 + $0x58] sm:$0xff]  ;;  %v503_v15 = vld [vmem:[%s724_s1 + $0x10] sm:$0xff] }
   0x6   :  { %251 = vmatpush.bf16.msra.mxu0 %v507_v3  ;;  %543 = vmatpush.bf16.msra.mxu3 %v507_v3  ;;  %v511_v16 = vld [vmem:[%s724_s1 + $0x50] sm:$0xff]  ;;  %v387_v17 = vld [vmem:[%s725_s0 + $0x20] sm:$0xf]  ;;  %v494_v18 = vld [vmem:[%s725_s0 + $0x28] sm:$0xf0] }
   0x7   :  { %551 = vmatpush.bf16.msra.mxu1 %v515_v4  ;;  %315 = vmatpush.bf16.msra.mxu2 %v517_v5  ;;  %v502_v19 = vld [vmem:[%s724_s1 + $0x8] sm:$0xff]  ;;  %v388_v21 = vor.u32 %v494_v18, %v387_v17  ;;  %v501_v22 = vld [vmem:[%s724_s1] sm:$0xff]  ;;  %v379_v23 = vld [vmem:[%s725_s0 + $0x18] sm:$0xf] }
   0x8   :  { %v510_v20 = vld [vmem:[%s724_s1 + $0x48] sm:$0xff]  ;;  %v493_v24 = vld [vmem:[%s725_s0 + $0x20] sm:$0xf0]  ;;  %v367_v25 = vld [vmem:[%s725_s0] sm:$0xf] }
   0x9   :  { %v490_v26 = vld [vmem:[%s725_s0 + $0x8] sm:$0xf0]  ;;  %v509_v27 = vld [vmem:[%s724_s1 + $0x40] sm:$0xff]  ;;  %v492_v28 = vld [vmem:[%s725_s0 + $0x1c] sm:$0xf]  ;;  %v380_v30 = vor.u32 %v493_v24, %v379_v23 }
   0xa   :  { %252 = vmatpush.bf16.msra.mxu0 %v506_v8  ;;  %544 = vmatpush.bf16.msra.mxu3 %v506_v8  ;;  %v381_v29 = vld [vmem:[%s725_s0 + $0x24] sm:$0xf0]  ;;  %v368_v31 = vor.u32 %v490_v26, %v367_v25  ;;  %v399_v33 = vld [vmem:[%s725_s0 + $0x38] sm:$0xf]  ;;  %v497_v34 = vld [vmem:[%s725_s0 + $0x40] sm:$0xf0] }
   0xb   :  { %552 = vmatpush.bf16.msra.mxu1 %v514_v9  ;;  %485 = vmatmul.msk.bf16.vlgmr.msra.gmra.mxu2 %vm237_vm0, %v376_v10  ;;  %v384_v32 = vor.u32 %v492_v28, %v381_v29  ;;  %v400_v35 = vor.u32 %v497_v34, %v399_v33  ;;  %v391_v36 = vld [vmem:[%s725_s0 + $0x30] sm:$0xf]  ;;  %v496_v37 = vld [vmem:[%s725_s0 + $0x38] sm:$0xf0]  ;;  %v495_v38 = vld [vmem:[%s725_s0 + $0x34] sm:$0xf] }
   0xc   :  { %v393_v39 = vld [vmem:[%s725_s0 + $0x3c] sm:$0xf0]  ;;  %v392_v40 = vor.u32 %v496_v37, %v391_v36  ;;  %v411_v42 = vld [vmem:[%s725_s0 + $0x50] sm:$0xf]  ;;  %v500_v43 = vld [vmem:[%s725_s0 + $0x58] sm:$0xf0] }
   0xd   :  { %v396_v41 = vor.u32 %v495_v38, %v393_v39  ;;  %v412_v44 = vor.u32 %v500_v43, %v411_v42  ;;  %v489_v45 = vld [vmem:[%s725_s0 + $0x4] sm:$0xf]  ;;  %v369_v46 = vld [vmem:[%s725_s0 + $0xc] sm:$0xf0]  ;;  %v403_v48 = vld [vmem:[%s725_s0 + $0x48] sm:$0xf] }
   0xe   :  { %253 = vmatpush.bf16.msra.mxu0 %v505_v11  ;;  %545 = vmatpush.bf16.msra.mxu3 %v505_v11  ;;  %v372_v47 = vor.u32 %v489_v45, %v369_v46  ;;  %v499_v49 = vld [vmem:[%s725_s0 + $0x50] sm:$0xf0]  ;;  %v498_v50 = vld [vmem:[%s725_s0 + $0x4c] sm:$0xf]  ;;  %v405_v51 = vld [vmem:[%s725_s0 + $0x54] sm:$0xf0] }
   0xf   :  { %553 = vmatpush.bf16.msra.mxu1 %v513_v12  ;;  %v404_v52 = vor.u32 %v499_v49, %v403_v48  ;;  %v408_v53 = vor.u32 %v498_v50, %v405_v51  ;;  %v558_v58 = vld [vmem:[%s726_s2] ss:$0 sm:$0xff] }
  0x12   :  { %254 = vmatpush.bf16.msra.mxu0 %v504_v13  ;;  %546 = vmatpush.bf16.msra.mxu3 %v504_v13 }
  0x13   :  { %554 = vmatpush.bf16.msra.mxu1 %v512_v14 }
  0x16   :  { %255 = vmatpush.bf16.msra.mxu0 %v503_v15  ;;  %547 = vmatpush.bf16.msra.mxu3 %v503_v15 }
  0x17   :  { %555 = vmatpush.bf16.msra.mxu1 %v511_v16 }
  0x1a   :  { %256 = vmatpush.bf16.msra.mxu0 %v502_v19  ;;  %548 = vmatpush.bf16.msra.mxu3 %v502_v19 }
  0x1b   :  { %556 = vmatpush.bf16.msra.mxu1 %v510_v20  ;;  %486 = vmatmul.msk.bf16.gmra.mxu2 %vm237_vm0, %v388_v21 }
  0x1e   :  { %257 = vmatpush.bf16.msra.mxu0 %v501_v22  ;;  %549 = vmatpush.bf16.msra.mxu3 %v501_v22 }
  0x1f   :  { %557 = vmatpush.bf16.msra.mxu1 %v509_v27 }
  0x21   :  { %263 = vmatmul.bf16.vlgmr.msra.gmra.mxu3 %v380_v30  ;;  %258 = vmatmul.bf16.vlgmr.msra.gmra.mxu0 %v368_v31 }
  0x22   :  { %279 = vmatpush.bf16.msrb.mxu0 %v516_v1  ;;  %292 = vmatmul.bf16.vlgmr.msra.gmra.mxu1 %v384_v32 }
  0x26   :  { %280 = vmatpush.bf16.msrb.mxu0 %v515_v4 }
  0x2a   :  { %281 = vmatpush.bf16.msrb.mxu0 %v514_v9 }
  0x2b   :  { %487 = vmatmul.msk.bf16.gmra.mxu2 %vm237_vm0, %v400_v35 }
  0x2e   :  { %282 = vmatpush.bf16.msrb.mxu0 %v513_v12 }
  0x31   :  { %268 = vmatmul.bf16.gmra.mxu3 %v392_v40 }
  0x32   :  { %283 = vmatpush.bf16.msrb.mxu0 %v512_v14  ;;  %297 = vmatmul.bf16.gmra.mxu1 %v396_v41 }
  0x36   :  { %284 = vmatpush.bf16.msrb.mxu0 %v511_v16 }
  0x3a   :  { %285 = vmatpush.bf16.msrb.mxu0 %v510_v20 }
  0x3b   :  { %488 = vmatmul.msk.bf16.gmra.mxu2 %vm237_vm0, %v412_v44 }
  0x3e   :  { %286 = vmatpush.bf16.msrb.mxu0 %v509_v27 }
  0x41   :  { %287 = vmatmul.bf16.vlgmr.msrb.gmra.mxu0 %v372_v47  ;;  %273 = vmatmul.bf16.gmra.mxu3 %v404_v52 }
  0x42   :  { %302 = vmatmul.bf16.gmra.mxu1 %v408_v53 }
  0x8e   :  { %v317_v54 = vpop.f32.mrf.mxu2 }
  0x96   :  { %v319_v55 = vpop.f32.mrf.mxu2 }
  0x9e   :  { %v322_v56 = vpop.f32.mrf.mxu2  ;;  %v259_v62 = vpop.f32.mrf.mxu0 }
  0x9f   :  { %v293_v57 = vpop.f32.mrf.mxu1  ;;  %v260_v20 = vadd.f32 %v558_v58, %v259_v62 }
  0xa4   :  { %v264_v59 = vpop.f32.mrf.mxu3 }
  0xa5   :  { %v265_v60 = vadd.f32 %v558_v58, %v264_v59 }
  0xa6   :  { %v324_v63 = vpop.f32.mrf.mxu2  ;;  %v261_v7 = vpop.f32.mrf.mxu0 }
  0xa7   :  { %v295_v61 = vpop.f32.mrf.mxu1  ;;  %v294_v0 = vadd.f32 %v293_v57, %v265_v60  ;;  %v262_v25 = vadd.f32 %v558_v58, %v261_v7 }
  0xa9   :  { %v323_v3 = vadd.f32 %v322_v56, %v294_v0 }
  0xab   :  { %v339_v9 = vmax.f32 %v323_v3, 0.0 }
  0xac   :  { %v266_v1 = vpop.f32.mrf.mxu3 }
  0xad   :  { %v267_v2 = vadd.f32 %v558_v58, %v266_v1 }
  0xae   :  { %v327_v8 = vpop.f32.mrf.mxu2 }
  0xaf   :  { %v296_v4 = vadd.f32 %v295_v61, %v267_v2  ;;  %v298_v5 = vpop.f32.mrf.mxu1 }
  0xb1   :  { %v325_v6 = vadd.f32 %v324_v63, %v296_v4 }
  0xb3   :  { %v340_v10 = vmax.f32 %v325_v6, 0.0 }
  0xb4   :  { %v269_v11 = vpop.f32.mrf.mxu3 }
  0xb5   :  { %v527_v12 = vpack.c.bf16 %v340_v10, %v339_v9  ;;  %v270_v13 = vadd.f32 %v558_v58, %v269_v11 }
  0xb6   :  { %v329_v17 = vpop.f32.mrf.mxu2 }
  0xb7   :  { %539 = vst [vmem:[%s727_s3 + $0x8] sm:$0xff] %v527_v12   ;;  %v300_v14 = vpop.f32.mrf.mxu1  ;;  %v299_v15 = vadd.f32 %v298_v5, %v270_v13 }
  0xb9   :  { %v328_v21 = vadd.f32 %v327_v8, %v299_v15 }
  0xbb   :  { %v341_v26 = vmax.f32 %v328_v21, 0.0 }
  0xbc   :  { %v271_v18 = vpop.f32.mrf.mxu3 }
  0xbd   :  { %v272_v19 = vadd.f32 %v558_v58, %v271_v18 }
  0xbe   :  { %v288_v16 = vpop.f32.mrf.mxu0  ;;  %v332_v34 = vpop.f32.mrf.mxu2 }
  0xbf   :  { %v301_v22 = vadd.f32 %v300_v14, %v272_v19  ;;  %v289_v23 = vadd.f32 %v288_v16, %v260_v20  ;;  %v303_v30 = vpop.f32.mrf.mxu1 }
  0xc1   :  { %v330_v24 = vadd.f32 %v329_v17, %v301_v22  ;;  %v318_v29 = vadd.f32 %v317_v54, %v289_v23 }
  0xc3   :  { %v342_v27 = vmax.f32 %v330_v24, 0.0  ;;  %v337_v37 = vmax.f32 %v318_v29, 0.0 }
  0xc4   :  { %v274_v32 = vpop.f32.mrf.mxu3 }
  0xc5   :  { %v532_v33 = vpack.c.bf16 %v342_v27, %v341_v26  ;;  %v275_v36 = vadd.f32 %v558_v58, %v274_v32 }
  0xc6   :  { %v290_v28 = vpop.f32.mrf.mxu0  ;;  %v334_v46 = vpop.f32.mrf.mxu2 }
  0xc7   :  { %v291_v31 = vadd.f32 %v290_v28, %v262_v25  ;;  %540 = vst [vmem:[%s727_s3 + $0x10] sm:$0xff] %v532_v33   ;;  %v304_v40 = vadd.f32 %v303_v30, %v275_v36  ;;  %v305_v43 = vpop.f32.mrf.mxu1 }
  0xc9   :  { %v320_v35 = vadd.f32 %v319_v55, %v291_v31  ;;  %v333_v44 = vadd.f32 %v332_v34, %v304_v40 }
  0xcb   :  { %v338_v38 = vmax.f32 %v320_v35, 0.0  ;;  %v343_v48 = vmax.f32 %v333_v44, 0.0 }
  0xcc   :  { %v276_v41 = vpop.f32.mrf.mxu3 }
  0xcd   :  { %v522_v39 = vpack.c.bf16 %v338_v38, %v337_v37  ;;  %v277_v42 = vadd.f32 %v558_v58, %v276_v41 }
  0xcf   :  { %523 = vst [vmem:[%s727_s3] sm:$0xff] %v522_v39   ;;  %v306_v45 = vadd.f32 %v305_v43, %v277_v42 }
  0xd1   :  { %v335_v47 = vadd.f32 %v334_v46, %v306_v45 }
  0xd3   :  { %v344_v49 = vmax.f32 %v335_v47, 0.0 }
  0xd5   :  { %v537_v50 = vpack.c.bf16 %v344_v49, %v343_v48 }
  0xd7   :  { %541 = vst [vmem:[%s727_s3 + $0x18] sm:$0xff] %v537_v50  }

// kernel: pspnet_forward.110
= control target key start
LH: loop header
LB: loop body
LE: loop exit
PB: predicated region body
PF: predicated region fallthrough
CT: control target
= control target key end

     0   :  { %s348_s1 = inlined_call_operand.vmem [shape: bf16[128,128], index: 1, kind: input, shape index: {}]   ;;  %s349_s2 = inlined_call_operand.vmem [shape: f32[4,128], index: 2, kind: input, shape index: {}]   ;;  %s350_s0 = inlined_call_operand.vmem [shape: bf16[64,128], index: 0, kind: input, shape index: {}]   ;;  %s351_s3 = inlined_call_operand.vmem [shape: bf16[64,128], index: 3, kind: output, shape index: {}]  }
   0x1   :  { %v228_v0 = vld [vmem:[%s348_s1 + $0x38] sm:$0xff]  ;;  %v227_v1 = vld [vmem:[%s348_s1 + $0x30] sm:$0xff]  ;;  %v226_v2 = vld [vmem:[%s348_s1 + $0x28] sm:$0xff] }
   0x2   :  { %112 = vmatpush.bf16.msra.mxu0 %v228_v0  ;;  %252 = vmatpush.bf16.msra.mxu1 %v228_v0  ;;  %v225_v3 = vld [vmem:[%s348_s1 + $0x20] sm:$0xff]  ;;  %v224_v4 = vld [vmem:[%s348_s1 + $0x18] sm:$0xff]  ;;  %v223_v5 = vld [vmem:[%s348_s1 + $0x10] sm:$0xff] }
   0x3   :  { %253 = vmatpush.bf16.msra.mxu2 %v228_v0  ;;  %254 = vmatpush.bf16.msra.mxu3 %v228_v0  ;;  %v222_v6 = vld [vmem:[%s348_s1 + $0x8] sm:$0xff]  ;;  %v221_v7 = vld [vmem:[%s348_s1] sm:$0xff]  ;;  %v219_v10 = vld [vmem:[%s350_s0 + $0x10] sm:$0xff] }
   0x4   :  { %v217_v8 = vld [vmem:[%s350_s0] sm:$0xff]  ;;  %v218_v9 = vld [vmem:[%s350_s0 + $0x8] sm:$0xff]  ;;  %v220_v11 = vld [vmem:[%s350_s0 + $0x18] sm:$0xff] }
   0x5   :  { %v276_v14 = vld [vmem:[%s349_s2] ss:$0 sm:$0xff] }
   0x6   :  { %113 = vmatpush.bf16.msra.mxu0 %v227_v1  ;;  %255 = vmatpush.bf16.msra.mxu1 %v227_v1 }
   0x7   :  { %256 = vmatpush.bf16.msra.mxu2 %v227_v1  ;;  %257 = vmatpush.bf16.msra.mxu3 %v227_v1 }
   0xa   :  { %114 = vmatpush.bf16.msra.mxu0 %v226_v2  ;;  %258 = vmatpush.bf16.msra.mxu1 %v226_v2 }
   0xb   :  { %259 = vmatpush.bf16.msra.mxu2 %v226_v2  ;;  %260 = vmatpush.bf16.msra.mxu3 %v226_v2 }
   0xe   :  { %115 = vmatpush.bf16.msra.mxu0 %v225_v3  ;;  %261 = vmatpush.bf16.msra.mxu1 %v225_v3 }
   0xf   :  { %262 = vmatpush.bf16.msra.mxu2 %v225_v3  ;;  %263 = vmatpush.bf16.msra.mxu3 %v225_v3 }
  0x12   :  { %116 = vmatpush.bf16.msra.mxu0 %v224_v4  ;;  %264 = vmatpush.bf16.msra.mxu1 %v224_v4 }
  0x13   :  { %265 = vmatpush.bf16.msra.mxu2 %v224_v4  ;;  %266 = vmatpush.bf16.msra.mxu3 %v224_v4 }
  0x16   :  { %117 = vmatpush.bf16.msra.mxu0 %v223_v5  ;;  %267 = vmatpush.bf16.msra.mxu1 %v223_v5 }
  0x17   :  { %268 = vmatpush.bf16.msra.mxu2 %v223_v5  ;;  %269 = vmatpush.bf16.msra.mxu3 %v223_v5 }
  0x1a   :  { %118 = vmatpush.bf16.msra.mxu0 %v222_v6  ;;  %270 = vmatpush.bf16.msra.mxu1 %v222_v6 }
  0x1b   :  { %271 = vmatpush.bf16.msra.mxu2 %v222_v6  ;;  %272 = vmatpush.bf16.msra.mxu3 %v222_v6 }
  0x1e   :  { %119 = vmatpush.bf16.msra.mxu0 %v221_v7  ;;  %273 = vmatpush.bf16.msra.mxu1 %v221_v7 }
  0x1f   :  { %274 = vmatpush.bf16.msra.mxu2 %v221_v7  ;;  %275 = vmatpush.bf16.msra.mxu3 %v221_v7 }
  0x21   :  { %120 = vmatmul.bf16.vlgmr.msra.gmra.mxu0 %v217_v8  ;;  %125 = vmatmul.bf16.vlgmr.msra.gmra.mxu1 %v218_v9 }
  0x22   :  { %130 = vmatmul.bf16.vlgmr.msra.gmra.mxu2 %v219_v10  ;;  %135 = vmatmul.bf16.vlgmr.msra.gmra.mxu3 %v220_v11 }
  0x9e   :  { %v121_v12 = vpop.f32.mrf.mxu0  ;;  %v126_v13 = vpop.f32.mrf.mxu1 }
  0x9f   :  { %v122_v15 = vadd.f32 %v276_v14, %v121_v12  ;;  %v127_v16 = vadd.f32 %v276_v14, %v126_v13 }
  0xa1   :  { %v141_v23 = vmax.f32 %v122_v15, 0.0  ;;  %v143_v24 = vmax.f32 %v127_v16, 0.0 }
  0xa5   :  { %v131_v17 = vpop.f32.mrf.mxu2  ;;  %v136_v18 = vpop.f32.mrf.mxu3 }
  0xa6   :  { %v123_v19 = vpop.f32.mrf.mxu0  ;;  %v128_v20 = vpop.f32.mrf.mxu1  ;;  %v132_v29 = vadd.f32 %v276_v14, %v131_v17  ;;  %v137_v30 = vadd.f32 %v276_v14, %v136_v18 }
  0xa7   :  { %v124_v21 = vadd.f32 %v276_v14, %v123_v19  ;;  %v129_v22 = vadd.f32 %v276_v14, %v128_v20 }
  0xa8   :  { %v145_v35 = vmax.f32 %v132_v29, 0.0  ;;  %v147_v36 = vmax.f32 %v137_v30, 0.0 }
  0xa9   :  { %v142_v25 = vmax.f32 %v124_v21, 0.0  ;;  %v144_v26 = vmax.f32 %v129_v22, 0.0 }
  0xab   :  { %v232_v27 = vpack.c.bf16 %v142_v25, %v141_v23  ;;  %v237_v28 = vpack.c.bf16 %v144_v26, %v143_v24 }
  0xad   :  { %233 = vst [vmem:[%s351_s3] sm:$0xff] %v232_v27   ;;  %v133_v31 = vpop.f32.mrf.mxu2  ;;  %v138_v32 = vpop.f32.mrf.mxu3 }
  0xae   :  { %249 = vst [vmem:[%s351_s3 + $0x8] sm:$0xff] %v237_v28   ;;  %v134_v33 = vadd.f32 %v276_v14, %v133_v31  ;;  %v139_v34 = vadd.f32 %v276_v14, %v138_v32 }
  0xb0   :  { %v146_v37 = vmax.f32 %v134_v33, 0.0  ;;  %v148_v38 = vmax.f32 %v139_v34, 0.0 }
  0xb2   :  { %v242_v39 = vpack.c.bf16 %v146_v37, %v145_v35  ;;  %v247_v40 = vpack.c.bf16 %v148_v38, %v147_v36 }
  0xb4   :  { %250 = vst [vmem:[%s351_s3 + $0x10] sm:$0xff] %v242_v39  }
  0xb5   :  { %251 = vst [vmem:[%s351_s3 + $0x18] sm:$0xff] %v247_v40  }

// kernel: pspnet_forward.116
= control target key start
LH: loop header
LB: loop body
LE: loop exit
PB: predicated region body
PF: predicated region fallthrough
CT: control target
= control target key end

     0   :  { %vm75_vm0 = vcmask 1043456   ;;  %vm76_vm1 = vcmask 1044480   ;;  %v216_v2 = vmov 65535   ;;  %vm62_vm2 = vcmask 203776   ;;  %s292_s1 = inlined_call_operand.vmem [shape: bf16[25,256], index: 1, kind: input, shape index: {}]   ;;  %s293_s0 = inlined_call_operand.vmem [shape: bf16[64,25], index: 0, kind: input, shape index: {}]   ;;  %s294_s2 = inlined_call_operand.vmem [shape: bf16[64,256], index: 2, kind: output, shape index: {}]  }
   0x1   :  { %v189_v0 = vld [vmem:[%s292_s1 + $0x10] sm:$0xf]  ;;  %v210_v1 = vld [vmem:[%s292_s1 + $0x14] sm:$0x10]  ;;  %v77_v3 = vsel %vm75_vm0, 4294967295, %v216_v2  ;;  %v203_v17 = vld [vmem:[%s293_s0] sm:$0xff] }
   0x2   :  { %v190_v4 = vor.u32 %v210_v1, %v189_v0  ;;  %v78_v5 = vsel %vm76_vm1, %v77_v3, 0  ;;  %v209_v6 = vld [vmem:[%s292_s1 + $0x14] sm:$0xf]  ;;  %v191_v7 = vld [vmem:[%s292_s1 + $0x18] sm:$0x10]  ;;  %v204_v19 = vld [vmem:[%s293_s0 + $0x8] sm:$0xff] }
   0x3   :  { %v194_v8 = vor.u32 %v209_v6, %v191_v7  ;;  %v181_v9 = vld [vmem:[%s292_s1] sm:$0xf]  ;;  %v208_v10 = vld [vmem:[%s292_s1 + $0x4] sm:$0xf0]  ;;  %v207_v12 = vld [vmem:[%s292_s1 + $0x4] sm:$0xf] }
   0x4   :  { %v80_v11 = vand.u32 %v190_v4, %v78_v5  ;;  %v183_v13 = vld [vmem:[%s292_s1 + $0x8] sm:$0xf0]  ;;  %v182_v15 = vor.u32 %v208_v10, %v181_v9  ;;  %v205_v18 = vld [vmem:[%s293_s0 + $0x10] sm:$0xff]  ;;  %v206_v20 = vld [vmem:[%s293_s0 + $0x18] sm:$0xff] }
   0x5   :  { %v83_v14 = vand.u32 %v194_v8, %v78_v5  ;;  %v186_v16 = vor.u32 %v207_v12, %v183_v13 }
   0x6   :  { %91 = vmatpush.bf16.msra.mxu0 %v80_v11  ;;  %211 = vmatpush.bf16.msra.mxu2 %v80_v11 }
   0x7   :  { %120 = vmatpush.bf16.msra.mxu1 %v83_v14  ;;  %213 = vmatpush.bf16.msra.mxu3 %v83_v14 }
   0xa   :  { %92 = vmatpush.bf16.msra.mxu0 %v182_v15  ;;  %212 = vmatpush.bf16.msra.mxu2 %v182_v15 }
   0xb   :  { %121 = vmatpush.bf16.msra.mxu1 %v186_v16  ;;  %214 = vmatpush.bf16.msra.mxu3 %v186_v16 }
   0xd   :  { %195 = vmatmul.msk.bf16.vlgmr.msra.gmra.mxu0 %vm62_vm2, %v203_v17  ;;  %197 = vmatmul.msk.bf16.vlgmr.msra.gmra.mxu2 %vm62_vm2, %v205_v18 }
   0xe   :  { %199 = vmatmul.msk.bf16.vlgmr.msra.gmra.mxu1 %vm62_vm2, %v203_v17  ;;  %201 = vmatmul.msk.bf16.vlgmr.msra.gmra.mxu3 %vm62_vm2, %v205_v18 }
  0x1d   :  { %196 = vmatmul.msk.bf16.gmra.mxu0 %vm62_vm2, %v204_v19  ;;  %198 = vmatmul.msk.bf16.gmra.mxu2 %vm62_vm2, %v206_v20 }
  0x1e   :  { %200 = vmatmul.msk.bf16.gmra.mxu1 %vm62_vm2, %v204_v19  ;;  %202 = vmatmul.msk.bf16.gmra.mxu3 %vm62_vm2, %v206_v20 }
  0x8a   :  { %v94_v21 = vpop.f32.mrf.mxu0 }
  0x8b   :  { %v123_v22 = vpop.f32.mrf.mxu1 }
  0x8c   :  { %v143_v23 = vpack.c.bf16 %v123_v22, %v94_v21 }
  0x8e   :  { %151 = vst [vmem:[%s294_s2] sm:$0xff] %v143_v23 }
  0x90   :  { %v104_v24 = vpop.f32.mrf.mxu2 }
  0x91   :  { %v133_v25 = vpop.f32.mrf.mxu3 }
  0x92   :  { %v147_v26 = vpack.c.bf16 %v133_v25, %v104_v24  ;;  %v96_v27 = vpop.f32.mrf.mxu0 }
  0x93   :  { %v125_v28 = vpop.f32.mrf.mxu1 }
  0x94   :  { %155 = vst [vmem:[%s294_s2 + $0x20] sm:$0xff] %v147_v26  ;;  %v144_v29 = vpack.c.bf16 %v125_v28, %v96_v27 }
  0x96   :  { %152 = vst [vmem:[%s294_s2 + $0x8] sm:$0xff] %v144_v29 }
  0x98   :  { %v106_v30 = vpop.f32.mrf.mxu2 }
  0x99   :  { %v135_v31 = vpop.f32.mrf.mxu3 }
  0x9a   :  { %v148_v32 = vpack.c.bf16 %v135_v31, %v106_v30  ;;  %v99_v33 = vpop.f32.mrf.mxu0 }
  0x9b   :  { %v128_v34 = vpop.f32.mrf.mxu1 }
  0x9c   :  { %156 = vst [vmem:[%s294_s2 + $0x28] sm:$0xff] %v148_v32  ;;  %v145_v35 = vpack.c.bf16 %v128_v34, %v99_v33 }
  0x9e   :  { %153 = vst [vmem:[%s294_s2 + $0x10] sm:$0xff] %v145_v35 }
  0xa0   :  { %v109_v36 = vpop.f32.mrf.mxu2 }
  0xa1   :  { %v138_v37 = vpop.f32.mrf.mxu3 }
  0xa2   :  { %v149_v38 = vpack.c.bf16 %v138_v37, %v109_v36  ;;  %v101_v39 = vpop.f32.mrf.mxu0 }
  0xa3   :  { %v130_v40 = vpop.f32.mrf.mxu1 }
  0xa4   :  { %157 = vst [vmem:[%s294_s2 + $0x30] sm:$0xff] %v149_v38  ;;  %v146_v41 = vpack.c.bf16 %v130_v40, %v101_v39 }
  0xa6   :  { %154 = vst [vmem:[%s294_s2 + $0x18] sm:$0xff] %v146_v41 }
  0xa8   :  { %v111_v42 = vpop.f32.mrf.mxu2 }
  0xa9   :  { %v140_v43 = vpop.f32.mrf.mxu3 }
  0xaa   :  { %v150_v44 = vpack.c.bf16 %v140_v43, %v111_v42 }
  0xac   :  { %158 = vst [vmem:[%s294_s2 + $0x38] sm:$0xff] %v150_v44 }

// kernel: pspnet_forward.117
= control target key start
LH: loop header
LB: loop body
LE: loop exit
PB: predicated region body
PF: predicated region fallthrough
CT: control target
= control target key end

     0   :  { %s456_s1 = inlined_call_operand.vmem [shape: bf16[128,128], index: 1, kind: input, shape index: {}]   ;;  %s457_s2 = inlined_call_operand.vmem [shape: f32[4,128], index: 2, kind: input, shape index: {}]   ;;  %s458_s0 = inlined_call_operand.vmem [shape: bf16[112,128], index: 0, kind: input, shape index: {}]   ;;  %s459_s3 = inlined_call_operand.vmem [shape: bf16[112,128], index: 3, kind: output, shape index: {}]  }
   0x1   :  { %v300_v0 = vld [vmem:[%s456_s1 + $0x38] sm:$0xff]  ;;  %v299_v1 = vld [vmem:[%s456_s1 + $0x30] sm:$0xff]  ;;  %v298_v2 = vld [vmem:[%s456_s1 + $0x28] sm:$0xff] }
   0x2   :  { %342 = vmatpush.bf16.msra.mxu1 %v300_v0  ;;  %343 = vmatpush.bf16.msra.mxu2 %v300_v0  ;;  %v297_v3 = vld [vmem:[%s456_s1 + $0x20] sm:$0xff]  ;;  %v296_v4 = vld [vmem:[%s456_s1 + $0x18] sm:$0xff]  ;;  %v295_v5 = vld [vmem:[%s456_s1 + $0x10] sm:$0xff] }
   0x3   :  { %344 = vmatpush.bf16.msra.mxu3 %v300_v0  ;;  %136 = vmatpush.bf16.msra.mxu0 %v300_v0  ;;  %v294_v6 = vld [vmem:[%s456_s1 + $0x8] sm:$0xff]  ;;  %v293_v7 = vld [vmem:[%s456_s1] sm:$0xff]  ;;  %v289_v9 = vld [vmem:[%s458_s0 + $0x18] sm:$0xff] }
   0x4   :  { %v287_v8 = vld [vmem:[%s458_s0 + $0x8] sm:$0xff]  ;;  %v286_v11 = vld [vmem:[%s458_s0] sm:$0xff]  ;;  %v288_v12 = vld [vmem:[%s458_s0 + $0x10] sm:$0xff] }
   0x5   :  { %v291_v10 = vld [vmem:[%s458_s0 + $0x28] sm:$0xff]  ;;  %v290_v13 = vld [vmem:[%s458_s0 + $0x20] sm:$0xff]  ;;  %v292_v14 = vld [vmem:[%s458_s0 + $0x30] sm:$0xff] }
   0x6   :  { %345 = vmatpush.bf16.msra.mxu1 %v299_v1  ;;  %346 = vmatpush.bf16.msra.mxu2 %v299_v1  ;;  %v366_v17 = vld [vmem:[%s457_s2] ss:$0 sm:$0xff] }
   0x7   :  { %347 = vmatpush.bf16.msra.mxu3 %v299_v1  ;;  %137 = vmatpush.bf16.msra.mxu0 %v299_v1 }
   0xa   :  { %348 = vmatpush.bf16.msra.mxu1 %v298_v2  ;;  %349 = vmatpush.bf16.msra.mxu2 %v298_v2 }
   0xb   :  { %350 = vmatpush.bf16.msra.mxu3 %v298_v2  ;;  %138 = vmatpush.bf16.msra.mxu0 %v298_v2 }
   0xe   :  { %351 = vmatpush.bf16.msra.mxu1 %v297_v3  ;;  %352 = vmatpush.bf16.msra.mxu2 %v297_v3 }
   0xf   :  { %353 = vmatpush.bf16.msra.mxu3 %v297_v3  ;;  %139 = vmatpush.bf16.msra.mxu0 %v297_v3 }
  0x12   :  { %354 = vmatpush.bf16.msra.mxu1 %v296_v4  ;;  %355 = vmatpush.bf16.msra.mxu2 %v296_v4 }
  0x13   :  { %356 = vmatpush.bf16.msra.mxu3 %v296_v4  ;;  %140 = vmatpush.bf16.msra.mxu0 %v296_v4 }
  0x16   :  { %357 = vmatpush.bf16.msra.mxu1 %v295_v5  ;;  %358 = vmatpush.bf16.msra.mxu2 %v295_v5 }
  0x17   :  { %359 = vmatpush.bf16.msra.mxu3 %v295_v5  ;;  %141 = vmatpush.bf16.msra.mxu0 %v295_v5 }
  0x1a   :  { %360 = vmatpush.bf16.msra.mxu1 %v294_v6  ;;  %361 = vmatpush.bf16.msra.mxu2 %v294_v6 }
  0x1b   :  { %362 = vmatpush.bf16.msra.mxu3 %v294_v6  ;;  %142 = vmatpush.bf16.msra.mxu0 %v294_v6 }
  0x1e   :  { %363 = vmatpush.bf16.msra.mxu1 %v293_v7  ;;  %364 = vmatpush.bf16.msra.mxu2 %v293_v7 }
  0x1f   :  { %365 = vmatpush.bf16.msra.mxu3 %v293_v7  ;;  %143 = vmatpush.bf16.msra.mxu0 %v293_v7 }
  0x21   :  { %149 = vmatmul.bf16.vlgmr.msra.gmra.mxu1 %v287_v8  ;;  %159 = vmatmul.bf16.vlgmr.msra.gmra.mxu2 %v289_v9 }
  0x22   :  { %169 = vmatmul.bf16.vlgmr.msra.gmra.mxu3 %v291_v10  ;;  %144 = vmatmul.bf16.vlgmr.msra.gmra.mxu0 %v286_v11 }
  0x31   :  { %154 = vmatmul.bf16.gmra.mxu1 %v288_v12  ;;  %164 = vmatmul.bf16.gmra.mxu2 %v290_v13 }
  0x32   :  { %174 = vmatmul.bf16.gmra.mxu3 %v292_v14 }
  0x9e   :  { %v150_v15 = vpop.f32.mrf.mxu1 }
  0x9f   :  { %v145_v16 = vpop.f32.mrf.mxu0  ;;  %v151_v20 = vadd.f32 %v366_v17, %v150_v15 }
  0xa0   :  { %v146_v19 = vadd.f32 %v366_v17, %v145_v16 }
  0xa1   :  { %v182_v27 = vmax.f32 %v151_v20, 0.0 }
  0xa2   :  { %v180_v25 = vmax.f32 %v146_v19, 0.0 }
  0xa4   :  { %v160_v18 = vpop.f32.mrf.mxu2 }
  0xa5   :  { %v170_v21 = vpop.f32.mrf.mxu3  ;;  %v161_v30 = vadd.f32 %v366_v17, %v160_v18 }
  0xa6   :  { %v152_v22 = vpop.f32.mrf.mxu1  ;;  %v171_v32 = vadd.f32 %v366_v17, %v170_v21 }
  0xa7   :  { %v153_v23 = vadd.f32 %v366_v17, %v152_v22  ;;  %v147_v24 = vpop.f32.mrf.mxu0  ;;  %v186_v39 = vmax.f32 %v161_v30, 0.0 }
  0xa8   :  { %v148_v26 = vadd.f32 %v366_v17, %v147_v24  ;;  %v190_v41 = vmax.f32 %v171_v32, 0.0 }
  0xa9   :  { %v183_v28 = vmax.f32 %v153_v23, 0.0 }
  0xaa   :  { %v181_v29 = vmax.f32 %v148_v26, 0.0 }
  0xab   :  { %v309_v31 = vpack.c.bf16 %v183_v28, %v182_v27 }
  0xac   :  { %v162_v33 = vpop.f32.mrf.mxu2  ;;  %v304_v34 = vpack.c.bf16 %v181_v29, %v180_v25 }
  0xad   :  { %336 = vst [vmem:[%s459_s3 + $0x8] sm:$0xff] %v309_v31   ;;  %v163_v35 = vadd.f32 %v366_v17, %v162_v33  ;;  %v172_v36 = vpop.f32.mrf.mxu3 }
  0xae   :  { %v173_v37 = vadd.f32 %v366_v17, %v172_v36  ;;  %v155_v38 = vpop.f32.mrf.mxu1  ;;  %305 = vst [vmem:[%s459_s3] sm:$0xff] %v304_v34  }
  0xaf   :  { %v187_v40 = vmax.f32 %v163_v35, 0.0  ;;  %v156_v46 = vadd.f32 %v366_v17, %v155_v38 }
  0xb0   :  { %v191_v42 = vmax.f32 %v173_v37, 0.0 }
  0xb1   :  { %v319_v43 = vpack.c.bf16 %v187_v40, %v186_v39  ;;  %v184_v50 = vmax.f32 %v156_v46, 0.0 }
  0xb2   :  { %v329_v44 = vpack.c.bf16 %v191_v42, %v190_v41 }
  0xb3   :  { %338 = vst [vmem:[%s459_s3 + $0x18] sm:$0xff] %v319_v43  }
  0xb4   :  { %340 = vst [vmem:[%s459_s3 + $0x28] sm:$0xff] %v329_v44   ;;  %v165_v45 = vpop.f32.mrf.mxu2 }
  0xb5   :  { %v175_v47 = vpop.f32.mrf.mxu3  ;;  %v166_v52 = vadd.f32 %v366_v17, %v165_v45 }
  0xb6   :  { %v157_v48 = vpop.f32.mrf.mxu1  ;;  %v176_v54 = vadd.f32 %v366_v17, %v175_v47 }
  0xb7   :  { %v158_v49 = vadd.f32 %v366_v17, %v157_v48  ;;  %v188_v59 = vmax.f32 %v166_v52, 0.0 }
  0xb8   :  { %v192_v61 = vmax.f32 %v176_v54, 0.0 }
  0xb9   :  { %v185_v51 = vmax.f32 %v158_v49, 0.0 }
  0xbb   :  { %v314_v53 = vpack.c.bf16 %v185_v51, %v184_v50 }
  0xbc   :  { %v167_v55 = vpop.f32.mrf.mxu2 }
  0xbd   :  { %337 = vst [vmem:[%s459_s3 + $0x10] sm:$0xff] %v314_v53   ;;  %v168_v56 = vadd.f32 %v366_v17, %v167_v55  ;;  %v177_v57 = vpop.f32.mrf.mxu3 }
  0xbe   :  { %v178_v58 = vadd.f32 %v366_v17, %v177_v57 }
  0xbf   :  { %v189_v60 = vmax.f32 %v168_v56, 0.0 }
  0xc0   :  { %v193_v62 = vmax.f32 %v178_v58, 0.0 }
  0xc1   :  { %v324_v63 = vpack.c.bf16 %v189_v60, %v188_v59 }
  0xc2   :  { %v334_v0 = vpack.c.bf16 %v193_v62, %v192_v61 }
  0xc3   :  { %339 = vst [vmem:[%s459_s3 + $0x20] sm:$0xff] %v324_v63  }
  0xc4   :  { %341 = vst [vmem:[%s459_s3 + $0x30] sm:$0xff] %v334_v0  }

// kernel: pspnet_forward.118
= control target key start
LH: loop header
LB: loop body
LE: loop exit
PB: predicated region body
PF: predicated region fallthrough
CT: control target
= control target key end

     0   :  { %vm75_vm0 = vcmask 1040384   ;;  %vm68_vm1 = vcmask 408576   ;;  %s256_s1 = inlined_call_operand.vmem [shape: bf16[50,256], index: 1, kind: input, shape index: {}]   ;;  %s257_s0 = inlined_call_operand.vmem [shape: bf16[32,50], index: 0, kind: input, shape index: {}]   ;;  %s258_s2 = inlined_call_operand.vmem [shape: bf16[32,256], index: 2, kind: output, shape index: {}]  }
   0x1   :  { %v22_v0 = vld [vmem:[%s256_s1 + $0x30] sm:$0x11]  ;;  %v158_v5 = vld [vmem:[%s256_s1 + $0x20] sm:$0xf]  ;;  %v175_v6 = vld [vmem:[%s256_s1 + $0x24] sm:$0xf0] }
   0x2   :  { %v52_v1 = vunpack.c.l.b16 %v22_v0  ;;  %v53_v2 = vunpack.c.h.b16 %v22_v0  ;;  %v174_v7 = vld [vmem:[%s256_s1 + $0x24] sm:$0xf]  ;;  %v160_v8 = vld [vmem:[%s256_s1 + $0x28] sm:$0xf0]  ;;  %v159_v11 = vor.u32 %v175_v6, %v158_v5  ;;  %v150_v13 = vld [vmem:[%s256_s1 + $0x10] sm:$0xf] }
   0x3   :  { %v163_v12 = vor.u32 %v174_v7, %v160_v8  ;;  %v173_v14 = vld [vmem:[%s256_s1 + $0x14] sm:$0xf0]  ;;  %v172_v15 = vld [vmem:[%s256_s1 + $0x14] sm:$0xf]  ;;  %v152_v16 = vld [vmem:[%s256_s1 + $0x18] sm:$0xf0] }
   0x4   :  { %v60_v3 = vpack.c.b16 %v52_v1, %v52_v1  ;;  %v61_v4 = vpack.c.b16 %v53_v2, %v53_v2  ;;  %v151_v17 = vor.u32 %v173_v14, %v150_v13  ;;  %v155_v18 = vor.u32 %v172_v15, %v152_v16  ;;  %v142_v19 = vld [vmem:[%s256_s1] sm:$0xf]  ;;  %v171_v20 = vld [vmem:[%s256_s1 + $0x4] sm:$0xf0]  ;;  %v170_v21 = vld [vmem:[%s256_s1 + $0x4] sm:$0xf] }
   0x5   :  { %v144_v22 = vld [vmem:[%s256_s1 + $0x8] sm:$0xf0]  ;;  %v143_v23 = vor.u32 %v171_v20, %v142_v19  ;;  %v168_v25 = vld [vmem:[%s257_s0] sm:$0xff] }
   0x6   :  { %v77_v9 = vsel %vm75_vm0, %v60_v3, 0  ;;  %v80_v10 = vsel %vm75_vm0, %v61_v4, 0  ;;  %v147_v24 = vor.u32 %v170_v21, %v144_v22  ;;  %v169_v26 = vld [vmem:[%s257_s0 + $0x8] sm:$0xff] }
   0x7   :  { %86 = vmatpush.bf16.msra.mxu0 %v77_v9  ;;  %176 = vmatpush.bf16.msra.mxu2 %v77_v9 }
   0x8   :  { %105 = vmatpush.bf16.msra.mxu1 %v80_v10  ;;  %180 = vmatpush.bf16.msra.mxu3 %v80_v10 }
   0xb   :  { %87 = vmatpush.bf16.msra.mxu0 %v159_v11  ;;  %177 = vmatpush.bf16.msra.mxu2 %v159_v11 }
   0xc   :  { %106 = vmatpush.bf16.msra.mxu1 %v163_v12  ;;  %181 = vmatpush.bf16.msra.mxu3 %v163_v12 }
   0xf   :  { %88 = vmatpush.bf16.msra.mxu0 %v151_v17  ;;  %178 = vmatpush.bf16.msra.mxu2 %v151_v17 }
  0x10   :  { %107 = vmatpush.bf16.msra.mxu1 %v155_v18  ;;  %182 = vmatpush.bf16.msra.mxu3 %v155_v18 }
  0x13   :  { %89 = vmatpush.bf16.msra.mxu0 %v143_v23  ;;  %179 = vmatpush.bf16.msra.mxu2 %v143_v23 }
  0x14   :  { %108 = vmatpush.bf16.msra.mxu1 %v147_v24  ;;  %183 = vmatpush.bf16.msra.mxu3 %v147_v24 }
  0x16   :  { %164 = vmatmul.msk.bf16.vlgmr.msra.gmra.mxu0 %vm68_vm1, %v168_v25  ;;  %165 = vmatmul.msk.bf16.vlgmr.msra.gmra.mxu2 %vm68_vm1, %v169_v26 }
  0x17   :  { %166 = vmatmul.msk.bf16.vlgmr.msra.gmra.mxu1 %vm68_vm1, %v168_v25  ;;  %167 = vmatmul.msk.bf16.vlgmr.msra.gmra.mxu3 %vm68_vm1, %v169_v26 }
  0x93   :  { %v91_v27 = vpop.f32.mrf.mxu0 }
  0x94   :  { %v110_v28 = vpop.f32.mrf.mxu1 }
  0x95   :  { %v120_v29 = vpack.c.bf16 %v110_v28, %v91_v27 }
  0x97   :  { %124 = vst [vmem:[%s258_s2] sm:$0xff] %v120_v29 }
  0x99   :  { %v96_v30 = vpop.f32.mrf.mxu2 }
  0x9a   :  { %v115_v31 = vpop.f32.mrf.mxu3 }
  0x9b   :  { %v122_v32 = vpack.c.bf16 %v115_v31, %v96_v30  ;;  %v93_v33 = vpop.f32.mrf.mxu0 }
  0x9c   :  { %v112_v34 = vpop.f32.mrf.mxu1 }
  0x9d   :  { %126 = vst [vmem:[%s258_s2 + $0x10] sm:$0xff] %v122_v32  ;;  %v121_v35 = vpack.c.bf16 %v112_v34, %v93_v33 }
  0x9f   :  { %125 = vst [vmem:[%s258_s2 + $0x8] sm:$0xff] %v121_v35 }
  0xa1   :  { %v98_v36 = vpop.f32.mrf.mxu2 }
  0xa2   :  { %v117_v37 = vpop.f32.mrf.mxu3 }
  0xa3   :  { %v123_v38 = vpack.c.bf16 %v117_v37, %v98_v36 }
  0xa5   :  { %127 = vst [vmem:[%s258_s2 + $0x18] sm:$0xff] %v123_v38 }

// kernel: pspnet_forward.120
= control target key start
LH: loop header
LB: loop body
LE: loop exit
PB: predicated region body
PF: predicated region fallthrough
CT: control target
= control target key end

     0   :  { %vm77_vm0 = vcmask 523264   ;;  %s300_s1 = inlined_call_operand.vmem [shape: bf16[64,128], index: 1, kind: input, shape index: {}]   ;;  %s301_s2 = inlined_call_operand.vmem [shape: f32[4,128], index: 2, kind: input, shape index: {}]   ;;  %s302_s0 = inlined_call_operand.vmem [shape: bf16[64,64], index: 0, kind: input, shape index: {}]   ;;  %s303_s3 = inlined_call_operand.vmem [shape: bf16[64,128], index: 3, kind: output, shape index: {}]  }
   0x1   :  { %v200_v0 = vld [vmem:[%s300_s1 + $0x18] sm:$0xff]  ;;  %v199_v1 = vld [vmem:[%s300_s1 + $0x10] sm:$0xff]  ;;  %v198_v2 = vld [vmem:[%s300_s1 + $0x8] sm:$0xff] }
   0x2   :  { %94 = vmatpush.bf16.msra.mxu0 %v200_v0  ;;  %224 = vmatpush.bf16.msra.mxu1 %v200_v0  ;;  %v197_v3 = vld [vmem:[%s300_s1] sm:$0xff]  ;;  %v194_v5 = vld [vmem:[%s302_s0 + $0x8] sm:$0xff]  ;;  %v195_v6 = vld [vmem:[%s302_s0 + $0x10] sm:$0xff] }
   0x3   :  { %225 = vmatpush.bf16.msra.mxu2 %v200_v0  ;;  %226 = vmatpush.bf16.msra.mxu3 %v200_v0  ;;  %v193_v4 = vld [vmem:[%s302_s0] sm:$0xff]  ;;  %v196_v7 = vld [vmem:[%s302_s0 + $0x18] sm:$0xff] }
   0x4   :  { %v236_v10 = vld [vmem:[%s301_s2] ss:$0 sm:$0xff]  ;;  %v237_v12 = vld [vmem:[%s301_s2 + $0x1] ss:$0 sm:$0xff] }
   0x6   :  { %95 = vmatpush.bf16.msra.mxu0 %v199_v1  ;;  %227 = vmatpush.bf16.msra.mxu1 %v199_v1 }
   0x7   :  { %228 = vmatpush.bf16.msra.mxu2 %v199_v1  ;;  %229 = vmatpush.bf16.msra.mxu3 %v199_v1 }
   0xa   :  { %96 = vmatpush.bf16.msra.mxu0 %v198_v2  ;;  %230 = vmatpush.bf16.msra.mxu1 %v198_v2 }
   0xb   :  { %231 = vmatpush.bf16.msra.mxu2 %v198_v2  ;;  %232 = vmatpush.bf16.msra.mxu3 %v198_v2 }
   0xe   :  { %97 = vmatpush.bf16.msra.mxu0 %v197_v3  ;;  %233 = vmatpush.bf16.msra.mxu1 %v197_v3 }
   0xf   :  { %234 = vmatpush.bf16.msra.mxu2 %v197_v3  ;;  %235 = vmatpush.bf16.msra.mxu3 %v197_v3 }
  0x11   :  { %189 = vmatmul.msk.bf16.vlgmr.msra.gmra.mxu0 %vm77_vm0, %v193_v4  ;;  %190 = vmatmul.msk.bf16.vlgmr.msra.gmra.mxu1 %vm77_vm0, %v194_v5 }
  0x12   :  { %191 = vmatmul.msk.bf16.vlgmr.msra.gmra.mxu2 %vm77_vm0, %v195_v6  ;;  %192 = vmatmul.msk.bf16.vlgmr.msra.gmra.mxu3 %vm77_vm0, %v196_v7 }
  0x8e   :  { %v99_v8 = vpop.f32.mrf.mxu0  ;;  %v104_v9 = vpop.f32.mrf.mxu1 }
  0x8f   :  { %v100_v11 = vadd.f32 %v236_v10, %v99_v8  ;;  %v105_v13 = vadd.f32 %v236_v10, %v104_v9 }
  0x91   :  { %v121_v18 = vmul.f32 %v237_v12, %v100_v11  ;;  %v123_v19 = vmul.f32 %v237_v12, %v105_v13 }
  0x93   :  { %v129_v26 = vmax.f32 %v100_v11, %v121_v18  ;;  %v131_v27 = vmax.f32 %v105_v13, %v123_v19 }
  0x95   :  { %v109_v14 = vpop.f32.mrf.mxu2  ;;  %v114_v15 = vpop.f32.mrf.mxu3 }
  0x96   :  { %v101_v16 = vpop.f32.mrf.mxu0  ;;  %v106_v17 = vpop.f32.mrf.mxu1  ;;  %v110_v24 = vadd.f32 %v236_v10, %v109_v14  ;;  %v115_v25 = vadd.f32 %v236_v10, %v114_v15 }
  0x97   :  { %v102_v20 = vadd.f32 %v236_v10, %v101_v16  ;;  %v107_v21 = vadd.f32 %v236_v10, %v106_v17 }
  0x98   :  { %v125_v34 = vmul.f32 %v237_v12, %v110_v24  ;;  %v127_v35 = vmul.f32 %v237_v12, %v115_v25 }
  0x99   :  { %v122_v22 = vmul.f32 %v237_v12, %v102_v20  ;;  %v124_v23 = vmul.f32 %v237_v12, %v107_v21 }
  0x9a   :  { %v133_v40 = vmax.f32 %v110_v24, %v125_v34  ;;  %v135_v41 = vmax.f32 %v115_v25, %v127_v35 }
  0x9b   :  { %v130_v28 = vmax.f32 %v102_v20, %v122_v22  ;;  %v132_v29 = vmax.f32 %v107_v21, %v124_v23 }
  0x9d   :  { %v204_v30 = vpack.c.bf16 %v130_v28, %v129_v26  ;;  %v209_v31 = vpack.c.bf16 %v132_v29, %v131_v27  ;;  %v111_v32 = vpop.f32.mrf.mxu2  ;;  %v116_v33 = vpop.f32.mrf.mxu3 }
  0x9e   :  { %v112_v36 = vadd.f32 %v236_v10, %v111_v32  ;;  %v117_v37 = vadd.f32 %v236_v10, %v116_v33 }
  0x9f   :  { %205 = vst [vmem:[%s303_s3] sm:$0xff] %v204_v30  }
  0xa0   :  { %221 = vst [vmem:[%s303_s3 + $0x8] sm:$0xff] %v209_v31   ;;  %v126_v38 = vmul.f32 %v237_v12, %v112_v36  ;;  %v128_v39 = vmul.f32 %v237_v12, %v117_v37 }
  0xa2   :  { %v134_v42 = vmax.f32 %v112_v36, %v126_v38  ;;  %v136_v43 = vmax.f32 %v117_v37, %v128_v39 }
  0xa4   :  { %v214_v44 = vpack.c.bf16 %v134_v42, %v133_v40  ;;  %v219_v45 = vpack.c.bf16 %v136_v43, %v135_v41 }
  0xa6   :  { %222 = vst [vmem:[%s303_s3 + $0x10] sm:$0xff] %v214_v44  }
  0xa7   :  { %223 = vst [vmem:[%s303_s3 + $0x18] sm:$0xff] %v219_v45  }

// kernel: pspnet_forward.121
= control target key start
LH: loop header
LB: loop body
LE: loop exit
PB: predicated region body
PF: predicated region fallthrough
CT: control target
= control target key end

     0   :  { %vm86_vm0 = vcmask 1042432   ;;  %vm73_vm1 = vcmask 441344   ;;  %s281_s1 = inlined_call_operand.vmem [shape: bf16[54,128], index: 1, kind: input, shape index: {}]   ;;  %s282_s2 = inlined_call_operand.vmem [shape: f32[4,128], index: 2, kind: input, shape index: {}]   ;;  %s283_s0 = inlined_call_operand.vmem [shape: bf16[64,54], index: 0, kind: input, shape index: {}]   ;;  %s284_s3 = inlined_call_operand.vmem [shape: bf16[64,128], index: 3, kind: output, shape index: {}]  }
   0x1   :  { %v29_v0 = vld [vmem:[%s281_s1 + $0x18] sm:$0x7]  ;;  %v185_v4 = vld [vmem:[%s281_s1 + $0x10] sm:$0xff]  ;;  %v184_v5 = vld [vmem:[%s281_s1 + $0x8] sm:$0xff] }
   0x2   :  { %v65_v1 = vunpack.c.l.b16 %v29_v0  ;;  %v183_v6 = vld [vmem:[%s281_s1] sm:$0xff]  ;;  %v180_v8 = vld [vmem:[%s283_s0 + $0x8] sm:$0xff]  ;;  %v181_v9 = vld [vmem:[%s283_s0 + $0x10] sm:$0xff] }
   0x3   :  { %v179_v7 = vld [vmem:[%s283_s0] sm:$0xff]  ;;  %v182_v10 = vld [vmem:[%s283_s0 + $0x18] sm:$0xff] }
   0x4   :  { %v69_v2 = vpack.c.b16 %v65_v1, %v65_v1  ;;  %v221_v13 = vld [vmem:[%s282_s2] ss:$0 sm:$0xff] }
   0x6   :  { %v88_v3 = vsel %vm86_vm0, %v69_v2, 0 }
   0x7   :  { %94 = vmatpush.bf16.msra.mxu0 %v88_v3  ;;  %209 = vmatpush.bf16.msra.mxu1 %v88_v3 }
   0x8   :  { %210 = vmatpush.bf16.msra.mxu2 %v88_v3  ;;  %211 = vmatpush.bf16.msra.mxu3 %v88_v3 }
   0xb   :  { %95 = vmatpush.bf16.msra.mxu0 %v185_v4  ;;  %212 = vmatpush.bf16.msra.mxu1 %v185_v4 }
   0xc   :  { %213 = vmatpush.bf16.msra.mxu2 %v185_v4  ;;  %214 = vmatpush.bf16.msra.mxu3 %v185_v4 }
   0xf   :  { %96 = vmatpush.bf16.msra.mxu0 %v184_v5  ;;  %215 = vmatpush.bf16.msra.mxu1 %v184_v5 }
  0x10   :  { %216 = vmatpush.bf16.msra.mxu2 %v184_v5  ;;  %217 = vmatpush.bf16.msra.mxu3 %v184_v5 }
  0x13   :  { %97 = vmatpush.bf16.msra.mxu0 %v183_v6  ;;  %218 = vmatpush.bf16.msra.mxu1 %v183_v6 }
  0x14   :  { %219 = vmatpush.bf16.msra.mxu2 %v183_v6  ;;  %220 = vmatpush.bf16.msra.mxu3 %v183_v6 }
  0x16   :  { %175 = vmatmul.msk.bf16.vlgmr.msra.gmra.mxu0 %vm73_vm1, %v179_v7  ;;  %176 = vmatmul.msk.bf16.vlgmr.msra.gmra.mxu1 %vm73_vm1, %v180_v8 }
  0x17   :  { %177 = vmatmul.msk.bf16.vlgmr.msra.gmra.mxu2 %vm73_vm1, %v181_v9  ;;  %178 = vmatmul.msk.bf16.vlgmr.msra.gmra.mxu3 %vm73_vm1, %v182_v10 }
  0x93   :  { %v99_v11 = vpop.f32.mrf.mxu0  ;;  %v104_v12 = vpop.f32.mrf.mxu1 }
  0x94   :  { %v100_v14 = vadd.f32 %v221_v13, %v99_v11  ;;  %v105_v15 = vadd.f32 %v221_v13, %v104_v12 }
  0x96   :  { %v119_v22 = vmax.f32 %v100_v14, 0.0  ;;  %v121_v23 = vmax.f32 %v105_v15, 0.0 }
  0x9a   :  { %v109_v16 = vpop.f32.mrf.mxu2  ;;  %v114_v17 = vpop.f32.mrf.mxu3 }
  0x9b   :  { %v101_v18 = vpop.f32.mrf.mxu0  ;;  %v106_v19 = vpop.f32.mrf.mxu1  ;;  %v110_v28 = vadd.f32 %v221_v13, %v109_v16  ;;  %v115_v29 = vadd.f32 %v221_v13, %v114_v17 }
  0x9c   :  { %v102_v20 = vadd.f32 %v221_v13, %v101_v18  ;;  %v107_v21 = vadd.f32 %v221_v13, %v106_v19 }
  0x9d   :  { %v123_v34 = vmax.f32 %v110_v28, 0.0  ;;  %v125_v35 = vmax.f32 %v115_v29, 0.0 }
  0x9e   :  { %v120_v24 = vmax.f32 %v102_v20, 0.0  ;;  %v122_v25 = vmax.f32 %v107_v21, 0.0 }
  0xa0   :  { %v189_v26 = vpack.c.bf16 %v120_v24, %v119_v22  ;;  %v194_v27 = vpack.c.bf16 %v122_v25, %v121_v23 }
  0xa2   :  { %190 = vst [vmem:[%s284_s3] sm:$0xff] %v189_v26   ;;  %v111_v30 = vpop.f32.mrf.mxu2  ;;  %v116_v31 = vpop.f32.mrf.mxu3 }
  0xa3   :  { %206 = vst [vmem:[%s284_s3 + $0x8] sm:$0xff] %v194_v27   ;;  %v112_v32 = vadd.f32 %v221_v13, %v111_v30  ;;  %v117_v33 = vadd.f32 %v221_v13, %v116_v31 }
  0xa5   :  { %v124_v36 = vmax.f32 %v112_v32, 0.0  ;;  %v126_v37 = vmax.f32 %v117_v33, 0.0 }
  0xa7   :  { %v199_v38 = vpack.c.bf16 %v124_v36, %v123_v34  ;;  %v204_v39 = vpack.c.bf16 %v126_v37, %v125_v35 }
  0xa9   :  { %207 = vst [vmem:[%s284_s3 + $0x10] sm:$0xff] %v199_v38  }
  0xaa   :  { %208 = vst [vmem:[%s284_s3 + $0x18] sm:$0xff] %v204_v39  }

// kernel: pspnet_forward.122
= control target key start
LH: loop header
LB: loop body
LE: loop exit
PB: predicated region body
PF: predicated region fallthrough
CT: control target
= control target key end

     0   :  { %vm59_vm0 = vcmask 1042432   ;;  %vm46_vm1 = vcmask 48128   ;;  %s249_s1 = inlined_call_operand.vmem [shape: bf16[6,128], index: 1, kind: input, shape index: {}]   ;;  %s250_s0 = inlined_call_operand.vmem [shape: bf16[64,6], index: 0, kind: input, shape index: {}]   ;;  %s251_s2 = inlined_call_operand.vmem [shape: f32[4,128], index: 2, kind: input, shape index: {}]   ;;  %s252_s3 = inlined_call_operand.vmem [shape: bf16[64,128], index: 3, kind: output, shape index: {}]  }
   0x1   :  { %v23_v0 = vld [vmem:[%s249_s1] sm:$0x7]  ;;  %v161_v3 = vld [vmem:[%s250_s0 + $0x8] sm:$0xff]  ;;  %v162_v4 = vld [vmem:[%s250_s0 + $0x10] sm:$0xff] }
   0x2   :  { %v160_v1 = vld [vmem:[%s250_s0] sm:$0xff]  ;;  %v61_v2 = vsel %vm59_vm0, %v23_v0, 0  ;;  %v163_v5 = vld [vmem:[%s250_s0 + $0x18] sm:$0xff] }
   0x3   :  { %70 = vmatpush.bf16.msra.mxu0 %v61_v2  ;;  %187 = vmatpush.bf16.msra.mxu1 %v61_v2  ;;  %v190_v6 = vld [vmem:[%s251_s2] ss:$0 sm:$0xff]  ;;  %v191_v12 = vld [vmem:[%s251_s2 + $0x2] ss:$0 sm:$0xff]  ;;  %v192_v23 = vld [vmem:[%s251_s2 + $0x3] ss:$0 sm:$0xff] }
   0x4   :  { %188 = vmatpush.bf16.msra.mxu2 %v61_v2  ;;  %189 = vmatpush.bf16.msra.mxu3 %v61_v2 }
   0x6   :  { %156 = vmatmul.msk.bf16.vlgmr.msra.gmra.mxu0 %vm46_vm1, %v160_v1  ;;  %157 = vmatmul.msk.bf16.vlgmr.msra.gmra.mxu1 %vm46_vm1, %v161_v3 }
   0x7   :  { %158 = vmatmul.msk.bf16.vlgmr.msra.gmra.mxu2 %vm46_vm1, %v162_v4  ;;  %159 = vmatmul.msk.bf16.vlgmr.msra.gmra.mxu3 %vm46_vm1, %v163_v5 }
  0x83   :  { %v72_v7 = vpop.f32.mrf.mxu0  ;;  %v77_v8 = vpop.f32.mrf.mxu1 }
  0x84   :  { %v73_v9 = vadd.f32 %v190_v6, %v72_v7  ;;  %v78_v10 = vadd.f32 %v190_v6, %v77_v8 }
  0x86   :  { %v92_v11 = vmax.f32 %v73_v9, 0.0  ;;  %v94_v13 = vmax.f32 %v78_v10, 0.0 }
  0x88   :  { %v102_v22 = vmul.f32 %v191_v12, %v92_v11  ;;  %v104_v24 = vmul.f32 %v191_v12, %v94_v13 }
  0x8a   :  { %v82_v14 = vpop.f32.mrf.mxu2  ;;  %v87_v15 = vpop.f32.mrf.mxu3  ;;  %v112_v31 = vadd.f32 %v192_v23, %v102_v22  ;;  %v114_v32 = vadd.f32 %v192_v23, %v104_v24 }
  0x8b   :  { %v74_v16 = vpop.f32.mrf.mxu0  ;;  %v79_v17 = vpop.f32.mrf.mxu1  ;;  %v83_v20 = vadd.f32 %v190_v6, %v82_v14  ;;  %v88_v21 = vadd.f32 %v190_v6, %v87_v15 }
  0x8c   :  { %v75_v18 = vadd.f32 %v190_v6, %v74_v16  ;;  %v80_v19 = vadd.f32 %v190_v6, %v79_v17 }
  0x8d   :  { %v96_v29 = vmax.f32 %v83_v20, 0.0  ;;  %v98_v30 = vmax.f32 %v88_v21, 0.0 }
  0x8e   :  { %v93_v25 = vmax.f32 %v75_v18, 0.0  ;;  %v95_v26 = vmax.f32 %v80_v19, 0.0 }
  0x8f   :  { %v106_v41 = vmul.f32 %v191_v12, %v96_v29  ;;  %v108_v42 = vmul.f32 %v191_v12, %v98_v30 }
  0x90   :  { %v103_v27 = vmul.f32 %v191_v12, %v93_v25  ;;  %v105_v28 = vmul.f32 %v191_v12, %v95_v26 }
  0x91   :  { %v116_v47 = vadd.f32 %v192_v23, %v106_v41  ;;  %v118_v48 = vadd.f32 %v192_v23, %v108_v42 }
  0x92   :  { %v113_v33 = vadd.f32 %v192_v23, %v103_v27  ;;  %v115_v34 = vadd.f32 %v192_v23, %v105_v28  ;;  %v84_v35 = vpop.f32.mrf.mxu2  ;;  %v89_v36 = vpop.f32.mrf.mxu3 }
  0x93   :  { %v85_v37 = vadd.f32 %v190_v6, %v84_v35  ;;  %v90_v38 = vadd.f32 %v190_v6, %v89_v36 }
  0x94   :  { %v167_v39 = vpack.c.bf16 %v113_v33, %v112_v31  ;;  %v172_v40 = vpack.c.bf16 %v115_v34, %v114_v32 }
  0x95   :  { %v97_v43 = vmax.f32 %v85_v37, 0.0  ;;  %v99_v44 = vmax.f32 %v90_v38, 0.0 }
  0x96   :  { %168 = vst [vmem:[%s252_s3] sm:$0xff] %v167_v39  }
  0x97   :  { %184 = vst [vmem:[%s252_s3 + $0x8] sm:$0xff] %v172_v40   ;;  %v107_v45 = vmul.f32 %v191_v12, %v97_v43  ;;  %v109_v46 = vmul.f32 %v191_v12, %v99_v44 }
  0x99   :  { %v117_v49 = vadd.f32 %v192_v23, %v107_v45  ;;  %v119_v50 = vadd.f32 %v192_v23, %v109_v46 }
  0x9b   :  { %v177_v51 = vpack.c.bf16 %v117_v49, %v116_v47  ;;  %v182_v52 = vpack.c.bf16 %v119_v50, %v118_v48 }
  0x9d   :  { %185 = vst [vmem:[%s252_s3 + $0x10] sm:$0xff] %v177_v51  }
  0x9e   :  { %186 = vst [vmem:[%s252_s3 + $0x18] sm:$0xff] %v182_v52  }

// kernel: pspnet_forward.119
= control target key start
LH: loop header
LB: loop body
LE: loop exit
PB: predicated region body
PF: predicated region fallthrough
CT: control target
= control target key end

     0   :  { %s4272_s1 = inlined_call_operand.vmem [shape: bf16[2304,128], index: 1, kind: input, shape index: {}]   ;;  %s4273_s2 = inlined_call_operand.vmem [shape: f32[4,128], index: 2, kind: input, shape index: {}]   ;;  %s4274_s0 = inlined_call_operand.vmem [shape: bf16[64,2304], index: 0, kind: input, shape index: {}]   ;;  %s4275_s3 = inlined_call_operand.vmem [shape: bf16[64,128], index: 3, kind: output, shape index: {}]  }
   0x1   :  { %v3093_v0 = vld [vmem:[%s4272_s1 + $0x38] sm:$0xff]  ;;  %v3092_v2 = vld [vmem:[%s4272_s1 + $0x30] sm:$0xff]  ;;  %v3091_v4 = vld [vmem:[%s4272_s1 + $0x28] sm:$0xff] }
   0x2   :  { %v3101_v1 = vld [vmem:[%s4272_s1 + $0x78] sm:$0xff]  ;;  %3253 = vmatpush.bf16.msra.mxu2 %v3093_v0  ;;  %v3100_v3 = vld [vmem:[%s4272_s1 + $0x70] sm:$0xff]  ;;  %1600 = vmatpush.bf16.msra.mxu0 %v3093_v0  ;;  %v3099_v5 = vld [vmem:[%s4272_s1 + $0x68] sm:$0xff] }
   0x3   :  { %3261 = vmatpush.bf16.msra.mxu3 %v3101_v1  ;;  %1629 = vmatpush.bf16.msra.mxu1 %v3101_v1  ;;  %v3090_v6 = vld [vmem:[%s4272_s1 + $0x20] sm:$0xff]  ;;  %v3089_v8 = vld [vmem:[%s4272_s1 + $0x18] sm:$0xff]  ;;  %v3088_v10 = vld [vmem:[%s4272_s1 + $0x10] sm:$0xff] }
   0x4   :  { %v3098_v7 = vld [vmem:[%s4272_s1 + $0x60] sm:$0xff]  ;;  %v3097_v9 = vld [vmem:[%s4272_s1 + $0x58] sm:$0xff]  ;;  %v3096_v11 = vld [vmem:[%s4272_s1 + $0x50] sm:$0xff] }
   0x5   :  { %v3087_v12 = vld [vmem:[%s4272_s1 + $0x8] sm:$0xff]  ;;  %v3086_v14 = vld [vmem:[%s4272_s1] sm:$0xff]  ;;  %v3109_v20 = vld [vmem:[%s4272_s1 + $0xb8] sm:$0xff] }
   0x6   :  { %3254 = vmatpush.bf16.msra.mxu2 %v3092_v2  ;;  %1601 = vmatpush.bf16.msra.mxu0 %v3092_v2  ;;  %v3095_v13 = vld [vmem:[%s4272_s1 + $0x48] sm:$0xff]  ;;  %v3094_v15 = vld [vmem:[%s4272_s1 + $0x40] sm:$0xff]  ;;  %v3117_v23 = vld [vmem:[%s4272_s1 + $0xf8] sm:$0xff] }
   0x7   :  { %3262 = vmatpush.bf16.msra.mxu3 %v3100_v3  ;;  %1630 = vmatpush.bf16.msra.mxu1 %v3100_v3  ;;  %v2296_v16 = vld [vmem:[%s4274_s0 + $0x120] sm:$0xf]  ;;  %v3059_v17 = vld [vmem:[%s4274_s0 + $0x164] sm:$0xf0]  ;;  %v3050_v18 = vld [vmem:[%s4274_s0 + $0x124] sm:$0xf] }
   0x8   :  { %v2298_v19 = vld [vmem:[%s4274_s0 + $0x168] sm:$0xf0]  ;;  %v2152_v21 = vld [vmem:[%s4274_s0] sm:$0xf]  ;;  %v3023_v22 = vld [vmem:[%s4274_s0 + $0x44] sm:$0xf0]  ;;  %v2297_v26 = vor.u32 %v3059_v17, %v2296_v16 }
   0x9   :  { %v3014_v24 = vld [vmem:[%s4274_s0 + $0x4] sm:$0xf]  ;;  %v2154_v25 = vld [vmem:[%s4274_s0 + $0x48] sm:$0xf0]  ;;  %v2301_v27 = vor.u32 %v3050_v18, %v2298_v19  ;;  %v2153_v28 = vor.u32 %v3023_v22, %v2152_v21  ;;  %v3133_v29 = vld [vmem:[%s4272_s1 + $0x178] sm:$0xff] }
   0xa   :  { %3255 = vmatpush.bf16.msra.mxu2 %v3091_v4  ;;  %1602 = vmatpush.bf16.msra.mxu0 %v3091_v4  ;;  %v3125_v30 = vld [vmem:[%s4272_s1 + $0x138] sm:$0xff]  ;;  %v2157_v31 = vor.u32 %v3014_v24, %v2154_v25  ;;  %v3108_v32 = vld [vmem:[%s4272_s1 + $0xb0] sm:$0xff]  ;;  %v3107_v36 = vld [vmem:[%s4272_s1 + $0xa8] sm:$0xff] }
   0xb   :  { %3263 = vmatpush.bf16.msra.mxu3 %v3099_v5  ;;  %1631 = vmatpush.bf16.msra.mxu1 %v3099_v5  ;;  %v3116_v33 = vld [vmem:[%s4272_s1 + $0xf0] sm:$0xff]  ;;  %v3115_v37 = vld [vmem:[%s4272_s1 + $0xe8] sm:$0xff]  ;;  %v3106_v40 = vld [vmem:[%s4272_s1 + $0xa0] sm:$0xff] }
   0xc   :  { %v3132_v34 = vld [vmem:[%s4272_s1 + $0x170] sm:$0xff]  ;;  %v3131_v38 = vld [vmem:[%s4272_s1 + $0x168] sm:$0xff]  ;;  %v3114_v41 = vld [vmem:[%s4272_s1 + $0xe0] sm:$0xff] }
   0xd   :  { %v3124_v35 = vld [vmem:[%s4272_s1 + $0x130] sm:$0xff]  ;;  %v3123_v39 = vld [vmem:[%s4272_s1 + $0x128] sm:$0xff]  ;;  %v3122_v42 = vld [vmem:[%s4272_s1 + $0x120] sm:$0xff] }
   0xe   :  { %3256 = vmatpush.bf16.msra.mxu2 %v3090_v6  ;;  %1603 = vmatpush.bf16.msra.mxu0 %v3090_v6  ;;  %v2368_v43 = vld [vmem:[%s4274_s0 + $0x1b0] sm:$0xf]  ;;  %v3077_v44 = vld [vmem:[%s4274_s0 + $0x1f4] sm:$0xf0]  ;;  %v3068_v45 = vld [vmem:[%s4274_s0 + $0x1b4] sm:$0xf] }
   0xf   :  { %3264 = vmatpush.bf16.msra.mxu3 %v3098_v7  ;;  %1632 = vmatpush.bf16.msra.mxu1 %v3098_v7  ;;  %v2370_v46 = vld [vmem:[%s4274_s0 + $0x1f8] sm:$0xf0]  ;;  %v3130_v47 = vld [vmem:[%s4272_s1 + $0x160] sm:$0xff]  ;;  %v2224_v49 = vld [vmem:[%s4274_s0 + $0x90] sm:$0xf]  ;;  %v2369_v54 = vor.u32 %v3077_v44, %v2368_v43 }
  0x10   :  { %v3105_v48 = vld [vmem:[%s4272_s1 + $0x98] sm:$0xff]  ;;  %v3032_v52 = vld [vmem:[%s4274_s0 + $0x94] sm:$0xf]  ;;  %v2373_v55 = vor.u32 %v3068_v45, %v2370_v46  ;;  %v3103_v0 = vld [vmem:[%s4272_s1 + $0x88] sm:$0xff] }
  0x11   :  { %v3041_v50 = vld [vmem:[%s4274_s0 + $0xd4] sm:$0xf0]  ;;  %v2226_v53 = vld [vmem:[%s4274_s0 + $0xd8] sm:$0xf0]  ;;  %v3104_v60 = vld [vmem:[%s4272_s1 + $0x90] sm:$0xff] }
  0x12   :  { %3257 = vmatpush.bf16.msra.mxu2 %v3089_v8  ;;  %1604 = vmatpush.bf16.msra.mxu0 %v3089_v8  ;;  %v3113_v51 = vld [vmem:[%s4272_s1 + $0xd8] sm:$0xff]  ;;  %v2225_v56 = vor.u32 %v3041_v50, %v2224_v49  ;;  %v2229_v59 = vor.u32 %v3032_v52, %v2226_v53  ;;  %v3112_v61 = vld [vmem:[%s4272_s1 + $0xd0] sm:$0xff]  ;;  %v3111_v1 = vld [vmem:[%s4272_s1 + $0xc8] sm:$0xff] }
  0x13   :  { %3265 = vmatpush.bf16.msra.mxu3 %v3097_v9  ;;  %1633 = vmatpush.bf16.msra.mxu1 %v3097_v9  ;;  %v3129_v57 = vld [vmem:[%s4272_s1 + $0x158] sm:$0xff]  ;;  %v3128_v62 = vld [vmem:[%s4272_s1 + $0x150] sm:$0xff]  ;;  %v3127_v2 = vld [vmem:[%s4272_s1 + $0x148] sm:$0xff] }
  0x14   :  { %v3121_v58 = vld [vmem:[%s4272_s1 + $0x118] sm:$0xff]  ;;  %v3120_v63 = vld [vmem:[%s4272_s1 + $0x110] sm:$0xff]  ;;  %v3119_v3 = vld [vmem:[%s4272_s1 + $0x108] sm:$0xff] }
  0x15   :  { %v3102_v4 = vld [vmem:[%s4272_s1 + $0x80] sm:$0xff]  ;;  %v2160_v6 = vld [vmem:[%s4274_s0 + $0x8] sm:$0xf]  ;;  %v3024_v8 = vld [vmem:[%s4274_s0 + $0x4c] sm:$0xf0] }
  0x16   :  { %3258 = vmatpush.bf16.msra.mxu2 %v3088_v10  ;;  %1605 = vmatpush.bf16.msra.mxu0 %v3088_v10  ;;  %v3110_v5 = vld [vmem:[%s4272_s1 + $0xc0] sm:$0xff]  ;;  %v3141_v9 = vld [vmem:[%s4272_s1 + $0x1b8] sm:$0xff]  ;;  %v3016_v17 = vld [vmem:[%s4274_s0 + $0x14] sm:$0xf] }
  0x17   :  { %3266 = vmatpush.bf16.msra.mxu3 %v3096_v11  ;;  %1634 = vmatpush.bf16.msra.mxu1 %v3096_v11  ;;  %v3118_v7 = vld [vmem:[%s4272_s1 + $0x100] sm:$0xff]  ;;  %v3149_v10 = vld [vmem:[%s4272_s1 + $0x1f8] sm:$0xff]  ;;  %v3015_v11 = vld [vmem:[%s4274_s0 + $0xc] sm:$0xf] }
  0x18   :  { %v3165_v16 = vld [vmem:[%s4272_s1 + $0x278] sm:$0xff]  ;;  %v3148_v25 = vld [vmem:[%s4272_s1 + $0x1f0] sm:$0xff]  ;;  %v3034_v43 = vld [vmem:[%s4274_s0 + $0xa4] sm:$0xf] }
  0x19   :  { %v2170_v18 = vld [vmem:[%s4274_s0 + $0x58] sm:$0xf0]  ;;  %v2242_v45 = vld [vmem:[%s4274_s0 + $0xe8] sm:$0xf0]  ;;  %v3144_v53 = vld [vmem:[%s4272_s1 + $0x1d0] sm:$0xff] }
  0x1a   :  { %3259 = vmatpush.bf16.msra.mxu2 %v3087_v12  ;;  %1606 = vmatpush.bf16.msra.mxu0 %v3087_v12  ;;  %v2162_v12 = vld [vmem:[%s4274_s0 + $0x50] sm:$0xf0]  ;;  %v3157_v19 = vld [vmem:[%s4272_s1 + $0x238] sm:$0xff]  ;;  %v2173_v24 = vor.u32 %v3016_v17, %v2170_v18  ;;  %v2245_v52 = vor.u32 %v3034_v43, %v2242_v45  ;;  %v3027_v43 = vld [vmem:[%s4274_s0 + $0x64] sm:$0xf0] }
  0x1b   :  { %3267 = vmatpush.bf16.msra.mxu3 %v3095_v13  ;;  %1635 = vmatpush.bf16.msra.mxu1 %v3095_v13  ;;  %v3126_v13 = vld [vmem:[%s4272_s1 + $0x140] sm:$0xff]  ;;  %v2165_v21 = vor.u32 %v3015_v11, %v2162_v12  ;;  %v3145_v44 = vld [vmem:[%s4272_s1 + $0x1d8] sm:$0xff]  ;;  %v2186_v45 = vld [vmem:[%s4274_s0 + $0x68] sm:$0xf0] }
  0x1c   :  { %v3153_v46 = vld [vmem:[%s4272_s1 + $0x218] sm:$0xff]  ;;  %v3158_v11 = vld [vmem:[%s4272_s1 + $0x240] sm:$0xff] }
  0x1d   :  { %v3173_v12 = vld [vmem:[%s4272_s1 + $0x2b8] sm:$0xff] }
  0x1e   :  { %3260 = vmatpush.bf16.msra.mxu2 %v3086_v14  ;;  %1607 = vmatpush.bf16.msra.mxu0 %v3086_v14  ;;  %v2168_v14 = vld [vmem:[%s4274_s0 + $0x10] sm:$0xf]  ;;  %v3197_v17 = vld [vmem:[%s4272_s1 + $0x378] sm:$0xff] }
  0x1f   :  { %3268 = vmatpush.bf16.msra.mxu3 %v3094_v15  ;;  %1636 = vmatpush.bf16.msra.mxu1 %v3094_v15  ;;  %v3025_v15 = vld [vmem:[%s4274_s0 + $0x54] sm:$0xf0] }
  0x20   :  { %v2169_v22 = vor.u32 %v3025_v15, %v2168_v14  ;;  %v3172_v14 = vld [vmem:[%s4272_s1 + $0x2b0] sm:$0xff]  ;;  %v3189_v15 = vld [vmem:[%s4272_s1 + $0x338] sm:$0xff] }
  0x21   :  { %1618 = vmatmul.bf16.vlgmr.msra.gmra.mxu2 %v2297_v26  ;;  %1608 = vmatmul.bf16.vlgmr.msra.gmra.mxu0 %v2153_v28  ;;  %v3156_v26 = vld [vmem:[%s4272_s1 + $0x230] sm:$0xff]  ;;  %v3139_v28 = vld [vmem:[%s4272_s1 + $0x1a8] sm:$0xff]  ;;  %v2376_v18 = vld [vmem:[%s4274_s0 + $0x1b8] sm:$0xf] }
  0x22   :  { %1658 = vmatpush.bf16.msrb.mxu2 %v3109_v20  ;;  %1647 = vmatmul.bf16.vlgmr.msra.gmra.mxu3 %v2301_v27  ;;  %v2161_v20 = vor.u32 %v3024_v8, %v2160_v6  ;;  %v3164_v27 = vld [vmem:[%s4272_s1 + $0x270] sm:$0xff]  ;;  %v2314_v6 = vld [vmem:[%s4274_s0 + $0x178] sm:$0xf0] }
  0x23   :  { %1687 = vmatpush.bf16.msrb.mxu3 %v3117_v23  ;;  %1745 = vmatpush.bf16.msrb.mxu1 %v3133_v29  ;;  %v3140_v23 = vld [vmem:[%s4272_s1 + $0x1b0] sm:$0xff]  ;;  %v3147_v29 = vld [vmem:[%s4272_s1 + $0x1e8] sm:$0xff] }
  0x24   :  { %1716 = vmatpush.bf16.msrb.mxu0 %v3125_v30  ;;  %1637 = vmatmul.bf16.vlgmr.msra.gmra.mxu1 %v2157_v31  ;;  %v3155_v30 = vld [vmem:[%s4272_s1 + $0x228] sm:$0xff] }
  0x25   :  { %v3163_v31 = vld [vmem:[%s4272_s1 + $0x268] sm:$0xff] }
  0x26   :  { %1659 = vmatpush.bf16.msrb.mxu2 %v3108_v32  ;;  %v3138_v32 = vld [vmem:[%s4272_s1 + $0x1a0] sm:$0xff] }
  0x27   :  { %1688 = vmatpush.bf16.msrb.mxu3 %v3116_v33  ;;  %1746 = vmatpush.bf16.msrb.mxu1 %v3132_v34  ;;  %v3146_v33 = vld [vmem:[%s4272_s1 + $0x1e0] sm:$0xff] }
  0x28   :  { %1717 = vmatpush.bf16.msrb.mxu0 %v3124_v35  ;;  %v3154_v34 = vld [vmem:[%s4272_s1 + $0x220] sm:$0xff] }
  0x29   :  { %v3162_v35 = vld [vmem:[%s4272_s1 + $0x260] sm:$0xff] }
  0x2a   :  { %1660 = vmatpush.bf16.msrb.mxu2 %v3107_v36  ;;  %v2232_v36 = vld [vmem:[%s4274_s0 + $0x98] sm:$0xf] }
  0x2b   :  { %1689 = vmatpush.bf16.msrb.mxu3 %v3115_v37  ;;  %1747 = vmatpush.bf16.msrb.mxu1 %v3131_v38  ;;  %v3042_v37 = vld [vmem:[%s4274_s0 + $0xdc] sm:$0xf0]  ;;  %v3033_v38 = vld [vmem:[%s4274_s0 + $0x9c] sm:$0xf] }
  0x2c   :  { %1718 = vmatpush.bf16.msrb.mxu0 %v3123_v39  ;;  %v2234_v39 = vld [vmem:[%s4274_s0 + $0xe0] sm:$0xf0] }
  0x2d   :  { %v2237_v49 = vor.u32 %v3033_v38, %v2234_v39  ;;  %v2176_v38 = vld [vmem:[%s4274_s0 + $0x18] sm:$0xf]  ;;  %v3026_v39 = vld [vmem:[%s4274_s0 + $0x5c] sm:$0xf0] }
  0x2e   :  { %1661 = vmatpush.bf16.msrb.mxu2 %v3106_v40  ;;  %v2240_v40 = vld [vmem:[%s4274_s0 + $0xa0] sm:$0xf] }
  0x2f   :  { %1690 = vmatpush.bf16.msrb.mxu3 %v3114_v41  ;;  %1748 = vmatpush.bf16.msrb.mxu1 %v3130_v47  ;;  %v3137_v41 = vld [vmem:[%s4272_s1 + $0x198] sm:$0xff] }
  0x30   :  { %1719 = vmatpush.bf16.msrb.mxu0 %v3122_v42  ;;  %v3043_v42 = vld [vmem:[%s4274_s0 + $0xe4] sm:$0xf0]  ;;  %v3161_v47 = vld [vmem:[%s4272_s1 + $0x258] sm:$0xff] }
  0x31   :  { %1623 = vmatmul.bf16.gmra.mxu2 %v2369_v54  ;;  %1613 = vmatmul.bf16.gmra.mxu0 %v2225_v56  ;;  %v2241_v50 = vor.u32 %v3043_v42, %v2240_v40  ;;  %v3135_v54 = vld [vmem:[%s4272_s1 + $0x188] sm:$0xff]  ;;  %v3017_v40 = vld [vmem:[%s4274_s0 + $0x1c] sm:$0xf]  ;;  %v2184_v42 = vld [vmem:[%s4274_s0 + $0x20] sm:$0xf] }
  0x32   :  { %1662 = vmatpush.bf16.msrb.mxu2 %v3105_v48  ;;  %1652 = vmatmul.bf16.gmra.mxu3 %v2373_v55  ;;  %v2233_v48 = vor.u32 %v3042_v37, %v2232_v36  ;;  %v3152_v55 = vld [vmem:[%s4272_s1 + $0x210] sm:$0xff]  ;;  %v3143_v56 = vld [vmem:[%s4272_s1 + $0x1c8] sm:$0xff] }
  0x33   :  { %1691 = vmatpush.bf16.msrb.mxu3 %v3113_v51  ;;  %1749 = vmatpush.bf16.msrb.mxu1 %v3129_v57  ;;  %v3136_v51 = vld [vmem:[%s4272_s1 + $0x190] sm:$0xff]  ;;  %v3187_v36 = vld [vmem:[%s4272_s1 + $0x328] sm:$0xff] }
  0x34   :  { %1720 = vmatpush.bf16.msrb.mxu0 %v3121_v58  ;;  %1642 = vmatmul.bf16.gmra.mxu1 %v2229_v59  ;;  %v3160_v57 = vld [vmem:[%s4272_s1 + $0x250] sm:$0xff]  ;;  %v3151_v58 = vld [vmem:[%s4272_s1 + $0x208] sm:$0xff] }
  0x35   :  { %v3159_v59 = vld [vmem:[%s4272_s1 + $0x248] sm:$0xff] }
  0x36   :  { %1663 = vmatpush.bf16.msrb.mxu2 %v3104_v60  ;;  %v3134_v60 = vld [vmem:[%s4272_s1 + $0x180] sm:$0xff]  ;;  %v3195_v37 = vld [vmem:[%s4272_s1 + $0x368] sm:$0xff] }
  0x37   :  { %1692 = vmatpush.bf16.msrb.mxu3 %v3112_v61  ;;  %1750 = vmatpush.bf16.msrb.mxu1 %v3128_v62  ;;  %v3142_v61 = vld [vmem:[%s4272_s1 + $0x1c0] sm:$0xff] }
  0x38   :  { %1721 = vmatpush.bf16.msrb.mxu0 %v3120_v63  ;;  %v3150_v62 = vld [vmem:[%s4272_s1 + $0x200] sm:$0xff]  ;;  %v2304_v63 = vld [vmem:[%s4274_s0 + $0x128] sm:$0xf] }
  0x3a   :  { %1664 = vmatpush.bf16.msrb.mxu2 %v3103_v0  ;;  %v3060_v0 = vld [vmem:[%s4274_s0 + $0x16c] sm:$0xf0] }
  0x3b   :  { %1693 = vmatpush.bf16.msrb.mxu3 %v3111_v1  ;;  %1751 = vmatpush.bf16.msrb.mxu1 %v3127_v2  ;;  %v3051_v1 = vld [vmem:[%s4274_s0 + $0x12c] sm:$0xf]  ;;  %v2306_v2 = vld [vmem:[%s4274_s0 + $0x170] sm:$0xf0] }
  0x3c   :  { %1722 = vmatpush.bf16.msrb.mxu0 %v3119_v3  ;;  %v2312_v3 = vld [vmem:[%s4274_s0 + $0x130] sm:$0xf]  ;;  %v2309_v8 = vor.u32 %v3051_v1, %v2306_v2 }
  0x3e   :  { %1665 = vmatpush.bf16.msrb.mxu2 %v3102_v4  ;;  %v3061_v4 = vld [vmem:[%s4274_s0 + $0x174] sm:$0xf0] }
  0x3f   :  { %1694 = vmatpush.bf16.msrb.mxu3 %v3110_v5  ;;  %1752 = vmatpush.bf16.msrb.mxu1 %v3126_v13  ;;  %v3052_v5 = vld [vmem:[%s4274_s0 + $0x134] sm:$0xf]  ;;  %v3181_v13 = vld [vmem:[%s4272_s1 + $0x2f8] sm:$0xff] }
  0x40   :  { %1723 = vmatpush.bf16.msrb.mxu0 %v3118_v7  ;;  %v2305_v7 = vor.u32 %v3060_v0, %v2304_v63  ;;  %v3036_v63 = vld [vmem:[%s4274_s0 + $0xb4] sm:$0xf]  ;;  %v2258_v0 = vld [vmem:[%s4274_s0 + $0xf8] sm:$0xf0] }
  0x41   :  { %1666 = vmatmul.bf16.vlgmr.msrb.gmra.mxu2 %v2161_v20  ;;  %v3069_v20 = vld [vmem:[%s4274_s0 + $0x1bc] sm:$0xf] }
  0x42   :  { %1774 = vmatpush.bf16.msra.mxu2 %v3141_v9  ;;  %1695 = vmatmul.bf16.vlgmr.msrb.gmra.mxu3 %v2165_v21  ;;  %v2313_v9 = vor.u32 %v3061_v4, %v2312_v3  ;;  %v2378_v21 = vld [vmem:[%s4274_s0 + $0x200] sm:$0xf0]  ;;  %v2261_v4 = vor.u32 %v3036_v63, %v2258_v0 }
  0x43   :  { %1803 = vmatpush.bf16.msra.mxu3 %v3149_v10  ;;  %1861 = vmatpush.bf16.msra.mxu1 %v3165_v16  ;;  %v2317_v10 = vor.u32 %v3052_v5, %v2314_v6  ;;  %v3180_v16 = vld [vmem:[%s4272_s1 + $0x2f0] sm:$0xff]  ;;  %v3193_v5 = vld [vmem:[%s4272_s1 + $0x358] sm:$0xff]  ;;  %v3167_v6 = vld [vmem:[%s4272_s1 + $0x288] sm:$0xff] }
  0x44   :  { %1832 = vmatpush.bf16.msra.mxu0 %v3157_v19  ;;  %1753 = vmatmul.bf16.vlgmr.msrb.gmra.mxu1 %v2173_v24  ;;  %v3078_v19 = vld [vmem:[%s4274_s0 + $0x1fc] sm:$0xf0]  ;;  %v3070_v24 = vld [vmem:[%s4274_s0 + $0x1c4] sm:$0xf] }
  0x45   :  { %1724 = vmatmul.bf16.vlgmr.msrb.gmra.mxu0 %v2169_v22  ;;  %v2384_v22 = vld [vmem:[%s4274_s0 + $0x1c0] sm:$0xf] }
  0x46   :  { %1775 = vmatpush.bf16.msra.mxu2 %v3140_v23  ;;  %v3079_v23 = vld [vmem:[%s4274_s0 + $0x204] sm:$0xf0] }
  0x47   :  { %1804 = vmatpush.bf16.msra.mxu3 %v3148_v25  ;;  %1862 = vmatpush.bf16.msra.mxu1 %v3164_v27  ;;  %v2386_v25 = vld [vmem:[%s4274_s0 + $0x208] sm:$0xf0]  ;;  %v2381_v27 = vor.u32 %v3069_v20, %v2378_v21 }
  0x48   :  { %1833 = vmatpush.bf16.msra.mxu0 %v3156_v26  ;;  %v2377_v26 = vor.u32 %v3078_v19, %v2376_v18  ;;  %v3063_v18 = vld [vmem:[%s4274_s0 + $0x184] sm:$0xf0]  ;;  %v3054_v19 = vld [vmem:[%s4274_s0 + $0x144] sm:$0xf]  ;;  %v2330_v20 = vld [vmem:[%s4274_s0 + $0x188] sm:$0xf0] }
  0x49   :  { %v3191_v21 = vld [vmem:[%s4272_s1 + $0x348] sm:$0xff] }
  0x4a   :  { %1776 = vmatpush.bf16.msra.mxu2 %v3139_v28  ;;  %v2385_v28 = vor.u32 %v3079_v23, %v2384_v22 }
  0x4b   :  { %1805 = vmatpush.bf16.msra.mxu3 %v3147_v29  ;;  %1863 = vmatpush.bf16.msra.mxu1 %v3163_v31  ;;  %v2389_v29 = vor.u32 %v3070_v24, %v2386_v25  ;;  %v3179_v31 = vld [vmem:[%s4272_s1 + $0x2e8] sm:$0xff]  ;;  %v3839_v24 = vld [vmem:[%s4273_s2] ss:$0 sm:$0xff] }
  0x4c   :  { %1834 = vmatpush.bf16.msra.mxu0 %v3155_v30  ;;  %v3171_v30 = vld [vmem:[%s4272_s1 + $0x2a8] sm:$0xff] }
  0x4e   :  { %1777 = vmatpush.bf16.msra.mxu2 %v3138_v32  ;;  %v3188_v32 = vld [vmem:[%s4272_s1 + $0x330] sm:$0xff] }
  0x4f   :  { %1806 = vmatpush.bf16.msra.mxu3 %v3146_v33  ;;  %1864 = vmatpush.bf16.msra.mxu1 %v3162_v35  ;;  %v3196_v33 = vld [vmem:[%s4272_s1 + $0x370] sm:$0xff]  ;;  %v3178_v35 = vld [vmem:[%s4272_s1 + $0x2e0] sm:$0xff] }
  0x50   :  { %1835 = vmatpush.bf16.msra.mxu0 %v3154_v34  ;;  %v3170_v34 = vld [vmem:[%s4272_s1 + $0x2a0] sm:$0xff] }
  0x51   :  { %1671 = vmatmul.bf16.gmra.mxu2 %v2233_v48  ;;  %v2185_v48 = vor.u32 %v3027_v43, %v2184_v42  ;;  %v2392_v42 = vld [vmem:[%s4274_s0 + $0x1c8] sm:$0xf]  ;;  %v3204_v43 = vld [vmem:[%s4272_s1 + $0x3b0] sm:$0xff] }
  0x52   :  { %1778 = vmatpush.bf16.msra.mxu2 %v3137_v41  ;;  %1700 = vmatmul.bf16.gmra.mxu3 %v2237_v49  ;;  %v2178_v41 = vld [vmem:[%s4274_s0 + $0x60] sm:$0xf0] }
  0x53   :  { %1807 = vmatpush.bf16.msra.mxu3 %v3145_v44  ;;  %1865 = vmatpush.bf16.msra.mxu1 %v3161_v47  ;;  %v3018_v44 = vld [vmem:[%s4274_s0 + $0x24] sm:$0xf]  ;;  %v2181_v47 = vor.u32 %v3017_v40, %v2178_v41 }
  0x54   :  { %1836 = vmatpush.bf16.msra.mxu0 %v3153_v46  ;;  %1758 = vmatmul.bf16.gmra.mxu1 %v2245_v52  ;;  %v2177_v46 = vor.u32 %v3026_v39, %v2176_v38  ;;  %v2189_v49 = vor.u32 %v3018_v44, %v2186_v45  ;;  %v3186_v52 = vld [vmem:[%s4272_s1 + $0x320] sm:$0xff]  ;;  %v3212_v44 = vld [vmem:[%s4272_s1 + $0x3f0] sm:$0xff]  ;;  %v3221_v45 = vld [vmem:[%s4272_s1 + $0x438] sm:$0xff] }
  0x55   :  { %1729 = vmatmul.bf16.gmra.mxu0 %v2241_v50  ;;  %v3169_v50 = vld [vmem:[%s4272_s1 + $0x298] sm:$0xff] }
  0x56   :  { %1779 = vmatpush.bf16.msra.mxu2 %v3136_v51  ;;  %v3177_v51 = vld [vmem:[%s4272_s1 + $0x2d8] sm:$0xff] }
  0x57   :  { %1808 = vmatpush.bf16.msra.mxu3 %v3144_v53  ;;  %1866 = vmatpush.bf16.msra.mxu1 %v3160_v57  ;;  %v3194_v53 = vld [vmem:[%s4272_s1 + $0x360] sm:$0xff]  ;;  %v3035_v57 = vld [vmem:[%s4274_s0 + $0xac] sm:$0xf] }
  0x58   :  { %1837 = vmatpush.bf16.msra.mxu0 %v3152_v55  ;;  %v2248_v55 = vld [vmem:[%s4274_s0 + $0xa8] sm:$0xf] }
  0x5a   :  { %1780 = vmatpush.bf16.msra.mxu2 %v3135_v54  ;;  %v3168_v54 = vld [vmem:[%s4272_s1 + $0x290] sm:$0xff] }
  0x5b   :  { %1809 = vmatpush.bf16.msra.mxu3 %v3143_v56  ;;  %1867 = vmatpush.bf16.msra.mxu1 %v3159_v59  ;;  %v3044_v56 = vld [vmem:[%s4274_s0 + $0xec] sm:$0xf0] }
  0x5c   :  { %1838 = vmatpush.bf16.msra.mxu0 %v3151_v58  ;;  %v2250_v58 = vld [vmem:[%s4274_s0 + $0xf0] sm:$0xf0]  ;;  %v2249_v1 = vor.u32 %v3044_v56, %v2248_v55  ;;  %v2402_v55 = vld [vmem:[%s4274_s0 + $0x218] sm:$0xf0] }
  0x5d   :  { %v3176_v59 = vld [vmem:[%s4272_s1 + $0x2d0] sm:$0xff]  ;;  %v2253_v2 = vor.u32 %v3035_v57, %v2250_v58 }
  0x5e   :  { %1781 = vmatpush.bf16.msra.mxu2 %v3134_v60  ;;  %v3185_v60 = vld [vmem:[%s4272_s1 + $0x318] sm:$0xff] }
  0x5f   :  { %1810 = vmatpush.bf16.msra.mxu3 %v3142_v61  ;;  %1868 = vmatpush.bf16.msra.mxu1 %v3158_v11  ;;  %v2256_v61 = vld [vmem:[%s4274_s0 + $0xb0] sm:$0xf]  ;;  %v2320_v11 = vld [vmem:[%s4274_s0 + $0x138] sm:$0xf] }
  0x60   :  { %1839 = vmatpush.bf16.msra.mxu0 %v3150_v62  ;;  %v3045_v62 = vld [vmem:[%s4274_s0 + $0xf4] sm:$0xf0] }
  0x61   :  { %1676 = vmatmul.bf16.gmra.mxu2 %v2305_v7  ;;  %v2257_v3 = vor.u32 %v3045_v62, %v2256_v61  ;;  %v3175_v7 = vld [vmem:[%s4272_s1 + $0x2c8] sm:$0xff] }
  0x62   :  { %1705 = vmatmul.bf16.gmra.mxu3 %v2309_v8  ;;  %1890 = vmatpush.bf16.msrb.mxu2 %v3173_v12  ;;  %v3184_v8 = vld [vmem:[%s4272_s1 + $0x310] sm:$0xff]  ;;  %v3062_v12 = vld [vmem:[%s4274_s0 + $0x17c] sm:$0xf0] }
  0x63   :  { %1919 = vmatpush.bf16.msrb.mxu3 %v3181_v13  ;;  %1977 = vmatpush.bf16.msrb.mxu1 %v3197_v17  ;;  %v3053_v13 = vld [vmem:[%s4274_s0 + $0x13c] sm:$0xf]  ;;  %v2328_v17 = vld [vmem:[%s4274_s0 + $0x140] sm:$0xf]  ;;  %v2321_v22 = vor.u32 %v3062_v12, %v2320_v11 }
  0x64   :  { %1763 = vmatmul.bf16.gmra.mxu1 %v2317_v10  ;;  %1948 = vmatpush.bf16.msrb.mxu0 %v3189_v15  ;;  %v3166_v10 = vld [vmem:[%s4272_s1 + $0x280] sm:$0xff]  ;;  %v2329_v25 = vor.u32 %v3063_v18, %v2328_v17 }
  0x65   :  { %1734 = vmatmul.bf16.gmra.mxu0 %v2313_v9  ;;  %v3192_v9 = vld [vmem:[%s4272_s1 + $0x350] sm:$0xff]  ;;  %v3174_v15 = vld [vmem:[%s4272_s1 + $0x2c0] sm:$0xff] }
  0x66   :  { %1891 = vmatpush.bf16.msrb.mxu2 %v3172_v14  ;;  %v2322_v14 = vld [vmem:[%s4274_s0 + $0x180] sm:$0xf0] }
  0x67   :  { %1920 = vmatpush.bf16.msrb.mxu3 %v3180_v16  ;;  %1978 = vmatpush.bf16.msrb.mxu1 %v3196_v33  ;;  %v3183_v16 = vld [vmem:[%s4272_s1 + $0x308] sm:$0xff]  ;;  %v2325_v23 = vor.u32 %v3053_v13, %v2322_v14  ;;  %v3028_v14 = vld [vmem:[%s4274_s0 + $0x6c] sm:$0xf0]  ;;  %v3210_v17 = vld [vmem:[%s4272_s1 + $0x3e0] sm:$0xff] }
  0x68   :  { %1949 = vmatpush.bf16.msrb.mxu0 %v3188_v32  ;;  %v3205_v32 = vld [vmem:[%s4272_s1 + $0x3b8] sm:$0xff]  ;;  %v2192_v13 = vld [vmem:[%s4274_s0 + $0x28] sm:$0xf] }
  0x6a   :  { %1892 = vmatpush.bf16.msrb.mxu2 %v3171_v30 }
  0x6b   :  { %1921 = vmatpush.bf16.msrb.mxu3 %v3179_v31  ;;  %1979 = vmatpush.bf16.msrb.mxu1 %v3195_v37  ;;  %v3190_v31 = vld [vmem:[%s4272_s1 + $0x340] sm:$0xff] }
  0x6c   :  { %1950 = vmatpush.bf16.msrb.mxu0 %v3187_v36 }
  0x6e   :  { %1893 = vmatpush.bf16.msrb.mxu2 %v3170_v34  ;;  %v3213_v34 = vld [vmem:[%s4272_s1 + $0x3f8] sm:$0xff] }
  0x6f   :  { %1922 = vmatpush.bf16.msrb.mxu3 %v3178_v35  ;;  %1980 = vmatpush.bf16.msrb.mxu1 %v3194_v53 }
  0x70   :  { %1951 = vmatpush.bf16.msrb.mxu0 %v3186_v52 }
  0x71   :  { %1681 = vmatmul.bf16.gmra.mxu2 %v2377_v26  ;;  %v3182_v26 = vld [vmem:[%s4272_s1 + $0x300] sm:$0xff] }
  0x72   :  { %1710 = vmatmul.bf16.gmra.mxu3 %v2381_v27  ;;  %1894 = vmatpush.bf16.msrb.mxu2 %v3169_v50  ;;  %v2400_v50 = vld [vmem:[%s4274_s0 + $0x1d0] sm:$0xf] }
  0x73   :  { %1923 = vmatpush.bf16.msrb.mxu3 %v3177_v51  ;;  %1981 = vmatpush.bf16.msrb.mxu1 %v3193_v5  ;;  %v3081_v51 = vld [vmem:[%s4274_s0 + $0x214] sm:$0xf0]  ;;  %v3220_v5 = vld [vmem:[%s4272_s1 + $0x430] sm:$0xff] }
  0x74   :  { %1768 = vmatmul.bf16.gmra.mxu1 %v2389_v29  ;;  %1952 = vmatpush.bf16.msrb.mxu0 %v3185_v60 }
  0x75   :  { %1739 = vmatmul.bf16.gmra.mxu0 %v2385_v28  ;;  %v2333_v28 = vor.u32 %v3054_v19, %v2330_v20  ;;  %v3019_v19 = vld [vmem:[%s4274_s0 + $0x2c] sm:$0xf]  ;;  %v2194_v20 = vld [vmem:[%s4274_s0 + $0x70] sm:$0xf0] }
  0x76   :  { %1895 = vmatpush.bf16.msrb.mxu2 %v3168_v54  ;;  %v3072_v54 = vld [vmem:[%s4274_s0 + $0x1d4] sm:$0xf] }
  0x77   :  { %1924 = vmatpush.bf16.msrb.mxu3 %v3176_v59  ;;  %1982 = vmatpush.bf16.msrb.mxu1 %v3192_v9  ;;  %v2401_v59 = vor.u32 %v3081_v51, %v2400_v50  ;;  %v2405_v62 = vor.u32 %v3072_v54, %v2402_v55  ;;  %v3046_v50 = vld [vmem:[%s4274_s0 + $0xfc] sm:$0xf0]  ;;  %v3037_v54 = vld [vmem:[%s4274_s0 + $0xbc] sm:$0xf]  ;;  %v2266_v55 = vld [vmem:[%s4274_s0 + $0x100] sm:$0xf0] }
  0x78   :  { %1953 = vmatpush.bf16.msrb.mxu0 %v3184_v8 }
  0x7a   :  { %1896 = vmatpush.bf16.msrb.mxu2 %v3167_v6 }
  0x7b   :  { %1925 = vmatpush.bf16.msrb.mxu3 %v3175_v7  ;;  %1983 = vmatpush.bf16.msrb.mxu1 %v3191_v21  ;;  %v3219_v21 = vld [vmem:[%s4272_s1 + $0x428] sm:$0xff] }
  0x7c   :  { %1954 = vmatpush.bf16.msrb.mxu0 %v3183_v16  ;;  %v3202_v16 = vld [vmem:[%s4272_s1 + $0x3a0] sm:$0xff] }
  0x7e   :  { %1897 = vmatpush.bf16.msrb.mxu2 %v3166_v10 }
  0x7f   :  { %1926 = vmatpush.bf16.msrb.mxu3 %v3174_v15  ;;  %1984 = vmatpush.bf16.msrb.mxu1 %v3190_v31  ;;  %v3228_v15 = vld [vmem:[%s4272_s1 + $0x470] sm:$0xff]  ;;  %v2197_v31 = vor.u32 %v3019_v19, %v2194_v20 }
  0x80   :  { %1955 = vmatpush.bf16.msrb.mxu0 %v3182_v26 }
  0x81   :  { %1782 = vmatmul.bf16.vlgmr.msra.gmra.mxu2 %v2177_v46 }
  0x82   :  { %1811 = vmatmul.bf16.vlgmr.msra.gmra.mxu3 %v2181_v47  ;;  %2006 = vmatpush.bf16.msra.mxu2 %v3205_v32  ;;  %v3080_v47 = vld [vmem:[%s4274_s0 + $0x20c] sm:$0xf0] }
  0x83   :  { %2035 = vmatpush.bf16.msra.mxu3 %v3213_v34  ;;  %v2393_v57 = vor.u32 %v3080_v47, %v2392_v42 }
  0x84   :  { %1869 = vmatmul.bf16.vlgmr.msra.gmra.mxu1 %v2189_v49  ;;  %v2394_v49 = vld [vmem:[%s4274_s0 + $0x210] sm:$0xf0] }
  0x85   :  { %1840 = vmatmul.bf16.vlgmr.msra.gmra.mxu0 %v2185_v48  ;;  %v3071_v48 = vld [vmem:[%s4274_s0 + $0x1cc] sm:$0xf] }
  0x86   :  { %2007 = vmatpush.bf16.msra.mxu2 %v3204_v43  ;;  %2064 = vmatpush.bf16.msra.mxu0 %v3221_v45  ;;  %v2397_v58 = vor.u32 %v3071_v48, %v2394_v49  ;;  %v2264_v49 = vld [vmem:[%s4274_s0 + $0xb8] sm:$0xf] }
  0x87   :  { %2036 = vmatpush.bf16.msra.mxu3 %v3212_v44 }
  0x8a   :  { %2065 = vmatpush.bf16.msra.mxu0 %v3220_v5 }
  0x8e   :  { %2066 = vmatpush.bf16.msra.mxu0 %v3219_v21 }
  0x91   :  { %1787 = vmatmul.bf16.gmra.mxu2 %v2249_v1  ;;  %v3229_v1 = vld [vmem:[%s4272_s1 + $0x478] sm:$0xff] }
  0x92   :  { %1816 = vmatmul.bf16.gmra.mxu3 %v2253_v2  ;;  %v3203_v2 = vld [vmem:[%s4272_s1 + $0x3a8] sm:$0xff]  ;;  %2093 = vmatpush.bf16.msra.mxu1 %v3229_v1 }
  0x93   :  { %2008 = vmatpush.bf16.msra.mxu2 %v3203_v2  ;;  %v2265_v2 = vor.u32 %v3046_v50, %v2264_v49 }
  0x94   :  { %1874 = vmatmul.bf16.gmra.mxu1 %v2261_v4  ;;  %v3211_v4 = vld [vmem:[%s4272_s1 + $0x3e8] sm:$0xff] }
  0x95   :  { %1845 = vmatmul.bf16.gmra.mxu0 %v2257_v3  ;;  %2037 = vmatpush.bf16.msra.mxu3 %v3211_v4  ;;  %v2269_v4 = vor.u32 %v3037_v54, %v2266_v55 }
  0x96   :  { %2094 = vmatpush.bf16.msra.mxu1 %v3228_v15 }
  0x97   :  { %2009 = vmatpush.bf16.msra.mxu2 %v3202_v16 }
  0x99   :  { %2038 = vmatpush.bf16.msra.mxu3 %v3210_v17 }
  0x9e   :  { %v1609_v27 = vpop.f32.mrf.mxu0 }
  0x9f   :  { %v1610_v29 = vadd.f32 %v3839_v24, %v1609_v27  ;;  %v3020_v27 = vld [vmem:[%s4274_s0 + $0x34] sm:$0xf] }
  0xa1   :  { %v1638_v30 = vpop.f32.mrf.mxu1  ;;  %1792 = vmatmul.bf16.gmra.mxu2 %v2321_v22  ;;  %v2200_v22 = vld [vmem:[%s4274_s0 + $0x30] sm:$0xf] }
  0xa2   :  { %1821 = vmatmul.bf16.gmra.mxu3 %v2325_v23  ;;  %v3851_v33 = vadd.f32 %v1638_v30, %v1610_v29  ;;  %v3029_v23 = vld [vmem:[%s4274_s0 + $0x74] sm:$0xf0]  ;;  %v2193_v30 = vor.u32 %v3028_v14, %v2192_v13  ;;  %v3199_v13 = vld [vmem:[%s4272_s1 + $0x388] sm:$0xff]  ;;  %v3216_v14 = vld [vmem:[%s4272_s1 + $0x410] sm:$0xff] }
  0xa3   :  { %v2201_v32 = vor.u32 %v3029_v23, %v2200_v22  ;;  %v2336_v23 = vld [vmem:[%s4274_s0 + $0x148] sm:$0xf] }
  0xa4   :  { %1879 = vmatmul.bf16.gmra.mxu1 %v2333_v28  ;;  %v1619_v35 = vpop.f32.mrf.mxu2  ;;  %v2202_v28 = vld [vmem:[%s4274_s0 + $0x78] sm:$0xf0] }
  0xa5   :  { %1850 = vmatmul.bf16.gmra.mxu0 %v2329_v25  ;;  %v1648_v36 = vpop.f32.mrf.mxu3  ;;  %v1620_v37 = vadd.f32 %v3839_v24, %v1619_v35 }
  0xa6   :  { %v1611_v39 = vpop.f32.mrf.mxu0 }
  0xa7   :  { %v3857_v38 = vadd.f32 %v1648_v36, %v1620_v37  ;;  %v1612_v40 = vadd.f32 %v3839_v24, %v1611_v39  ;;  %v2205_v36 = vor.u32 %v3020_v27, %v2202_v28  ;;  %v3227_v39 = vld [vmem:[%s4272_s1 + $0x468] sm:$0xff]  ;;  %v3198_v27 = vld [vmem:[%s4272_s1 + $0x380] sm:$0xff] }
  0xa8   :  { %2095 = vmatpush.bf16.msra.mxu1 %v3227_v39  ;;  %v3215_v28 = vld [vmem:[%s4272_s1 + $0x408] sm:$0xff] }
  0xa9   :  { %v1640_v41 = vpop.f32.mrf.mxu1 }
  0xaa   :  { %v3872_v46 = vadd.f32 %v1640_v41, %v1612_v40  ;;  %v3201_v40 = vld [vmem:[%s4272_s1 + $0x398] sm:$0xff]  ;;  %v3218_v41 = vld [vmem:[%s4272_s1 + $0x420] sm:$0xff] }
  0xab   :  { %2010 = vmatpush.bf16.msra.mxu2 %v3201_v40  ;;  %2067 = vmatpush.bf16.msra.mxu0 %v3218_v41  ;;  %v3056_v40 = vld [vmem:[%s4274_s0 + $0x154] sm:$0xf]  ;;  %v3223_v41 = vld [vmem:[%s4272_s1 + $0x448] sm:$0xff] }
  0xac   :  { %v1621_v52 = vpop.f32.mrf.mxu2 }
  0xad   :  { %v1650_v53 = vpop.f32.mrf.mxu3  ;;  %v1622_v56 = vadd.f32 %v3839_v24, %v1621_v52  ;;  %v3226_v52 = vld [vmem:[%s4272_s1 + $0x460] sm:$0xff] }
  0xae   :  { %v1614_v61 = vpop.f32.mrf.mxu0  ;;  %2096 = vmatpush.bf16.msra.mxu1 %v3226_v52  ;;  %v3222_v52 = vld [vmem:[%s4272_s1 + $0x440] sm:$0xff] }
  0xaf   :  { %v3896_v60 = vadd.f32 %v1650_v53, %v1622_v56  ;;  %v1615_v63 = vadd.f32 %v3839_v24, %v1614_v61  ;;  %v3208_v53 = vld [vmem:[%s4272_s1 + $0x3d0] sm:$0xff]  ;;  %v3217_v56 = vld [vmem:[%s4272_s1 + $0x418] sm:$0xff] }
  0xb0   :  { %2068 = vmatpush.bf16.msra.mxu0 %v3217_v56 }
  0xb1   :  { %v1643_v0 = vpop.f32.mrf.mxu1  ;;  %1797 = vmatmul.bf16.gmra.mxu2 %v2393_v57  ;;  %v2272_v57 = vld [vmem:[%s4274_s0 + $0xc0] sm:$0xf] }
  0xb2   :  { %1826 = vmatmul.bf16.gmra.mxu3 %v2397_v58  ;;  %v3905_v3 = vadd.f32 %v1643_v0, %v1615_v63  ;;  %v3047_v58 = vld [vmem:[%s4274_s0 + $0x104] sm:$0xf0]  ;;  %v3038_v63 = vld [vmem:[%s4274_s0 + $0xc4] sm:$0xf]  ;;  %v2274_v0 = vld [vmem:[%s4274_s0 + $0x108] sm:$0xf0] }
  0xb3   :  { %v2273_v5 = vor.u32 %v3047_v58, %v2272_v57 }
  0xb4   :  { %1884 = vmatmul.bf16.gmra.mxu1 %v2405_v62  ;;  %v1624_v6 = vpop.f32.mrf.mxu2  ;;  %2069 = vmatpush.bf16.msra.mxu0 %v3216_v14 }
  0xb5   :  { %1855 = vmatmul.bf16.gmra.mxu0 %v2401_v59  ;;  %v1653_v7 = vpop.f32.mrf.mxu3  ;;  %v1625_v8 = vadd.f32 %v3839_v24, %v1624_v6 }
  0xb6   :  { %v1616_v10 = vpop.f32.mrf.mxu0 }
  0xb7   :  { %v3914_v9 = vadd.f32 %v1653_v7, %v1625_v8  ;;  %v1617_v11 = vadd.f32 %v3839_v24, %v1616_v10  ;;  %v2277_v8 = vor.u32 %v3038_v63, %v2274_v0  ;;  %v3082_v63 = vld [vmem:[%s4274_s0 + $0x21c] sm:$0xf0]  ;;  %v3073_v0 = vld [vmem:[%s4274_s0 + $0x1dc] sm:$0xf] }
  0xb8   :  { %2070 = vmatpush.bf16.msra.mxu0 %v3215_v28  ;;  %v3030_v28 = vld [vmem:[%s4274_s0 + $0x7c] sm:$0xf0] }
  0xb9   :  { %v1645_v12 = vpop.f32.mrf.mxu1 }
  0xba   :  { %v3932_v18 = vadd.f32 %v1645_v12, %v1617_v11  ;;  %v3225_v12 = vld [vmem:[%s4272_s1 + $0x458] sm:$0xff] }
  0xbb   :  { %2097 = vmatpush.bf16.msra.mxu1 %v3225_v12 }
  0xbc   :  { %v1626_v25 = vpop.f32.mrf.mxu2 }
  0xbd   :  { %v1655_v26 = vpop.f32.mrf.mxu3  ;;  %v1627_v29 = vadd.f32 %v3839_v24, %v1626_v25  ;;  %v3209_v24 = vld [vmem:[%s4272_s1 + $0x3d8] sm:$0xff]  ;;  %v3224_v25 = vld [vmem:[%s4272_s1 + $0x450] sm:$0xff] }
  0xbe   :  { %2039 = vmatpush.bf16.msra.mxu3 %v3209_v24  ;;  %v2346_v24 = vld [vmem:[%s4274_s0 + $0x198] sm:$0xf0] }
  0xbf   :  { %v3956_v34 = vadd.f32 %v1655_v26, %v1627_v29  ;;  %v3064_v29 = vld [vmem:[%s4274_s0 + $0x18c] sm:$0xf0]  ;;  %2098 = vmatpush.bf16.msra.mxu1 %v3224_v25  ;;  %v2349_v50 = vor.u32 %v3056_v40, %v2346_v24  ;;  %v2218_v40 = vld [vmem:[%s4274_s0 + $0x88] sm:$0xf0] }
  0xc1   :  { %v1754_v37 = vpop.f32.mrf.mxu1  ;;  %1898 = vmatmul.bf16.vlgmr.msrb.gmra.mxu2 %v2193_v30  ;;  %v3055_v30 = vld [vmem:[%s4274_s0 + $0x14c] sm:$0xf] }
  0xc2   :  { %v1725_v35 = vpop.f32.mrf.mxu0  ;;  %1927 = vmatmul.bf16.vlgmr.msrb.gmra.mxu3 %v2197_v31  ;;  %v2338_v31 = vld [vmem:[%s4274_s0 + $0x190] sm:$0xf0] }
  0xc3   :  { %2040 = vmatpush.bf16.msra.mxu3 %v3208_v53  ;;  %2099 = vmatpush.bf16.msra.mxu1 %v3223_v41 }
  0xc4   :  { %1985 = vmatmul.bf16.vlgmr.msrb.gmra.mxu1 %v2205_v36  ;;  %v1667_v42 = vpop.f32.mrf.mxu2 }
  0xc5   :  { %1956 = vmatmul.bf16.vlgmr.msrb.gmra.mxu0 %v2201_v32  ;;  %v1696_v43 = vpop.f32.mrf.mxu3  ;;  %v1668_v44 = vadd.f32 %v1667_v42, %v3851_v33  ;;  %v3200_v33 = vld [vmem:[%s4272_s1 + $0x390] sm:$0xff] }
  0xc6   :  { %2011 = vmatpush.bf16.msra.mxu2 %v3200_v33  ;;  %v2344_v32 = vld [vmem:[%s4274_s0 + $0x150] sm:$0xf] }
  0xc7   :  { %v1697_v45 = vadd.f32 %v1696_v43, %v1668_v44  ;;  %v2337_v43 = vor.u32 %v3064_v29, %v2336_v23  ;;  %v2341_v44 = vor.u32 %v3055_v30, %v2338_v31  ;;  %2100 = vmatpush.bf16.msra.mxu1 %v3222_v52  ;;  %v3021_v29 = vld [vmem:[%s4274_s0 + $0x3c] sm:$0xf]  ;;  %v2216_v30 = vld [vmem:[%s4274_s0 + $0x40] sm:$0xf]  ;;  %v3031_v31 = vld [vmem:[%s4274_s0 + $0x84] sm:$0xf0] }
  0xc9   :  { %v1756_v48 = vpop.f32.mrf.mxu1  ;;  %v1726_v51 = vadd.f32 %v1725_v35, %v1697_v45  ;;  %v3065_v35 = vld [vmem:[%s4274_s0 + $0x194] sm:$0xf0] }
  0xca   :  { %v1727_v47 = vpop.f32.mrf.mxu0  ;;  %2012 = vmatpush.bf16.msra.mxu2 %v3199_v13  ;;  %v2345_v45 = vor.u32 %v3065_v35, %v2344_v32 }
  0xcb   :  { %v4001_v59 = vadd.f32 %v1754_v37, %v1726_v51 }
  0xcc   :  { %v1669_v61 = vpop.f32.mrf.mxu2 }
  0xcd   :  { %v1698_v62 = vpop.f32.mrf.mxu3  ;;  %v1670_v1 = vadd.f32 %v1669_v61, %v3872_v46  ;;  %v3207_v46 = vld [vmem:[%s4272_s1 + $0x3c8] sm:$0xff] }
  0xce   :  { %2041 = vmatpush.bf16.msra.mxu3 %v3207_v46  ;;  %2013 = vmatpush.bf16.msra.mxu2 %v3198_v27 }
  0xcf   :  { %v1699_v6 = vadd.f32 %v1698_v62, %v1670_v1  ;;  %v2408_v62 = vld [vmem:[%s4274_s0 + $0x1d8] sm:$0xf]  ;;  %v2416_v1 = vld [vmem:[%s4274_s0 + $0x1e0] sm:$0xf] }
  0xd1   :  { %v1759_v10 = vpop.f32.mrf.mxu1  ;;  %v1728_v11 = vadd.f32 %v1727_v47, %v1699_v6  ;;  %1903 = vmatmul.bf16.gmra.mxu2 %v2265_v2  ;;  %v3214_v47 = vld [vmem:[%s4272_s1 + $0x400] sm:$0xff]  ;;  %v3083_v2 = vld [vmem:[%s4274_s0 + $0x224] sm:$0xf0] }
  0xd2   :  { %v1730_v7 = vpop.f32.mrf.mxu0  ;;  %1932 = vmatmul.bf16.gmra.mxu3 %v2269_v4  ;;  %2071 = vmatpush.bf16.msra.mxu0 %v3214_v47  ;;  %v2417_v13 = vor.u32 %v3083_v2, %v2416_v1  ;;  %v3040_v1 = vld [vmem:[%s4274_s0 + $0xd4] sm:$0xf]  ;;  %v2290_v2 = vld [vmem:[%s4274_s0 + $0x118] sm:$0xf0] }
  0xd3   :  { %v4022_v15 = vadd.f32 %v1756_v48, %v1728_v11  ;;  %v2409_v11 = vor.u32 %v3082_v63, %v2408_v62  ;;  %v3049_v62 = vld [vmem:[%s4274_s0 + $0x114] sm:$0xf0] }
  0xd4   :  { %1990 = vmatmul.bf16.gmra.mxu1 %v2277_v8  ;;  %v1672_v16 = vpop.f32.mrf.mxu2  ;;  %v2418_v8 = vld [vmem:[%s4274_s0 + $0x228] sm:$0xf0] }
  0xd5   :  { %1961 = vmatmul.bf16.gmra.mxu0 %v2273_v5  ;;  %v1701_v17 = vpop.f32.mrf.mxu3  ;;  %v1673_v19 = vadd.f32 %v1672_v16, %v3905_v3  ;;  %v3206_v3 = vld [vmem:[%s4272_s1 + $0x3c0] sm:$0xff] }
  0xd6   :  { %2042 = vmatpush.bf16.msra.mxu3 %v3206_v3  ;;  %v2208_v3 = vld [vmem:[%s4274_s0 + $0x38] sm:$0xf] }
  0xd7   :  { %v1702_v20 = vadd.f32 %v1701_v17, %v1673_v19  ;;  %v2209_v41 = vor.u32 %v3030_v28, %v2208_v3  ;;  %v3067_v3 = vld [vmem:[%s4274_s0 + $0x1a4] sm:$0xf0] }
  0xd9   :  { %v1761_v22 = vpop.f32.mrf.mxu1  ;;  %v1731_v26 = vadd.f32 %v1730_v7, %v1702_v20  ;;  %v3074_v7 = vld [vmem:[%s4274_s0 + $0x1e4] sm:$0xf] }
  0xda   :  { %v1732_v21 = vpop.f32.mrf.mxu0  ;;  %v2421_v16 = vor.u32 %v3074_v7, %v2418_v8 }
  0xdb   :  { %v4055_v36 = vadd.f32 %v1759_v10, %v1731_v26 }
  0xdc   :  { %v1674_v37 = vpop.f32.mrf.mxu2 }
  0xdd   :  { %v1703_v39 = vpop.f32.mrf.mxu3  ;;  %v1675_v42 = vadd.f32 %v1674_v37, %v3932_v18 }
  0xdf   :  { %v1704_v48 = vadd.f32 %v1703_v39, %v1675_v42  ;;  %v3022_v39 = vld [vmem:[%s4274_s0 + $0x44] sm:$0xf] }
  0xe0   :  { %v2221_v47 = vor.u32 %v3022_v39, %v2218_v40 }
  0xe1   :  { %v1764_v51 = vpop.f32.mrf.mxu1  ;;  %v1733_v33 = vadd.f32 %v1732_v21, %v1704_v48  ;;  %1908 = vmatmul.bf16.gmra.mxu2 %v2337_v43  ;;  %v2217_v43 = vor.u32 %v3031_v31, %v2216_v30  ;;  %v3058_v30 = vld [vmem:[%s4274_s0 + $0x164] sm:$0xf]  ;;  %v2362_v31 = vld [vmem:[%s4274_s0 + $0x1a8] sm:$0xf0] }
  0xe2   :  { %v1735_v49 = vpop.f32.mrf.mxu0  ;;  %1937 = vmatmul.bf16.gmra.mxu3 %v2341_v44 }
  0xe3   :  { %v4073_v18 = vadd.f32 %v1761_v22, %v1733_v33 }
  0xe4   :  { %1995 = vmatmul.bf16.gmra.mxu1 %v2349_v50  ;;  %v1677_v53 = vpop.f32.mrf.mxu2 }
  0xe5   :  { %1966 = vmatmul.bf16.gmra.mxu0 %v2345_v45  ;;  %v1706_v54 = vpop.f32.mrf.mxu3  ;;  %v1678_v55 = vadd.f32 %v1677_v53, %v3857_v38  ;;  %v2410_v38 = vld [vmem:[%s4274_s0 + $0x220] sm:$0xf0] }
  0xe6   :  { %v2413_v12 = vor.u32 %v3073_v0, %v2410_v38 }
  0xe7   :  { %v1707_v56 = vadd.f32 %v1706_v54, %v1678_v55 }
  0xe9   :  { %v1766_v58 = vpop.f32.mrf.mxu1  ;;  %v1736_v61 = vadd.f32 %v1735_v49, %v1707_v56  ;;  %v2280_v56 = vld [vmem:[%s4274_s0 + $0xc8] sm:$0xf] }
  0xea   :  { %v1737_v57 = vpop.f32.mrf.mxu0 }
  0xeb   :  { %v4094_v4 = vadd.f32 %v1764_v51, %v1736_v61  ;;  %v2288_v61 = vld [vmem:[%s4274_s0 + $0xd0] sm:$0xf] }
  0xec   :  { %v1679_v5 = vpop.f32.mrf.mxu2  ;;  %v2289_v8 = vor.u32 %v3049_v62, %v2288_v61  ;;  %v3076_v61 = vld [vmem:[%s4274_s0 + $0x1f4] sm:$0xf]  ;;  %v2434_v62 = vld [vmem:[%s4274_s0 + $0x238] sm:$0xf0] }
  0xed   :  { %v1708_v6 = vpop.f32.mrf.mxu3  ;;  %v1680_v10 = vadd.f32 %v1679_v5, %v3896_v60 }
  0xef   :  { %v1709_v46 = vadd.f32 %v1708_v6, %v1680_v10 }
  0xf1   :  { %v1769_v17 = vpop.f32.mrf.mxu1  ;;  %v1738_v19 = vadd.f32 %v1737_v57, %v1709_v46  ;;  %1913 = vmatmul.bf16.gmra.mxu2 %v2409_v11  ;;  %v3048_v57 = vld [vmem:[%s4274_s0 + $0x10c] sm:$0xf0] }
  0xf2   :  { %v1740_v14 = vpop.f32.mrf.mxu0  ;;  %1942 = vmatmul.bf16.gmra.mxu3 %v2413_v12  ;;  %v2281_v6 = vor.u32 %v3048_v57, %v2280_v56  ;;  %v2293_v12 = vor.u32 %v3040_v1, %v2290_v2  ;;  %v3085_v56 = vld [vmem:[%s4274_s0 + $0x234] sm:$0xf0] }
  0xf3   :  { %v4103_v20 = vadd.f32 %v1766_v58, %v1738_v19  ;;  %v3039_v58 = vld [vmem:[%s4274_s0 + $0xcc] sm:$0xf] }
  0xf4   :  { %2000 = vmatmul.bf16.gmra.mxu1 %v2421_v16  ;;  %v1682_v21 = vpop.f32.mrf.mxu2 }
  0xf5   :  { %1971 = vmatmul.bf16.gmra.mxu0 %v2417_v13  ;;  %v1711_v22 = vpop.f32.mrf.mxu3  ;;  %v1683_v23 = vadd.f32 %v1682_v21, %v3914_v9  ;;  %v2210_v9 = vld [vmem:[%s4274_s0 + $0x80] sm:$0xf0] }
  0xf6   :  { %v2213_v42 = vor.u32 %v3021_v29, %v2210_v9 }
  0xf7   :  { %v1712_v25 = vadd.f32 %v1711_v22, %v1683_v23 }
  0xf9   :  { %v1771_v26 = vpop.f32.mrf.mxu1  ;;  %v1741_v27 = vadd.f32 %v1740_v14, %v1712_v25  ;;  %v2352_v25 = vld [vmem:[%s4274_s0 + $0x158] sm:$0xf] }
  0xfa   :  { %v1742_v60 = vpop.f32.mrf.mxu0 }
  0xfb   :  { %v4124_v32 = vadd.f32 %v1769_v17, %v1741_v27  ;;  %v2360_v27 = vld [vmem:[%s4274_s0 + $0x160] sm:$0xf] }
  0xfc   :  { %v1684_v35 = vpop.f32.mrf.mxu2  ;;  %v2361_v40 = vor.u32 %v3067_v3, %v2360_v27 }
  0xfd   :  { %v1713_v37 = vpop.f32.mrf.mxu3  ;;  %v1685_v24 = vadd.f32 %v1684_v35, %v3956_v34 }
  0xff   :  { %v1714_v44 = vadd.f32 %v1713_v37, %v1685_v24 }
 0x101   :  { %v1870_v48 = vpop.f32.mrf.mxu1  ;;  %v1743_v49 = vadd.f32 %v1742_v60, %v1714_v44  ;;  %2014 = vmatmul.bf16.vlgmr.msra.gmra.mxu2 %v2209_v41  ;;  %v3066_v60 = vld [vmem:[%s4274_s0 + $0x19c] sm:$0xf0] }
 0x102   :  { %v1841_v45 = vpop.f32.mrf.mxu0  ;;  %2043 = vmatmul.bf16.vlgmr.msra.gmra.mxu3 %v2213_v42  ;;  %v2353_v37 = vor.u32 %v3066_v60, %v2352_v25  ;;  %v2365_v42 = vor.u32 %v3058_v30, %v2362_v31 }
 0x103   :  { %v4133_v50 = vadd.f32 %v1771_v26, %v1743_v49  ;;  %v3057_v26 = vld [vmem:[%s4274_s0 + $0x15c] sm:$0xf] }
 0x104   :  { %2101 = vmatmul.bf16.vlgmr.msra.gmra.mxu1 %v2221_v47  ;;  %v1783_v51 = vpop.f32.mrf.mxu2 }
 0x105   :  { %2072 = vmatmul.bf16.vlgmr.msra.gmra.mxu0 %v2217_v43  ;;  %v1812_v52 = vpop.f32.mrf.mxu3  ;;  %v1784_v33 = vadd.f32 %v1783_v51, %v4001_v59  ;;  %v2282_v59 = vld [vmem:[%s4274_s0 + $0x110] sm:$0xf0] }
 0x106   :  { %v2285_v7 = vor.u32 %v3039_v58, %v2282_v59 }
 0x107   :  { %v1813_v53 = vadd.f32 %v1812_v52, %v1784_v33 }
 0x109   :  { %v1872_v54 = vpop.f32.mrf.mxu1  ;;  %v1842_v55 = vadd.f32 %v1841_v45, %v1813_v53  ;;  %v2424_v53 = vld [vmem:[%s4274_s0 + $0x1e8] sm:$0xf] }
 0x10a   :  { %v1843_v34 = vpop.f32.mrf.mxu0 }
 0x10b   :  { %v4154_v63 = vadd.f32 %v1870_v48, %v1842_v55  ;;  %v2432_v55 = vld [vmem:[%s4274_s0 + $0x1f0] sm:$0xf] }
 0x10c   :  { %v1785_v0 = vpop.f32.mrf.mxu2  ;;  %v2433_v2 = vor.u32 %v3085_v56, %v2432_v55 }
 0x10d   :  { %v1814_v38 = vpop.f32.mrf.mxu3  ;;  %v1786_v5 = vadd.f32 %v1785_v0, %v4022_v15 }
 0x10f   :  { %v1815_v10 = vadd.f32 %v1814_v38, %v1786_v5 }
 0x111   :  { %v1875_v13 = vpop.f32.mrf.mxu1  ;;  %v1844_v46 = vadd.f32 %v1843_v34, %v1815_v10  ;;  %2019 = vmatmul.bf16.gmra.mxu2 %v2281_v6  ;;  %v3084_v34 = vld [vmem:[%s4274_s0 + $0x22c] sm:$0xf0] }
 0x112   :  { %v1846_v11 = vpop.f32.mrf.mxu0  ;;  %2048 = vmatmul.bf16.gmra.mxu3 %v2285_v7  ;;  %v2425_v38 = vor.u32 %v3084_v34, %v2424_v53  ;;  %v2437_v7 = vor.u32 %v3076_v61, %v2434_v62 }
 0x113   :  { %v4163_v14 = vadd.f32 %v1872_v54, %v1844_v46  ;;  %v3075_v54 = vld [vmem:[%s4274_s0 + $0x1ec] sm:$0xf] }
 0x114   :  { %2106 = vmatmul.bf16.gmra.mxu1 %v2293_v12  ;;  %v1788_v16 = vpop.f32.mrf.mxu2 }
 0x115   :  { %2077 = vmatmul.bf16.gmra.mxu0 %v2289_v8  ;;  %v1817_v17 = vpop.f32.mrf.mxu3  ;;  %v1789_v19 = vadd.f32 %v1788_v16, %v4055_v36  ;;  %v2354_v36 = vld [vmem:[%s4274_s0 + $0x1a0] sm:$0xf0] }
 0x116   :  { %v2357_v39 = vor.u32 %v3057_v26, %v2354_v36 }
 0x117   :  { %v1818_v21 = vadd.f32 %v1817_v17, %v1789_v19 }
 0x119   :  { %v1877_v22 = vpop.f32.mrf.mxu1  ;;  %v1847_v23 = vadd.f32 %v1846_v11, %v1818_v21 }
 0x11a   :  { %v1848_v15 = vpop.f32.mrf.mxu0 }
 0x11b   :  { %v4184_v28 = vadd.f32 %v1875_v13, %v1847_v23 }
 0x11c   :  { %v1790_v29 = vpop.f32.mrf.mxu2 }
 0x11d   :  { %v1819_v9 = vpop.f32.mrf.mxu3  ;;  %v1791_v35 = vadd.f32 %v1790_v29, %v4073_v18 }
 0x11f   :  { %v1820_v24 = vadd.f32 %v1819_v9, %v1791_v35 }
 0x121   :  { %v1880_v43 = vpop.f32.mrf.mxu1  ;;  %v1849_v44 = vadd.f32 %v1848_v15, %v1820_v24  ;;  %2024 = vmatmul.bf16.gmra.mxu2 %v2353_v37 }
 0x122   :  { %v1851_v41 = vpop.f32.mrf.mxu0  ;;  %2053 = vmatmul.bf16.gmra.mxu3 %v2357_v39 }
 0x123   :  { %v4193_v45 = vadd.f32 %v1877_v22, %v1849_v44 }
 0x124   :  { %2111 = vmatmul.bf16.gmra.mxu1 %v2365_v42  ;;  %v1793_v47 = vpop.f32.mrf.mxu2 }
 0x125   :  { %2082 = vmatmul.bf16.gmra.mxu0 %v2361_v40  ;;  %v1822_v48 = vpop.f32.mrf.mxu3  ;;  %v1794_v49 = vadd.f32 %v1793_v47, %v4094_v4  ;;  %v2426_v4 = vld [vmem:[%s4274_s0 + $0x230] sm:$0xf0] }
 0x126   :  { %v2429_v1 = vor.u32 %v3075_v54, %v2426_v4 }
 0x127   :  { %v1823_v51 = vadd.f32 %v1822_v48, %v1794_v49 }
 0x129   :  { %v1882_v52 = vpop.f32.mrf.mxu1  ;;  %v1852_v33 = vadd.f32 %v1851_v41, %v1823_v51 }
 0x12a   :  { %v1853_v18 = vpop.f32.mrf.mxu0 }
 0x12b   :  { %v1881_v57 = vadd.f32 %v1880_v43, %v1852_v33 }
 0x12c   :  { %v1795_v58 = vpop.f32.mrf.mxu2 }
 0x12d   :  { %v1824_v59 = vpop.f32.mrf.mxu3  ;;  %v1796_v0 = vadd.f32 %v1795_v58, %v4103_v20 }
 0x12f   :  { %v1825_v5 = vadd.f32 %v1824_v59, %v1796_v0 }
 0x131   :  { %v1885_v8 = vpop.f32.mrf.mxu1  ;;  %v1854_v10 = vadd.f32 %v1853_v18, %v1825_v5  ;;  %2029 = vmatmul.bf16.gmra.mxu2 %v2425_v38 }
 0x132   :  { %v1856_v6 = vpop.f32.mrf.mxu0  ;;  %2058 = vmatmul.bf16.gmra.mxu3 %v2429_v1 }
 0x133   :  { %v4221_v11 = vadd.f32 %v1882_v52, %v1854_v10 }
 0x134   :  { %2116 = vmatmul.bf16.gmra.mxu1 %v2437_v7  ;;  %v1798_v12 = vpop.f32.mrf.mxu2 }
 0x135   :  { %2087 = vmatmul.bf16.gmra.mxu0 %v2433_v2  ;;  %v1827_v13 = vpop.f32.mrf.mxu3  ;;  %v1799_v46 = vadd.f32 %v1798_v12, %v4124_v32 }
 0x137   :  { %v1828_v16 = vadd.f32 %v1827_v13, %v1799_v46 }
 0x139   :  { %v1887_v17 = vpop.f32.mrf.mxu1  ;;  %v1857_v19 = vadd.f32 %v1856_v6, %v1828_v16 }
 0x13a   :  { %v1858_v20 = vpop.f32.mrf.mxu0 }
 0x13b   :  { %v1886_v21 = vadd.f32 %v1885_v8, %v1857_v19 }
 0x13c   :  { %v1800_v15 = vpop.f32.mrf.mxu2 }
 0x13d   :  { %v1829_v22 = vpop.f32.mrf.mxu3  ;;  %v1801_v23 = vadd.f32 %v1800_v15, %v4133_v50 }
 0x13f   :  { %v1830_v25 = vadd.f32 %v1829_v22, %v1801_v23 }
 0x141   :  { %v1986_v26 = vpop.f32.mrf.mxu1  ;;  %v1859_v36 = vadd.f32 %v1858_v20, %v1830_v25 }
 0x142   :  { %v1957_v60 = vpop.f32.mrf.mxu0 }
 0x143   :  { %v4225_v27 = vadd.f32 %v1887_v17, %v1859_v36 }
 0x144   :  { %v1899_v3 = vpop.f32.mrf.mxu2 }
 0x145   :  { %v1928_v29 = vpop.f32.mrf.mxu3  ;;  %v1900_v9 = vadd.f32 %v1899_v3, %v4154_v63 }
 0x147   :  { %v1929_v32 = vadd.f32 %v1928_v29, %v1900_v9 }
 0x149   :  { %v1988_v31 = vpop.f32.mrf.mxu1  ;;  %v1958_v35 = vadd.f32 %v1957_v60, %v1929_v32 }
 0x14a   :  { %v1959_v30 = vpop.f32.mrf.mxu0 }
 0x14b   :  { %v1987_v37 = vadd.f32 %v1986_v26, %v1958_v35 }
 0x14c   :  { %v1901_v39 = vpop.f32.mrf.mxu2 }
 0x14d   :  { %v1930_v40 = vpop.f32.mrf.mxu3  ;;  %v1902_v13 = vadd.f32 %v1901_v39, %v4163_v14 }
 0x14f   :  { %v1931_v20 = vadd.f32 %v1930_v40, %v1902_v13 }
 0x151   :  { %v1991_v41 = vpop.f32.mrf.mxu1  ;;  %v1960_v15 = vadd.f32 %v1959_v30, %v1931_v20 }
 0x152   :  { %v1962_v24 = vpop.f32.mrf.mxu0 }
 0x153   :  { %v1989_v60 = vadd.f32 %v1988_v31, %v1960_v15 }
 0x154   :  { %v1904_v50 = vpop.f32.mrf.mxu2 }
 0x155   :  { %v1933_v42 = vpop.f32.mrf.mxu3  ;;  %v1905_v43 = vadd.f32 %v1904_v50, %v4184_v28 }
 0x157   :  { %v1934_v44 = vadd.f32 %v1933_v42, %v1905_v43 }
 0x159   :  { %v4229_v48 = vpop.f32.mrf.mxu1  ;;  %v1963_v49 = vadd.f32 %v1962_v24, %v1934_v44 }
 0x15a   :  { %v1964_v47 = vpop.f32.mrf.mxu0 }
 0x15b   :  { %v1992_v51 = vadd.f32 %v1991_v41, %v1963_v49 }
 0x15c   :  { %v1906_v63 = vpop.f32.mrf.mxu2 }
 0x15d   :  { %v1935_v18 = vpop.f32.mrf.mxu3  ;;  %v1907_v9 = vadd.f32 %v1906_v63, %v4193_v45 }
 0x15f   :  { %v1936_v40 = vadd.f32 %v1935_v18, %v1907_v9 }
 0x161   :  { %v1996_v33 = vpop.f32.mrf.mxu1  ;;  %v1965_v44 = vadd.f32 %v1964_v47, %v1936_v40 }
 0x162   :  { %v1967_v52 = vpop.f32.mrf.mxu0 }
 0x164   :  { %v1909_v53 = vpop.f32.mrf.mxu2 }
 0x165   :  { %v1938_v34 = vpop.f32.mrf.mxu3  ;;  %v1910_v54 = vadd.f32 %v1909_v53, %v1881_v57 }
 0x167   :  { %v1939_v4 = vadd.f32 %v1938_v34, %v1910_v54 }
 0x169   :  { %v4233_v56 = vpop.f32.mrf.mxu1  ;;  %v1968_v58 = vadd.f32 %v1967_v52, %v1939_v4  ;;  %v1994_v52 = vadd.f32 %v4229_v48, %v1965_v44 }
 0x16a   :  { %v4231_v55 = vpop.f32.mrf.mxu0 }
 0x16b   :  { %v4235_v28 = vadd.f32 %v1996_v33, %v1968_v58 }
 0x16c   :  { %v1911_v59 = vpop.f32.mrf.mxu2 }
 0x16d   :  { %v1940_v61 = vpop.f32.mrf.mxu3  ;;  %v1912_v54 = vadd.f32 %v1911_v59, %v4221_v11 }
 0x171   :  { %v2001_v0 = vpop.f32.mrf.mxu1 }
 0x172   :  { %v1972_v62 = vpop.f32.mrf.mxu0 }
 0x174   :  { %v1914_v38 = vpop.f32.mrf.mxu2 }
 0x175   :  { %v1943_v1 = vpop.f32.mrf.mxu3  ;;  %v1915_v2 = vadd.f32 %v1914_v38, %v1886_v21 }
 0x177   :  { %v1944_v5 = vadd.f32 %v1943_v1, %v1915_v2 }
 0x179   :  { %v4239_v7 = vpop.f32.mrf.mxu1  ;;  %v1973_v57 = vadd.f32 %v1972_v62, %v1944_v5  ;;  %v1941_v62 = vadd.f32 %v1940_v61, %v1912_v54 }
 0x17a   :  { %v4237_v6 = vpop.f32.mrf.mxu0 }
 0x17b   :  { %v4241_v8 = vadd.f32 %v2001_v0, %v1973_v57  ;;  %v1970_v48 = vadd.f32 %v4231_v55, %v1941_v62 }
 0x17c   :  { %v4243_v10 = vpop.f32.mrf.mxu2 }
 0x17d   :  { %v4245_v12 = vpop.f32.mrf.mxu3  ;;  %v1917_v15 = vadd.f32 %v4243_v10, %v4225_v27 }
 0x181   :  { %v2102_v16 = vpop.f32.mrf.mxu1 }
 0x182   :  { %v2073_v46 = vpop.f32.mrf.mxu0 }
 0x184   :  { %v2015_v17 = vpop.f32.mrf.mxu2 }
 0x185   :  { %v2044_v19 = vpop.f32.mrf.mxu3  ;;  %v2016_v21 = vadd.f32 %v2015_v17, %v1987_v37 }
 0x187   :  { %v2045_v25 = vadd.f32 %v2044_v19, %v2016_v21 }
 0x189   :  { %v2104_v23 = vpop.f32.mrf.mxu1  ;;  %v2074_v3 = vadd.f32 %v2073_v46, %v2045_v25 }
 0x18a   :  { %v2075_v22 = vpop.f32.mrf.mxu0 }
 0x18b   :  { %v2103_v39 = vadd.f32 %v2102_v16, %v2074_v3  ;;  %v1999_v16 = vadd.f32 %v4233_v56, %v1970_v48 }
 0x18c   :  { %v2017_v26 = vpop.f32.mrf.mxu2 }
 0x18d   :  { %v2046_v36 = vpop.f32.mrf.mxu3  ;;  %v2018_v29 = vadd.f32 %v2017_v26, %v1989_v60  ;;  %v2122_v30 = vmax.f32 %v2103_v39, 0.0 }
 0x18f   :  { %v2047_v32 = vadd.f32 %v2046_v36, %v2018_v29 }
 0x191   :  { %v2107_v14 = vpop.f32.mrf.mxu1  ;;  %v2076_v24 = vadd.f32 %v2075_v22, %v2047_v32 }
 0x192   :  { %v2078_v35 = vpop.f32.mrf.mxu0 }
 0x193   :  { %v2105_v41 = vadd.f32 %v2104_v23, %v2076_v24  ;;  %v1946_v23 = vadd.f32 %v4245_v12, %v1917_v15 }
 0x194   :  { %v2020_v50 = vpop.f32.mrf.mxu2 }
 0x195   :  { %v2049_v37 = vpop.f32.mrf.mxu3  ;;  %v2123_v42 = vmax.f32 %v2105_v41, 0.0  ;;  %v2021_v43 = vadd.f32 %v2020_v50, %v1992_v51  ;;  %v1975_v9 = vadd.f32 %v4237_v6, %v1946_v23 }
 0x197   :  { %v3233_v31 = vpack.c.bf16 %v2123_v42, %v2122_v30  ;;  %v2050_v45 = vadd.f32 %v2049_v37, %v2021_v43  ;;  %v2004_v10 = vadd.f32 %v4239_v7, %v1975_v9 }
 0x199   :  { %3234 = vst [vmem:[%s4275_s3] sm:$0xff] %v3233_v31   ;;  %v2109_v63 = vpop.f32.mrf.mxu1  ;;  %v2079_v18 = vadd.f32 %v2078_v35, %v2050_v45 }
 0x19a   :  { %v2080_v49 = vpop.f32.mrf.mxu0 }
 0x19b   :  { %v2108_v58 = vadd.f32 %v2107_v14, %v2079_v18 }
 0x19c   :  { %v2022_v33 = vpop.f32.mrf.mxu2 }
 0x19d   :  { %v2051_v53 = vpop.f32.mrf.mxu3  ;;  %v2023_v34 = vadd.f32 %v2022_v33, %v1994_v52  ;;  %v2124_v5 = vmax.f32 %v2108_v58, 0.0 }
 0x19f   :  { %v2052_v4 = vadd.f32 %v2051_v53, %v2023_v34 }
 0x1a1   :  { %v2081_v51 = vadd.f32 %v2080_v49, %v2052_v4  ;;  %v2112_v38 = vpop.f32.mrf.mxu1 }
 0x1a2   :  { %v2083_v47 = vpop.f32.mrf.mxu0 }
 0x1a3   :  { %v2110_v0 = vadd.f32 %v2109_v63, %v2081_v51 }
 0x1a4   :  { %v2025_v1 = vpop.f32.mrf.mxu2 }
 0x1a5   :  { %v2054_v2 = vpop.f32.mrf.mxu3  ;;  %v2125_v57 = vmax.f32 %v2110_v0, 0.0  ;;  %v2026_v13 = vadd.f32 %v2025_v1, %v4235_v28 }
 0x1a7   :  { %v3238_v46 = vpack.c.bf16 %v2125_v57, %v2124_v5  ;;  %v2055_v11 = vadd.f32 %v2054_v2, %v2026_v13 }
 0x1a9   :  { %3250 = vst [vmem:[%s4275_s3 + $0x8] sm:$0xff] %v3238_v46   ;;  %v2084_v17 = vadd.f32 %v2083_v47, %v2055_v11  ;;  %v2114_v21 = vpop.f32.mrf.mxu1 }
 0x1aa   :  { %v2085_v59 = vpop.f32.mrf.mxu0 }
 0x1ab   :  { %v2113_v22 = vadd.f32 %v2112_v38, %v2084_v17 }
 0x1ac   :  { %v2027_v61 = vpop.f32.mrf.mxu2 }
 0x1ad   :  { %v2056_v20 = vpop.f32.mrf.mxu3  ;;  %v2028_v19 = vadd.f32 %v2027_v61, %v1999_v16  ;;  %v2126_v36 = vmax.f32 %v2113_v22, 0.0 }
 0x1af   :  { %v2057_v28 = vadd.f32 %v2056_v20, %v2028_v19 }
 0x1b1   :  { %v2086_v55 = vadd.f32 %v2085_v59, %v2057_v28  ;;  %v2117_v35 = vpop.f32.mrf.mxu1 }
 0x1b2   :  { %v2088_v29 = vpop.f32.mrf.mxu0 }
 0x1b3   :  { %v2115_v25 = vadd.f32 %v2114_v21, %v2086_v55 }
 0x1b4   :  { %v2030_v60 = vpop.f32.mrf.mxu2 }
 0x1b5   :  { %v2059_v26 = vpop.f32.mrf.mxu3  ;;  %v2127_v3 = vmax.f32 %v2115_v25, 0.0  ;;  %v2031_v56 = vadd.f32 %v2030_v60, %v4241_v8 }
 0x1b7   :  { %v3243_v32 = vpack.c.bf16 %v2127_v3, %v2126_v36  ;;  %v2060_v27 = vadd.f32 %v2059_v26, %v2031_v56 }
 0x1b9   :  { %3251 = vst [vmem:[%s4275_s3 + $0x10] sm:$0xff] %v3243_v32   ;;  %v2089_v14 = vadd.f32 %v2088_v29, %v2060_v27  ;;  %v2119_v37 = vpop.f32.mrf.mxu1 }
 0x1ba   :  { %v2090_v41 = vpop.f32.mrf.mxu0 }
 0x1bb   :  { %v2118_v50 = vadd.f32 %v2117_v35, %v2089_v14 }
 0x1bc   :  { %v2032_v12 = vpop.f32.mrf.mxu2 }
 0x1bd   :  { %v2033_v39 = vadd.f32 %v2032_v12, %v2004_v10  ;;  %v2061_v24 = vpop.f32.mrf.mxu3  ;;  %v2128_v6 = vmax.f32 %v2118_v50, 0.0 }
 0x1bf   :  { %v2062_v40 = vadd.f32 %v2061_v24, %v2033_v39 }
 0x1c1   :  { %v2091_v8 = vadd.f32 %v2090_v41, %v2062_v40 }
 0x1c3   :  { %v2120_v30 = vadd.f32 %v2119_v37, %v2091_v8 }
 0x1c5   :  { %v2129_v42 = vmax.f32 %v2120_v30, 0.0 }
 0x1c7   :  { %v3248_v43 = vpack.c.bf16 %v2129_v42, %v2128_v6 }
 0x1c9   :  { %3252 = vst [vmem:[%s4275_s3 + $0x18] sm:$0xff] %v3248_v43  }

// kernel: pspnet_forward.124
= control target key start
LH: loop header
LB: loop body
LE: loop exit
PB: predicated region body
PF: predicated region fallthrough
CT: control target
= control target key end

     0   :  { %vm59_vm0 = vcmask 1042432   ;;  %vm46_vm1 = vcmask 48128   ;;  %s221_s1 = inlined_call_operand.vmem [shape: bf16[6,128], index: 1, kind: input, shape index: {}]   ;;  %s222_s0 = inlined_call_operand.vmem [shape: bf16[64,6], index: 0, kind: input, shape index: {}]   ;;  %s223_s2 = inlined_call_operand.vmem [shape: f32[4,128], index: 2, kind: input, shape index: {}]   ;;  %s224_s3 = inlined_call_operand.vmem [shape: bf16[64,128], index: 3, kind: output, shape index: {}]  }
   0x1   :  { %v23_v0 = vld [vmem:[%s221_s1] sm:$0x7]  ;;  %v141_v3 = vld [vmem:[%s222_s0 + $0x8] sm:$0xff]  ;;  %v142_v4 = vld [vmem:[%s222_s0 + $0x10] sm:$0xff] }
   0x2   :  { %v61_v1 = vsel %vm59_vm0, %v23_v0, 0  ;;  %v140_v2 = vld [vmem:[%s222_s0] sm:$0xff]  ;;  %v143_v5 = vld [vmem:[%s222_s0 + $0x18] sm:$0xff] }
   0x3   :  { %70 = vmatpush.bf16.msra.mxu0 %v61_v1  ;;  %167 = vmatpush.bf16.msra.mxu1 %v61_v1  ;;  %v170_v8 = vld [vmem:[%s223_s2] ss:$0 sm:$0xff] }
   0x4   :  { %168 = vmatpush.bf16.msra.mxu2 %v61_v1  ;;  %169 = vmatpush.bf16.msra.mxu3 %v61_v1 }
   0x6   :  { %136 = vmatmul.msk.bf16.vlgmr.msra.gmra.mxu0 %vm46_vm1, %v140_v2  ;;  %137 = vmatmul.msk.bf16.vlgmr.msra.gmra.mxu1 %vm46_vm1, %v141_v3 }
   0x7   :  { %138 = vmatmul.msk.bf16.vlgmr.msra.gmra.mxu2 %vm46_vm1, %v142_v4  ;;  %139 = vmatmul.msk.bf16.vlgmr.msra.gmra.mxu3 %vm46_vm1, %v143_v5 }
  0x83   :  { %v72_v6 = vpop.f32.mrf.mxu0  ;;  %v77_v7 = vpop.f32.mrf.mxu1 }
  0x84   :  { %v73_v9 = vadd.f32 %v170_v8, %v72_v6  ;;  %v78_v10 = vadd.f32 %v170_v8, %v77_v7 }
  0x86   :  { %v92_v17 = vmax.f32 %v73_v9, 0.0  ;;  %v94_v18 = vmax.f32 %v78_v10, 0.0 }
  0x8a   :  { %v82_v11 = vpop.f32.mrf.mxu2  ;;  %v87_v12 = vpop.f32.mrf.mxu3 }
  0x8b   :  { %v74_v13 = vpop.f32.mrf.mxu0  ;;  %v79_v14 = vpop.f32.mrf.mxu1  ;;  %v83_v23 = vadd.f32 %v170_v8, %v82_v11  ;;  %v88_v24 = vadd.f32 %v170_v8, %v87_v12 }
  0x8c   :  { %v75_v15 = vadd.f32 %v170_v8, %v74_v13  ;;  %v80_v16 = vadd.f32 %v170_v8, %v79_v14 }
  0x8d   :  { %v96_v29 = vmax.f32 %v83_v23, 0.0  ;;  %v98_v30 = vmax.f32 %v88_v24, 0.0 }
  0x8e   :  { %v93_v19 = vmax.f32 %v75_v15, 0.0  ;;  %v95_v20 = vmax.f32 %v80_v16, 0.0 }
  0x90   :  { %v147_v21 = vpack.c.bf16 %v93_v19, %v92_v17  ;;  %v152_v22 = vpack.c.bf16 %v95_v20, %v94_v18 }
  0x92   :  { %148 = vst [vmem:[%s224_s3] sm:$0xff] %v147_v21   ;;  %v84_v25 = vpop.f32.mrf.mxu2  ;;  %v89_v26 = vpop.f32.mrf.mxu3 }
  0x93   :  { %164 = vst [vmem:[%s224_s3 + $0x8] sm:$0xff] %v152_v22   ;;  %v85_v27 = vadd.f32 %v170_v8, %v84_v25  ;;  %v90_v28 = vadd.f32 %v170_v8, %v89_v26 }
  0x95   :  { %v97_v31 = vmax.f32 %v85_v27, 0.0  ;;  %v99_v32 = vmax.f32 %v90_v28, 0.0 }
  0x97   :  { %v157_v33 = vpack.c.bf16 %v97_v31, %v96_v29  ;;  %v162_v34 = vpack.c.bf16 %v99_v32, %v98_v30 }
  0x99   :  { %165 = vst [vmem:[%s224_s3 + $0x10] sm:$0xff] %v157_v33  }
  0x9a   :  { %166 = vst [vmem:[%s224_s3 + $0x18] sm:$0xff] %v162_v34  }

// kernel: pspnet_forward.126
= control target key start
LH: loop header
LB: loop body
LE: loop exit
PB: predicated region body
PF: predicated region fallthrough
CT: control target
= control target key end

     0   :  { %vm59_vm0 = vcmask 1042432   ;;  %vm46_vm1 = vcmask 48128   ;;  %s194_s1 = inlined_call_operand.vmem [shape: bf16[6,128], index: 1, kind: input, shape index: {}]   ;;  %s195_s0 = inlined_call_operand.vmem [shape: bf16[64,6], index: 0, kind: input, shape index: {}]   ;;  %s196_s2 = inlined_call_operand.vmem [shape: f32[4,128], index: 2, kind: input, shape index: {}]   ;;  %s197_s3 = inlined_call_operand.vmem [shape: f32[64,128], index: 3, kind: output, shape index: {}]  }
   0x1   :  { %v23_v0 = vld [vmem:[%s194_s1] sm:$0x7]  ;;  %v125_v3 = vld [vmem:[%s195_s0 + $0x8] sm:$0xff]  ;;  %v126_v4 = vld [vmem:[%s195_s0 + $0x10] sm:$0xff] }
   0x2   :  { %v61_v1 = vsel %vm59_vm0, %v23_v0, 0  ;;  %v124_v2 = vld [vmem:[%s195_s0] sm:$0xff]  ;;  %v127_v5 = vld [vmem:[%s195_s0 + $0x18] sm:$0xff] }
   0x3   :  { %70 = vmatpush.bf16.msra.mxu0 %v61_v1  ;;  %128 = vmatpush.bf16.msra.mxu1 %v61_v1  ;;  %v131_v6 = vld [vmem:[%s196_s2] ss:$0 sm:$0xff] }
   0x4   :  { %129 = vmatpush.bf16.msra.mxu2 %v61_v1  ;;  %130 = vmatpush.bf16.msra.mxu3 %v61_v1 }
   0x6   :  { %120 = vmatmul.msk.bf16.vlgmr.msra.gmra.mxu0 %vm46_vm1, %v124_v2  ;;  %121 = vmatmul.msk.bf16.vlgmr.msra.gmra.mxu1 %vm46_vm1, %v125_v3 }
   0x7   :  { %122 = vmatmul.msk.bf16.vlgmr.msra.gmra.mxu2 %vm46_vm1, %v126_v4  ;;  %123 = vmatmul.msk.bf16.vlgmr.msra.gmra.mxu3 %vm46_vm1, %v127_v5 }
  0x83   :  { %v72_v7 = vpop.f32.mrf.mxu0  ;;  %v77_v8 = vpop.f32.mrf.mxu1 }
  0x84   :  { %v73_v9 = vadd.f32 %v131_v6, %v72_v7  ;;  %v78_v10 = vadd.f32 %v131_v6, %v77_v8 }
  0x86   :  { %92 = vst [vmem:[%s197_s3] sm:$0xff] %v73_v9 }
  0x87   :  { %94 = vst [vmem:[%s197_s3 + $0x10] sm:$0xff] %v78_v10 }
  0x8a   :  { %v82_v11 = vpop.f32.mrf.mxu2  ;;  %v87_v12 = vpop.f32.mrf.mxu3 }
  0x8b   :  { %v83_v13 = vadd.f32 %v131_v6, %v82_v11  ;;  %v88_v14 = vadd.f32 %v131_v6, %v87_v12  ;;  %v74_v15 = vpop.f32.mrf.mxu0  ;;  %v79_v16 = vpop.f32.mrf.mxu1 }
  0x8c   :  { %v75_v17 = vadd.f32 %v131_v6, %v74_v15  ;;  %v80_v18 = vadd.f32 %v131_v6, %v79_v16 }
  0x8d   :  { %96 = vst [vmem:[%s197_s3 + $0x20] sm:$0xff] %v83_v13 }
  0x8e   :  { %98 = vst [vmem:[%s197_s3 + $0x30] sm:$0xff] %v88_v14 }
  0x8f   :  { %93 = vst [vmem:[%s197_s3 + $0x8] sm:$0xff] %v75_v17 }
  0x90   :  { %95 = vst [vmem:[%s197_s3 + $0x18] sm:$0xff] %v80_v18 }
  0x92   :  { %v84_v19 = vpop.f32.mrf.mxu2  ;;  %v89_v20 = vpop.f32.mrf.mxu3 }
  0x93   :  { %v85_v21 = vadd.f32 %v131_v6, %v84_v19  ;;  %v90_v22 = vadd.f32 %v131_v6, %v89_v20 }
  0x95   :  { %97 = vst [vmem:[%s197_s3 + $0x28] sm:$0xff] %v85_v21 }
  0x96   :  { %99 = vst [vmem:[%s197_s3 + $0x38] sm:$0xff] %v90_v22 }

// kernel: pspnet_forward.125
= control target key start
LH: loop header
LB: loop body
LE: loop exit
PB: predicated region body
PF: predicated region fallthrough
CT: control target
= control target key end

     0   :  { %vm158_vm0 = vcmask 1040384   ;;  %vm145_vm1 = vcmask 277504   ;;  %s497_s1 = inlined_call_operand.vmem [shape: bf16[162,128], index: 1, kind: input, shape index: {}]   ;;  %s498_s0 = inlined_call_operand.vmem [shape: bf16[64,162], index: 0, kind: input, shape index: {}]   ;;  %s499_s2 = inlined_call_operand.vmem [shape: f32[4,128], index: 2, kind: input, shape index: {}]   ;;  %s500_s3 = inlined_call_operand.vmem [shape: bf16[64,128], index: 3, kind: output, shape index: {}]  }
   0x1   :  { %v339_v0 = vld [vmem:[%s497_s1 + $0x38] sm:$0xff]  ;;  %v43_v1 = vld [vmem:[%s497_s1 + $0x50] sm:$0x1]  ;;  %v341_v6 = vld [vmem:[%s497_s1 + $0x48] sm:$0xff] }
   0x2   :  { %v123_v2 = vunpack.c.l.b16 %v43_v1  ;;  %162 = vmatpush.bf16.msra.mxu0 %v339_v0  ;;  %365 = vmatpush.bf16.msra.mxu2 %v339_v0  ;;  %v338_v3 = vld [vmem:[%s497_s1 + $0x30] sm:$0xff]  ;;  %v337_v7 = vld [vmem:[%s497_s1 + $0x28] sm:$0xff]  ;;  %v340_v8 = vld [vmem:[%s497_s1 + $0x40] sm:$0xff] }
   0x3   :  { %v336_v9 = vld [vmem:[%s497_s1 + $0x20] sm:$0xff]  ;;  %v326_v10 = vld [vmem:[%s498_s0 + $0x14] sm:$0xf]  ;;  %v260_v11 = vld [vmem:[%s498_s0 + $0x18] sm:$0xf0] }
   0x4   :  { %v134_v4 = vpack.c.b16 %v123_v2, %v123_v2  ;;  %v324_v12 = vld [vmem:[%s498_s0 + $0x4] sm:$0xf]  ;;  %v252_v13 = vld [vmem:[%s498_s0 + $0x8] sm:$0xf0]  ;;  %v263_v14 = vor.u32 %v326_v10, %v260_v11  ;;  %v335_v15 = vld [vmem:[%s497_s1 + $0x18] sm:$0xff] }
   0x5   :  { %v255_v16 = vor.u32 %v324_v12, %v252_v13  ;;  %v334_v17 = vld [vmem:[%s497_s1 + $0x10] sm:$0xff]  ;;  %v333_v18 = vld [vmem:[%s497_s1 + $0x8] sm:$0xff]  ;;  %v332_v19 = vld [vmem:[%s497_s1] sm:$0xff] }
   0x6   :  { %v160_v5 = vsel %vm158_vm0, %v134_v4, 0  ;;  %163 = vmatpush.bf16.msra.mxu0 %v338_v3  ;;  %366 = vmatpush.bf16.msra.mxu2 %v338_v3  ;;  %v328_v20 = vld [vmem:[%s498_s0 + $0x24] sm:$0xf]  ;;  %v268_v21 = vld [vmem:[%s498_s0 + $0x28] sm:$0xf0] }
   0x7   :  { %373 = vmatpush.bf16.msra.mxu3 %v160_v5  ;;  %196 = vmatpush.bf16.msra.mxu1 %v160_v5  ;;  %v250_v22 = vld [vmem:[%s498_s0] sm:$0xf]  ;;  %v325_v23 = vld [vmem:[%s498_s0 + $0x4] sm:$0xf0]  ;;  %v271_v26 = vor.u32 %v328_v20, %v268_v21  ;;  %v330_v29 = vld [vmem:[%s498_s0 + $0x34] sm:$0xf] }
   0x8   :  { %v266_v24 = vld [vmem:[%s498_s0 + $0x20] sm:$0xf]  ;;  %v329_v25 = vld [vmem:[%s498_s0 + $0x24] sm:$0xf0]  ;;  %v251_v27 = vor.u32 %v325_v23, %v250_v22  ;;  %v276_v30 = vld [vmem:[%s498_s0 + $0x38] sm:$0xf0] }
   0x9   :  { %v267_v28 = vor.u32 %v329_v25, %v266_v24  ;;  %v258_v31 = vld [vmem:[%s498_s0 + $0x10] sm:$0xf]  ;;  %v327_v32 = vld [vmem:[%s498_s0 + $0x14] sm:$0xf0]  ;;  %v279_v35 = vor.u32 %v330_v29, %v276_v30  ;;  %v376_v42 = vld [vmem:[%s499_s2] ss:$0 sm:$0xff] }
   0xa   :  { %164 = vmatpush.bf16.msra.mxu0 %v337_v7  ;;  %367 = vmatpush.bf16.msra.mxu2 %v337_v7  ;;  %v274_v33 = vld [vmem:[%s498_s0 + $0x30] sm:$0xf]  ;;  %v331_v34 = vld [vmem:[%s498_s0 + $0x34] sm:$0xf0]  ;;  %v259_v36 = vor.u32 %v327_v32, %v258_v31 }
   0xb   :  { %374 = vmatpush.bf16.msra.mxu3 %v341_v6  ;;  %197 = vmatpush.bf16.msra.mxu1 %v341_v6  ;;  %v275_v37 = vor.u32 %v331_v34, %v274_v33 }
   0xe   :  { %165 = vmatpush.bf16.msra.mxu0 %v336_v9  ;;  %368 = vmatpush.bf16.msra.mxu2 %v336_v9 }
   0xf   :  { %375 = vmatpush.bf16.msra.mxu3 %v340_v8  ;;  %198 = vmatpush.bf16.msra.mxu1 %v340_v8 }
  0x12   :  { %321 = vmatmul.msk.bf16.vlgmr.msra.gmra.mxu3 %vm145_vm1, %v263_v14  ;;  %166 = vmatpush.bf16.msra.mxu0 %v335_v15 }
  0x13   :  { %320 = vmatmul.msk.bf16.vlgmr.msra.gmra.mxu1 %vm145_vm1, %v255_v16  ;;  %369 = vmatpush.bf16.msra.mxu2 %v335_v15 }
  0x16   :  { %167 = vmatpush.bf16.msra.mxu0 %v334_v17 }
  0x17   :  { %370 = vmatpush.bf16.msra.mxu2 %v334_v17 }
  0x1a   :  { %168 = vmatpush.bf16.msra.mxu0 %v333_v18 }
  0x1b   :  { %371 = vmatpush.bf16.msra.mxu2 %v333_v18 }
  0x1e   :  { %169 = vmatpush.bf16.msra.mxu0 %v332_v19 }
  0x1f   :  { %372 = vmatpush.bf16.msra.mxu2 %v332_v19 }
  0x21   :  { %170 = vmatmul.bf16.vlgmr.msra.gmra.mxu0 %v251_v27 }
  0x22   :  { %322 = vmatmul.msk.bf16.gmra.mxu3 %vm145_vm1, %v271_v26  ;;  %180 = vmatmul.bf16.vlgmr.msra.gmra.mxu2 %v267_v28 }
  0x31   :  { %175 = vmatmul.bf16.gmra.mxu0 %v259_v36 }
  0x32   :  { %323 = vmatmul.msk.bf16.gmra.mxu3 %vm145_vm1, %v279_v35  ;;  %185 = vmatmul.bf16.gmra.mxu2 %v275_v37 }
  0x90   :  { %v200_v40 = vpop.f32.mrf.mxu1 }
  0x95   :  { %v205_v38 = vpop.f32.mrf.mxu3 }
  0x98   :  { %v202_v47 = vpop.f32.mrf.mxu1 }
  0x9d   :  { %v207_v39 = vpop.f32.mrf.mxu3 }
  0x9e   :  { %v171_v41 = vpop.f32.mrf.mxu0 }
  0x9f   :  { %v172_v43 = vadd.f32 %v376_v42, %v171_v41 }
  0xa1   :  { %v201_v48 = vadd.f32 %v200_v40, %v172_v43 }
  0xa3   :  { %v220_v52 = vmax.f32 %v201_v48, 0.0 }
  0xa5   :  { %v210_v44 = vpop.f32.mrf.mxu3  ;;  %v181_v45 = vpop.f32.mrf.mxu2 }
  0xa6   :  { %v173_v46 = vpop.f32.mrf.mxu0  ;;  %v182_v51 = vadd.f32 %v376_v42, %v181_v45 }
  0xa7   :  { %v174_v49 = vadd.f32 %v376_v42, %v173_v46 }
  0xa8   :  { %v211_v57 = vadd.f32 %v210_v44, %v182_v51 }
  0xa9   :  { %v203_v50 = vadd.f32 %v202_v47, %v174_v49 }
  0xaa   :  { %v224_v61 = vmax.f32 %v211_v57, 0.0 }
  0xab   :  { %v221_v53 = vmax.f32 %v203_v50, 0.0 }
  0xad   :  { %v212_v54 = vpop.f32.mrf.mxu3  ;;  %v345_v55 = vpack.c.bf16 %v221_v53, %v220_v52  ;;  %v183_v56 = vpop.f32.mrf.mxu2 }
  0xae   :  { %v184_v58 = vadd.f32 %v376_v42, %v183_v56  ;;  %v176_v59 = vpop.f32.mrf.mxu0 }
  0xaf   :  { %346 = vst [vmem:[%s500_s3] sm:$0xff] %v345_v55   ;;  %v177_v63 = vadd.f32 %v376_v42, %v176_v59 }
  0xb0   :  { %v213_v60 = vadd.f32 %v212_v54, %v184_v58 }
  0xb1   :  { %v206_v4 = vadd.f32 %v205_v38, %v177_v63 }
  0xb2   :  { %v225_v62 = vmax.f32 %v213_v60, 0.0 }
  0xb3   :  { %v222_v8 = vmax.f32 %v206_v4, 0.0 }
  0xb4   :  { %v355_v0 = vpack.c.bf16 %v225_v62, %v224_v61 }
  0xb5   :  { %v215_v1 = vpop.f32.mrf.mxu3  ;;  %v186_v2 = vpop.f32.mrf.mxu2 }
  0xb6   :  { %363 = vst [vmem:[%s500_s3 + $0x10] sm:$0xff] %v355_v0   ;;  %v178_v3 = vpop.f32.mrf.mxu0  ;;  %v187_v7 = vadd.f32 %v376_v42, %v186_v2 }
  0xb7   :  { %v179_v5 = vadd.f32 %v376_v42, %v178_v3 }
  0xb8   :  { %v216_v12 = vadd.f32 %v215_v1, %v187_v7 }
  0xb9   :  { %v208_v6 = vadd.f32 %v207_v39, %v179_v5 }
  0xba   :  { %v226_v16 = vmax.f32 %v216_v12, 0.0 }
  0xbb   :  { %v223_v9 = vmax.f32 %v208_v6, 0.0 }
  0xbd   :  { %v350_v10 = vpack.c.bf16 %v223_v9, %v222_v8  ;;  %v188_v11 = vpop.f32.mrf.mxu2  ;;  %v217_v14 = vpop.f32.mrf.mxu3 }
  0xbe   :  { %v189_v13 = vadd.f32 %v376_v42, %v188_v11 }
  0xbf   :  { %362 = vst [vmem:[%s500_s3 + $0x8] sm:$0xff] %v350_v10  }
  0xc0   :  { %v218_v15 = vadd.f32 %v217_v14, %v189_v13 }
  0xc2   :  { %v227_v17 = vmax.f32 %v218_v15, 0.0 }
  0xc4   :  { %v360_v18 = vpack.c.bf16 %v227_v17, %v226_v16 }
  0xc6   :  { %364 = vst [vmem:[%s500_s3 + $0x18] sm:$0xff] %v360_v18  }

// kernel: pspnet_forward.127
= control target key start
LH: loop header
LB: loop body
LE: loop exit
PB: predicated region body
PF: predicated region fallthrough
CT: control target
= control target key end

     0   :  { %vm56_vm0 = vcmask 1040384   ;;  %vm49_vm1 = vcmask 203776   ;;  %s577_s1 = inlined_call_operand.vmem [shape: f32[25,1152], index: 1, kind: input, shape index: {}]   ;;  %s578_s0 = inlined_call_operand.vmem [shape: f32[16,25], index: 0, kind: input, shape index: {}]   ;;  %s579_s2 = inlined_call_operand.vmem [shape: f32[16,1152], index: 2, kind: output, shape index: {}]  }
   0x1   :  { %v40_v0 = vld [vmem:[%s577_s1 + $0xd8] sm:$0x1]  ;;  %v31_v1 = vld [vmem:[%s577_s1 + $0x90] sm:$0xff]  ;;  %v42_v2 = vld [vmem:[%s577_s1 + $0xe8] sm:$0x1] }
   0x2   :  { %313 = vmatpush.msk.msra.mxu0 %vm56_vm0, %v40_v0  ;;  %340 = vmatpush.msk.msra.mxu1 %vm56_vm0, %v40_v0  ;;  %v43_v3 = vld [vmem:[%s577_s1 + $0xf0] sm:$0x1]  ;;  %v33_v4 = vld [vmem:[%s577_s1 + $0xa0] sm:$0xff]  ;;  %v22_v5 = vld [vmem:[%s577_s1 + $0x48] sm:$0xff] }
   0x3   :  { %319 = vmatpush.msk.msra.mxu2 %vm56_vm0, %v42_v2  ;;  %322 = vmatpush.msk.msra.mxu3 %vm56_vm0, %v43_v3  ;;  %v34_v6 = vld [vmem:[%s577_s1 + $0xa8] sm:$0xff]  ;;  %v24_v7 = vld [vmem:[%s577_s1 + $0x58] sm:$0xff]  ;;  %v25_v8 = vld [vmem:[%s577_s1 + $0x60] sm:$0xff] }
   0x4   :  { %97 = vmatpush.msra.mxu0 %v31_v1  ;;  %341 = vmatpush.msra.mxu1 %v31_v1  ;;  %v13_v9 = vld [vmem:[%s577_s1] sm:$0xff]  ;;  %v401_v11 = vld [vmem:[%s578_s0 + $0x8] sm:$0xff]  ;;  %v44_v13 = vld [vmem:[%s577_s1 + $0xf8] sm:$0x1] }
   0x5   :  { %143 = vmatpush.msra.mxu2 %v33_v4  ;;  %166 = vmatpush.msra.mxu3 %v34_v6  ;;  %v396_v10 = vld [vmem:[%s578_s0] sm:$0xff]  ;;  %v15_v14 = vld [vmem:[%s577_s1 + $0x10] sm:$0xff]  ;;  %v16_v15 = vld [vmem:[%s577_s1 + $0x18] sm:$0xff] }
   0x6   :  { %98 = vmatpush.msra.mxu0 %v22_v5  ;;  %342 = vmatpush.msra.mxu1 %v22_v5  ;;  %v41_v12 = vld [vmem:[%s577_s1 + $0xe0] sm:$0x1]  ;;  %v32_v16 = vld [vmem:[%s577_s1 + $0x98] sm:$0xff]  ;;  %v35_v17 = vld [vmem:[%s577_s1 + $0xb0] sm:$0xff] }
   0x7   :  { %144 = vmatpush.msra.mxu2 %v24_v7  ;;  %167 = vmatpush.msra.mxu3 %v25_v8  ;;  %v46_v18 = vld [vmem:[%s577_s1 + $0x108] sm:$0x1]  ;;  %v47_v19 = vld [vmem:[%s577_s1 + $0x110] sm:$0x1]  ;;  %v37_v22 = vld [vmem:[%s577_s1 + $0xc0] sm:$0xff] }
   0x8   :  { %99 = vmatpush.msra.mxu0 %v13_v9  ;;  %343 = vmatpush.msra.mxu1 %v13_v9  ;;  %v23_v20 = vld [vmem:[%s577_s1 + $0x50] sm:$0xff]  ;;  %v26_v21 = vld [vmem:[%s577_s1 + $0x68] sm:$0xff]  ;;  %v17_v25 = vld [vmem:[%s577_s1 + $0x20] sm:$0xff] }
   0x9   :  { %314 = vmatmul.msk.f32.vlgmr.msra.gmra.mxu0 %vm49_vm1, %v396_v10  ;;  %315 = vmatmul.msk.f32.vlgmr.msra.gmra.mxu1 %vm49_vm1, %v401_v11  ;;  %v38_v23 = vld [vmem:[%s577_s1 + $0xc8] sm:$0xff]  ;;  %v45_v26 = vld [vmem:[%s577_s1 + $0x100] sm:$0x1]  ;;  %v48_v27 = vld [vmem:[%s577_s1 + $0x118] sm:$0x1] }
   0xa   :  { %316 = vmatpush.msk.msrb.mxu1 %vm56_vm0, %v41_v12  ;;  %325 = vmatpush.msk.msrb.mxu0 %vm56_vm0, %v44_v13  ;;  %v14_v24 = vld [vmem:[%s577_s1 + $0x8] sm:$0xff]  ;;  %v29_v28 = vld [vmem:[%s577_s1 + $0x80] sm:$0xff]  ;;  %v28_v29 = vld [vmem:[%s577_s1 + $0x78] sm:$0xff] }
   0xb   :  { %145 = vmatpush.msra.mxu2 %v15_v14  ;;  %168 = vmatpush.msra.mxu3 %v16_v15  ;;  %v36_v30 = vld [vmem:[%s577_s1 + $0xb8] sm:$0xff]  ;;  %v39_v31 = vld [vmem:[%s577_s1 + $0xd0] sm:$0xff]  ;;  %v30_v35 = vld [vmem:[%s577_s1 + $0x88] sm:$0xff] }
   0xc   :  { %120 = vmatpush.msrb.mxu1 %v32_v16  ;;  %320 = vmatmul.msk.f32.vlgmr.msra.gmra.mxu2 %vm49_vm1, %v396_v10  ;;  %v19_v32 = vld [vmem:[%s577_s1 + $0x30] sm:$0xff]  ;;  %v20_v33 = vld [vmem:[%s577_s1 + $0x38] sm:$0xff]  ;;  %v18_v36 = vld [vmem:[%s577_s1 + $0x28] sm:$0xff] }
   0xd   :  { %323 = vmatmul.msk.f32.vlgmr.msra.gmra.mxu3 %vm49_vm1, %v396_v10  ;;  %189 = vmatpush.msrb.mxu0 %v35_v17  ;;  %v27_v34 = vld [vmem:[%s577_s1 + $0x70] sm:$0xff]  ;;  %v21_v37 = vld [vmem:[%s577_s1 + $0x40] sm:$0xff] }
   0xe   :  { %331 = vmatpush.msk.msrb.mxu2 %vm56_vm0, %v46_v18  ;;  %334 = vmatpush.msk.msrb.mxu3 %vm56_vm0, %v47_v19 }
   0xf   :  { %121 = vmatpush.msrb.mxu1 %v23_v20  ;;  %190 = vmatpush.msrb.mxu0 %v26_v21 }
  0x10   :  { %235 = vmatpush.msrb.mxu2 %v37_v22  ;;  %258 = vmatpush.msrb.mxu3 %v38_v23 }
  0x11   :  { %122 = vmatpush.msrb.mxu1 %v14_v24  ;;  %191 = vmatpush.msrb.mxu0 %v17_v25 }
  0x12   :  { %317 = vmatmul.msk.f32.vlgmr.msrb.gmra.mxu1 %vm49_vm1, %v396_v10  ;;  %326 = vmatmul.msk.f32.vlgmr.msrb.gmra.mxu0 %vm49_vm1, %v396_v10 }
  0x13   :  { %328 = vmatpush.msk.msra.mxu1 %vm56_vm0, %v45_v26  ;;  %337 = vmatpush.msk.msra.mxu0 %vm56_vm0, %v48_v27 }
  0x14   :  { %321 = vmatmul.msk.f32.gmra.mxu2 %vm49_vm1, %v401_v11  ;;  %259 = vmatpush.msrb.mxu3 %v29_v28 }
  0x15   :  { %324 = vmatmul.msk.f32.gmra.mxu3 %vm49_vm1, %v401_v11  ;;  %236 = vmatpush.msrb.mxu2 %v28_v29 }
  0x16   :  { %212 = vmatpush.msra.mxu1 %v36_v30  ;;  %281 = vmatpush.msra.mxu0 %v39_v31 }
  0x17   :  { %237 = vmatpush.msrb.mxu2 %v19_v32  ;;  %260 = vmatpush.msrb.mxu3 %v20_v33 }
  0x18   :  { %213 = vmatpush.msra.mxu1 %v27_v34  ;;  %282 = vmatpush.msra.mxu0 %v30_v35 }
  0x1a   :  { %318 = vmatmul.msk.f32.gmra.mxu1 %vm49_vm1, %v401_v11  ;;  %327 = vmatmul.msk.f32.gmra.mxu0 %vm49_vm1, %v401_v11 }
  0x1b   :  { %214 = vmatpush.msra.mxu1 %v18_v36  ;;  %283 = vmatpush.msra.mxu0 %v21_v37 }
  0x1c   :  { %332 = vmatmul.msk.f32.vlgmr.msrb.gmra.mxu2 %vm49_vm1, %v396_v10 }
  0x1d   :  { %335 = vmatmul.msk.f32.vlgmr.msrb.gmra.mxu3 %vm49_vm1, %v396_v10 }
  0x22   :  { %329 = vmatmul.msk.f32.vlgmr.msra.gmra.mxu1 %vm49_vm1, %v396_v10  ;;  %338 = vmatmul.msk.f32.vlgmr.msra.gmra.mxu0 %vm49_vm1, %v396_v10 }
  0x24   :  { %333 = vmatmul.msk.f32.gmra.mxu2 %vm49_vm1, %v401_v11 }
  0x25   :  { %336 = vmatmul.msk.f32.gmra.mxu3 %vm49_vm1, %v401_v11 }
  0x2a   :  { %330 = vmatmul.msk.f32.gmra.mxu1 %vm49_vm1, %v401_v11  ;;  %339 = vmatmul.msk.f32.gmra.mxu0 %vm49_vm1, %v401_v11 }
  0x86   :  { %v101_v38 = vpop.f32.mrf.mxu0  ;;  %v104_v39 = vpop.f32.mrf.mxu1 }
  0x87   :  { %291 = vst [vmem:[%s579_s2] sm:$0xff] %v101_v38 }
  0x88   :  { %300 = vst [vmem:[%s579_s2 + $0x48] sm:$0xff] %v104_v39 }
  0x8f   :  { %v124_v40 = vpop.f32.mrf.mxu1  ;;  %v147_v41 = vpop.f32.mrf.mxu2 }
  0x90   :  { %292 = vst [vmem:[%s579_s2 + $0x8] sm:$0xff] %v124_v40  ;;  %v170_v42 = vpop.f32.mrf.mxu3  ;;  %v193_v43 = vpop.f32.mrf.mxu0 }
  0x91   :  { %293 = vst [vmem:[%s579_s2 + $0x10] sm:$0xff] %v147_v41 }
  0x92   :  { %294 = vst [vmem:[%s579_s2 + $0x18] sm:$0xff] %v170_v42 }
  0x93   :  { %295 = vst [vmem:[%s579_s2 + $0x20] sm:$0xff] %v193_v43 }
  0x97   :  { %v127_v44 = vpop.f32.mrf.mxu1  ;;  %v150_v45 = vpop.f32.mrf.mxu2 }
  0x98   :  { %301 = vst [vmem:[%s579_s2 + $0x50] sm:$0xff] %v127_v44  ;;  %v173_v46 = vpop.f32.mrf.mxu3  ;;  %v196_v47 = vpop.f32.mrf.mxu0 }
  0x99   :  { %302 = vst [vmem:[%s579_s2 + $0x58] sm:$0xff] %v150_v45 }
  0x9a   :  { %303 = vst [vmem:[%s579_s2 + $0x60] sm:$0xff] %v173_v46 }
  0x9b   :  { %304 = vst [vmem:[%s579_s2 + $0x68] sm:$0xff] %v196_v47 }
  0x9f   :  { %v216_v48 = vpop.f32.mrf.mxu1  ;;  %v239_v49 = vpop.f32.mrf.mxu2 }
  0xa0   :  { %296 = vst [vmem:[%s579_s2 + $0x28] sm:$0xff] %v216_v48  ;;  %v262_v50 = vpop.f32.mrf.mxu3  ;;  %v285_v51 = vpop.f32.mrf.mxu0 }
  0xa1   :  { %297 = vst [vmem:[%s579_s2 + $0x30] sm:$0xff] %v239_v49 }
  0xa2   :  { %298 = vst [vmem:[%s579_s2 + $0x38] sm:$0xff] %v262_v50 }
  0xa3   :  { %299 = vst [vmem:[%s579_s2 + $0x40] sm:$0xff] %v285_v51 }
  0xa7   :  { %v219_v52 = vpop.f32.mrf.mxu1  ;;  %v242_v53 = vpop.f32.mrf.mxu2 }
  0xa8   :  { %305 = vst [vmem:[%s579_s2 + $0x70] sm:$0xff] %v219_v52  ;;  %v265_v54 = vpop.f32.mrf.mxu3  ;;  %v288_v55 = vpop.f32.mrf.mxu0 }
  0xa9   :  { %306 = vst [vmem:[%s579_s2 + $0x78] sm:$0xff] %v242_v53 }
  0xaa   :  { %307 = vst [vmem:[%s579_s2 + $0x80] sm:$0xff] %v265_v54 }
  0xab   :  { %308 = vst [vmem:[%s579_s2 + $0x88] sm:$0xff] %v288_v55 }

</bundles_post_ra>
